<compile_context>
chip_gen: v6e
topology: v6e:2x2x1
jax: 0.10.0
libtpu: 0.0.40
codegen_flags: <defaults>
</compile_context>

<pallas_src>
import math
import functools

import jax
import jax.numpy as jnp
from jax import lax
from jax.experimental import pallas as pl
from jax.experimental.pallas import tpu as pltpu


def siren_kernel(*refs, n_layers, chunk, n_chunks):
    """refs = (x_ref, w0, b0, ..., w_{L-1}, b_{L-1}, out_ref).

    Feature-major: x_ref is (d_in, batch_tile), w_i is (out_i, in_i) (torch layout),
    b_i is (out_i, 1), out_ref is (d_out, batch_tile).
        h = x ; for i < L-1: h = sin(W_i @ h + b_i) ; out = W_{L-1} @ h + b_{L-1}
    """
    x_ref, out_ref = refs[0], refs[-1]
    params = refs[1:-1]

    # Hoist weight/bias loads out of the chunk loop (loop-invariant, ~3 vregs total).
    ws = [params[2 * i][...] for i in range(n_layers)]
    bs = [params[2 * i + 1][...] for i in range(n_layers)]

    def run_mlp(h):
        # h: (d_in, chunk) f32, batch on the lane axis.
        for i in range(n_layers):
            z = jnp.dot(ws[i], h, preferred_element_type=jnp.float32) + bs[i]
            h = jnp.sin(z) if i < n_layers - 1 else z
        return h

    if n_chunks == 1:
        out_ref[...] = run_mlp(x_ref[...]).astype(out_ref.dtype)
    else:
        def body(c, carry):
            col = pl.multiple_of(c * chunk, 128)
            out_ref[:, pl.ds(col, chunk)] = run_mlp(
                x_ref[:, pl.ds(col, chunk)]).astype(out_ref.dtype)
            return carry

        lax.fori_loop(0, n_chunks, body, 0)


def _ceil_to(x, m):
    return -(-x // m) * m


def siren_forward(x, weights, biases, *, batch_tile=1024, chunk=512):
    """Pallas SIREN forward.

    x: (B, d_in) f32.  weights[i]: (out_i, in_i) (native PyTorch orientation),
    biases[i]: (out_i,).  Returns (B, d_out) f32.
    """
    B, d_in = x.shape
    n_layers = len(weights)
    d_out = weights[-1].shape[0]

    # Effective lane-chunk (multiple of 128) and batch tile (multiple of chunk).
    chunk = _ceil_to(max(128, min(chunk, batch_tile)), 128)
    bt = _ceil_to(max(chunk, min(batch_tile, _ceil_to(B, chunk))), chunk)
    n_chunks = bt // chunk
    Bp = _ceil_to(B, bt)

    # Pad ragged batch, switch to feature-major (features on sublanes, batch on lanes).
    xp = x if Bp == B else jnp.pad(x, ((0, Bp - B), (0, 0)))
    xt = xp.T                                   # (d_in, Bp)
    biases2d = [b.reshape(-1, 1) for b in biases]  # (out_i, 1) -> lane broadcast in-kernel

    in_specs = [pl.BlockSpec((d_in, bt), lambda i: (0, i))]
    args = [xt]
    for w, b2 in zip(weights, biases2d):
        in_specs.append(pl.BlockSpec(w.shape, lambda i: (0, 0)))   # constant index: no re-DMA
        in_specs.append(pl.BlockSpec(b2.shape, lambda i: (0, 0)))
        args.append(w)
        args.append(b2)
    out_spec = pl.BlockSpec((d_out, bt), lambda i: (0, i))

    # Explicit VMEM budget: double-buffered x/out tiles + params + headroom (v7x-safe).
    x_bytes = d_in * bt * 4
    out_bytes = d_out * bt * 4
    param_bytes = 4 * sum(int(w.size) + int(b.size) for w, b in zip(weights, biases2d))
    vmem_limit = int(min(32 << 20,
                         max(8 << 20, 2 * (x_bytes + out_bytes + param_bytes) + (2 << 20))))

    kernel = functools.partial(siren_kernel, n_layers=n_layers,
                               chunk=chunk, n_chunks=n_chunks)
    out_t = pl.pallas_call(
        kernel,
        out_shape=jax.ShapeDtypeStruct((d_out, Bp), jnp.float32),
        grid_spec=pltpu.PrefetchScalarGridSpec(
            num_scalar_prefetch=0,
            grid=(Bp // bt,),
            in_specs=in_specs,
            out_specs=out_spec,
        ),
        compiler_params=pltpu.CompilerParams(
            dimension_semantics=("parallel",),
            vmem_limit_bytes=vmem_limit),
    )(*args)                                    # (d_out, Bp), lane-dense output

    return out_t.T[:B]                          # back to (B, d_out)


def init_siren_params(key, dims):
    """Deterministic SIREN-style init, weights in native torch (out_dim, in_dim) layout.

    Layers 0 .. L-2 get the SIREN uniform init (first layer scaled by 30); the last
    layer keeps a plain 1/sqrt(in) uniform init (PyTorch Linear default scale).
    Exact PyTorch RNG draws are not reproduced (synthetic weights).
    """
    weights, biases = [], []
    n_layers = len(dims) - 1
    for i in range(n_layers):
        in_dim, out_dim = dims[i], dims[i + 1]
        key, kw, kb = jax.random.split(key, 3)
        if i < n_layers - 1:
            bound = math.sqrt(6.0 / in_dim)
            if i == 0:
                bound *= 30.0
            b_bound = 1.0 / in_dim
        else:
            bound = 1.0 / math.sqrt(in_dim)
            b_bound = 1.0 / math.sqrt(in_dim)
        w = jax.random.uniform(kw, (out_dim, in_dim), jnp.float32, -bound, bound)
        b = jax.random.uniform(kb, (out_dim,), jnp.float32, -b_bound, b_bound)
        weights.append(w)
        biases.append(b)
    return weights, biases


def siren_reference(x, weights, biases):
    """Plain-JAX reference matching the PyTorch forward (get_gradient=False)."""
    hp = jax.lax.Precision.HIGHEST
    h = x
    for i in range(len(weights) - 1):
        h = jnp.sin(jnp.matmul(h, weights[i].T, precision=hp) + biases[i])
    return jnp.matmul(h, weights[-1].T, precision=hp) + biases[-1]


# TODO(synk): get_gradient=True analytic-gradient branch not implemented in-kernel.

if __name__ == "__main__":
    dims = (4, 32, 32, 32, 1)   # SIREN([4, 32, 32, 32, 1])
    B = 8192                    # 8 grid steps of 1024 rows (even grid for v7x's 2 TCs)

    key = jax.random.PRNGKey(0)
    key, kx = jax.random.split(key)
    x = jax.random.uniform(kx, (B, dims[0]), jnp.float32, -1.0, 1.0)
    weights, biases = init_siren_params(key, dims)

    fwd = jax.jit(functools.partial(siren_forward, batch_tile=1024, chunk=512))
    out = jax.block_until_ready(fwd(x, weights, biases))

    ref = siren_reference(x, weights, biases)
    assert out.shape == (B, dims[-1])
    # The 30x-scaled first layer drives |W @ x| to O(100); sin() of large f32 arguments
    # amplifies matmul rounding-order differences between the MXU kernel and the XLA
    # reference, so the tolerance is looser than machine epsilon (still catches any
    # structural bug, which would produce O(1) errors).
    assert jnp.allclose(out, ref, atol=1e-3, rtol=1e-3), "mismatch vs reference"
    print("KERNEL_OK")
</pallas_src>

<mosaic_0001>
module attributes {stable_mosaic.version = 11 : i64} {
  func.func @siren_kernel(%arg0: i32, %arg1: memref<4x1024xf32, #tpu.memory_space<vmem>>, %arg2: memref<32x4xf32, #tpu.memory_space<vmem>>, %arg3: memref<32x1xf32, #tpu.memory_space<vmem>>, %arg4: memref<32x32xf32, #tpu.memory_space<vmem>>, %arg5: memref<32x1xf32, #tpu.memory_space<vmem>>, %arg6: memref<32x32xf32, #tpu.memory_space<vmem>>, %arg7: memref<32x1xf32, #tpu.memory_space<vmem>>, %arg8: memref<1x32xf32, #tpu.memory_space<vmem>>, %arg9: memref<1x1xf32, #tpu.memory_space<vmem>>, %arg10: memref<1x1024xf32, #tpu.memory_space<vmem>>) attributes {dimension_semantics = [#tpu.dimension_semantics<parallel>], iteration_bounds = array<i64: 8>, scalar_prefetch = 0 : i64, scratch_operands = 0 : i64, tpu.core_type = #tpu.core_type<tc>, window_params = [{transform_indices = @transform_0, window_bounds = array<i64: 4, 1024>}, {pipeline_mode = #tpu.pipeline_mode<synchronous>, transform_indices = @transform_1, window_bounds = array<i64: 32, 4>}, {pipeline_mode = #tpu.pipeline_mode<synchronous>, transform_indices = @transform_2, window_bounds = array<i64: 32, 1>}, {pipeline_mode = #tpu.pipeline_mode<synchronous>, transform_indices = @transform_3, window_bounds = array<i64: 32, 32>}, {pipeline_mode = #tpu.pipeline_mode<synchronous>, transform_indices = @transform_4, window_bounds = array<i64: 32, 1>}, {pipeline_mode = #tpu.pipeline_mode<synchronous>, transform_indices = @transform_5, window_bounds = array<i64: 32, 32>}, {pipeline_mode = #tpu.pipeline_mode<synchronous>, transform_indices = @transform_6, window_bounds = array<i64: 32, 1>}, {pipeline_mode = #tpu.pipeline_mode<synchronous>, transform_indices = @transform_7, window_bounds = array<i64: 1, 32>}, {pipeline_mode = #tpu.pipeline_mode<synchronous>, transform_indices = @transform_8, window_bounds = array<i64: 1, 1>}, {transform_indices = @transform_9, window_bounds = array<i64: 1, 1024>}]} {
    %c0 = arith.constant 0 : index
    %c0_0 = arith.constant 0 : index
    %0 = vector.load %arg2[%c0, %c0_0] : memref<32x4xf32, #tpu.memory_space<vmem>>, vector<32x4xf32>
    %c0_1 = arith.constant 0 : index
    %c0_2 = arith.constant 0 : index
    %1 = vector.load %arg4[%c0_1, %c0_2] : memref<32x32xf32, #tpu.memory_space<vmem>>, vector<32x32xf32>
    %c0_3 = arith.constant 0 : index
    %c0_4 = arith.constant 0 : index
    %2 = vector.load %arg6[%c0_3, %c0_4] : memref<32x32xf32, #tpu.memory_space<vmem>>, vector<32x32xf32>
    %c0_5 = arith.constant 0 : index
    %c0_6 = arith.constant 0 : index
    %3 = vector.load %arg8[%c0_5, %c0_6] : memref<1x32xf32, #tpu.memory_space<vmem>>, vector<1x32xf32>
    %c0_7 = arith.constant 0 : index
    %c0_8 = arith.constant 0 : index
    %4 = vector.load %arg3[%c0_7, %c0_8] : memref<32x1xf32, #tpu.memory_space<vmem>>, vector<32x1xf32>
    %c0_9 = arith.constant 0 : index
    %c0_10 = arith.constant 0 : index
    %5 = vector.load %arg5[%c0_9, %c0_10] : memref<32x1xf32, #tpu.memory_space<vmem>>, vector<32x1xf32>
    %c0_11 = arith.constant 0 : index
    %c0_12 = arith.constant 0 : index
    %6 = vector.load %arg7[%c0_11, %c0_12] : memref<32x1xf32, #tpu.memory_space<vmem>>, vector<32x1xf32>
    %c0_13 = arith.constant 0 : index
    %c0_14 = arith.constant 0 : index
    %7 = vector.load %arg9[%c0_13, %c0_14] : memref<1x1xf32, #tpu.memory_space<vmem>>, vector<1x1xf32>
    %c0_i32 = arith.constant 0 : i32
    %c2_i32 = arith.constant 2 : i32
    %8 = arith.addi %c0_i32, %c2_i32 : i32
    %c1_i32 = arith.constant 1 : i32
    scf.for %arg11 = %c0_i32 to %8 step %c1_i32  : i32 {
      %c512_i32 = arith.constant 512 : i32
      %9 = arith.muli %arg11, %c512_i32 : i32
      %10 = tpu.assume_multiple %9, 128 : i32
      %c0_16 = arith.constant 0 : index
      %11 = arith.index_cast %10 : i32 to index
      %12 = vector.load %arg1[%c0_16, %11] : memref<4x1024xf32, #tpu.memory_space<vmem>>, vector<4x512xf32>
      %cst = arith.constant dense<0.000000e+00> : vector<32x512xf32>
      %13 = tpu.matmul %0, %12, %cst {dimension_numbers = #tpu.dot_dimension_numbers<[1], [0], [0], [1], [0, 0, 1, 1], [], []>} : vector<32x4xf32>, vector<4x512xf32>, vector<32x512xf32> -> vector<32x512xf32>
      %14 = vector.broadcast %4 : vector<32x1xf32> to vector<32x512xf32>
      %15 = arith.addf %13, %14 : vector<32x512xf32>
      %16 = math.sin %15 : vector<32x512xf32>
      %cst_17 = arith.constant dense<0.000000e+00> : vector<32x512xf32>
      %17 = tpu.matmul %1, %16, %cst_17 {dimension_numbers = #tpu.dot_dimension_numbers<[1], [0], [0], [1], [0, 0, 1, 1], [], []>} : vector<32x32xf32>, vector<32x512xf32>, vector<32x512xf32> -> vector<32x512xf32>
      %18 = vector.broadcast %5 : vector<32x1xf32> to vector<32x512xf32>
      %19 = arith.addf %17, %18 : vector<32x512xf32>
      %20 = math.sin %19 : vector<32x512xf32>
      %cst_18 = arith.constant dense<0.000000e+00> : vector<32x512xf32>
      %21 = tpu.matmul %2, %20, %cst_18 {dimension_numbers = #tpu.dot_dimension_numbers<[1], [0], [0], [1], [0, 0, 1, 1], [], []>} : vector<32x32xf32>, vector<32x512xf32>, vector<32x512xf32> -> vector<32x512xf32>
      %22 = vector.broadcast %6 : vector<32x1xf32> to vector<32x512xf32>
      %23 = arith.addf %21, %22 : vector<32x512xf32>
      %24 = math.sin %23 : vector<32x512xf32>
      %cst_19 = arith.constant dense<0.000000e+00> : vector<1x512xf32>
      %25 = tpu.matmul %3, %24, %cst_19 {dimension_numbers = #tpu.dot_dimension_numbers<[1], [0], [0], [1], [0, 0, 1, 1], [], []>} : vector<1x32xf32>, vector<32x512xf32>, vector<1x512xf32> -> vector<1x512xf32>
      %26 = vector.broadcast %7 : vector<1x1xf32> to vector<1x512xf32>
      %27 = arith.addf %25, %26 : vector<1x512xf32>
      %c0_20 = arith.constant 0 : index
      %28 = arith.index_cast %10 : i32 to index
      %29 = vector.load %arg10[%c0_20, %28] : memref<1x1024xf32, #tpu.memory_space<vmem>>, vector<1x512xf32>
      tpu.vector_store %arg10[%c0_20, %28], %27 {strides = array<i32>} : memref<1x1024xf32, #tpu.memory_space<vmem>>, vector<1x512xf32>,
    }
    %c2_i32_15 = arith.constant 2 : i32
    return
  }
  func.func @transform_0(%arg0: i32) -> (i32, i32) {
    %c0_i32 = arith.constant 0 : i32
    %c0_i32_0 = arith.constant 0 : i32
    return %c0_i32, %arg0 : i32, i32
  }
  func.func @transform_1(%arg0: i32) -> (i32, i32) {
    %c0_i32 = arith.constant 0 : i32
    %c0_i32_0 = arith.constant 0 : i32
    %c0_i32_1 = arith.constant 0 : i32
    return %c0_i32, %c0_i32_0 : i32, i32
  }
  func.func @transform_2(%arg0: i32) -> (i32, i32) {
    %c0_i32 = arith.constant 0 : i32
    %c0_i32_0 = arith.constant 0 : i32
    %c0_i32_1 = arith.constant 0 : i32
    return %c0_i32, %c0_i32_0 : i32, i32
  }
  func.func @transform_3(%arg0: i32) -> (i32, i32) {
    %c0_i32 = arith.constant 0 : i32
    %c0_i32_0 = arith.constant 0 : i32
    %c0_i32_1 = arith.constant 0 : i32
    return %c0_i32, %c0_i32_0 : i32, i32
  }
  func.func @transform_4(%arg0: i32) -> (i32, i32) {
    %c0_i32 = arith.constant 0 : i32
    %c0_i32_0 = arith.constant 0 : i32
    %c0_i32_1 = arith.constant 0 : i32
    return %c0_i32, %c0_i32_0 : i32, i32
  }
  func.func @transform_5(%arg0: i32) -> (i32, i32) {
    %c0_i32 = arith.constant 0 : i32
    %c0_i32_0 = arith.constant 0 : i32
    %c0_i32_1 = arith.constant 0 : i32
    return %c0_i32, %c0_i32_0 : i32, i32
  }
  func.func @transform_6(%arg0: i32) -> (i32, i32) {
    %c0_i32 = arith.constant 0 : i32
    %c0_i32_0 = arith.constant 0 : i32
    %c0_i32_1 = arith.constant 0 : i32
    return %c0_i32, %c0_i32_0 : i32, i32
  }
  func.func @transform_7(%arg0: i32) -> (i32, i32) {
    %c0_i32 = arith.constant 0 : i32
    %c0_i32_0 = arith.constant 0 : i32
    %c0_i32_1 = arith.constant 0 : i32
    return %c0_i32, %c0_i32_0 : i32, i32
  }
  func.func @transform_8(%arg0: i32) -> (i32, i32) {
    %c0_i32 = arith.constant 0 : i32
    %c0_i32_0 = arith.constant 0 : i32
    %c0_i32_1 = arith.constant 0 : i32
    return %c0_i32, %c0_i32_0 : i32, i32
  }
  func.func @transform_9(%arg0: i32) -> (i32, i32) {
    %c0_i32 = arith.constant 0 : i32
    %c0_i32_0 = arith.constant 0 : i32
    return %c0_i32, %arg0 : i32, i32
  }
}

</mosaic_0001>

<bundles_post_ra>
// kernel: siren_forward.1
= control target key start
LH: loop header
LB: loop body
LE: loop exit
PB: predicated region body
PF: predicated region fallthrough
CT: control target
= control target key end

     0   :  { %s11988_s0 = inlined_call_operand.hbm [shape: f32[4,8192], index: 0, kind: input, shape index: {}]   ;;  %s11989_s1 = inlined_call_operand.vmem [shape: f32[32,4], index: 1, kind: input, shape index: {}]   ;;  %s11990_s2 = inlined_call_operand.vmem [shape: f32[32,1], index: 2, kind: input, shape index: {}]   ;;  %s11991_s3 = inlined_call_operand.vmem [shape: f32[32,32], index: 3, kind: input, shape index: {}]   ;;  %s11992_s4 = inlined_call_operand.vmem [shape: f32[32,1], index: 4, kind: input, shape index: {}]   ;;  %s11993_s5 = inlined_call_operand.vmem [shape: f32[32,32], index: 5, kind: input, shape index: {}]   ;;  %s11994_s6 = inlined_call_operand.vmem [shape: f32[32,1], index: 6, kind: input, shape index: {}]   ;;  %s11995_s7 = inlined_call_operand.vmem [shape: f32[1,32], index: 7, kind: input, shape index: {}]   ;;  %s11996_s8 = inlined_call_operand.<no memory space> [shape: f32[1,1], index: 8, kind: input, shape index: {}]   ;;  %s11997_s9 = inlined_call_operand.hbm [shape: f32[1,8192], index: 9, kind: output, shape index: {}]  }
   0x1   :  { %v14_v0 = vstv %s11996_s8 }
   0x2   :  { %15 = vst [vmem:[#allocation2] sm:$0x1] %v14_v0 }
   0x3   :  { %16 = vsyncpa [#allocation4], 0 }
   0x4   :  { %18 = vsyncpa [#allocation4 + $0x1], 0 }
   0x5   :  { %19 = vsyncpa [#allocation5], 0 }
   0x6   :  { %21 = vsyncpa [#allocation5 + $0x1], 0  ;;  %s7168_s11 = smov 0   ;;  %s7170_s12 = smov 0  }
   0x7   :  { %s7172_s13 = smov 0   ;;  %s7174_s14 = smov 0  }
   0x8 LB: > { %s7189_s8 = sadd.s32 4294967295, %s7098_s14   ;;  %s6311_s15 = sadd.s32 4294967294, %s7098_s14   ;;  %s7098_s14 = sphi %s7174_s14, %s12721_s14   ;;  %s7094_s13 = sphi %s7172_s13, %s12720_s13   ;;  %s7090_s12 = sphi %s7170_s12, %s12719_s12   ;;  %s7086_s11 = sphi %s7168_s11, %s12718_s11  }
   0x9   : > { %s7193_s16 = sadd.s32 1, %s7098_s14   ;;  %s34_s17 = sadd.s32 1, %s7094_s13 }
   0xa   : > { %s31_s18 = ssub.s32 %s7098_s14, %s7193_s16  ;;  %p41_p0 = scmp.ne.s32.totalorder %s7094_s13, %s7090_s12 }
   0xb   : > { %p32_p1 = scmp.eq.s32.totalorder %s31_s18, 0  ;;  %p42_p2 = scmp.eq.s32.totalorder %s7098_s14, 0 }
   0xc   : > { %p47_p3 = scmp.ne.s32.totalorder %s7090_s12, %s7086_s11  ;;  %p48_p4 = scmp.eq.s32.totalorder %s7189_s8, 0 }
   0xd   : > { %s7205_s19 = scalar_select %p32_p1, %s7094_s13, %s34_s17  }
   0xe   : > { %p7207_p5 = por %p42_p2, %p41_p0  ;;  %p7211_p6 = por %p48_p4, %p47_p3 }
   0xf   : > { %12232 = sst [smem:[#allocation9_spill]] %s7205_s19  ;;  %p239_p7 = scmp.eq.s32.totalorder %s7189_s8, 7 }
  0x10   : > { %s12234_s21 = scalar_select %p7211_p6, 1, 0 }
  0x11   : > { %p245_p8 = scmp.eq.s32.totalorder %s6311_s15, 7  ;;  %p6755_p9 = scmp.lt.s32.totalorder %s7098_s14, 8 }
  0x12   : > { %p7217_p10 = por %p239_p7, %p41_p0  ;;  %s289_s24 = sand.u32 1, %s7094_s13  }
  0x13   : > { %p7221_p11 = por %p245_p8, %p47_p3  ;;  %s6549_s25 = sshll.u32 %s7098_s14, 9 }
  0x14   : > { %s12235_s22 = scalar_select %p7217_p10, 1, 0 }
  0x15   : > { %s12236_s23 = scalar_select %p7221_p11, 1, 0 }
  0x16   : > { %s6314_s26 = sshll.u32 %s289_s24, 5  ;;  %s7230_s29 = scalar_lea.hbm %s11988_s0, %s6549_s25 }
  0x17   : > { %s293_s30 = scalar_lea.vmem [#allocation3], %s6314_s26  ;;  %p7234_p12 = pnand %p6755_p9, %p7207_p5 }
  0x18   : > { %s301_s10 = sshll.u32 %s293_s30, 4  ;;  %s290_s17 = scalar_lea.sflag [#allocation4], %s289_s24  ;;  %s7238_s10 = int_to_ptr.vmem [resolvable:$true] %s301_s10 }
  0x19   : > { %s7002_s18 = scalar_lea.hbm %s7230_s29, 512  ;;  %p7004_p2 = pneg %p7234_p12 }
  0x1a   : > { %p7003_p1 = scmp.ne.s32.totalorder %s7230_s29, %s7002_s18  ;;  %s7007_s20 = scalar_lea.hbm %s11988_s0, 4096 }
  0x1b   : > { %p7008_p5 = scmp.lt.s32.totalorder %s7230_s29, %s11988_s0  ;;  %p7009_p7 = scmp.lt.s32.totalorder %s7007_s20, %s7002_s18 }
  0x1c   : > { %p7005_p3 = pnand %p7004_p2, %p7003_p1 }
  0x1d   : > { %p7010_p8 = por %p7009_p7, %p7008_p5 }
  0x1e   : > { %p7006_p4 = pneg %p7005_p3 }
  0x20   : > { %p7011_p9 = pnand %p7010_p8, %p7006_p4 }
  0x22   : > { %7014 = shalt.err (!%p7011_p9)
}
  0x23   : > { %s7015_s24 = scalar_lea.vmem %s7238_s10, 512  ;;  %s7104_s30 = smov [#allocation3]  }
  0x24   : > { %p7016_p13 = scmp.ne.s32.totalorder %s7238_s10, %s7015_s24  ;;  %s7020_s19 = sshll.u32 %s7104_s30, 4  ;;  %s7021_s19 = int_to_ptr.vmem [resolvable:$false] %s7020_s19 }
  0x25   : > { %s7022_s25 = scalar_lea.vmem %s7021_s19, 1024  ;;  %p7023_p3 = scmp.lt.s32.totalorder %s7238_s10, %s7021_s19 }
  0x26   : > { %p7018_p0 = pnand %p7016_p13, %p7004_p2  ;;  %p7024_p11 = scmp.lt.s32.totalorder %s7022_s25, %s7015_s24 }
  0x28   : > { %p7019_p1 = pneg %p7018_p0  ;;  %p7025_p10 = por %p7024_p11, %p7023_p3 }
  0x2a   : > { %p7026_p6 = pnand %p7025_p10, %p7019_p1 }
  0x2c   : > { %7029 = shalt.err (!%p7026_p6)
}
  0x2d   : > { %6750 = dma.hbm_to_vmem [thread:$0]  (!%p7234_p12), %s7230_s29, 512, %s7238_s10, %s290_s17  }
  0x2e   : > { %p12238_p4 = scmp.lt.s32.totalorder %s7098_s14, 9  ;;  %p12239_p5 = scmp.ge.s32.totalorder %s7098_s14, 1 }
  0x30   : > { %p307_p13 = pnand %p12239_p5, %p12238_p4 }
  0x32   : > { %310 = sbr.rel (%p307_p13) target bundleno = 2116 (0x844), region = 56 }
  0x37   : > { %s7265_s18 = sand.u32 1, %s7090_s12   ;;  %p12240_p6 = scmp.ne.s32.totalorder %s12234_s21, 0 }
  0x38   : > { %s6318_s19 = sshll.u32 %s7265_s18, 5  ;;  %s313_s26 = scalar_lea.sflag [#allocation4], %s7265_s18 }
  0x39   : > { %s7269_s20 = scalar_lea.vmem [#allocation3], %s6318_s19 }
  0x3a   : > { %7077 = dma.done.wait (%p12240_p6), %s313_s26, 512  }
  0x3b   : > { %7079 = vsyncadd (%p12240_p6), %s313_s26, 4294966784  ;;  %s6319_s29 = sshll.u32 %s7265_s18, 3  ;;  %v7279_v1 = vld [vmem:[%s11989_s1] sm:$0xff]  ;;  %v7284_v2 = vld [vmem:[%s11989_s1 + $0x8] sm:$0xff]  ;;  %s7405_s21 = smov 0  }
  0x3c   : > { %12241 = vst [vmem:[#allocation10_spill] sm:$0xff] %v7279_v1  ;;  %12242 = vst [vmem:[#allocation11_spill] sm:$0xff] %v7284_v2  ;;  %v7289_v3 = vld [vmem:[%s11989_s1 + $0x10] sm:$0xff]  ;;  %v7294_v4 = vld [vmem:[%s11989_s1 + $0x18] sm:$0xff]  ;;  %s7403_s30 = scalar_lea.vmem [#allocation6], %s6319_s29 }
  0x3d   : > { %12243 = vst [vmem:[#allocation12_spill] sm:$0xff] %v7289_v3  ;;  %12244 = vst [vmem:[#allocation13_spill] sm:$0xff] %v7294_v4  ;;  %v7299_v5 = vld [vmem:[%s11991_s3] sm:$0xff]  ;;  %v7304_v6 = vld [vmem:[%s11991_s3 + $0x8] sm:$0xff] }
  0x3e   : > { %12245 = vst [vmem:[#allocation14_spill] sm:$0xff] %v7299_v5  ;;  %12246 = vst [vmem:[#allocation15_spill] sm:$0xff] %v7304_v6  ;;  %v7309_v7 = vld [vmem:[%s11991_s3 + $0x10] sm:$0xff]  ;;  %v7314_v8 = vld [vmem:[%s11991_s3 + $0x18] sm:$0xff] }
  0x3f   : > { %12247 = vst [vmem:[#allocation16_spill] sm:$0xff] %v7309_v7  ;;  %12248 = vst [vmem:[#allocation17_spill] sm:$0xff] %v7314_v8  ;;  %v7319_v9 = vld [vmem:[%s11993_s5] sm:$0xff]  ;;  %v7324_v10 = vld [vmem:[%s11993_s5 + $0x8] sm:$0xff] }
  0x40   : > { %12249 = vst [vmem:[#allocation18_spill] sm:$0xff] %v7319_v9  ;;  %12250 = vst [vmem:[#allocation19_spill] sm:$0xff] %v7324_v10  ;;  %v7329_v11 = vld [vmem:[%s11993_s5 + $0x10] sm:$0xff]  ;;  %v7334_v12 = vld [vmem:[%s11993_s5 + $0x18] sm:$0xff] }
  0x41   : > { %12251 = vst [vmem:[#allocation20_spill] sm:$0xff] %v7329_v11  ;;  %12252 = vst [vmem:[#allocation21_spill] sm:$0xff] %v7334_v12  ;;  %v7339_v13 = vld [vmem:[%s11995_s7] sm:$0x1]  ;;  %v7349_v15 = vld [vmem:[%s11990_s2 + $0x8] sm:$0xff] }
  0x42   : > { %12253 = vst [vmem:[#allocation22_spill] sm:$0xff] %v7339_v13  ;;  %v7344_v14 = vld [vmem:[%s11990_s2] sm:$0xff]  ;;  %12255 = vst [vmem:[#allocation24_spill] sm:$0xff] %v7349_v15  ;;  %v7354_v16 = vld [vmem:[%s11990_s2 + $0x10] sm:$0xff] }
  0x43   : > { %12254 = vst [vmem:[#allocation23_spill] sm:$0xff] %v7344_v14  ;;  %12256 = vst [vmem:[#allocation25_spill] sm:$0xff] %v7354_v16  ;;  %v7359_v17 = vld [vmem:[%s11990_s2 + $0x18] sm:$0xff]  ;;  %v7364_v18 = vld [vmem:[%s11992_s4] sm:$0xff] }
  0x44   : > { %12257 = vst [vmem:[#allocation26_spill] sm:$0xff] %v7359_v17  ;;  %12258 = vst [vmem:[#allocation27_spill] sm:$0xff] %v7364_v18  ;;  %v7369_v19 = vld [vmem:[%s11992_s4 + $0x8] sm:$0xff]  ;;  %v7374_v20 = vld [vmem:[%s11992_s4 + $0x10] sm:$0xff] }
  0x45   : > { %12259 = vst [vmem:[#allocation28_spill] sm:$0xff] %v7369_v19  ;;  %12260 = vst [vmem:[#allocation29_spill] sm:$0xff] %v7374_v20  ;;  %v7379_v21 = vld [vmem:[%s11992_s4 + $0x18] sm:$0xff]  ;;  %v7384_v22 = vld [vmem:[%s11994_s6] sm:$0xff] }
  0x46   : > { %12261 = vst [vmem:[#allocation30_spill] sm:$0xff] %v7379_v21  ;;  %12262 = vst [vmem:[#allocation31_spill] sm:$0xff] %v7384_v22  ;;  %v7389_v23 = vld [vmem:[%s11994_s6 + $0x8] sm:$0xff]  ;;  %v7394_v24 = vld [vmem:[%s11994_s6 + $0x10] sm:$0xff] }
  0x47   : > { %12263 = vst [vmem:[#allocation32_spill] sm:$0xff] %v7389_v23  ;;  %12264 = vst [vmem:[#allocation33_spill] sm:$0xff] %v7394_v24  ;;  %v7399_v25 = vld [vmem:[%s11994_s6 + $0x18] sm:$0xff]  ;;  %v7401_v26 = vld [vmem:[#allocation2] sm:$0x1] }
  0x48   : > { %12265 = vst [vmem:[#allocation34_spill] sm:$0xff] %v7399_v25  ;;  %12266 = vst [vmem:[#allocation35_spill] sm:$0xff] %v7401_v26 }
  0x49 LB: >> { %v12267_v4 = vld [vmem:[#allocation13_spill] sm:$0xff]  ;;  %v12268_v3 = vld [vmem:[#allocation12_spill] sm:$0xff]  ;;  %v12269_v2 = vld [vmem:[#allocation11_spill] sm:$0xff]  ;;  %v12000_v27 = vmov 0.0   ;;  %s6320_s25 = sshll.u32 %s7102_s21, 9  ;;  %v7106_v28 = vmov 0   ;;  %s7102_s21 = sphi %s7405_s21, %s384_s21  }
  0x4a   : >> { %v12270_v1 = vld [vmem:[#allocation10_spill] sm:$0xff]  ;;  %502 = vmatprep.mubr.f32.mxu0 %v12000_v27  ;;  %591 = vmatprep.mubr.f32.mxu1 %v12000_v27  ;;  %s7413_s29 = sshra.s32 %s6320_s25, 7  ;;  %v12272_v15 = vld [vmem:[#allocation24_spill] sm:$0xff]  ;;  %vm429_vm0 = vcmask 1043456   ;;  %v12273_v16 = vld [vmem:[#allocation25_spill] sm:$0xff]  ;;  %vm416_vm1 = vcmask 31744  }
  0x4b   : >> { %6806 = vset.pattern.permute.xlu0 %v7106_v28  ;;  %6807 = vset.pattern.permute.xlu1 %v7106_v28  ;;  %v12271_v17 = vld [vmem:[#allocation26_spill] sm:$0xff]  ;;  %s6321_s19 = sshll.u32 %s7413_s29, 2  ;;  %v12274_v14 = vld [vmem:[#allocation23_spill] sm:$0xff]  ;;  %v12309_v11 = vmov 0  ;;  %s6212_s10 = scalar_lea.vmem %s7403_s30, %s7413_s29 [#allocation6] }
  0x4c   : >> { %409 = vperm.xlu0 %6806, %v12271_v17   ;;  %399 = vperm.xlu1 %6807, %v12272_v15   ;;  %s389_s26 = scalar_lea.vmem %s7269_s20, %s6321_s19 [#allocation3]  ;;  %v12276_v20 = vld [vmem:[#allocation29_spill] sm:$0xff]  ;;  %v12277_v19 = vld [vmem:[#allocation28_spill] sm:$0xff]  ;;  %v12278_v18 = vld [vmem:[#allocation27_spill] sm:$0xff]  ;;  %s384_s21 = sadd.s32 1, %s7102_s21  }
  0x4d   : >> { %v390_v29 = vld [vmem:[%s389_s26] sm:$0xff]  ;;  %v391_v30 = vld [vmem:[%s389_s26 + $0x8] sm:$0xff]  ;;  %v12275_v21 = vld [vmem:[#allocation30_spill] sm:$0xff]  ;;  %p381_p10 = scmp.ge.s32.totalorder %s384_s21, 2  }
  0x4e   : >> { %v414_v31 = vcombine.high %v390_v29, %v390_v29  ;;  %v415_v32 = vcombine.high %v391_v30, %v391_v30  ;;  %v12280_v24 = vld [vmem:[#allocation33_spill] sm:$0xff]  ;;  %v12281_v23 = vld [vmem:[#allocation32_spill] sm:$0xff]  ;;  %v12282_v22 = vld [vmem:[#allocation31_spill] sm:$0xff]  ;;  %s6550_s15 = sshll.u32 (%p381_p10), %s7189_s8, 7  ;;  %s6233_s24 = sshll.u32 (%p381_p10), %s7403_s30, 4  ;;  %s6234_s24 = int_to_ptr.vmem [resolvable:$true] %s6233_s24 }
  0x4f   : >> { %v12279_v25 = vld [vmem:[#allocation34_spill] sm:$0xff]  ;;  %v12283_v26 = vld [vmem:[#allocation35_spill] sm:$0xff]  ;;  %s6231_s28 = scalar_lea.hbm (%p381_p10), %s11997_s9, %s6550_s15  ;;  %s6219_s25 = scalar_lea.sflag (%p381_p10), [#allocation5], %s7265_s18 }
  0x50   : >> { %404 = vperm.xlu0 %6806, %v12273_v16   ;;  %394 = vperm.xlu1 %6807, %v12274_v14   ;;  %s7030_s29 = scalar_lea.vmem (%p381_p10), %s6234_s24, 128  ;;  %p12715_p12 = scmp.ne.s32.totalorder (%p381_p10), %s12235_s22, 0 }
  0x51   : >> { %6322 = vmatprep.subr.msk.mxu0 %vm429_vm0, %v414_v31  ;;  %6328 = vmatprep.subr.msk.mxu1 %vm429_vm0, %v415_v32  ;;  %p7031_p11 = scmp.ne.s32.totalorder (%p381_p10), %s6234_s24, %s7030_s29  ;;  %s7114_s19 = smov (%p381_p10), [#allocation6]  }
  0x52   : >> { %6323 = vmatpush1.msk.msra.mxu0 %vm429_vm0, %v390_v29  ;;  %6329 = vmatpush1.msk.msra.mxu1 %vm429_vm0, %v391_v30  ;;  %s7034_s21 = sshll.u32 (%p381_p10), %s7114_s19, 4  ;;  %s7035_s21 = int_to_ptr.vmem [resolvable:$false] %s7034_s21 }
  0x53   : >> { %6324 = vmatmul.mubr.msk.f32.vlgmr.msra.gmra.mxu0 %vm416_vm1, %v12270_v1  ;;  %6330 = vmatmul.mubr.msk.f32.vlgmr.msra.gmra.mxu1 %vm416_vm1, %v12270_v1  ;;  %p7032_p0 = pnand (%p381_p10), %p7031_p11, %p12715_p12  ;;  %s7036_s20 = scalar_lea.vmem (%p381_p10), %s7035_s21, 256 }
  0x54   : >> { %508 = vmatprep.mubr.f32.mxu0 %v12000_v27  ;;  %597 = vmatprep.mubr.f32.mxu1 %v12000_v27  ;;  %p7037_p7 = scmp.lt.s32.totalorder (%p381_p10), %s6234_s24, %s7035_s21  ;;  %p7038_p8 = scmp.lt.s32.totalorder (%p381_p10), %s7036_s20, %s7030_s29 }
  0x55   : >> { %2297 = vperm.xlu0 %6806, %v12275_v21   ;;  %2292 = vperm.xlu1 %6807, %v12276_v20   ;;  %p7033_p2 = pneg (%p381_p10), %p7032_p0 }
  0x56   : > { %p7039_p9 = por (%p381_p10), %p7038_p8, %p7037_p7 }
  0x57   : >> { %6325 = vmatmul.mubr.msk.f32.gmra.mxu0 %vm416_vm1, %v12269_v2  ;;  %6331 = vmatmul.mubr.msk.f32.gmra.mxu1 %vm416_vm1, %v12269_v2 }
  0x58   : >> { %514 = vmatprep.mubr.f32.mxu0 %v12000_v27  ;;  %603 = vmatprep.mubr.f32.mxu1 %v12000_v27  ;;  %p7040_p1 = pnand (%p381_p10), %p7039_p9, %p7033_p2 }
  0x59   : >> { %2287 = vperm.xlu0 %6806, %v12277_v19   ;;  %2282 = vperm.xlu1 %6807, %v12278_v18  }
  0x5b   : >> { %6326 = vmatmul.mubr.msk.f32.gmra.mxu0 %vm416_vm1, %v12268_v3  ;;  %6332 = vmatmul.mubr.msk.f32.gmra.mxu1 %vm416_vm1, %v12268_v3 }
  0x5c   : >> { %520 = vmatprep.mubr.f32.mxu0 %v12000_v27  ;;  %609 = vmatprep.mubr.f32.mxu1 %v12000_v27 }
  0x5d   : >> { %4172 = vperm.xlu0 %6806, %v12279_v25   ;;  %4167 = vperm.xlu1 %6807, %v12280_v24  }
  0x5f   : >> { %6327 = vmatmul.mubr.msk.f32.gmra.mxu0 %vm416_vm1, %v12267_v4  ;;  %6333 = vmatmul.mubr.msk.f32.gmra.mxu1 %vm416_vm1, %v12267_v4 }
  0x60   : >> { %2377 = vmatprep.mubr.f32.mxu0 %v12000_v27  ;;  %2466 = vmatprep.mubr.f32.mxu1 %v12000_v27 }
  0x61   : >> { %4162 = vperm.xlu0 %6806, %v12281_v23   ;;  %4157 = vperm.xlu1 %6807, %v12282_v22  }
  0x65   : >> { %6031 = vperm.xlu0 %6806, %v12283_v26  }
  0xc7   : >> { %v7454_v33 = vpop.permute.xlu1 %399 }
  0xcb   : >> { %v395_v34 = vpop.permute.xlu1 %394 }
 0x113   : >> { %v504_v35 = vpop.f32.mrf.mxu0  ;;  %v593_v36 = vpop.f32.mrf.mxu1 }
 0x114   : >> { %v7456_v37 = vadd.f32 %v504_v35, %v395_v34  ;;  %v7458_v38 = vadd.f32 %v593_v36, %v395_v34 }
 0x115   : >> { %v506_v39 = vpop.f32.mrf.mxu0  ;;  %v595_v52 = vpop.f32.mrf.mxu1 }
 0x116   : >> { %12284 = vst [vmem:[#allocation36_spill] sm:$0xff] %v7456_v37  ;;  %12285 = vst [vmem:[#allocation37_spill] sm:$0xff] %v7458_v38  ;;  %v12004_v40 = vand.u32 2147483647, %v7456_v37  ;;  %v619_v41 = vand.u32 2139095040, %v7456_v37  ;;  %v827_v43 = vand.u32 2139095040, %v7458_v38  ;;  %v7464_v44 = vadd.f32 %v506_v39, %v395_v34 }
 0x117   : >> { %v12003_v42 = vand.u32 2147483647, %v7458_v38  ;;  %v7476_v60 = vadd.f32 %v595_v52, %v395_v34  ;;  %v12015_v39 = vmov 683565275   ;;  %v12009_v52 = vmov 920167782  }
 0x118   : >> { %12286 = vst [vmem:[#allocation38_spill] sm:$0xff] %v7464_v44  ;;  %v620_v45 = vshrl.u32 %v619_v41, 23  ;;  %v623_v46 = vand.u32 8388607, %v12004_v40  ;;  %v828_v47 = vshrl.u32 %v827_v43, 23  ;;  %v723_v51 = vand.u32 2139095040, %v7464_v44 }
 0x119   : >> { %v831_v48 = vand.u32 8388607, %v12003_v42  ;;  %v12002_v50 = vand.u32 2147483647, %v7464_v44  ;;  %12287 = vst [vmem:[#allocation39_spill] sm:$0xff] %v7476_v60 }
 0x11a   : >> { %v6334_v49 = vadd.s32 4294967169, %v620_v45  ;;  %v624_v53 = vor.u32 8388608, %v623_v46  ;;  %v6342_v54 = vadd.s32 4294967169, %v828_v47  ;;  %v724_v57 = vshrl.u32 %v723_v51, 23 }
 0x11b   : >> { %v832_v56 = vor.u32 8388608, %v831_v48  ;;  %v7474_v59 = vand.u32 8388607, %v12002_v50  ;;  %v12011_v43 = vmov 2475754826  }
 0x11c   : >> { %v626_v55 = vadd.s32 1, %v6334_v49  ;;  %v834_v58 = vadd.s32 1, %v6342_v54  ;;  %v6338_v61 = vadd.s32 4294967169, %v724_v57  ;;  %v7478_v63 = vshll.u32 %v624_v53, 8 }
 0x11d   : >> { %v7480_v30 = vshll.u32 %v832_v56, 8  ;;  %v12007_v47 = vmov 2131351028   ;;  %v12005_v49 = vmov 2102212464  }
 0x11e   : >> { %vm627_vm2 = vcmp.gt.s32.totalorder %v626_v55, 0  ;;  %vm835_vm3 = vcmp.gt.s32.totalorder %v834_v58, 0  ;;  %v7485_v35 = vadd.s32 1, %v6338_v61  ;;  %v12013_v61 = vmov 1326507024  }
 0x11f   : >> { %v628_v62 = vsel %vm627_vm2, %v626_v55, 0  ;;  %v836_v29 = vsel %vm835_vm3, %v834_v58, 0  ;;  %v12308_v12 = vand.u32 2147483647, %v7458_v38 }
 0x120   : >> { %v629_v0 = vshrl.u32 %v628_v62, 5  ;;  %v630_v28 = vand.u32 31, %v628_v62  ;;  %v7482_v31 = vshrl.u32 %v836_v29, 5  ;;  %v838_v46 = vand.u32 31, %v836_v29 }
 0x121   : >> { %vm731_vm13 = vcmp.gt.s32.totalorder %v7485_v35, 0 }
 0x122   : >> { %v631_v36 = vsub.s32 32, %v630_v28  ;;  %v633_v41 = vshll.u32 %v12015_v39, %v630_v28  ;;  %v636_v45 = vshll.u32 %v12011_v43, %v630_v28  ;;  %v639_v48 = vshll.u32 %v12007_v47, %v630_v28 }
 0x123   : >> { %v642_v51 = vshll.u32 %v12005_v49, %v630_v28  ;;  %v645_v53 = vshll.u32 %v12009_v52, %v630_v28  ;;  %vm648_vm4 = vcmp.lt.s32.totalorder %v629_v0, 1  ;;  %vm649_vm5 = vcmp.lt.s32.totalorder %v629_v0, 2 }
 0x124   : >> { %v634_v54 = vshrl.u32 %v12011_v43, %v631_v36  ;;  %v637_v55 = vshrl.u32 %v12007_v47, %v631_v36  ;;  %v640_v56 = vshrl.u32 %v12005_v49, %v631_v36  ;;  %v632_v57 = vshrl.u32 %v12015_v39, %v631_v36 }
 0x125   : >> { %v643_v58 = vshrl.u32 %v12009_v52, %v631_v36  ;;  %v646_v62 = vshrl.u32 %v12013_v61, %v631_v36  ;;  %vm650_vm6 = vcmp.lt.s32.totalorder %v629_v0, 3  ;;  %v839_v28 = vsub.s32 32, %v838_v46 }
 0x126   : >> { %v635_v29 = vor.u32 %v634_v54, %v633_v41  ;;  %v638_v27 = vor.u32 %v637_v55, %v636_v45  ;;  %v641_v50 = vor.u32 %v640_v56, %v639_v48  ;;  %vm651_vm7 = vcmp.lt.s32.totalorder %v629_v0, 4 }
 0x127   : >> { %v644_v42 = vor.u32 %v643_v58, %v642_v51  ;;  %v647_v40 = vor.u32 %v646_v62, %v645_v53  ;;  %v841_v32 = vshll.u32 %v12015_v39, %v838_v46  ;;  %v12288_v41 = vmov 2475754826  }
 0x128   : >> { %v652_v34 = vsel %vm648_vm4, %v632_v57, %v635_v29  ;;  %v653_v49 = vsel %vm651_vm7, %v641_v50, 2102212464  ;;  %v656_v47 = vsel %vm648_vm4, %v635_v29, %v638_v27  ;;  %v660_v52 = vsel %vm648_vm4, %v638_v27, %v641_v50 }
 0x129   : >> { %v654_v43 = vsel %vm650_vm6, %v638_v27, %v653_v49  ;;  %v657_v36 = vsel %vm651_vm7, %v644_v42, 920167782  ;;  %v661_v61 = vsel %vm651_vm7, %v647_v40, 1326507024  ;;  %v844_v45 = vshll.u32 %v12288_v41, %v838_v46 }
 0x12a   : >> { %v658_v48 = vsel %vm650_vm6, %v641_v50, %v657_v36  ;;  %v662_v51 = vsel %vm650_vm6, %v644_v42, %v661_v61  ;;  %v840_v53 = vshrl.u32 %v12015_v39, %v839_v28  ;;  %v842_v54 = vshrl.u32 %v12288_v41, %v839_v28 }
 0x12b   : >> { %v655_v55 = vsel %vm649_vm5, %v652_v34, %v654_v43  ;;  %v659_v56 = vsel %vm649_vm5, %v656_v47, %v658_v48  ;;  %v663_v57 = vsel %vm649_vm5, %v660_v52, %v662_v51  ;;  %v12289_v58 = vmov 2131351028  }
 0x12c   : >> { %v845_v27 = vshrl.u32 %v12289_v58, %v839_v28  ;;  %v7514_v40 = vmul.u32.u64.low %v7478_v63, %v663_v57  ;;  %v7515_v49 = vmul.u32.u64.high %v7478_v63, %v663_v57, %v7514_v40  ;;  %v843_v42 = vor.u32 %v842_v54, %v841_v32 }
 0x12d   : >> { %v7518_v50 = vmul.u32.u64.low %v7478_v63, %v659_v56  ;;  %v7519_v62 = vmul.u32.u64.high %v7478_v63, %v659_v56, %v7518_v50  ;;  %v847_v29 = vshll.u32 %v12289_v58, %v838_v46  ;;  %v12290_v34 = vmov 2102212464  }
 0x12e   : >> { %v846_v61 = vor.u32 %v845_v27, %v844_v45  ;;  %v848_v43 = vshrl.u32 %v12290_v34, %v839_v28  ;;  %v671_v0 = vmul.u32 %v7478_v63, %v655_v55  ;;  %v850_v47 = vshll.u32 %v12290_v34, %v838_v46 }
 0x12f   : >> { %v12291_v52 = vmov 920167782   ;;  %v12292_v48 = vmov 1326507024   ;;  %vm856_vm8 = vcmp.lt.s32.totalorder %v7482_v31, 1  ;;  %vm857_vm9 = vcmp.lt.s32.totalorder %v7482_v31, 2 }
 0x130   : >> { %v851_v36 = vshrl.u32 %v12291_v52, %v839_v28  ;;  %v854_v51 = vshrl.u32 %v12292_v48, %v839_v28  ;;  %v849_v57 = vor.u32 %v848_v43, %v847_v29  ;;  %v853_v40 = vshll.u32 %v12291_v52, %v838_v46 }
 0x131   : >> { %vm673_vm10 = vc.u32 %v7515_v49, %v7518_v50  ;;  %v674_v32 = vadd.s32 1, %v7519_v62  ;;  %vm858_vm11 = vcmp.lt.s32.totalorder %v7482_v31, 3  ;;  %vm859_vm12 = vcmp.lt.s32.totalorder %v7482_v31, 4 }
 0x132   : >> { %v852_v45 = vor.u32 %v851_v36, %v850_v47  ;;  %v855_v63 = vor.u32 %v854_v51, %v853_v40  ;;  %v860_v54 = vsel %vm856_vm8, %v840_v53, %v843_v42  ;;  %v864_v28 = vsel %vm856_vm8, %v843_v42, %v846_v61 }
 0x133   : >> { %v675_v55 = vsel %vm673_vm10, %v674_v32, %v7519_v62  ;;  %v861_v46 = vsel %vm859_vm12, %v849_v57, 2102212464  ;;  %v868_v27 = vsel %vm856_vm8, %v846_v61, %v849_v57  ;;  %v12293_v36 = vand.u32 2139095040, %v7476_v60 }
 0x134   : >> { %v865_v56 = vsel %vm859_vm12, %v852_v45, 920167782  ;;  %v676_v29 = vadd.s32 %v675_v55, %v671_v0  ;;  %v862_v43 = vsel %vm858_vm11, %v846_v61, %v861_v46  ;;  %v869_v1 = vsel %vm859_vm12, %v855_v63, 1326507024 }
 0x135   : >> { %v866_v39 = vsel %vm858_vm11, %v849_v57, %v865_v56  ;;  %v870_v47 = vsel %vm858_vm11, %v852_v45, %v869_v1  ;;  %v932_v51 = vshrl.u32 %v12293_v36, 23  ;;  %v863_v61 = vsel %vm857_vm9, %v860_v54, %v862_v43 }
 0x136   : >> { %v867_v2 = vsel %vm857_vm9, %v864_v28, %v866_v39  ;;  %v677_v53 = vadd.s32 536870912, %v676_v29  ;;  %v871_v62 = vsel %vm857_vm9, %v868_v27, %v870_v47  ;;  %v732_v0 = vsel %vm731_vm13, %v7485_v35, 0 }
 0x137   : >> { %v7545_v42 = vmul.u32.u64.low %v7480_v30, %v867_v2  ;;  %v7546_v40 = vmul.u32.u64.high %v7480_v30, %v867_v2, %v7545_v42  ;;  %v7552_v39 = vmul.u32.u64.low %v7480_v30, %v871_v62  ;;  %v7553_v1 = vmul.u32.u64.high %v7480_v30, %v871_v62, %v7552_v39 }
 0x138   : >> { %v7556_v57 = vshrl.u32 %v677_v53, 30  ;;  %v734_v32 = vand.u32 31, %v732_v0  ;;  %v12295_v45 = vor.u32 8388608, %v7474_v59  ;;  %v6346_v28 = vadd.s32 4294967169, %v932_v51 }
 0x139   : >> { %v879_v55 = vmul.u32 %v7480_v30, %v863_v61  ;;  %v882_v31 = vadd.s32 1, %v7546_v40  ;;  %vm881_vm14 = vc.u32 %v7553_v1, %v7545_v42  ;;  %v733_v46 = vshrl.u32 %v732_v0, 5 }
 0x13a   : >> { %12294 = vst [vmem:[#allocation40_spill] sm:$0xff] %v7556_v57  ;;  %v7560_v63 = vshll.u32 %v12295_v45, 8  ;;  %v679_v2 = vshll.u32 %v7556_v57, 30  ;;  %v735_v54 = vsub.s32 32, %v734_v32  ;;  %v12296_v35 = vmov 683565275  }
 0x13b   : >> { %v737_v56 = vshll.u32 %v12296_v35, %v734_v32  ;;  %v740_v27 = vshll.u32 %v12288_v41, %v734_v32  ;;  %v883_v59 = vsel %vm881_vm14, %v882_v31, %v7546_v40  ;;  %v743_v36 = vshll.u32 %v12289_v58, %v734_v32 }
 0x13c   : >> { %v7569_v43 = vsub.s32 %v676_v29, %v679_v2  ;;  %v738_v47 = vshrl.u32 %v12288_v41, %v735_v54  ;;  %v884_v30 = vadd.s32 %v883_v59, %v879_v55  ;;  %v741_v51 = vshrl.u32 %v12289_v58, %v735_v54 }
 0x13d   : >> { %v744_v53 = vshrl.u32 %v12290_v34, %v735_v54  ;;  %v746_v62 = vshll.u32 %v12290_v34, %v734_v32  ;;  %v747_v0 = vshrl.u32 %v12291_v52, %v735_v54  ;;  %v749_v29 = vshll.u32 %v12291_v52, %v734_v32 }
 0x13e   : >> { %v682_v61 = vsub.s32 0, %v7569_v43  ;;  %v739_v39 = vor.u32 %v738_v47, %v737_v56  ;;  %v885_v45 = vadd.s32 536870912, %v884_v30  ;;  %v742_v40 = vor.u32 %v741_v51, %v740_v27 }
 0x13f   : >> { %v745_v2 = vor.u32 %v744_v53, %v743_v36  ;;  %v750_v31 = vshrl.u32 %v12292_v48, %v735_v54  ;;  %v736_v59 = vshrl.u32 %v12296_v35, %v735_v54  ;;  %v748_v3 = vor.u32 %v747_v0, %v746_v62 }
 0x140   : >> { %v6335_v55 = vmin.u32 %v682_v61, %v7569_v43  ;;  %v938_v4 = vadd.s32 1, %v6346_v28  ;;  %v7583_v14 = vshrl.u32 %v885_v45, 30  ;;  %vm752_vm15 = vcmp.lt.s32.totalorder %v733_v46, 1 }
 0x141   : >> { %v751_v15 = vor.u32 %v750_v31, %v749_v29  ;;  %vm755_vm0 = vcmp.lt.s32.totalorder %v733_v46, 4  ;;  %vm753_vm1 = vcmp.lt.s32.totalorder %v733_v46, 2  ;;  %v760_v32 = vsel %vm752_vm15, %v739_v39, %v742_v40 }
 0x142   : >> { %12297 = vst [vmem:[#allocation41_spill] sm:$0xff] %v7583_v14  ;;  %v684_v56 = vclz %v6335_v55  ;;  %v757_v47 = vsel %vm755_vm0, %v745_v2, 2102212464  ;;  %v887_v27 = vshll.u32 %v7583_v14, 30  ;;  %vm754_vm2 = vcmp.lt.s32.totalorder %v733_v46, 3 }
 0x143   : >> { %v761_v36 = vsel %vm755_vm0, %v748_v3, 920167782  ;;  %v764_v51 = vsel %vm752_vm15, %v742_v40, %v745_v2  ;;  %v756_v61 = vsel %vm752_vm15, %v736_v59, %v739_v39  ;;  %v765_v54 = vsel %vm755_vm0, %v751_v15, 1326507024 }
 0x144   : >> { %v6336_v53 = vadd.s32 4294967294, %v684_v56  ;;  %v762_v16 = vsel %vm754_vm2, %v745_v2, %v761_v36  ;;  %v7586_v62 = vsub.s32 %v884_v30, %v887_v27  ;;  %v758_v28 = vsel %vm754_vm2, %v742_v40, %v757_v47  ;;  %v510_v2 = vpop.f32.mrf.mxu0 }
 0x145   : >> { %v763_v0 = vsel %vm753_vm1, %v760_v32, %v762_v16  ;;  %v766_v29 = vsel %vm754_vm2, %v748_v3, %v765_v54  ;;  %v759_v30 = vsel %vm753_vm1, %v756_v61, %v758_v28  ;;  %v12021_v16 = vand.u32 2147483647, %v7476_v60 }
 0x146   : >> { %vm6337_vm3 = vcmp.lt.s32.totalorder %v6336_v53, 0  ;;  %v767_v45 = vsel %vm753_vm1, %v764_v51, %v766_v29  ;;  %v7591_v31 = vmul.u32.u64.low %v7560_v63, %v763_v0  ;;  %v7592_v55 = vmul.u32.u64.high %v7560_v63, %v763_v0, %v7591_v31 }
 0x147   : >> { %v687_v17 = vsel %vm6337_vm3, 0, %v6336_v53  ;;  %v890_v56 = vsub.s32 0, %v7586_v62  ;;  %v7597_v39 = vmul.u32.u64.low %v7560_v63, %v767_v45  ;;  %v7598_v15 = vmul.u32.u64.high %v7560_v63, %v767_v45, %v7597_v39 }
 0x148   : >> { %vm939_vm4 = vcmp.gt.s32.totalorder %v938_v4, 0  ;;  %v692_v59 = vsub.s32 4294967266, %v687_v17  ;;  %v778_v47 = vadd.s32 1, %v7592_v55  ;;  %v775_v27 = vmul.u32 %v7560_v63, %v759_v30 }
 0x149   : >> { %v6343_v3 = vmin.u32 %v890_v56, %v7586_v62  ;;  %v940_v40 = vsel %vm939_vm4, %v938_v4, 0  ;;  %vm777_vm5 = vc.u32 %v7598_v15, %v7591_v31  ;;  %v935_v51 = vand.u32 8388607, %v12021_v16 }
 0x14a   : >> { %v942_v36 = vand.u32 31, %v940_v40  ;;  %v779_v46 = vsel %vm777_vm5, %v778_v47, %v7592_v55  ;;  %v7611_v53 = vadd.f32 %v510_v2, %v7454_v33  ;;  %v688_v4 = vsub.s32 32, %v687_v17 }
 0x14b   : >> { %v892_v32 = vclz %v6343_v3  ;;  %v780_v54 = vadd.s32 %v779_v46, %v775_v27  ;;  %v693_v0 = vadd.s32 127, %v692_v59  ;;  %v672_v63 = vadd.s32 %v7518_v50, %v7515_v49 }
 0x14c   : >> { %12298 = vst [vmem:[#allocation42_spill] sm:$0xff] %v7611_v53  ;;  %v943_v28 = vsub.s32 32, %v942_v36  ;;  %v936_v45 = vor.u32 8388608, %v935_v51  ;;  %v1035_v56 = vand.u32 2139095040, %v7611_v53  ;;  %v941_v47 = vshrl.u32 %v940_v40, 5 }
 0x14d   : >> { %v6344_v61 = vadd.s32 4294967294, %v892_v32  ;;  %v781_v29 = vadd.s32 536870912, %v780_v54  ;;  %v690_v55 = vshrl.u32 %v672_v63, %v688_v4  ;;  %v694_v2 = vshll.u32 %v693_v0, 23 }
 0x14e   : >> { %v946_v30 = vshrl.u32 %v12288_v41, %v943_v28  ;;  %v949_v3 = vshrl.u32 %v12289_v58, %v943_v28  ;;  %v945_v32 = vshll.u32 %v12296_v35, %v942_v36  ;;  %v952_v59 = vshrl.u32 %v12290_v34, %v943_v28 }
 0x14f   : >> { %vm6345_vm6 = vcmp.lt.s32.totalorder %v6344_v61, 0  ;;  %v7616_v39 = vshrl.u32 %v781_v29, 30  ;;  %v948_v50 = vshll.u32 %v12288_v41, %v942_v36  ;;  %v951_v46 = vshll.u32 %v12289_v58, %v942_v36 }
 0x150   : >> { %v895_v27 = vsel %vm6345_vm6, 0, %v6344_v61  ;;  %v954_v51 = vshll.u32 %v12290_v34, %v942_v36  ;;  %v955_v4 = vshrl.u32 %v12291_v52, %v943_v28  ;;  %v957_v63 = vshll.u32 %v12291_v52, %v942_v36 }
 0x151   : >> { %12299 = vst [vmem:[#allocation43_spill] sm:$0xff] %v7616_v39  ;;  %v783_v49 = vshll.u32 %v7616_v39, 30  ;;  %v958_v0 = vshrl.u32 %v12292_v48, %v943_v28  ;;  %v947_v40 = vor.u32 %v946_v30, %v945_v32  ;;  %v950_v29 = vor.u32 %v949_v3, %v948_v50 }
 0x152   : >> { %v976_v16 = vshll.u32 %v936_v45, 8  ;;  %v12022_v18 = vand.u32 2147483647, %v7611_v53  ;;  %v689_v61 = vshll.u32 %v7569_v43, %v687_v17  ;;  %v953_v19 = vor.u32 %v952_v59, %v951_v46 }
 0x153   : >> { %v956_v20 = vor.u32 %v955_v4, %v954_v51  ;;  %v959_v21 = vor.u32 %v958_v0, %v957_v63  ;;  %v880_v22 = vadd.s32 %v7545_v42, %v7553_v1  ;;  %v900_v23 = vsub.s32 4294967266, %v895_v27 }
 0x154   : >> { %v7633_v24 = vsub.s32 %v780_v54, %v783_v49  ;;  %v1036_v25 = vshrl.u32 %v1035_v56, 23  ;;  %v691_v36 = vor.u32 %v690_v55, %v689_v61  ;;  %v695_v26 = vor.u32 4788187, %v694_v2 }
 0x155   : >> { %v944_v30 = vshrl.u32 %v12296_v35, %v943_v28  ;;  %vm960_vm7 = vcmp.lt.s32.totalorder %v941_v47, 1  ;;  %v896_v45 = vsub.s32 32, %v895_v27  ;;  %vm962_vm8 = vcmp.lt.s32.totalorder %v941_v47, 3 }
 0x156   : >> { %vm963_vm9 = vcmp.lt.s32.totalorder %v941_v47, 4  ;;  %v968_v17 = vsel %vm960_vm7, %v947_v40, %v950_v29  ;;  %v972_v32 = vsel %vm960_vm7, %v950_v29, %v953_v19  ;;  %v901_v42 = vadd.s32 127, %v900_v23 }
 0x157   : >> { %v965_v43 = vsel %vm963_vm9, %v953_v19, 2102212464  ;;  %v969_v3 = vsel %vm963_vm9, %v956_v20, 920167782  ;;  %v973_v59 = vsel %vm963_vm9, %v959_v21, 1326507024  ;;  %v898_v49 = vshrl.u32 %v880_v22, %v896_v45 }
 0x158   : >> { %v786_v1 = vsub.s32 0, %v7633_v24  ;;  %vm961_vm10 = vcmp.lt.s32.totalorder %v941_v47, 2  ;;  %v970_v54 = vsel %vm962_vm8, %v953_v19, %v969_v3  ;;  %v696_v56 = vand.u32 2147483647, %v695_v26 }
 0x159   : >> { %v971_v28 = vsel %vm961_vm10, %v968_v17, %v970_v54  ;;  %v974_v55 = vsel %vm962_vm8, %v956_v20, %v973_v59  ;;  %v6350_v2 = vadd.s32 4294967169, %v1036_v25  ;;  %v964_v50 = vsel %vm960_vm7, %v944_v30, %v947_v40 }
 0x15a   : >> { %v966_v46 = vsel %vm962_vm8, %v950_v29, %v965_v43  ;;  %v975_v51 = vsel %vm961_vm10, %v972_v32, %v974_v55  ;;  %v7648_v4 = vmul.u32.u64.low %v976_v16, %v971_v28  ;;  %v7649_v63 = vmul.u32.u64.high %v976_v16, %v971_v28, %v7648_v4  ;;  %v599_v29 = vpop.f32.mrf.mxu1 }
 0x15b   : >> { %v7645_v21 = vmul.u32.u64.low %v976_v16, %v975_v51  ;;  %v7646_v23 = vmul.u32.u64.high %v976_v16, %v975_v51, %v7645_v21  ;;  %v902_v19 = vshll.u32 %v901_v42, 23  ;;  %v6339_v26 = vmin.u32 %v786_v1, %v7633_v24 }
 0x15c   : >> { %v1042_v0 = vadd.s32 1, %v6350_v2  ;;  %v698_v20 = vcvt.s32.f32 %v691_v36  ;;  %v897_v22 = vshll.u32 %v7586_v62, %v895_v27  ;;  %v967_v25 = vsel %vm961_vm10, %v964_v50, %v966_v46 }
 0x15d   : >> { %v1039_v40 = vand.u32 8388607, %v12022_v18  ;;  %vm985_vm11 = vc.u32 %v7646_v23, %v7648_v4  ;;  %v986_v45 = vadd.s32 1, %v7649_v63  ;;  %v903_v17 = vor.u32 4788187, %v902_v19 }
 0x15e   : >> { %v7657_v61 = vmul.f32 %v698_v20, %v696_v56  ;;  %v899_v30 = vor.u32 %v898_v49, %v897_v22  ;;  %v788_v43 = vclz %v6339_v26  ;;  %v983_v3 = vmul.u32 %v976_v16, %v967_v25 }
 0x15f   : >> { %vm1043_vm12 = vcmp.gt.s32.totalorder %v1042_v0, 0  ;;  %v987_v62 = vsel %vm985_vm11, %v986_v45, %v7649_v63  ;;  %v1040_v47 = vor.u32 8388608, %v1039_v40  ;;  %v7664_v36 = vadd.f32 %v599_v29, %v7454_v33 }
 0x160   : >> { %v1044_v27 = vsel %vm1043_vm12, %v1042_v0, 0  ;;  %v988_v32 = vadd.s32 %v987_v62, %v983_v3  ;;  %v700_v42 = vxor.u32 2147483648, %v7657_v61  ;;  %v904_v1 = vand.u32 2147483647, %v903_v17  ;;  %v512_v0 = vpop.f32.mrf.mxu0 }
 0x161   : >> { %12300 = vst [vmem:[#allocation44_spill] sm:$0xff] %v7664_v36  ;;  %v1046_v59 = vand.u32 31, %v1044_v27  ;;  %v906_v54 = vcvt.s32.f32 %v899_v30  ;;  %v6340_v28 = vadd.s32 4294967294, %v788_v43  ;;  %v7667_v2 = vshll.u32 %v1040_v47, 8 }
 0x162   : >> { %v989_v56 = vadd.s32 536870912, %v988_v32  ;;  %v1243_v16 = vand.u32 2139095040, %v7664_v36  ;;  %v1045_v50 = vshrl.u32 %v1044_v27, 5  ;;  %v7684_v62 = vadd.f32 %v512_v0, %v7454_v33 }
 0x163   : >> { %v1047_v55 = vsub.s32 32, %v1046_v59  ;;  %v1049_v46 = vshll.u32 %v12296_v35, %v1046_v59  ;;  %v1052_v51 = vshll.u32 %v12288_v41, %v1046_v59  ;;  %v1055_v19 = vshll.u32 %v12289_v58, %v1046_v59 }
 0x164   : >> { %v7670_v49 = vshrl.u32 %v989_v56, 30  ;;  %v1058_v20 = vshll.u32 %v12290_v34, %v1046_v59  ;;  %v1061_v25 = vshll.u32 %v12291_v52, %v1046_v59  ;;  %vm1064_vm13 = vcmp.lt.s32.totalorder %v1045_v50, 1  ;;  %12302 = vst [vmem:[#allocation46_spill] sm:$0xff] %v7684_v62 }
 0x165   : >> { %v1050_v21 = vshrl.u32 %v12288_v41, %v1047_v55  ;;  %v1053_v63 = vshrl.u32 %v12289_v58, %v1047_v55  ;;  %v1056_v26 = vshrl.u32 %v12290_v34, %v1047_v55  ;;  %v1059_v22 = vshrl.u32 %v12291_v52, %v1047_v55 }
 0x166   : >> { %12301 = vst [vmem:[#allocation45_spill] sm:$0xff] %v7670_v49  ;;  %v1062_v40 = vshrl.u32 %v12292_v48, %v1047_v55  ;;  %v991_v29 = vshll.u32 %v7670_v49, 30  ;;  %v1048_v47 = vshrl.u32 %v12296_v35, %v1047_v55  ;;  %vm1067_vm14 = vcmp.lt.s32.totalorder %v1045_v50, 4 }
 0x167   : >> { %v1051_v30 = vor.u32 %v1050_v21, %v1049_v46  ;;  %v1054_v45 = vor.u32 %v1053_v63, %v1052_v51  ;;  %v1057_v17 = vor.u32 %v1056_v26, %v1055_v19  ;;  %v1060_v43 = vor.u32 %v1059_v22, %v1058_v20 }
 0x168   : >> { %v1063_v3 = vor.u32 %v1062_v40, %v1061_v25  ;;  %v1244_v56 = vshrl.u32 %v1243_v16, 23  ;;  %vm1065_vm15 = vcmp.lt.s32.totalorder %v1045_v50, 2  ;;  %vm1066_vm0 = vcmp.lt.s32.totalorder %v1045_v50, 3 }
 0x169   : >> { %v1072_v27 = vsel %vm1064_vm13, %v1051_v30, %v1054_v45  ;;  %v1069_v59 = vsel %vm1067_vm14, %v1057_v17, 2102212464  ;;  %v1073_v18 = vsel %vm1067_vm14, %v1060_v43, 920167782  ;;  %v7687_v13 = vsub.s32 %v988_v32, %v991_v29 }
 0x16a   : >> { %v1074_v46 = vsel %vm1066_vm0, %v1057_v17, %v1073_v18  ;;  %v1076_v51 = vsel %vm1064_vm13, %v1054_v45, %v1057_v17  ;;  %v1077_v21 = vsel %vm1067_vm14, %v1063_v3, 1326507024  ;;  %v1068_v63 = vsel %vm1064_vm13, %v1048_v47, %v1051_v30 }
 0x16b   : >> { %v1070_v19 = vsel %vm1066_vm0, %v1054_v45, %v1069_v59  ;;  %v1075_v26 = vsel %vm1065_vm15, %v1072_v27, %v1074_v46  ;;  %v1078_v0 = vsel %vm1066_vm0, %v1060_v43, %v1077_v21  ;;  %v907_v20 = vmul.f32 %v906_v54, %v904_v1 }
 0x16c   : >> { %v1079_v55 = vsel %vm1065_vm15, %v1076_v51, %v1078_v0  ;;  %v7692_v22 = vmul.u32.u64.low %v7667_v2, %v1075_v26  ;;  %v7693_v16 = vmul.u32.u64.high %v7667_v2, %v1075_v26, %v7692_v22  ;;  %v6358_v18 = vadd.s32 4294967169, %v1244_v56 }
 0x16d   : >> { %v7697_v25 = vmul.u32.u64.low %v7667_v2, %v1079_v55  ;;  %v7698_v32 = vmul.u32.u64.high %v7667_v2, %v1079_v55, %v7697_v25  ;;  %vm6341_vm1 = vcmp.lt.s32.totalorder %v6340_v28, 0  ;;  %v994_v40 = vsub.s32 0, %v7687_v13 }
 0x16e   : >> { %v1071_v29 = vsel %vm1065_vm15, %v1068_v63, %v1070_v19  ;;  %v12024_v30 = vand.u32 2147483647, %v7664_v36  ;;  %vm12069_vm2 = vcmp.lt.s32.totalorder %v7456_v37, 0  ;;  %v1250_v1 = vadd.s32 1, %v6358_v18 }
 0x16f   : >> { %v1139_v54 = vand.u32 2139095040, %v7684_v62  ;;  %v701_v45 = vsel %vm12069_vm2, %v700_v42, %v7657_v61  ;;  %v908_v17 = vxor.u32 2147483648, %v907_v20  ;;  %v1090_v43 = vadd.s32 1, %v7693_v16 }
 0x170   : >> { %v7709_v3 = vsel %vm6341_vm1, 0, %v6340_v28  ;;  %v1087_v47 = vmul.u32 %v7667_v2, %v1071_v29  ;;  %vm1089_vm3 = vc.u32 %v7698_v32, %v7692_v22  ;;  %vm1251_vm4 = vcmp.gt.s32.totalorder %v1250_v1, 0 }
 0x171   : >> { %v6347_v50 = vmin.u32 %v994_v40, %v7687_v13  ;;  %v1091_v27 = vsel %vm1089_vm3, %v1090_v43, %v7693_v16  ;;  %v1247_v56 = vand.u32 8388607, %v12024_v30  ;;  %v1252_v59 = vsel %vm1251_vm4, %v1250_v1, 0 }
 0x172   : >> { %v12303_v61 = vand.u32 2147483647, %v7456_v37  ;;  %v12304_v42 = vmov 0  ;;  %v1092_v28 = vadd.s32 %v1091_v27, %v1087_v47  ;;  %v1140_v2 = vshrl.u32 %v1139_v54, 23 }
 0x173   : >> { %vm12068_vm6 = vcmp.lt.s32.totalorder %v7458_v38, 0  ;;  %v7732_v51 = vadd.s32 %v7591_v31, %v7598_v15  ;;  %v1254_v21 = vand.u32 31, %v1252_v59  ;;  %v796_v26 = vsub.s32 4294967266, %v7709_v3 }
 0x174   : >> { %vm7720_vm5 = vcmp.le.f32.partialorder %v12303_v61, 0.7853982  ;;  %v7736_v63 = vsel %vm12068_vm6, %v908_v17, %v907_v20  ;;  %v1093_v0 = vadd.s32 536870912, %v1092_v28  ;;  %v996_v55 = vclz %v6347_v50 }
 0x175   : >> { %v12305_v42 = vsel %vm7720_vm5, 4294967295, %v12304_v42  ;;  %v7727_v46 = vsel %vm7720_vm5, %v7456_v37, %v701_v45  ;;  %v1248_v16 = vor.u32 8388608, %v1247_v56  ;;  %v1255_v25 = vsub.s32 32, %v1254_v21 }
 0x176   : >> { %12306 = vst [vmem:[#allocation47_spill] sm:$0xff] %v12305_v42  ;;  %v7741_v40 = vshrl.u32 %v1093_v0, 30  ;;  %v1257_v31 = vshll.u32 %v12296_v35, %v1254_v21  ;;  %v1260_v15 = vshll.u32 %v12288_v41, %v1254_v21  ;;  %v6354_v29 = vadd.s32 4294967169, %v1140_v2 }
 0x177   : >> { %v1258_v20 = vshrl.u32 %v12288_v41, %v1255_v25  ;;  %v1261_v1 = vshrl.u32 %v12289_v58, %v1255_v25  ;;  %v1263_v54 = vshll.u32 %v12289_v58, %v1254_v21  ;;  %v1264_v45 = vshrl.u32 %v12290_v34, %v1255_v25 }
 0x178   : >> { %12307 = vst [vmem:[#allocation48_spill] sm:$0xff] %v7741_v40  ;;  %v1095_v17 = vshll.u32 %v7741_v40, 30  ;;  %v1253_v43 = vshrl.u32 %v1252_v59, 5  ;;  %v1266_v47 = vshll.u32 %v12290_v34, %v1254_v21  ;;  %v1267_v50 = vshrl.u32 %v12291_v52, %v1255_v25 }
 0x179   : >> { %v6348_v27 = vadd.s32 4294967294, %v996_v55  ;;  %v1259_v56 = vor.u32 %v1258_v20, %v1257_v31  ;;  %v1262_v61 = vor.u32 %v1261_v1, %v1260_v15  ;;  %v1265_v0 = vor.u32 %v1264_v45, %v1263_v54 }
 0x17a   : >> { %v7752_v2 = vsub.s32 %v1092_v28, %v1095_v17  ;;  %v1268_v30 = vor.u32 %v1267_v50, %v1266_v47  ;;  %v1269_v19 = vshll.u32 %v12291_v52, %v1254_v21  ;;  %v1270_v18 = vshrl.u32 %v12292_v48, %v1255_v25 }
 0x17b   : >> { %vm7758_vm7 = vcmp.le.f32.partialorder %v12308_v12, 0.7853982  ;;  %v1256_v59 = vshrl.u32 %v12296_v35, %v1255_v25  ;;  %v1288_v10 = vshll.u32 %v1248_v16, 8  ;;  %v12312_v55 = vand.u32 2147483647, %v7684_v62 }
 0x17c   : >> { %v12310_v11 = vsel %vm7758_vm7, 4294967295, %v12309_v11  ;;  %v1146_v15 = vadd.s32 1, %v6354_v29  ;;  %v1098_v28 = vsub.s32 0, %v7752_v2  ;;  %v1271_v20 = vor.u32 %v1270_v18, %v1269_v19 }
 0x17d   : >> { %12311 = vst [vmem:[#allocation49_spill] sm:$0xff] %v12310_v11  ;;  %v1143_v31 = vand.u32 8388607, %v12312_v55  ;;  %vm1272_vm8 = vcmp.lt.s32.totalorder %v1253_v43, 1  ;;  %vm1275_vm9 = vcmp.lt.s32.totalorder %v1253_v43, 4  ;;  %vm1274_vm10 = vcmp.lt.s32.totalorder %v1253_v43, 3 }
 0x17e   : >> { %v1277_v21 = vsel %vm1275_vm9, %v1265_v0, 2102212464  ;;  %v1280_v1 = vsel %vm1272_vm8, %v1259_v56, %v1262_v61  ;;  %v1281_v54 = vsel %vm1275_vm9, %v1268_v30, 920167782  ;;  %v6351_v12 = vmin.u32 %v1098_v28, %v7752_v2 }
 0x17f   : >> { %vm1273_vm11 = vcmp.lt.s32.totalorder %v1253_v43, 2  ;;  %v1282_v45 = vsel %vm1274_vm10, %v1265_v0, %v1281_v54  ;;  %v1284_v17 = vsel %vm1272_vm8, %v1262_v61, %v1265_v0  ;;  %vm6349_vm12 = vcmp.lt.s32.totalorder %v6348_v27, 0 }
 0x180   : >> { %v1283_v16 = vsel %vm1273_vm11, %v1280_v1, %v1282_v45  ;;  %v1285_v25 = vsel %vm1275_vm9, %v1271_v20, 1326507024  ;;  %vm1147_vm13 = vcmp.gt.s32.totalorder %v1146_v15, 0  ;;  %v1100_v29 = vclz %v6351_v12 }
 0x181   : >> { %v1276_v47 = vsel %vm1272_vm8, %v1256_v59, %v1259_v56  ;;  %v1278_v50 = vsel %vm1274_vm10, %v1262_v61, %v1277_v21  ;;  %v1286_v19 = vsel %vm1274_vm10, %v1268_v30, %v1285_v25  ;;  %v1148_v8 = vsel %vm1147_vm13, %v1146_v15, 0  ;;  %v601_v61 = vpop.f32.mrf.mxu1 }
 0x182   : >> { %v1287_v18 = vsel %vm1273_vm11, %v1284_v17, %v1286_v19  ;;  %v7769_v55 = vmul.u32.u64.low %v1288_v10, %v1283_v16  ;;  %v7770_v9 = vmul.u32.u64.high %v1288_v10, %v1283_v16, %v7769_v55  ;;  %v7773_v28 = vadd.s32 127, %v796_v26 }
 0x183   : >> { %v6352_v54 = vadd.s32 4294967294, %v1100_v29  ;;  %v7775_v0 = vmul.u32.u64.low %v1288_v10, %v1287_v18  ;;  %v7776_v7 = vmul.u32.u64.high %v1288_v10, %v1287_v18, %v7775_v0  ;;  %6810 = vcosq.f32 %v7727_v46 }
 0x184   : >> { %v7779_v20 = vsel %vm6349_vm12, 0, %v6348_v27  ;;  %v1279_v56 = vsel %vm1273_vm11, %v1276_v47, %v1278_v50  ;;  %v1150_v30 = vand.u32 31, %v1148_v8  ;;  %v7786_v59 = vsel %vm7758_vm7, %v7458_v38, %v7736_v63 }
 0x185   : >> { %v7792_v15 = vadd.s32 %v7648_v4, %v7646_v23  ;;  %vm6353_vm14 = vcmp.lt.s32.totalorder %v6352_v54, 0  ;;  %v12313_v27 = vsub.s32 32, %v7709_v3  ;;  %v1298_v21 = vadd.s32 1, %v7770_v9 }
 0x186   : >> { %v1144_v1 = vor.u32 8388608, %v1143_v31  ;;  %v1151_v12 = vsub.s32 32, %v1150_v30  ;;  %v1295_v17 = vmul.u32 %v1288_v10, %v1279_v56  ;;  %v7801_v16 = vadd.f32 %v601_v61, %v7454_v33 }
 0x187   : >> { %v794_v43 = vshrl.u32 %v7732_v51, %v12313_v27  ;;  %v7803_v25 = vsel %vm6353_vm14, 0, %v6352_v54  ;;  %vm1297_vm15 = vc.u32 %v7776_v7, %v7769_v55  ;;  %v1149_v23 = vshrl.u32 %v1148_v8, 5 }
 0x188   : >> { %12314 = vst [vmem:[#allocation50_spill] sm:$0xff] %v7801_v16  ;;  %v1154_v4 = vshrl.u32 %v12288_v41, %v1151_v12  ;;  %v1299_v51 = vsel %vm1297_vm15, %v1298_v21, %v7770_v9  ;;  %v1153_v31 = vshll.u32 %v12296_v35, %v1150_v30  ;;  %v1156_v29 = vshll.u32 %v12288_v41, %v1150_v30 }
 0x189   : >> { %v1157_v47 = vshrl.u32 %v12289_v58, %v1151_v12  ;;  %v1300_v10 = vadd.s32 %v1299_v51, %v1295_v17  ;;  %v1159_v33 = vshll.u32 %v12289_v58, %v1150_v30  ;;  %v1160_v50 = vshrl.u32 %v12290_v34, %v1151_v12 }
 0x18a   : >> { %v7814_v19 = vshll.u32 %v1144_v1, 8  ;;  %v1108_v18 = vsub.s32 4294967266, %v7803_v25  ;;  %v1155_v8 = vor.u32 %v1154_v4, %v1153_v31  ;;  %v1347_v0 = vand.u32 2139095040, %v7801_v16 }
 0x18b   : >> { %v1158_v54 = vor.u32 %v1157_v47, %v1156_v29  ;;  %v1301_v9 = vadd.s32 536870912, %v1300_v10  ;;  %v1161_v56 = vor.u32 %v1160_v50, %v1159_v33  ;;  %v1162_v61 = vshll.u32 %v12290_v34, %v1150_v30  ;;  %v7827_v33 = vpop.permute.xlu0 %409 }
 0x18c   : >> { %v1163_v27 = vshrl.u32 %v12291_v52, %v1151_v12  ;;  %v1165_v21 = vshll.u32 %v12291_v52, %v1150_v30  ;;  %v1166_v17 = vshrl.u32 %v12292_v48, %v1151_v12  ;;  %vm1168_vm0 = vcmp.lt.s32.totalorder %v1149_v23, 1 }
 0x18d   : >> { %vm1171_vm1 = vcmp.lt.s32.totalorder %v1149_v23, 4  ;;  %v7822_v1 = vshrl.u32 %v1301_v9, 30  ;;  %vm1169_vm3 = vcmp.lt.s32.totalorder %v1149_v23, 2  ;;  %v1152_v31 = vshrl.u32 %v12296_v35, %v1151_v12 }
 0x18e   : >> { %v1164_v51 = vor.u32 %v1163_v27, %v1162_v61  ;;  %v1173_v4 = vsel %vm1171_vm1, %v1161_v56, 2102212464  ;;  %v1167_v29 = vor.u32 %v1166_v17, %v1165_v21  ;;  %vm1170_vm4 = vcmp.lt.s32.totalorder %v1149_v23, 3 }
 0x18f   : >> { %12315 = vst [vmem:[#allocation51_spill] sm:$0xff] %v7822_v1  ;;  %v1176_v47 = vsel %vm1168_vm0, %v1155_v8, %v1158_v54  ;;  %v1109_v50 = vadd.s32 127, %v1108_v18  ;;  %v1303_v30 = vshll.u32 %v7822_v1, 30  ;;  %v1180_v9 = vsel %vm1168_vm0, %v1158_v54, %v1161_v56 }
 0x190   : >> { %v1177_v63 = vsel %vm1171_vm1, %v1164_v51, 920167782  ;;  %v7832_v45 = vpop.eup %6810  ;;  %v1172_v61 = vsel %vm1168_vm0, %v1152_v31, %v1155_v8  ;;  %v1174_v27 = vsel %vm1170_vm4, %v1158_v54, %v1173_v4  ;;  %v1181_v12 = vsel %vm1171_vm1, %v1167_v29, 1326507024  ;;  %v7858_v31 = vpop.permute.xlu0 %404 }
 0x191   : >> { %12316 = vst [vmem:[#allocation52_spill] sm:$0xff] %v7832_v45  ;;  %v1178_v26 = vsel %vm1170_vm4, %v1161_v56, %v1177_v63  ;;  %v7836_v21 = vsub.s32 %v1300_v10, %v1303_v30  ;;  %v1182_v6 = vsel %vm1170_vm4, %v1164_v51, %v1181_v12  ;;  %v1348_v18 = vshrl.u32 %v1347_v0, 23  ;;  %v516_v56 = vpop.f32.mrf.mxu0 }
 0x192   : >> { %v1179_v17 = vsel %vm1169_vm3, %v1176_v47, %v1178_v26  ;;  %v1004_v5 = vsub.s32 4294967266, %v7779_v20  ;;  %v1183_v11 = vsel %vm1169_vm3, %v1180_v9, %v1182_v6  ;;  %v12317_v26 = vshll.u32 %v7633_v24, %v7709_v3 }
 0x193   : >> { %v7842_v38 = vmul.u32.u64.low %v7814_v19, %v1179_v17  ;;  %v7843_v42 = vmul.u32.u64.high %v7814_v19, %v1179_v17, %v7842_v38  ;;  %v1306_v8 = vsub.s32 0, %v7836_v21  ;;  %v6362_v10 = vadd.s32 4294967169, %v1348_v18 }
 0x194   : >> { %v7848_v63 = vmul.u32.u64.low %v7814_v19, %v1183_v11  ;;  %v7849_v54 = vmul.u32.u64.high %v7814_v19, %v1183_v11, %v7848_v63  ;;  %v7854_v0 = vor.u32 %v794_v43, %v12317_v26  ;;  %v1104_v6 = vsub.s32 32, %v7803_v25 }
 0x195   : >> { %v1110_v51 = vshll.u32 %v1109_v50, 23  ;;  %v1175_v4 = vsel %vm1169_vm3, %v1172_v61, %v1174_v27  ;;  %v12318_v29 = vshll.u32 %v7773_v28, 23  ;;  %v6359_v11 = vmin.u32 %v1306_v8, %v7836_v21 }
 0x196   : >> { %v12037_v30 = vand.u32 2147483647, %v7801_v16  ;;  %v1354_v9 = vadd.s32 1, %v6362_v10  ;;  %v12319_v24 = vsub.s32 32, %v7779_v20  ;;  %v1088_v43 = vadd.s32 %v7692_v22, %v7698_v32 }
 0x197   : >> { %v7862_v47 = vor.u32 4788187, %v12318_v29  ;;  %v1194_v23 = vadd.s32 1, %v7843_v42  ;;  %v7873_v50 = vadd.f32 %v516_v56, %v7858_v31  ;;  %v1005_v28 = vadd.s32 127, %v1004_v5 }
 0x198   : >> { %v1002_v3 = vshrl.u32 %v7792_v15, %v12319_v24  ;;  %v1308_v61 = vclz %v6359_v11  ;;  %v1191_v27 = vmul.u32 %v7814_v19, %v1175_v4  ;;  %vm1193_vm8 = vc.u32 %v7849_v54, %v7842_v38 }
 0x199   : >> { %v1106_v12 = vshrl.u32 %v1088_v43, %v1104_v6  ;;  %v1111_v17 = vor.u32 4788187, %v1110_v51  ;;  %v1195_v18 = vsel %vm1193_vm8, %v1194_v23, %v7843_v42  ;;  %vm1355_vm9 = vcmp.gt.s32.totalorder %v1354_v9, 0 }
 0x19a   : >> { %v6360_v15 = vadd.s32 4294967294, %v1308_v61  ;;  %v1196_v8 = vadd.s32 %v1195_v18, %v1191_v27  ;;  %v1351_v22 = vand.u32 8388607, %v12037_v30  ;;  %v1356_v32 = vsel %vm1355_vm9, %v1354_v9, 0 }
 0x19b   : >> { %v1001_v5 = vshll.u32 %v7687_v13, %v7779_v20  ;;  %v1105_v19 = vshll.u32 %v7752_v2, %v7803_v25  ;;  %v1358_v63 = vand.u32 31, %v1356_v32  ;;  %v1451_v10 = vand.u32 2139095040, %v7873_v50 }
 0x19c   : >> { %vm6361_vm10 = vcmp.lt.s32.totalorder %v6360_v15, 0  ;;  %v1197_v26 = vadd.s32 536870912, %v1196_v8  ;;  %v1006_v51 = vshll.u32 %v1005_v28, 23  ;;  %v1112_v11 = vand.u32 2147483647, %v1111_v17 }
 0x19d   : >> { %v7888_v6 = vor.u32 %v1002_v3, %v1001_v5  ;;  %v1107_v4 = vor.u32 %v1106_v12, %v1105_v19  ;;  %v1359_v29 = vsub.s32 32, %v1358_v63  ;;  %v7890_v9 = vsel %vm6361_vm10, 0, %v6360_v15 }
 0x19e   : >> { %v7892_v13 = vshrl.u32 %v1197_v26, 30  ;;  %v1352_v2 = vor.u32 8388608, %v1351_v22  ;;  %v1357_v20 = vshrl.u32 %v1356_v32, 5  ;;  %v1452_v43 = vshrl.u32 %v1451_v10, 23 }
 0x19f   : >> { %v1362_v25 = vshrl.u32 %v12288_v41, %v1359_v29  ;;  %v1365_v24 = vshrl.u32 %v12289_v58, %v1359_v29  ;;  %v1361_v3 = vshll.u32 %v12296_v35, %v1358_v63  ;;  %v1364_v28 = vshll.u32 %v12288_v41, %v1358_v63 }
 0x1a0   : >> { %12320 = vst [vmem:[#allocation53_spill] sm:$0xff] %v7892_v13  ;;  %v1199_v23 = vshll.u32 %v7892_v13, 30  ;;  %v1368_v61 = vshrl.u32 %v12290_v34, %v1359_v29  ;;  %v1316_v27 = vsub.s32 4294967266, %v7890_v9  ;;  %v1367_v12 = vshll.u32 %v12289_v58, %v1358_v63 }
 0x1a1   : >> { %v1370_v17 = vshll.u32 %v12290_v34, %v1358_v63  ;;  %v1371_v18 = vshrl.u32 %v12291_v52, %v1359_v29  ;;  %v1114_v15 = vcvt.s32.f32 %v1107_v4  ;;  %v1363_v32 = vor.u32 %v1362_v25, %v1361_v3 }
 0x1a2   : >> { %v7904_v22 = vsub.s32 %v1196_v8, %v1199_v23  ;;  %v1366_v5 = vor.u32 %v1365_v24, %v1364_v28  ;;  %v1369_v19 = vor.u32 %v1368_v61, %v1367_v12  ;;  %v1373_v26 = vshll.u32 %v12291_v52, %v1358_v63 }
 0x1a3   : >> { %v1372_v10 = vor.u32 %v1371_v18, %v1370_v17  ;;  %v1374_v30 = vshrl.u32 %v12292_v48, %v1359_v29  ;;  %v1007_v42 = vor.u32 4788187, %v1006_v51  ;;  %v1115_v56 = vmul.f32 %v1114_v15, %v1112_v11 }
 0x1a4   : >> { %v1392_v45 = vshll.u32 %v1352_v2, 8  ;;  %v12047_v37 = vand.u32 2147483647, %v7873_v50  ;;  %v1317_v14 = vadd.s32 127, %v1316_v27  ;;  %vm1376_vm11 = vcmp.lt.s32.totalorder %v1357_v20, 1 }
 0x1a5   : >> { %v1375_v57 = vor.u32 %v1374_v30, %v1373_v26  ;;  %v6366_v49 = vadd.s32 4294967169, %v1452_v43  ;;  %v1202_v8 = vsub.s32 0, %v7904_v22  ;;  %vm1378_vm12 = vcmp.lt.s32.totalorder %v1357_v20, 3 }
 0x1a6   : >> { %vm1379_vm13 = vcmp.lt.s32.totalorder %v1357_v20, 4  ;;  %v1384_v4 = vsel %vm1376_vm11, %v1363_v32, %v1366_v5  ;;  %v1388_v63 = vsel %vm1376_vm11, %v1366_v5, %v1369_v19  ;;  %vm12090_vm14 = vcmp.lt.s32.totalorder %v7611_v53, 0 }
 0x1a7   : >> { %v1381_v25 = vsel %vm1379_vm13, %v1369_v19, 2102212464  ;;  %v1385_v24 = vsel %vm1379_vm13, %v1372_v10, 920167782  ;;  %v1389_v23 = vsel %vm1379_vm13, %v1375_v57, 1326507024  ;;  %v1360_v11 = vshrl.u32 %v12296_v35, %v1359_v29 }
 0x1a8   : >> { %v1312_v51 = vsub.s32 32, %v7890_v9  ;;  %vm1377_vm15 = vcmp.lt.s32.totalorder %v1357_v20, 2  ;;  %v1386_v30 = vsel %vm1378_vm12, %v1369_v19, %v1385_v24  ;;  %v1318_v2 = vshll.u32 %v1317_v14, 23 }
 0x1a9   : >> { %v1387_v43 = vsel %vm1377_vm15, %v1384_v4, %v1386_v30  ;;  %v1390_v3 = vsel %vm1378_vm12, %v1372_v10, %v1389_v23  ;;  %v1458_v28 = vadd.s32 1, %v6366_v49  ;;  %v6355_v61 = vmin.u32 %v1202_v8, %v7904_v22 }
 0x1aa   : >> { %v1380_v27 = vsel %vm1376_vm11, %v1360_v11, %v1363_v32  ;;  %v1382_v57 = vsel %vm1378_vm12, %v1366_v5, %v1381_v25  ;;  %v1391_v12 = vsel %vm1377_vm15, %v1388_v63, %v1390_v3  ;;  %6812 = vsinq.f32 %v7727_v46 }
 0x1ab   : >> { %v7922_v17 = vmul.u32.u64.low %v1392_v45, %v1391_v12  ;;  %v7923_v18 = vmul.u32.u64.high %v1392_v45, %v1391_v12, %v7922_v17  ;;  %v7925_v29 = vmul.u32.u64.low %v1392_v45, %v1387_v43  ;;  %v7926_v15 = vmul.u32.u64.high %v1392_v45, %v1387_v43, %v7925_v29 }
 0x1ac   : >> { %v12321_v14 = vand.u32 2147483647, %v7862_v47  ;;  %v12322_v49 = vcvt.s32.f32 %v7854_v0  ;;  %v1296_v32 = vadd.s32 %v7769_v55, %v7776_v7  ;;  %vm1459_vm0 = vcmp.gt.s32.totalorder %v1458_v28, 0  ;;  %v605_v0 = vpop.f32.mrf.mxu1 }
 0x1ad   : >> { %v1008_v5 = vand.u32 2147483647, %v1007_v42  ;;  %v1116_v10 = vxor.u32 2147483648, %v1115_v56  ;;  %v1383_v26 = vsel %vm1377_vm15, %v1380_v27, %v1382_v57  ;;  %v1460_v8 = vsel %vm1459_vm0, %v1458_v28, 0 }
 0x1ae   : >> { %v7934_v19 = vmul.f32 %v12322_v49, %v12321_v14  ;;  %6814 = vcosq.f32 %v7786_v59  ;;  %v1010_v4 = vcvt.s32.f32 %v7888_v6  ;;  %v1314_v46 = vshrl.u32 %v1296_v32, %v1312_v51 }
 0x1af   : >> { %v1455_v47 = vand.u32 8388607, %v12047_v37  ;;  %v1319_v25 = vor.u32 4788187, %v1318_v2  ;;  %v1204_v24 = vclz %v6355_v61  ;;  %vm1401_vm1 = vc.u32 %v7923_v18, %v7925_v29 }
 0x1b0   : >> { %v1402_v7 = vadd.s32 1, %v7926_v15  ;;  %v804_v55 = vxor.u32 2147483648, %v7934_v19  ;;  %v1313_v42 = vshll.u32 %v7836_v21, %v7890_v9  ;;  %v1399_v20 = vmul.u32 %v1392_v45, %v1383_v26 }
 0x1b1   : >> { %v1462_v63 = vand.u32 31, %v1460_v8  ;;  %v7949_v6 = vmul.f32 %v1010_v4, %v1008_v5  ;;  %v7953_v23 = vsel %vm12090_vm14, %v1116_v10, %v1115_v56  ;;  %v7957_v11 = vadd.f32 %v605_v0, %v7858_v31 }
 0x1b2   : >> { %v1403_v51 = vsel %vm1401_vm1, %v1402_v7, %v7926_v15  ;;  %v1315_v30 = vor.u32 %v1314_v46, %v1313_v42  ;;  %v1456_v43 = vor.u32 8388608, %v1455_v47  ;;  %v1320_v28 = vand.u32 2147483647, %v1319_v25 }
 0x1b3   : >> { %v1404_v2 = vadd.s32 %v1403_v51, %v1399_v20  ;;  %v1463_v3 = vsub.s32 32, %v1462_v63  ;;  %v6356_v61 = vadd.s32 4294967294, %v1204_v24  ;;  %v1461_v21 = vshrl.u32 %v1460_v8, 5 }
 0x1b4   : >> { %v1465_v45 = vshll.u32 %v12296_v35, %v1462_v63  ;;  %v1468_v27 = vshll.u32 %v12288_v41, %v1462_v63  ;;  %v1471_v56 = vshll.u32 %v12289_v58, %v1462_v63  ;;  %v1474_v57 = vshll.u32 %v12290_v34, %v1462_v63 }
 0x1b5   : >> { %v1405_v9 = vadd.s32 536870912, %v1404_v2  ;;  %v1466_v12 = vshrl.u32 %v12288_v41, %v1463_v3  ;;  %v1469_v17 = vshrl.u32 %v12289_v58, %v1463_v3  ;;  %v1472_v15 = vshrl.u32 %v12290_v34, %v1463_v3 }
 0x1b6   : >> { %v1475_v14 = vshrl.u32 %v12291_v52, %v1463_v3  ;;  %v1322_v49 = vcvt.s32.f32 %v1315_v30  ;;  %v1477_v5 = vshll.u32 %v12291_v52, %v1462_v63  ;;  %v1478_v10 = vshrl.u32 %v12292_v48, %v1463_v3 }
 0x1b7   : >> { %v7967_v32 = vshrl.u32 %v1405_v9, 30  ;;  %v1467_v26 = vor.u32 %v1466_v12, %v1465_v45  ;;  %v1470_v8 = vor.u32 %v1469_v17, %v1468_v27  ;;  %v1473_v4 = vor.u32 %v1472_v15, %v1471_v56  ;;  %v7975_v7 = vpop.eup %6812 }
 0x1b8   : >> { %v1476_v46 = vor.u32 %v1475_v14, %v1474_v57  ;;  %vm12073_vm3 = vcmp.lt.s32.totalorder %v7464_v44, 0  ;;  %v7972_v47 = vmul.f32 %v1322_v49, %v1320_v28  ;;  %v1479_v25 = vor.u32 %v1478_v10, %v1477_v5  ;;  %12324 = vst [vmem:[#allocation55_spill] sm:$0xff] %v7975_v7  ;;  %v518_v49 = vpop.f32.mrf.mxu0 }
 0x1b9   : >> { %12323 = vst [vmem:[#allocation54_spill] sm:$0xff] %v7967_v32  ;;  %v1407_v0 = vshll.u32 %v7967_v32, 30  ;;  %v1496_v24 = vshll.u32 %v1456_v43, 8  ;;  %v12325_v42 = vand.u32 2147483647, %v7611_v53  ;;  %v12326_v20 = vmov 0 }
 0x1ba   : >> { %vm6357_vm8 = vcmp.lt.s32.totalorder %v6356_v61, 0  ;;  %vm1480_vm9 = vcmp.lt.s32.totalorder %v1461_v21, 1  ;;  %vm1483_vm10 = vcmp.lt.s32.totalorder %v1461_v21, 4  ;;  %v1659_v63 = vand.u32 2139095040, %v7957_v11 }
 0x1bb   : >> { %vm7979_vm4 = vcmp.le.f32.partialorder %v12325_v42, 0.7853982  ;;  %v7984_v51 = vsub.s32 %v1404_v2, %v1407_v0  ;;  %v1464_v30 = vshrl.u32 %v12296_v35, %v1463_v3  ;;  %v1485_v28 = vsel %vm1483_vm10, %v1473_v4, 2102212464  ;;  %v7987_v43 = vpop.eup %6814 }
 0x1bc   : >> { %v12327_v20 = vsel %vm7979_vm4, 4294967295, %v12326_v20  ;;  %v1488_v45 = vsel %vm1480_vm9, %v1467_v26, %v1470_v8  ;;  %12329 = vst [vmem:[#allocation57_spill] sm:$0xff] %v7987_v43  ;;  %vm1482_vm11 = vcmp.lt.s32.totalorder %v1461_v21, 3  ;;  %v1489_v9 = vsel %vm1483_vm10, %v1476_v46, 920167782 }
 0x1bd   : >> { %12328 = vst [vmem:[#allocation56_spill] sm:$0xff] %v12327_v20  ;;  %v1492_v27 = vsel %vm1480_vm9, %v1470_v8, %v1473_v4  ;;  %v1493_v56 = vsel %vm1483_vm10, %v1479_v25, 1326507024  ;;  %vm12070_vm12 = vcmp.lt.s32.totalorder %v7476_v60, 0  ;;  %v1410_v57 = vsub.s32 0, %v7984_v51 }
 0x1be   : >> { %vm1481_vm13 = vcmp.lt.s32.totalorder %v1461_v21, 2  ;;  %v1484_v12 = vsel %vm1480_vm9, %v1464_v30, %v1467_v26  ;;  %v1490_v17 = vsel %vm1482_vm11, %v1473_v4, %v1489_v9  ;;  %v1486_v15 = vsel %vm1482_vm11, %v1470_v8, %v1485_v28 }
 0x1bf   : >> { %v1491_v2 = vsel %vm1481_vm13, %v1488_v45, %v1490_v17  ;;  %v1494_v14 = vsel %vm1482_vm11, %v1476_v46, %v1493_v56  ;;  %v1660_v3 = vshrl.u32 %v1659_v63, 23  ;;  %v12048_v25 = vand.u32 2147483647, %v7957_v11 }
 0x1c0   : >> { %v1495_v5 = vsel %vm1481_vm13, %v1492_v27, %v1494_v14  ;;  %v7993_v10 = vmul.u32.u64.low %v1496_v24, %v1491_v2  ;;  %v7994_v0 = vmul.u32.u64.high %v1496_v24, %v1491_v2, %v7993_v10  ;;  %v7999_v42 = vsel %vm6357_vm8, 0, %v6356_v61 }
 0x1c1   : >> { %v8001_v37 = vmul.u32.u64.low %v1496_v24, %v1495_v5  ;;  %v8002_v26 = vmul.u32.u64.high %v1496_v24, %v1495_v5, %v8001_v37  ;;  %v6374_v8 = vadd.s32 4294967169, %v1660_v3  ;;  %6816 = vsinq.f32 %v7786_v59 }
 0x1c2   : >> { %v6363_v4 = vmin.u32 %v1410_v57, %v7984_v51  ;;  %v1487_v46 = vsel %vm1481_vm13, %v1484_v12, %v1486_v15  ;;  %v8008_v63 = vadd.f32 %v518_v49, %v7858_v31  ;;  %v8015_v61 = vsel %vm12073_vm3, %v804_v55, %v7934_v19 }
 0x1c3   : >> { %12330 = vst [vmem:[#allocation58_spill] sm:$0xff] %v8015_v61  ;;  %v1012_v30 = vxor.u32 2147483648, %v7949_v6  ;;  %vm12081_vm15 = vcmp.lt.s32.totalorder %v7664_v36, 0  ;;  %v1666_v37 = vadd.s32 1, %v6374_v8  ;;  %v1120_v59 = vsel %vm7979_vm4, %v7611_v53, %v7953_v23 }
 0x1c4   : >> { %v1324_v21 = vxor.u32 2147483648, %v7972_v47  ;;  %v1212_v28 = vsub.s32 4294967266, %v7999_v42  ;;  %v1506_v45 = vadd.s32 1, %v7994_v0  ;;  %v1503_v9 = vmul.u32 %v1496_v24, %v1487_v46 }
 0x1c5   : >> { %vm1505_vm0 = vc.u32 %v8002_v26, %v7993_v10  ;;  %v1663_v19 = vand.u32 8388607, %v12048_v25  ;;  %vm1667_vm1 = vcmp.gt.s32.totalorder %v1666_v37, 0  ;;  %v1412_v55 = vclz %v6363_v4 }
 0x1c6   : >> { %v1507_v27 = vsel %vm1505_vm0, %v1506_v45, %v7994_v0  ;;  %v1668_v56 = vsel %vm1667_vm1, %v1666_v37, 0  ;;  %v1555_v23 = vand.u32 2139095040, %v8008_v63  ;;  %v8035_v57 = vsel %vm12070_vm12, %v1012_v30, %v7949_v6 }
 0x1c7   : >> { %12331 = vst [vmem:[#allocation59_spill] sm:$0xff] %v8035_v57  ;;  %6818 = vcosq.f32 %v1120_v59  ;;  %v1508_v24 = vadd.s32 %v1507_v27, %v1503_v9  ;;  %v1670_v12 = vand.u32 31, %v1668_v56  ;;  %v8040_v17 = vsel %vm12081_vm15, %v1324_v21, %v7972_v47 }
 0x1c8   : >> { %6820 = vsinq.f32 %v1120_v59  ;;  %v8044_v15 = vadd.s32 %v7842_v38, %v7849_v54  ;;  %v8046_v2 = vadd.s32 127, %v1212_v28  ;;  %v1664_v3 = vor.u32 8388608, %v1663_v19  ;;  %v607_v54 = vpop.f32.mrf.mxu1 }
 0x1c9   : >> { %v1509_v14 = vadd.s32 536870912, %v1508_v24  ;;  %v1671_v49 = vsub.s32 32, %v1670_v12  ;;  %v6364_v5 = vadd.s32 4294967294, %v1412_v55  ;;  %v1669_v0 = vshrl.u32 %v1668_v56, 5 }
 0x1ca   : >> { %v1673_v8 = vshll.u32 %v12296_v35, %v1670_v12  ;;  %v1556_v4 = vshrl.u32 %v1555_v23, 23  ;;  %v1676_v30 = vshll.u32 %v12288_v41, %v1670_v12  ;;  %v1679_v37 = vshll.u32 %v12289_v58, %v1670_v12 }
 0x1cb   : >> { %v8050_v46 = vshrl.u32 %v1509_v14, 30  ;;  %v1674_v47 = vshrl.u32 %v12288_v41, %v1671_v49  ;;  %v1677_v38 = vshrl.u32 %v12289_v58, %v1671_v49  ;;  %v1680_v59 = vshrl.u32 %v12290_v34, %v1671_v49 }
 0x1cc   : >> { %v1682_v21 = vshll.u32 %v12290_v34, %v1670_v12  ;;  %v1683_v28 = vshrl.u32 %v12291_v52, %v1671_v49  ;;  %v8060_v55 = vshll.u32 %v1664_v3, 8  ;;  %vm6365_vm8 = vcmp.lt.s32.totalorder %v6364_v5, 0 }
 0x1cd   : >> { %v1511_v45 = vshll.u32 %v8050_v46, 30  ;;  %v1675_v9 = vor.u32 %v1674_v47, %v1673_v8  ;;  %v1678_v19 = vor.u32 %v1677_v38, %v1676_v30  ;;  %v1681_v27 = vor.u32 %v1680_v59, %v1679_v37 }
 0x1ce   : >> { %v1684_v56 = vor.u32 %v1683_v28, %v1682_v21  ;;  %v8063_v23 = vadd.f32 %v607_v54, %v7858_v31  ;;  %v8065_v14 = vpop.eup %6816  ;;  %v1685_v6 = vshll.u32 %v12291_v52, %v1670_v12  ;;  %v1686_v43 = vshrl.u32 %v12292_v48, %v1671_v49 }
 0x1cf   : >> { %12332 = vst [vmem:[#allocation60_spill] sm:$0xff] %v8065_v14  ;;  %v8067_v25 = vsub.s32 %v1508_v24, %v1511_v45  ;;  %v6370_v7 = vadd.s32 4294967169, %v1556_v4  ;;  %v1672_v8 = vshrl.u32 %v12296_v35, %v1671_v49  ;;  %vm1688_vm9 = vcmp.lt.s32.totalorder %v1669_v0, 1 }
 0x1d0   : >> { %vm1689_vm10 = vcmp.lt.s32.totalorder %v1669_v0, 2  ;;  %vm1691_vm11 = vcmp.lt.s32.totalorder %v1669_v0, 4  ;;  %v1687_v47 = vor.u32 %v1686_v43, %v1685_v6  ;;  %v1696_v31 = vsel %vm1688_vm9, %v1675_v9, %v1678_v19 }
 0x1d1   : >> { %v1514_v3 = vsub.s32 0, %v8067_v25  ;;  %v1693_v30 = vsel %vm1691_vm11, %v1681_v27, 2102212464  ;;  %vm1690_vm13 = vcmp.lt.s32.totalorder %v1669_v0, 3  ;;  %v1692_v38 = vsel %vm1688_vm9, %v1672_v8, %v1675_v9 }
 0x1d2   : >> { %v1697_v54 = vsel %vm1691_vm11, %v1684_v56, 920167782  ;;  %v1700_v24 = vsel %vm1688_vm9, %v1678_v19, %v1681_v27  ;;  %v1694_v12 = vsel %vm1690_vm13, %v1678_v19, %v1693_v30  ;;  %v1701_v21 = vsel %vm1691_vm11, %v1687_v47, 1326507024 }
 0x1d3   : >> { %v6367_v37 = vmin.u32 %v1514_v3, %v8067_v25  ;;  %v1698_v59 = vsel %vm1690_vm13, %v1681_v27, %v1697_v54  ;;  %v8077_v49 = vsel %vm6365_vm8, 0, %v6364_v5  ;;  %v1702_v45 = vsel %vm1690_vm13, %v1684_v56, %v1701_v21 }
 0x1d4   : >> { %v8074_v4 = vpop.eup %6818  ;;  %v1699_v28 = vsel %vm1689_vm10, %v1696_v31, %v1698_v59  ;;  %v12334_v43 = vand.u32 2147483647, %v8008_v63  ;;  %v1703_v8 = vsel %vm1689_vm10, %v1700_v24, %v1702_v45  ;;  %v1695_v3 = vsel %vm1689_vm10, %v1692_v38, %v1694_v12 }
 0x1d5   : >> { %12333 = vst [vmem:[#allocation61_spill] sm:$0xff] %v8074_v4  ;;  %v8082_v14 = vpop.eup %6820  ;;  %v1516_v9 = vclz %v6367_v37  ;;  %v8086_v19 = vmul.u32.u64.low %v8060_v55, %v1699_v28  ;;  %v8087_v27 = vmul.u32.u64.high %v8060_v55, %v1699_v28, %v8086_v19  ;;  %v1562_v56 = vadd.s32 1, %v6370_v7 }
 0x1d6   : >> { %v1559_v6 = vand.u32 8388607, %v12334_v43  ;;  %12335 = vst [vmem:[#allocation62_spill] sm:$0xff] %v8082_v14  ;;  %v8092_v5 = vmul.u32.u64.low %v8060_v55, %v1703_v8  ;;  %v8093_v47 = vmul.u32.u64.high %v8060_v55, %v1703_v8, %v8092_v5  ;;  %v1208_v30 = vsub.s32 32, %v7999_v42 }
 0x1d7   : >> { %v8100_v54 = vadd.s32 %v7925_v29, %v7923_v18  ;;  %v6368_v24 = vadd.s32 4294967294, %v1516_v9  ;;  %v1214_v37 = vshll.u32 %v8046_v2, 23  ;;  %v1420_v0 = vsub.s32 4294967266, %v8077_v49 }
 0x1d8   : >> { %v1560_v38 = vor.u32 8388608, %v1559_v6  ;;  %vm1563_vm0 = vcmp.gt.s32.totalorder %v1562_v56, 0  ;;  %v1711_v12 = vmul.u32 %v8060_v55, %v1695_v3  ;;  %v1714_v7 = vadd.s32 1, %v8087_v27 }
 0x1d9   : >> { %vm6369_vm1 = vcmp.lt.s32.totalorder %v6368_v24, 0  ;;  %v1564_v59 = vsel %vm1563_vm0, %v1562_v56, 0  ;;  %vm1713_vm8 = vc.u32 %v8093_v47, %v8086_v19  ;;  %v1763_v29 = vand.u32 2139095040, %v8063_v23 }
 0x1da   : >> { %v8106_v21 = vsel %vm6369_vm1, 0, %v6368_v24  ;;  %v8110_v18 = vshrl.u32 %v1564_v59, 5  ;;  %v1210_v2 = vshrl.u32 %v8044_v15, %v1208_v30  ;;  %v1715_v55 = vsel %vm1713_vm8, %v1714_v7, %v8087_v27 }
 0x1db   : >> { %v1520_v28 = vsub.s32 32, %v8106_v21  ;;  %v1524_v45 = vsub.s32 4294967266, %v8106_v21  ;;  %v8117_v43 = vor.u32 4788187, %v1214_v37  ;;  %v1504_v6 = vadd.s32 %v7993_v10, %v8002_v26 }
 0x1dc   : >> { %v1716_v9 = vadd.s32 %v1715_v55, %v1711_v12  ;;  %v1566_v8 = vand.u32 31, %v1564_v59  ;;  %v1416_v3 = vsub.s32 32, %v8077_v49  ;;  %v8122_v5 = vadd.s32 127, %v1420_v0 }
 0x1dd   : >> { %v8124_v56 = vshll.u32 %v1560_v38, 8  ;;  %vm1584_vm9 = vcmp.lt.s32.totalorder %v8110_v18, 1  ;;  %v1764_v27 = vshrl.u32 %v1763_v29, 23  ;;  %v1522_v37 = vshrl.u32 %v1504_v6, %v1520_v28 }
 0x1de   : >> { %v1717_v30 = vadd.s32 536870912, %v1716_v9  ;;  %v1567_v24 = vsub.s32 32, %v1566_v8  ;;  %v1525_v7 = vadd.s32 127, %v1524_v45  ;;  %v1569_v31 = vshll.u32 %v12296_v35, %v1566_v8 }
 0x1df   : >> { %vm1585_vm10 = vcmp.lt.s32.totalorder %v8110_v18, 2  ;;  %v1572_v0 = vshll.u32 %v12288_v41, %v1566_v8  ;;  %v1575_v12 = vshll.u32 %v12289_v58, %v1566_v8  ;;  %v1578_v29 = vshll.u32 %v12290_v34, %v1566_v8 }
 0x1e0   : >> { %v8130_v10 = vshrl.u32 %v1717_v30, 30  ;;  %v1570_v26 = vshrl.u32 %v12288_v41, %v1567_v24  ;;  %v1573_v38 = vshrl.u32 %v12289_v58, %v1567_v24  ;;  %v1576_v59 = vshrl.u32 %v12290_v34, %v1567_v24 }
 0x1e1   : >> { %v1579_v28 = vshrl.u32 %v12291_v52, %v1567_v24  ;;  %vm1586_vm11 = vcmp.lt.s32.totalorder %v8110_v18, 3  ;;  %v1581_v57 = vshll.u32 %v12291_v52, %v1566_v8  ;;  %v1582_v60 = vshrl.u32 %v12292_v48, %v1567_v24 }
 0x1e2   : >> { %v1719_v45 = vshll.u32 %v8130_v10, 30  ;;  %v1571_v55 = vor.u32 %v1570_v26, %v1569_v31  ;;  %v1574_v6 = vor.u32 %v1573_v38, %v1572_v0  ;;  %v1577_v30 = vor.u32 %v1576_v59, %v1575_v12 }
 0x1e3   : >> { %v1580_v15 = vor.u32 %v1579_v28, %v1578_v29  ;;  %v1568_v39 = vshrl.u32 %v12296_v35, %v1567_v24  ;;  %vm1587_vm13 = vcmp.lt.s32.totalorder %v8110_v18, 4  ;;  %v1526_v44 = vshll.u32 %v1525_v7, 23 }
 0x1e4   : >> { %v8143_v61 = vsub.s32 %v1716_v9, %v1719_v45  ;;  %v1592_v4 = vsel %vm1584_vm9, %v1571_v55, %v1574_v6  ;;  %v1583_v31 = vor.u32 %v1582_v60, %v1581_v57  ;;  %v1589_v26 = vsel %vm1587_vm13, %v1577_v30, 2102212464 }
 0x1e5   : >> { %v1593_v0 = vsel %vm1587_vm13, %v1580_v15, 920167782  ;;  %v1588_v8 = vsel %vm1584_vm9, %v1568_v39, %v1571_v55  ;;  %v1596_v24 = vsel %vm1584_vm9, %v1574_v6, %v1577_v30  ;;  %v1590_v12 = vsel %vm1586_vm11, %v1574_v6, %v1589_v26 }
 0x1e6   : >> { %v1722_v38 = vsub.s32 0, %v8143_v61  ;;  %v1594_v9 = vsel %vm1586_vm11, %v1577_v30, %v1593_v0  ;;  %v1597_v60 = vsel %vm1587_vm13, %v1583_v31, 1326507024  ;;  %v6378_v57 = vadd.s32 4294967169, %v1764_v27 }
 0x1e7   : >> { %v1595_v7 = vsel %vm1585_vm10, %v1592_v4, %v1594_v9  ;;  %v1598_v29 = vsel %vm1586_vm11, %v1580_v15, %v1597_v60  ;;  %v1418_v45 = vshrl.u32 %v8100_v54, %v1416_v3  ;;  %v1521_v55 = vshll.u32 %v8067_v25, %v8106_v21 }
 0x1e8   : >> { %v6375_v59 = vmin.u32 %v1722_v38, %v8143_v61  ;;  %v8164_v39 = vmul.u32.u64.low %v8124_v56, %v1595_v7  ;;  %v8165_v28 = vmul.u32.u64.high %v8124_v56, %v1595_v7, %v8164_v39  ;;  %v1527_v6 = vor.u32 4788187, %v1526_v44 }
 0x1e9   : >> { %v1599_v4 = vsel %vm1585_vm10, %v1596_v24, %v1598_v29  ;;  %v12336_v27 = vshll.u32 %v7904_v22, %v7999_v42  ;;  %v1417_v54 = vshll.u32 %v7984_v51, %v8077_v49  ;;  %v1523_v3 = vor.u32 %v1522_v37, %v1521_v55 }
 0x1ea   : >> { %v1724_v15 = vclz %v6375_v59  ;;  %v8179_v31 = vmul.u32.u64.low %v8124_v56, %v1599_v4  ;;  %v8180_v26 = vmul.u32.u64.high %v8124_v56, %v1599_v4, %v8179_v31  ;;  %v1591_v44 = vsel %vm1585_vm10, %v1588_v8, %v1590_v12 }
 0x1eb   : >> { %v8176_v30 = vor.u32 %v1210_v2, %v12336_v27  ;;  %v1770_v25 = vadd.s32 1, %v6378_v57  ;;  %v1216_v21 = vand.u32 2147483647, %v8117_v43  ;;  %v1422_v0 = vshll.u32 %v8122_v5, 23 }
 0x1ec   : >> { %v6376_v22 = vadd.s32 4294967294, %v1724_v15  ;;  %v1610_v42 = vadd.s32 1, %v8165_v28  ;;  %v8189_v2 = vor.u32 %v1418_v45, %v1417_v54  ;;  %v1528_v38 = vand.u32 2147483647, %v1527_v6 }
 0x1ed   : >> { %v12337_v9 = vand.u32 2147483647, %v8063_v23  ;;  %vm1771_vm0 = vcmp.gt.s32.totalorder %v1770_v25, 0  ;;  %v1607_v51 = vmul.u32 %v8124_v56, %v1591_v44  ;;  %vm1609_vm8 = vc.u32 %v8180_v26, %v8164_v39 }
 0x1ee   : >> { %vm6377_vm1 = vcmp.lt.s32.totalorder %v6376_v22, 0  ;;  %v1772_v49 = vsel %vm1771_vm0, %v1770_v25, 0  ;;  %v1530_v18 = vcvt.s32.f32 %v1523_v3  ;;  %v1611_v5 = vsel %vm1609_vm8, %v1610_v42, %v8165_v28 }
 0x1ef   : >> { %v1767_v24 = vand.u32 8388607, %v12337_v9  ;;  %v1727_v37 = vsel %vm6377_vm1, 0, %v6376_v22  ;;  %v1774_v8 = vand.u32 31, %v1772_v49  ;;  %v8197_v12 = vor.u32 4788187, %v1422_v0 }
 0x1f0   : >> { %v1712_v7 = vadd.s32 %v8086_v19, %v8093_v47  ;;  %v1732_v60 = vsub.s32 4294967266, %v1727_v37  ;;  %v1612_v57 = vadd.s32 %v1611_v5, %v1607_v51  ;;  %v8201_v59 = vmul.f32 %v1530_v18, %v1528_v38  ;;  %v522_v47 = vpop.f32.mrf.mxu0 }
 0x1f1   : >> { %v1728_v29 = vsub.s32 32, %v1727_v37  ;;  %v1768_v56 = vor.u32 8388608, %v1767_v24  ;;  %v1775_v45 = vsub.s32 32, %v1774_v8  ;;  %v1777_v6 = vshll.u32 %v12296_v35, %v1774_v8 }
 0x1f2   : >> { %v1613_v55 = vadd.s32 536870912, %v1612_v57  ;;  %v1780_v4 = vshll.u32 %v12288_v41, %v1774_v8  ;;  %v1783_v28 = vshll.u32 %v12289_v58, %v1774_v8  ;;  %v1733_v27 = vadd.s32 127, %v1732_v60 }
 0x1f3   : >> { %v1778_v15 = vshrl.u32 %v12288_v41, %v1775_v45  ;;  %v1781_v31 = vshrl.u32 %v12289_v58, %v1775_v45  ;;  %v1784_v19 = vshrl.u32 %v12290_v34, %v1775_v45  ;;  %v1773_v3 = vshrl.u32 %v1772_v49, 5 }
 0x1f4   : >> { %v8209_v54 = vshrl.u32 %v1613_v55, 30  ;;  %v1786_v44 = vshll.u32 %v12290_v34, %v1774_v8  ;;  %v1787_v25 = vshrl.u32 %v12291_v52, %v1775_v45  ;;  %v8213_v38 = vshll.u32 %v1768_v56, 8 }
 0x1f5   : >> { %v1779_v0 = vor.u32 %v1778_v15, %v1777_v6  ;;  %v1782_v22 = vor.u32 %v1781_v31, %v1780_v4  ;;  %v1785_v42 = vor.u32 %v1784_v19, %v1783_v28  ;;  %v12338_v9 = vand.u32 2147483647, %v7664_v36 }
 0x1f6   : >> { %v12339_v24 = vmov 0  ;;  %v1729_v51 = vshll.u32 %v8143_v61, %v1727_v37  ;;  %v1615_v18 = vshll.u32 %v8209_v54, 30  ;;  %v1788_v49 = vor.u32 %v1787_v25, %v1786_v44 }
 0x1f7   : >> { %vm8217_vm9 = vcmp.le.f32.partialorder %v12338_v9, 0.7853982  ;;  %v8224_v5 = vadd.f32 %v522_v47, %v7827_v33  ;;  %v1730_v60 = vshrl.u32 %v1712_v7, %v1728_v29  ;;  %v1734_v55 = vshll.u32 %v1733_v27, 23 }
 0x1f8   : >> { %v12340_v24 = vsel %vm8217_vm9, 4294967295, %v12339_v24  ;;  %v1789_v6 = vshll.u32 %v12291_v52, %v1774_v8  ;;  %v1790_v56 = vshrl.u32 %v12292_v48, %v1775_v45  ;;  %v8228_v4 = vsub.s32 %v1612_v57, %v1615_v18 }
 0x1f9   : >> { %12341 = vst [vmem:[#allocation63_spill] sm:$0xff] %v12340_v24  ;;  %vm1792_vm10 = vcmp.lt.s32.totalorder %v1773_v3, 1  ;;  %vm1794_vm11 = vcmp.lt.s32.totalorder %v1773_v3, 3  ;;  %vm1795_vm13 = vcmp.lt.s32.totalorder %v1773_v3, 4  ;;  %v1776_v19 = vshrl.u32 %v12296_v35, %v1775_v45 }
 0x1fa   : >> { %v1791_v28 = vor.u32 %v1790_v56, %v1789_v6  ;;  %v1797_v15 = vsel %vm1795_vm13, %v1785_v42, 2102212464  ;;  %v1800_v61 = vsel %vm1792_vm10, %v1779_v0, %v1782_v22  ;;  %v1801_v37 = vsel %vm1795_vm13, %v1788_v49, 920167782 }
 0x1fb   : >> { %v1618_v31 = vsub.s32 0, %v8228_v4  ;;  %vm1793_vm0 = vcmp.lt.s32.totalorder %v1773_v3, 2  ;;  %v1802_v7 = vsel %vm1794_vm11, %v1785_v42, %v1801_v37  ;;  %vm12094_vm1 = vcmp.lt.s32.totalorder %v7873_v50, 0 }
 0x1fc   : >> { %v1735_v8 = vor.u32 4788187, %v1734_v55  ;;  %v1803_v57 = vsel %vm1793_vm0, %v1800_v61, %v1802_v7  ;;  %v1804_v29 = vsel %vm1792_vm10, %v1782_v22, %v1785_v42  ;;  %v1805_v27 = vsel %vm1795_vm13, %v1791_v28, 1326507024 }
 0x1fd   : >> { %v6371_v47 = vmin.u32 %v1618_v31, %v8228_v4  ;;  %v1796_v44 = vsel %vm1792_vm10, %v1776_v19, %v1779_v0  ;;  %v1798_v25 = vsel %vm1794_vm11, %v1782_v22, %v1797_v15  ;;  %v1806_v9 = vsel %vm1794_vm11, %v1788_v49, %v1805_v27 }
 0x1fe   : >> { %v1731_v45 = vor.u32 %v1730_v60, %v1729_v51  ;;  %v1807_v18 = vsel %vm1793_vm0, %v1804_v29, %v1806_v9  ;;  %v8243_v6 = vmul.u32.u64.low %v8213_v38, %v1803_v57  ;;  %v8244_v56 = vmul.u32.u64.high %v8213_v38, %v1803_v57, %v8243_v6 }
 0x1ff   : >> { %v1218_v55 = vcvt.s32.f32 %v8176_v30  ;;  %v1620_v42 = vclz %v6371_v47  ;;  %v8249_v28 = vmul.u32.u64.low %v8213_v38, %v1807_v18  ;;  %v8250_v61 = vmul.u32.u64.high %v8213_v38, %v1807_v18, %v8249_v28 }
 0x200   : >> { %v1328_v0 = vsel %vm8217_vm9, %v7664_v36, %v8040_v17  ;;  %vm12092_vm8 = vcmp.lt.s32.totalorder %v7684_v62, 0  ;;  %v1736_v22 = vand.u32 2147483647, %v1735_v8  ;;  %v1799_v51 = vsel %vm1793_vm0, %v1796_v44, %v1798_v25  ;;  %v611_v8 = vpop.f32.mrf.mxu1 }
 0x201   : >> { %v12060_v49 = vand.u32 2147483647, %v8224_v5  ;;  %v1219_v30 = vmul.f32 %v1218_v55, %v1216_v21  ;;  %v1532_v60 = vxor.u32 2147483648, %v8201_v59  ;;  %v6372_v15 = vadd.s32 4294967294, %v1620_v42 }
 0x202   : >> { %v1867_v37 = vand.u32 2139095040, %v8224_v5  ;;  %v1424_v31 = vand.u32 2147483647, %v8197_v12  ;;  %v1426_v19 = vcvt.s32.f32 %v8189_v2  ;;  %v1738_v17 = vcvt.s32.f32 %v1731_v45 }
 0x203   : >> { %v1818_v7 = vadd.s32 1, %v8244_v56  ;;  %vm6373_vm10 = vcmp.lt.s32.totalorder %v6372_v15, 0  ;;  %v1815_v3 = vmul.u32 %v8213_v38, %v1799_v51  ;;  %vm1817_vm11 = vc.u32 %v8250_v61, %v8243_v6 }
 0x204   : >> { %v1868_v43 = vshrl.u32 %v1867_v37, 23  ;;  %v1739_v21 = vmul.f32 %v1738_v17, %v1736_v22  ;;  %v8269_v57 = vsel %vm6373_vm10, 0, %v6372_v15  ;;  %v1871_v12 = vand.u32 8388607, %v12060_v49 }
 0x205   : >> { %v1819_v29 = vsel %vm1817_vm11, %v1818_v7, %v8244_v56  ;;  %v1220_v2 = vxor.u32 2147483648, %v1219_v30  ;;  %v1533_v27 = vsel %vm12094_vm1, %v1532_v60, %v8201_v59  ;;  %v8278_v38 = vadd.f32 %v611_v8, %v7827_v33 }
 0x206   : >> { %v1820_v47 = vadd.s32 %v1819_v29, %v1815_v3  ;;  %6822 = vcosq.f32 %v1328_v0  ;;  %v8280_v44 = vmul.f32 %v1426_v19, %v1424_v31  ;;  %v1628_v25 = vsub.s32 4294967266, %v8269_v57  ;;  %v524_v19 = vpop.f32.mrf.mxu0 }
 0x207   : >> { %v6382_v9 = vadd.s32 4294967169, %v1868_v43  ;;  %6824 = vsinq.f32 %v1328_v0  ;;  %v12342_v45 = vand.u32 2147483647, %v7873_v50  ;;  %vm12093_vm0 = vcmp.lt.s32.totalorder %v7957_v11, 0 }
 0x208   : >> { %v1821_v59 = vadd.s32 536870912, %v1820_v47  ;;  %v1740_v55 = vxor.u32 2147483648, %v1739_v21  ;;  %v1872_v42 = vor.u32 8388608, %v1871_v12  ;;  %v8297_v0 = vsel %vm12092_vm8, %v1220_v2, %v1219_v30 }
 0x209   : >> { %vm8285_vm13 = vcmp.le.f32.partialorder %v12342_v45, 0.7853982  ;;  %v1874_v28 = vadd.s32 1, %v6382_v9  ;;  %12345 = vst [vmem:[#allocation64_spill] sm:$0xff] %v8297_v0  ;;  %v1624_v22 = vsub.s32 32, %v8269_v57  ;;  %v8304_v37 = vadd.s32 127, %v1628_v25 }
 0x20a   : >> { %v8293_v56 = vsel %vm8285_vm13, %v7873_v50, %v1533_v27  ;;  %v8300_v51 = vshrl.u32 %v1821_v59, 30  ;;  %v12059_v60 = vand.u32 2147483647, %v8278_v38  ;;  %v2075_v31 = vand.u32 2139095040, %v8278_v38 }
 0x20b   : >> { %vm1875_vm10 = vcmp.gt.s32.totalorder %v1874_v28, 0  ;;  %6826 = vcosq.f32 %v8293_v56  ;;  %v1608_v30 = vadd.s32 %v8164_v39, %v8180_v26  ;;  %v1741_v8 = vsel %vm12093_vm0, %v1740_v55, %v1739_v21 }
 0x20c   : >> { %v1823_v17 = vshll.u32 %v8300_v51, 30  ;;  %v1876_v7 = vsel %vm1875_vm10, %v1874_v28, 0  ;;  %v1625_v3 = vshll.u32 %v8228_v4, %v8269_v57  ;;  %v8315_v29 = vshll.u32 %v1872_v42, 8 }
 0x20d   : >> { %v1878_v43 = vand.u32 31, %v1876_v7  ;;  %v1626_v12 = vshrl.u32 %v1608_v30, %v1624_v22  ;;  %v8321_v27 = vand.u32 8388607, %v12059_v60  ;;  %v8324_v39 = vadd.f32 %v524_v19, %v7827_v33 }
 0x20e   : >> { %v8317_v2 = vsub.s32 %v1820_v47, %v1823_v17  ;;  %v1630_v26 = vshll.u32 %v8304_v37, 23  ;;  %v1877_v25 = vshrl.u32 %v1876_v7, 5  ;;  %v2076_v9 = vshrl.u32 %v2075_v31, 23 }
 0x20f   : >> { %v1879_v21 = vsub.s32 32, %v1878_v43  ;;  %v1881_v57 = vshll.u32 %v12296_v35, %v1878_v43  ;;  %v1884_v45 = vshll.u32 %v12288_v41, %v1878_v43  ;;  %v1887_v47 = vshll.u32 %v12289_v58, %v1878_v43 }
 0x210   : >> { %v1826_v4 = vsub.s32 0, %v8317_v2  ;;  %vm12091_vm11 = vcmp.lt.s32.totalorder %v7801_v16, 0  ;;  %v12346_v59 = vand.u32 2147483647, %v7957_v11  ;;  %v1890_v37 = vshll.u32 %v12290_v34, %v1878_v43 }
 0x211   : >> { %v1882_v42 = vshrl.u32 %v12288_v41, %v1879_v21  ;;  %v1885_v28 = vshrl.u32 %v12289_v58, %v1879_v21  ;;  %v1888_v22 = vshrl.u32 %v12290_v34, %v1879_v21  ;;  %v1891_v19 = vshrl.u32 %v12291_v52, %v1879_v21 }
 0x212   : >> { %vm8334_vm10 = vcmp.le.f32.partialorder %v12346_v59, 0.7853982  ;;  %v6379_v31 = vmin.u32 %v1826_v4, %v8317_v2  ;;  %v1893_v30 = vshll.u32 %v12291_v52, %v1878_v43  ;;  %v1894_v17 = vshrl.u32 %v12292_v48, %v1879_v21 }
 0x213   : >> { %v1883_v7 = vor.u32 %v1882_v42, %v1881_v57  ;;  %v1886_v59 = vor.u32 %v1885_v28, %v1884_v45  ;;  %v1889_v60 = vor.u32 %v1888_v22, %v1887_v47  ;;  %v12074_v49 = vand.u32 2147483647, %v8324_v39  ;;  %v8347_v15 = vpop.eup %6822 }
 0x214   : >> { %12349 = vst [vmem:[#allocation65_spill] sm:$0xff] %v8347_v15  ;;  %v1828_v24 = vclz %v6379_v31  ;;  %v1892_v36 = vor.u32 %v1891_v19, %v1890_v37  ;;  %v1895_v14 = vor.u32 %v1894_v17, %v1893_v30  ;;  %v6390_v1 = vadd.s32 4294967169, %v2076_v9  ;;  %v8349_v20 = vpop.eup %6824 }
 0x215   : >> { %12350 = vst [vmem:[#allocation66_spill] sm:$0xff] %v8349_v20  ;;  %v1880_v4 = vshrl.u32 %v12296_v35, %v1879_v21  ;;  %vm1896_vm6 = vcmp.lt.s32.totalorder %v1877_v25, 1  ;;  %vm1898_vm2 = vcmp.lt.s32.totalorder %v1877_v25, 3  ;;  %vm1899_vm12 = vcmp.lt.s32.totalorder %v1877_v25, 4 }
 0x216   : >> { %v6380_v43 = vadd.s32 4294967294, %v1828_v24  ;;  %v1901_v53 = vsel %vm1899_vm12, %v1889_v60, 2102212464  ;;  %v1904_v57 = vsel %vm1896_vm6, %v1883_v7, %v1886_v59  ;;  %v1905_v45 = vsel %vm1899_vm12, %v1892_v36, 920167782 }
 0x217   : >> { %vm1897_vm3 = vcmp.lt.s32.totalorder %v1877_v25, 2  ;;  %v1906_v47 = vsel %vm1898_vm2, %v1889_v60, %v1905_v45  ;;  %v1908_v42 = vsel %vm1896_vm6, %v1886_v59, %v1889_v60  ;;  %v1909_v28 = vsel %vm1899_vm12, %v1895_v14, 1326507024 }
 0x218   : >> { %v1900_v22 = vsel %vm1896_vm6, %v1880_v4, %v1883_v7  ;;  %v1907_v37 = vsel %vm1897_vm3, %v1904_v57, %v1906_v47  ;;  %v1910_v31 = vsel %vm1898_vm2, %v1892_v36, %v1909_v28  ;;  %v1971_v9 = vand.u32 2139095040, %v8324_v39  ;;  %v8354_v19 = vpop.eup %6826  ;;  %v613_v57 = vpop.f32.mrf.mxu1 }
 0x219   : >> { %v1902_v21 = vsel %vm1898_vm2, %v1886_v59, %v1901_v53  ;;  %v1911_v30 = vsel %vm1897_vm3, %v1908_v42, %v1910_v31  ;;  %v8358_v24 = vmul.u32.u64.low %v8315_v29, %v1907_v37  ;;  %v8359_v17 = vmul.u32.u64.high %v8315_v29, %v1907_v37, %v8358_v24 }
 0x21a   : >> { %v12351_v60 = vxor.u32 2147483648, %v8280_v44  ;;  %6828 = vsinq.f32 %v8293_v56  ;;  %v8373_v53 = vsel %vm8334_vm10, %v7957_v11, %v1741_v8  ;;  %vm6381_vm2 = vcmp.lt.s32.totalorder %v6380_v43, 0 }
 0x21b   : >> { %v8375_v36 = vor.u32 %v1626_v12, %v1625_v3  ;;  %v8378_v7 = vmul.u32.u64.low %v8315_v29, %v1911_v30  ;;  %v8379_v59 = vmul.u32.u64.high %v8315_v29, %v1911_v30, %v8378_v7  ;;  %v2082_v4 = vadd.s32 1, %v6390_v1 }
 0x21c   : >> { %v8367_v14 = vsel %vm12091_vm11, %v12351_v60, %v8280_v44  ;;  %v8381_v45 = vor.u32 4788187, %v1630_v26  ;;  %v1903_v44 = vsel %vm1897_vm3, %v1900_v22, %v1902_v21  ;;  %v2080_v56 = vor.u32 8388608, %v8321_v27 }
 0x21d   : >> { %12352 = vst [vmem:[#allocation67_spill] sm:$0xff] %v8367_v14  ;;  %v8387_v47 = vand.u32 8388607, %v12074_v49  ;;  %v8389_v8 = vsel %vm6381_vm2, 0, %v6380_v43  ;;  %v1922_v3 = vadd.s32 1, %v8359_v17  ;;  %vm2083_vm6 = vcmp.gt.s32.totalorder %v2082_v4, 0 }
 0x21e   : >> { %v1972_v12 = vshrl.u32 %v1971_v9, 23  ;;  %6830 = vcosq.f32 %v8373_v53  ;;  %v8395_v1 = vadd.s32 %v8243_v6, %v8250_v61  ;;  %v2084_v26 = vsel %vm2083_vm6, %v2082_v4, 0 }
 0x21f   : >> { %v8398_v25 = vadd.f32 %v613_v57, %v7827_v33  ;;  %v1919_v42 = vmul.u32 %v8315_v29, %v1903_v44  ;;  %vm1921_vm3 = vc.u32 %v8379_v59, %v8358_v24  ;;  %v2086_v43 = vand.u32 31, %v2084_v26 }
 0x220   : >> { %v1836_v22 = vsub.s32 4294967266, %v8389_v8  ;;  %v1923_v37 = vsel %vm1921_vm3, %v1922_v3, %v8359_v17  ;;  %v8407_v6 = vshll.u32 %v2080_v56, 8  ;;  %v6386_v33 = vadd.s32 4294967169, %v1972_v12 }
 0x221   : >> { %v1924_v61 = vadd.s32 %v1923_v37, %v1919_v42  ;;  %v2087_v31 = vsub.s32 32, %v2086_v43  ;;  %v1976_v9 = vor.u32 8388608, %v8387_v47  ;;  %v2085_v21 = vshrl.u32 %v2084_v26, 5 }
 0x222   : >> { %v2089_v29 = vshll.u32 %v12296_v35, %v2086_v43  ;;  %v2092_v30 = vshll.u32 %v12288_v41, %v2086_v43  ;;  %v2095_v60 = vshll.u32 %v12289_v58, %v2086_v43  ;;  %v2098_v17 = vshll.u32 %v12290_v34, %v2086_v43 }
 0x223   : >> { %v1925_v7 = vadd.s32 536870912, %v1924_v61  ;;  %v2090_v4 = vshrl.u32 %v12288_v41, %v2087_v31  ;;  %v2093_v57 = vshrl.u32 %v12289_v58, %v2087_v31  ;;  %v2096_v44 = vshrl.u32 %v12290_v34, %v2087_v31 }
 0x224   : >> { %v2099_v56 = vshrl.u32 %v12291_v52, %v2087_v31  ;;  %v2101_v47 = vshll.u32 %v12291_v52, %v2086_v43  ;;  %v2102_v3 = vshrl.u32 %v12292_v48, %v2087_v31  ;;  %v1978_v37 = vadd.s32 1, %v6386_v33 }
 0x225   : >> { %v8420_v12 = vshrl.u32 %v1925_v7, 30  ;;  %v2091_v26 = vor.u32 %v2090_v4, %v2089_v29  ;;  %v2094_v42 = vor.u32 %v2093_v57, %v2092_v30  ;;  %v2088_v49 = vshrl.u32 %v12296_v35, %v2087_v31 }
 0x226   : >> { %v2097_v27 = vor.u32 %v2096_v44, %v2095_v60  ;;  %v2100_v28 = vor.u32 %v2099_v56, %v2098_v17  ;;  %v2103_v15 = vor.u32 %v2102_v3, %v2101_v47  ;;  %vm2104_vm12 = vcmp.lt.s32.totalorder %v2085_v21, 1 }
 0x227   : >> { %v8423_v20 = vpop.eup %6828  ;;  %v1927_v40 = vshll.u32 %v8420_v12, 30  ;;  %vm2107_vm2 = vcmp.lt.s32.totalorder %v2085_v21, 4  ;;  %v12082_v43 = vand.u32 2147483647, %v8398_v25  ;;  %vm2106_vm6 = vcmp.lt.s32.totalorder %v2085_v21, 3 }
 0x228   : >> { %v2108_v14 = vsel %vm2104_vm12, %v2088_v49, %v2091_v26  ;;  %v2109_v7 = vsel %vm2107_vm2, %v2097_v27, 2102212464  ;;  %v2112_v32 = vsel %vm2104_vm12, %v2091_v26, %v2094_v42  ;;  %v2113_v31 = vsel %vm2107_vm2, %v2100_v28, 920167782 }
 0x229   : >> { %v8427_v29 = vsub.s32 %v1924_v61, %v1927_v40  ;;  %v2110_v33 = vsel %vm2106_vm6, %v2094_v42, %v2109_v7  ;;  %v2116_v30 = vsel %vm2104_vm12, %v2094_v42, %v2097_v27  ;;  %vm2105_vm3 = vcmp.lt.s32.totalorder %v2085_v21, 2 }
 0x22a   : >> { %v2114_v60 = vsel %vm2106_vm6, %v2097_v27, %v2113_v31  ;;  %v2117_v4 = vsel %vm2107_vm2, %v2103_v15, 1326507024  ;;  %vm1979_vm15 = vcmp.gt.s32.totalorder %v1978_v37, 0  ;;  %v2111_v44 = vsel %vm2105_vm3, %v2108_v14, %v2110_v33 }
 0x22b   : >> { %v8431_v57 = vpop.eup %6830  ;;  %v1930_v17 = vsub.s32 0, %v8427_v29  ;;  %v2115_v56 = vsel %vm2105_vm3, %v2112_v32, %v2114_v60  ;;  %v2118_v49 = vsel %vm2106_vm6, %v2100_v28, %v2117_v4  ;;  %v1980_v3 = vsel %vm1979_vm15, %v1978_v37, 0 }
 0x22c   : >> { %12353 = vst [vmem:[#allocation68_spill] sm:$0xff] %v8431_v57  ;;  %v2119_v47 = vsel %vm2105_vm3, %v2116_v30, %v2118_v49  ;;  %v8436_v40 = vmul.u32.u64.low %v8407_v6, %v2115_v56  ;;  %v8437_v61 = vmul.u32.u64.high %v8407_v6, %v2115_v56, %v8436_v40  ;;  %v8445_v42 = vshrl.u32 %v1980_v3, 5 }
 0x22d   : >> { %v6383_v26 = vmin.u32 %v1930_v17, %v8427_v29  ;;  %v8442_v15 = vmul.u32.u64.low %v8407_v6, %v2119_v47  ;;  %v8443_v27 = vmul.u32.u64.high %v8407_v6, %v2119_v47, %v8442_v15  ;;  %v8448_v32 = vadd.s32 127, %v1836_v22 }
 0x22e   : >> { %v1982_v28 = vand.u32 31, %v1980_v3  ;;  %v8450_v21 = vshll.u32 %v1976_v9, 8  ;;  %v1920_v7 = vadd.s32 %v8358_v24, %v8379_v59  ;;  %v2127_v37 = vmul.u32 %v8407_v6, %v2111_v44 }
 0x22f   : >> { %v1932_v33 = vclz %v6383_v26  ;;  %v2179_v31 = vand.u32 2139095040, %v8398_v25  ;;  %v2130_v30 = vadd.s32 1, %v8437_v61  ;;  %vm2000_vm15 = vcmp.lt.s32.totalorder %v8445_v42, 1 }
 0x230   : >> { %v1983_v60 = vsub.s32 32, %v1982_v28  ;;  %v8460_v22 = vand.u32 8388607, %v12082_v43  ;;  %vm2129_vm12 = vc.u32 %v8443_v27, %v8436_v40  ;;  %v1985_v24 = vshll.u32 %v12296_v35, %v1982_v28 }
 0x231   : >> { %v6384_v4 = vadd.s32 4294967294, %v1932_v33  ;;  %v1988_v59 = vshll.u32 %v12288_v41, %v1982_v28  ;;  %v2131_v6 = vsel %vm2129_vm12, %v2130_v30, %v8437_v61  ;;  %v1991_v44 = vshll.u32 %v12289_v58, %v1982_v28 }
 0x232   : >> { %v1986_v9 = vshrl.u32 %v12288_v41, %v1983_v60  ;;  %v1989_v17 = vshrl.u32 %v12289_v58, %v1983_v60  ;;  %v2132_v56 = vadd.s32 %v2131_v6, %v2127_v37  ;;  %v1992_v49 = vshrl.u32 %v12290_v34, %v1983_v60 }
 0x233   : >> { %vm6385_vm2 = vcmp.lt.s32.totalorder %v6384_v4, 0  ;;  %v1994_v47 = vshll.u32 %v12290_v34, %v1982_v28  ;;  %v1995_v33 = vshrl.u32 %v12291_v52, %v1983_v60  ;;  %v1997_v0 = vshll.u32 %v12291_v52, %v1982_v28 }
 0x234   : >> { %v1935_v3 = vsel %vm6385_vm2, 0, %v6384_v4  ;;  %v1987_v26 = vor.u32 %v1986_v9, %v1985_v24  ;;  %v1990_v15 = vor.u32 %v1989_v17, %v1988_v59  ;;  %v2133_v14 = vadd.s32 536870912, %v2132_v56 }
 0x235   : >> { %v1936_v43 = vsub.s32 32, %v1935_v3  ;;  %v1937_v61 = vshll.u32 %v8427_v29, %v1935_v3  ;;  %v1940_v30 = vsub.s32 4294967266, %v1935_v3  ;;  %v1993_v16 = vor.u32 %v1992_v49, %v1991_v44 }
 0x236   : >> { %v1996_v57 = vor.u32 %v1995_v33, %v1994_v47  ;;  %v1998_v37 = vshrl.u32 %v12292_v48, %v1983_v60  ;;  %v8476_v13 = vshrl.u32 %v2133_v14, 30  ;;  %vm2003_vm6 = vcmp.lt.s32.totalorder %v8445_v42, 4 }
 0x237   : >> { %v1938_v6 = vshrl.u32 %v1920_v7, %v1936_v43  ;;  %v1941_v62 = vadd.s32 127, %v1940_v30  ;;  %v1984_v4 = vshrl.u32 %v12296_v35, %v1983_v60  ;;  %vm2001_vm3 = vcmp.lt.s32.totalorder %v8445_v42, 2 }
 0x238   : >> { %v1999_v24 = vor.u32 %v1998_v37, %v1997_v0  ;;  %v2005_v29 = vsel %vm2003_vm6, %v1993_v16, 2102212464  ;;  %v2135_v17 = vshll.u32 %v8476_v13, 30  ;;  %v2008_v28 = vsel %vm2000_vm15, %v1987_v26, %v1990_v15 }
 0x239   : >> { %v1939_v59 = vor.u32 %v1938_v6, %v1937_v61  ;;  %v1942_v9 = vshll.u32 %v1941_v62, 23  ;;  %vm1866_vm12 = vcmp.lt.s32.totalorder %v8224_v5, 0  ;;  %vm2002_vm2 = vcmp.lt.s32.totalorder %v8445_v42, 3 }
 0x23a   : >> { %v2009_v43 = vsel %vm2003_vm6, %v1996_v57, 920167782  ;;  %v2012_v14 = vsel %vm2000_vm15, %v1990_v15, %v1993_v16  ;;  %v2013_v7 = vsel %vm2003_vm6, %v1999_v24, 1326507024  ;;  %v8488_v60 = vsub.s32 %v2132_v56, %v2135_v17 }
 0x23b   : >> { %v1943_v0 = vor.u32 4788187, %v1942_v9  ;;  %v2004_v62 = vsel %vm2000_vm15, %v1984_v4, %v1987_v26  ;;  %v2010_v44 = vsel %vm2002_vm2, %v1993_v16, %v2009_v43  ;;  %v2006_v49 = vsel %vm2002_vm2, %v1990_v15, %v2005_v29 }
 0x23c   : >> { %v2011_v47 = vsel %vm2001_vm3, %v2008_v28, %v2010_v44  ;;  %v2014_v3 = vsel %vm2002_vm2, %v1996_v57, %v2013_v7  ;;  %v2180_v33 = vshrl.u32 %v2179_v31, 23  ;;  %v1946_v30 = vcvt.s32.f32 %v1939_v59 }
 0x23d   : >> { %v1944_v61 = vand.u32 2147483647, %v1943_v0  ;;  %v2138_v37 = vsub.s32 0, %v8488_v60  ;;  %v2015_v6 = vsel %vm2001_vm3, %v2012_v14, %v2014_v3  ;;  %v12354_v15 = vand.u32 2147483647, %v8224_v5 }
 0x23e   : >> { %v8498_v56 = vmul.u32.u64.low %v8450_v21, %v2015_v6  ;;  %v8499_v24 = vmul.u32.u64.high %v8450_v21, %v2015_v6, %v8498_v56  ;;  %v8502_v26 = vmul.u32.u64.low %v8450_v21, %v2011_v47  ;;  %v8503_v16 = vmul.u32.u64.high %v8450_v21, %v2011_v47, %v8502_v26 }
 0x23f   : >> { %vm8508_vm15 = vcmp.le.f32.partialorder %v12354_v15, 0.7853982  ;;  %v1947_v31 = vmul.f32 %v1946_v30, %v1944_v61  ;;  %v6391_v4 = vmin.u32 %v2138_v37, %v8488_v60  ;;  %v6394_v29 = vadd.s32 4294967169, %v2180_v33 }
 0x240   : >> { %v12357_v59 = vand.u32 2147483647, %v8381_v45  ;;  %v12358_v9 = vcvt.s32.f32 %v8375_v36  ;;  %v12359_v28 = vsub.s32 32, %v8389_v8  ;;  %v1838_v14 = vshll.u32 %v8448_v32, 23 }
 0x241   : >> { %v2007_v7 = vsel %vm2001_vm3, %v2004_v62, %v2006_v49  ;;  %v1948_v0 = vxor.u32 2147483648, %v1947_v31  ;;  %v2140_v44 = vclz %v6391_v4  ;;  %v2184_v47 = vor.u32 8388608, %v8460_v22 }
 0x242   : >> { %v8517_v17 = vmul.f32 %v12358_v9, %v12357_v59  ;;  %v1834_v43 = vshrl.u32 %v8395_v1, %v12359_v28  ;;  %v2186_v3 = vadd.s32 1, %v6394_v29  ;;  %v1833_v45 = vshll.u32 %v8317_v2, %v8389_v8 }
 0x243   : >> { %vm2025_vm6 = vc.u32 %v8499_v24, %v8502_v26  ;;  %v2026_v36 = vadd.s32 1, %v8503_v16  ;;  %v1950_v1 = vsub.s32 4, %v8420_v12  ;;  %v1949_v32 = vsel %vm1866_vm12, %v1948_v0, %v1947_v31 }
 0x244   : >> { %v6392_v42 = vadd.s32 4294967294, %v2140_v44  ;;  %v2023_v62 = vmul.u32 %v8450_v21, %v2007_v7  ;;  %vm2187_vm3 = vcmp.gt.s32.totalorder %v2186_v3, 0  ;;  %v8535_v49 = vor.u32 %v1834_v43, %v1833_v45 }
 0x245   : >> { %v8537_v22 = vor.u32 4788187, %v1838_v14  ;;  %v2027_v2 = vsel %vm2025_vm6, %v2026_v36, %v8503_v16  ;;  %v2188_v8 = vsel %vm2187_vm3, %v2186_v3, 0  ;;  %v2128_v33 = vadd.s32 %v8436_v40, %v8443_v27 }
 0x246   : >> { %vm6393_vm2 = vcmp.lt.s32.totalorder %v6392_v42, 0  ;;  %v2028_v61 = vadd.s32 %v2027_v2, %v2023_v62  ;;  %v8542_v30 = vshll.u32 %v2184_v47, 8  ;;  %v1952_v37 = vsel %vm8508_vm15, %v8224_v5, %v1949_v32 }
 0x247   : >> { %v2143_v21 = vsel %vm6393_vm2, 0, %v6392_v42  ;;  %v2190_v6 = vand.u32 31, %v2188_v8  ;;  %v8550_v56 = vsel %vm1866_vm12, %v1950_v1, %v8420_v12  ;;  %v8552_v4 = vshrl.u32 %v2188_v8, 5 }
 0x248   : >> { %v2144_v16 = vsub.s32 32, %v2143_v21  ;;  %v2148_v15 = vsub.s32 4294967266, %v2143_v21  ;;  %v2029_v31 = vadd.s32 536870912, %v2028_v61  ;;  %v2145_v40 = vshll.u32 %v8488_v60, %v2143_v21 }
 0x249   : >> { %v2191_v27 = vsub.s32 32, %v2190_v6  ;;  %v2193_v29 = vshll.u32 %v12296_v35, %v2190_v6  ;;  %v2196_v59 = vshll.u32 %v12288_v41, %v2190_v6  ;;  %v2199_v14 = vshll.u32 %v12289_v58, %v2190_v6 }
 0x24a   : >> { %v2146_v9 = vshrl.u32 %v2128_v33, %v2144_v16  ;;  %v2149_v28 = vadd.s32 127, %v2148_v15  ;;  %v8557_v43 = vshrl.u32 %v2029_v31, 30  ;;  %v2202_v44 = vshll.u32 %v12290_v34, %v2190_v6 }
 0x24b   : >> { %v2194_v12 = vshrl.u32 %v12288_v41, %v2191_v27  ;;  %v2197_v7 = vshrl.u32 %v12289_v58, %v2191_v27  ;;  %v2200_v0 = vshrl.u32 %v12290_v34, %v2191_v27  ;;  %v2203_v45 = vshrl.u32 %v12291_v52, %v2191_v27 }
 0x24c   : >> { %v2147_v60 = vor.u32 %v2146_v9, %v2145_v40  ;;  %v2150_v47 = vshll.u32 %v2149_v28, 23  ;;  %v2031_v3 = vshll.u32 %v8557_v43, 30  ;;  %6832 = vsinq.f32 %v1952_v37 }
 0x24d   : >> { %vm2074_vm12 = vcmp.lt.s32.totalorder %v8278_v38, 0  ;;  %v2192_v36 = vshrl.u32 %v12296_v35, %v2191_v27  ;;  %v2195_v1 = vor.u32 %v2194_v12, %v2193_v29  ;;  %v2198_v32 = vor.u32 %v2197_v7, %v2196_v59 }
 0x24e   : >> { %v12360_v42 = vand.u32 2147483647, %v8278_v38  ;;  %v2151_v2 = vor.u32 4788187, %v2150_v47  ;;  %v8574_v8 = vsub.s32 %v2028_v61, %v2031_v3  ;;  %v2201_v33 = vor.u32 %v2200_v0, %v2199_v14 }
 0x24f   : >> { %v2204_v21 = vor.u32 %v2203_v45, %v2202_v44  ;;  %v2154_v16 = vcvt.s32.f32 %v2147_v60  ;;  %v2205_v15 = vshll.u32 %v12291_v52, %v2190_v6  ;;  %v2206_v31 = vshrl.u32 %v12292_v48, %v2191_v27 }
 0x250   : >> { %vm8570_vm6 = vcmp.le.f32.partialorder %v12360_v42, 0.7853982  ;;  %vm2208_vm3 = vcmp.lt.s32.totalorder %v8552_v4, 1  ;;  %v2152_v40 = vand.u32 2147483647, %v2151_v2  ;;  %v2034_v29 = vsub.s32 0, %v8574_v8 }
 0x251   : >> { %vm2209_vm2 = vcmp.lt.s32.totalorder %v8552_v4, 2  ;;  %vm2211_vm14 = vcmp.lt.s32.totalorder %v8552_v4, 4  ;;  %v2207_v59 = vor.u32 %v2206_v31, %v2205_v15  ;;  %vm2210_vm11 = vcmp.lt.s32.totalorder %v8552_v4, 3 }
 0x252   : >> { %v2216_v61 = vsel %vm2208_vm3, %v2195_v1, %v2198_v32  ;;  %v2217_v9 = vsel %vm2211_vm14, %v2204_v21, 920167782  ;;  %v2155_v28 = vmul.f32 %v2154_v16, %v2152_v40  ;;  %v6387_v6 = vmin.u32 %v2034_v29, %v8574_v8 }
 0x253   : >> { %v2213_v27 = vsel %vm2211_vm14, %v2201_v33, 2102212464  ;;  %v2218_v14 = vsel %vm2210_vm11, %v2201_v33, %v2217_v9  ;;  %6834 = vcosq.f32 %v1952_v37  ;;  %v2220_v7 = vsel %vm2208_vm3, %v2198_v32, %v2201_v33 }
 0x254   : >> { %v2219_v12 = vsel %vm2209_vm2, %v2216_v61, %v2218_v14  ;;  %v2221_v0 = vsel %vm2211_vm14, %v2207_v59, 1326507024  ;;  %vm1554_vm8 = vcmp.lt.s32.totalorder %v8008_v63, 0  ;;  %v2156_v44 = vxor.u32 2147483648, %v2155_v28 }
 0x255   : >> { %v2036_v60 = vclz %v6387_v6  ;;  %v2212_v47 = vsel %vm2208_vm3, %v2192_v36, %v2195_v1  ;;  %v2222_v3 = vsel %vm2210_vm11, %v2204_v21, %v2221_v0  ;;  %v2214_v37 = vsel %vm2210_vm11, %v2198_v32, %v2213_v27 }
 0x256   : >> { %v2223_v45 = vsel %vm2209_vm2, %v2220_v7, %v2222_v3  ;;  %v8602_v42 = vmul.u32.u64.low %v8542_v30, %v2219_v12  ;;  %v8603_v2 = vmul.u32.u64.high %v8542_v30, %v2219_v12, %v8602_v42  ;;  %v2157_v33 = vsel %vm2074_vm12, %v2156_v44, %v2155_v28 }
 0x257   : >> { %v6388_v16 = vadd.s32 4294967294, %v2036_v60  ;;  %v8609_v36 = vmul.u32.u64.low %v8542_v30, %v2223_v45  ;;  %v8610_v1 = vmul.u32.u64.high %v8542_v30, %v2223_v45, %v8609_v36  ;;  %v1636_v21 = vxor.u32 2147483648, %v8517_v17 }
 0x258   : >> { %v1840_v32 = vand.u32 2147483647, %v8537_v22  ;;  %v2160_v15 = vsel %vm8570_vm6, %v8278_v38, %v2157_v33  ;;  %vm1970_vm14 = vcmp.lt.s32.totalorder %v8324_v39, 0  ;;  %v1842_v31 = vcvt.s32.f32 %v8535_v49 }
 0x259   : >> { %vm6389_vm11 = vcmp.lt.s32.totalorder %v6388_v16, 0  ;;  %v2215_v40 = vsel %vm2209_vm2, %v2212_v47, %v2214_v37  ;;  %v1953_v29 = vsel %vm8508_vm15, 0, %v8550_v56  ;;  %6836 = vcosq.f32 %v2160_v15  ;;  %v8626_v9 = vpop.eup %6832 }
 0x25a   : >> { %v2039_v59 = vsel %vm6389_vm11, 0, %v6388_v16  ;;  %v2234_v22 = vadd.s32 1, %v8603_v2  ;;  %v2054_v61 = vsub.s32 4, %v8557_v43  ;;  %6838 = vsinq.f32 %v2160_v15 }
 0x25b   : >> { %v2024_v49 = vadd.s32 %v8502_v26, %v8499_v24  ;;  %v2040_v28 = vsub.s32 32, %v2039_v59  ;;  %v2044_v6 = vsub.s32 4294967266, %v2039_v59  ;;  %vm1762_vm3 = vcmp.lt.s32.totalorder %v8063_v23, 0 }
 0x25c   : >> { %v1843_v4 = vmul.f32 %v1842_v31, %v1840_v32  ;;  %v2231_v57 = vmul.u32 %v8542_v30, %v2215_v40  ;;  %vm2233_vm15 = vc.u32 %v8610_v1, %v8602_v42  ;;  %v1957_v56 = vadd.s32 3, %v1953_v29 }
 0x25d   : >> { %v2041_v27 = vshll.u32 %v8574_v8, %v2039_v59  ;;  %v2042_v14 = vshrl.u32 %v2024_v49, %v2040_v28  ;;  %v2045_v12 = vadd.s32 127, %v2044_v6  ;;  %v2235_v7 = vsel %vm2233_vm15, %v2234_v22, %v8603_v2 }
 0x25e   : >> { %6840 = vsinq.f32 %v8373_v53  ;;  %v1637_v24 = vsel %vm1554_vm8, %v1636_v21, %v8517_v17  ;;  %v2236_v26 = vadd.s32 %v2235_v7, %v2231_v57  ;;  %v2055_v30 = vsel %vm1970_vm14, %v2054_v61, %v8557_v43 }
 0x25f   : >> { %v2043_v0 = vor.u32 %v2042_v14, %v2041_v27  ;;  %v2046_v44 = vshll.u32 %v2045_v12, 23  ;;  %vm12095_vm2 = vcmp.lt.s32.totalorder %v8398_v25, 0  ;;  %v2158_v8 = vsub.s32 4, %v8476_v13 }
 0x260   : >> { %v1844_v60 = vxor.u32 2147483648, %v1843_v4  ;;  %v2237_v47 = vadd.s32 536870912, %v2236_v26  ;;  %v12363_v3 = vand.u32 2147483647, %v8324_v39  ;;  %v1958_v17 = vand.u32 3, %v1957_v56  ;;  %v6835_v37 = vpop.eup %6834  ;;  %v12390_v56 = vld [vmem:[#allocation54_spill] sm:$0xff] }
 0x261   : >> { %v2047_v45 = vor.u32 4788187, %v2046_v44  ;;  %v2159_v2 = vsel %vm2074_vm12, %v2158_v8, %v8476_v13  ;;  %v12366_v33 = vand.u32 2147483647, %v8008_v63  ;;  %v1638_v32 = vsub.s32 4, %v8209_v54 }
 0x262   : >> { %vm8647_vm11 = vcmp.le.f32.partialorder %v12363_v3, 0.7853982  ;;  %v2238_v36 = vshrl.u32 %v2237_v47, 30  ;;  %v2161_v21 = vsel %vm8570_vm6, 0, %v2159_v2  ;;  %v2050_v40 = vcvt.s32.f32 %v2043_v0 }
 0x263   : >> { %v2057_v43 = vsel %vm8647_vm11, 0, %v2055_v30  ;;  %vm8658_vm15 = vcmp.le.f32.partialorder %v12366_v33, 0.7853982  ;;  %v2048_v31 = vand.u32 2147483647, %v2047_v45  ;;  %v1961_v13 = vxor.u32 2147483648, %v8626_v9 }
 0x264   : >> { %v1640_v15 = vsel %vm8658_vm15, %v8008_v63, %v1637_v24  ;;  %v2239_v29 = vshll.u32 %v2238_v36, 30  ;;  %v2262_v59 = vsub.s32 4, %v2238_v36  ;;  %v1639_v22 = vsel %vm1554_vm8, %v1638_v32, %v8209_v54 }
 0x265   : >> { %6842 = vcosq.f32 %v1640_v15  ;;  %v1845_v62 = vsel %vm1762_vm3, %v1844_v60, %v1843_v4  ;;  %v2051_v61 = vmul.f32 %v2050_v40, %v2048_v31  ;;  %v1964_v49 = vxor.u32 2147483648, %v6835_v37 }
 0x266   : >> { %6844 = vsinq.f32 %v1640_v15  ;;  %v2165_v28 = vadd.s32 3, %v2161_v21  ;;  %v8674_v6 = vsub.s32 %v2236_v26, %v2239_v29  ;;  %v12369_v57 = vand.u32 2147483647, %v8398_v25  ;;  %v6837_v27 = vpop.eup %6836 }
 0x267   : >> { %vm1959_vm6 = vcmp.lt.s32.totalorder %v1958_v17, 2  ;;  %vm1960_vm0 = vcmp.eq.s32.totalorder %v1958_v17, 0  ;;  %v2052_v14 = vxor.u32 2147483648, %v2051_v61  ;;  %v2061_v54 = vadd.s32 3, %v2057_v43  ;;  %v6839_v7 = vpop.eup %6838 }
 0x268   : >> { %vm8678_vm12 = vcmp.le.f32.partialorder %v12369_v57, 0.7853982  ;;  %v2263_v12 = vsel %vm12095_vm2, %v2262_v59, %v2238_v36  ;;  %vm1956_vm8 = vweird.f32 %v8224_v5  ;;  %v1641_v4 = vsel %vm8658_vm15, 0, %v1639_v22 }
 0x269   : >> { %v2232_v24 = vadd.s32 %v8602_v42, %v8610_v1  ;;  %v2242_v26 = vsub.s32 0, %v8674_v6  ;;  %v1962_v30 = vsel %vm1960_vm0, %v6835_v37, %v1961_v13  ;;  %vm1963_vm1 = vcmp.eq.s32.totalorder %v1958_v17, 2 }
 0x26a   : >> { %v2053_v0 = vsel %vm1970_vm14, %v2052_v14, %v2051_v61  ;;  %v1965_v44 = vsel %vm1963_vm1, %v1964_v49, %v8626_v9  ;;  %v2166_v8 = vand.u32 3, %v2165_v28  ;;  %v1846_v60 = vsub.s32 4, %v8300_v51 }
 0x26b   : >> { %v6395_v47 = vmin.u32 %v2242_v26, %v8674_v6  ;;  %v2056_v3 = vsel %vm8647_vm11, %v8324_v39, %v2053_v0  ;;  %v2265_v42 = vsel %vm8678_vm12, 0, %v2263_v12  ;;  %v1645_v1 = vadd.s32 3, %v1641_v4  ;;  %v8700_v37 = vpop.eup %6840 }
 0x26c   : >> { %6846 = vcosq.f32 %v2056_v3  ;;  %v8702_v45 = vand.u32 3, %v2061_v54  ;;  %v2169_v43 = vxor.u32 2147483648, %v6839_v7  ;;  %v2172_v9 = vxor.u32 2147483648, %v6837_v27 }
 0x26d   : >> { %v2244_v2 = vclz %v6395_v47  ;;  %6848 = vsinq.f32 %v2056_v3  ;;  %v1966_v33 = vsel %vm1959_vm6, %v1962_v30, %v1965_v44  ;;  %v12372_v16 = vand.u32 2147483647, %v8063_v23 }
 0x26e   : >> { %v2269_v36 = vadd.s32 3, %v2265_v42  ;;  %vm2168_vm0 = vcmp.eq.s32.totalorder %v2166_v8, 0  ;;  %v1847_v21 = vsel %vm1762_vm3, %v1846_v60, %v8300_v51  ;;  %vm2171_vm14 = vcmp.eq.s32.totalorder %v2166_v8, 2 }
 0x26f   : >> { %vm8707_vm1 = vcmp.le.f32.partialorder %v12372_v16, 0.7853982  ;;  %v6396_v15 = vadd.s32 4294967294, %v2244_v2  ;;  %v8717_v17 = vand.u32 3, %v1645_v1  ;;  %v2170_v31 = vsel %vm2168_vm0, %v6837_v27, %v2169_v43  ;;  %v12377_v16 = vld [vmem:[#allocation53_spill] sm:$0xff] }
 0x270   : >> { %v1848_v32 = vsel %vm8707_vm1, %v8063_v23, %v1845_v62  ;;  %v2173_v40 = vsel %vm2171_vm14, %v2172_v9, %v6839_v7  ;;  %v1534_v13 = vsub.s32 4, %v8050_v46  ;;  %v8722_v59 = vsel %vm1956_vm8, nan, %v1966_v33 }
 0x271   : >> { %6850 = vcosq.f32 %v1848_v32  ;;  %vm6397_vm11 = vcmp.lt.s32.totalorder %v6396_v15, 0  ;;  %vm2164_vm3 = vweird.f32 %v8278_v38  ;;  %v1849_v51 = vsel %vm8707_vm1, 0, %v1847_v21 }
 0x272   : >> { %6852 = vsinq.f32 %v1848_v32  ;;  %v6843_v29 = vpop.eup %6842  ;;  %v2247_v62 = vsel %vm6397_vm11, 0, %v6396_v15  ;;  %v8727_v61 = vand.u32 3, %v2269_v36  ;;  %vm2167_vm15 = vcmp.lt.s32.totalorder %v2166_v8, 2 }
 0x273   : >> { %v6845_v22 = vpop.eup %6844  ;;  %vm12375_vm6 = vcmp.lt.s32.totalorder %v7873_v50, 0  ;;  %v2248_v28 = vsub.s32 32, %v2247_v62  ;;  %v2252_v57 = vsub.s32 4294967266, %v2247_v62  ;;  %vm2067_vm0 = vcmp.eq.s32.totalorder %v8702_v45, 2 }
 0x274   : >> { %v1535_v49 = vsel %vm12375_vm6, %v1534_v13, %v8050_v46  ;;  %v2174_v5 = vsel %vm2167_vm15, %v2170_v31, %v2173_v40  ;;  %vm1647_vm8 = vcmp.lt.s32.totalorder %v8717_v17, 2  ;;  %v2249_v27 = vshll.u32 %v8674_v6, %v2247_v62  ;;  %v12378_v62 = vld [vmem:[#allocation46_spill] sm:$0xff] }
 0x275   : >> { %vm2064_vm1 = vcmp.eq.s32.totalorder %v8702_v45, 0  ;;  %vm1648_vm14 = vcmp.eq.s32.totalorder %v8717_v17, 0  ;;  %v1652_v14 = vxor.u32 2147483648, %v6843_v29  ;;  %v1853_v54 = vadd.s32 3, %v1849_v51 }
 0x276   : >> { %v2250_v12 = vshrl.u32 %v2232_v24, %v2248_v28  ;;  %v2253_v4 = vadd.s32 127, %v2252_v57  ;;  %vm2063_vm11 = vcmp.lt.s32.totalorder %v8702_v45, 2  ;;  %v1649_v46 = vxor.u32 2147483648, %v6845_v22 }
 0x277   : >> { %v1537_v7 = vsel %vm8285_vm13, 0, %v1535_v49  ;;  %vm2060_vm15 = vweird.f32 %v8324_v39  ;;  %v8743_v26 = vsel %vm2164_vm3, nan, %v2174_v5  ;;  %vm1651_vm6 = vcmp.eq.s32.totalorder %v8717_v17, 2 }
 0x278   : >> { %v1541_v6 = vadd.s32 3, %v1537_v7  ;;  %v1742_v30 = vsub.s32 4, %v8130_v10  ;;  %v2251_v0 = vor.u32 %v2250_v12, %v2249_v27  ;;  %v2254_v24 = vshll.u32 %v2253_v4, 23 }
 0x279   : >> { %v1545_v44 = vxor.u32 2147483648, %v8423_v20  ;;  %v1548_v8 = vxor.u32 2147483648, %v8354_v19  ;;  %vm1644_vm2 = vweird.f32 %v8008_v63  ;;  %v1653_v18 = vsel %vm1651_vm6, %v1652_v14, %v6845_v22  ;;  %v6847_v3 = vpop.eup %6846 }
 0x27a   : >> { %v8750_v60 = vand.u32 3, %v1853_v54  ;;  %v1542_v47 = vand.u32 3, %v1541_v6  ;;  %vm12376_vm13 = vcmp.lt.s32.totalorder %v7957_v11, 0  ;;  %v2255_v42 = vor.u32 4788187, %v2254_v24  ;;  %v6849_v2 = vpop.eup %6848  ;;  %v12383_v54 = vld [vmem:[#allocation64_spill] sm:$0xff] }
 0x27b   : >> { %v1743_v38 = vsel %vm12376_vm13, %v1742_v30, %v8130_v10  ;;  %v2258_v1 = vcvt.s32.f32 %v2251_v0  ;;  %v1650_v43 = vsel %vm1648_vm14, %v6843_v29, %v1649_v46  ;;  %v2068_v33 = vxor.u32 2147483648, %v6847_v3  ;;  %v12386_v24 = vld [vmem:[#allocation50_spill] sm:$0xff] }
 0x27c   : >> { %v1745_v9 = vsel %vm8334_vm10, 0, %v1743_v38  ;;  %vm1544_vm3 = vcmp.eq.s32.totalorder %v1542_v47, 0  ;;  %vm1547_vm6 = vcmp.eq.s32.totalorder %v1542_v47, 2  ;;  %v1222_v53 = vsub.s32 4, %v12377_v16 }
 0x27d   : >> { %v2256_v36 = vand.u32 2147483647, %v2255_v42  ;;  %v2065_v21 = vxor.u32 2147483648, %v6849_v2  ;;  %v1546_v32 = vsel %vm1544_vm3, %v8354_v19, %v1545_v44  ;;  %v1549_v10 = vsel %vm1547_vm6, %v1548_v8, %v8423_v20 }
 0x27e   : >> { %v6851_v15 = vpop.eup %6850  ;;  %v2069_v31 = vsel %vm2067_vm0, %v2068_v33, %v6849_v2  ;;  %v1654_v55 = vsel %vm1647_vm8, %v1650_v43, %v1653_v18  ;;  %vm1543_vm10 = vcmp.lt.s32.totalorder %v1542_v47, 2  ;;  %v1749_v40 = vadd.s32 3, %v1745_v9  ;;  %v12391_v47 = vld [vmem:[#allocation67_spill] sm:$0xff] }
 0x27f   : >> { %v6853_v13 = vpop.eup %6852  ;;  %v2259_v29 = vmul.f32 %v2258_v1, %v2256_v36  ;;  %v2066_v51 = vsel %vm2064_vm1, %v6847_v3, %v2065_v21  ;;  %v1550_v22 = vsel %vm1543_vm10, %v1546_v32, %v1549_v10  ;;  %v12379_v49 = vand.u32 2147483647, %v12378_v62  ;;  %v12392_v3 = vld [vmem:[#allocation48_spill] sm:$0xff] }
 0x280   : >> { %v2070_v20 = vsel %vm2063_vm11, %v2066_v51, %v2069_v31  ;;  %v1857_v28 = vxor.u32 2147483648, %v6853_v13  ;;  %v1860_v17 = vxor.u32 2147483648, %v6851_v15  ;;  %vm12382_vm0 = vcmp.lt.s32.totalorder %v12378_v62, 0 }
 0x281   : >> { %vm8770_vm14 = vcmp.le.f32.partialorder %v12379_v49, 0.7853982  ;;  %v1223_v57 = vsel %vm12382_vm0, %v1222_v53, %v12377_v16  ;;  %v2260_v5 = vxor.u32 2147483648, %v2259_v29  ;;  %v2071_v27 = vsel %vm2060_vm15, nan, %v2070_v20  ;;  %v12404_v49 = vld [vmem:[#allocation44_spill] sm:$0xff]  ;;  %v12406_v20 = vld [vmem:[#allocation43_spill] sm:$0xff] }
 0x282   : >> { %v1750_v14 = vand.u32 3, %v1749_v40  ;;  %v1224_v12 = vsel %vm8770_vm14, %v12378_v62, %v12383_v54  ;;  %2337 = vmatprep.subr.mxu0 %v2071_v27  ;;  %vm1855_vm8 = vcmp.lt.s32.totalorder %v8750_v60, 2  ;;  %vm1856_vm1 = vcmp.eq.s32.totalorder %v8750_v60, 0  ;;  %v12420_v54 = vld [vmem:[#allocation40_spill] sm:$0xff] }
 0x283   : >> { %vm1859_vm11 = vcmp.eq.s32.totalorder %v8750_v60, 2  ;;  %vm1540_vm13 = vweird.f32 %v7873_v50  ;;  %vm12384_vm3 = vcmp.lt.s32.totalorder %v8398_v25, 0  ;;  %2338 = vmatpush1.msra.mxu0 %v8722_v59  ;;  %v1655_v39 = vsel %vm1644_vm2, nan, %v1654_v55  ;;  %v12385_v50 = vld [vmem:[#allocation68_spill] sm:$0xff]  ;;  %v12397_v60 = vld [vmem:[#allocation51_spill] sm:$0xff]  ;;  %v12398_v55 = vld [vmem:[#allocation62_spill] sm:$0xff] }
 0x284   : >> { %v2261_v45 = vsel %vm12384_vm3, %v2260_v5, %v2259_v29  ;;  %v1753_v4 = vxor.u32 2147483648, %v8700_v37  ;;  %v1225_v46 = vsel %vm8770_vm14, 0, %v1223_v57  ;;  %2339 = vmatprep.subr.mxu0 %v1655_v39  ;;  %v1551_v6 = vsel %vm1540_vm13, nan, %v1550_v22 }
 0x285   : >> { %v2264_v7 = vsel %vm8678_vm12, %v8398_v25, %v2261_v45  ;;  %v1756_v30 = vxor.u32 2147483648, %v12385_v50  ;;  %6854 = vcosq.f32 %v1224_v12  ;;  %v1858_v0 = vsel %vm1856_vm1, %v6851_v15, %v1857_v28  ;;  %2340 = vmatpush1.msra.mxu0 %v1551_v6 }
 0x286   : >> { %6856 = vcosq.f32 %v2264_v7  ;;  %v1861_v59 = vsel %vm1859_vm11, %v1860_v17, %v6853_v13  ;;  %vm1752_vm15 = vcmp.eq.s32.totalorder %v1750_v14, 0  ;;  %v1229_v63 = vadd.s32 3, %v1225_v46  ;;  %v12399_v13 = vld [vmem:[#allocation38_spill] sm:$0xff] }
 0x287   : >> { %6858 = vsinq.f32 %v2264_v7  ;;  %v12387_v44 = vand.u32 2147483647, %v12386_v24  ;;  %v1430_v18 = vsub.s32 4, %v12390_v56  ;;  %vm1755_vm12 = vcmp.eq.s32.totalorder %v1750_v14, 2  ;;  %v12407_v17 = vld [vmem:[#allocation58_spill] sm:$0xff] }
 0x288   : >> { %6860 = vsinq.f32 %v1224_v12  ;;  %v1118_v42 = vsub.s32 4, %v12392_v3  ;;  %v1754_v1 = vsel %vm1752_vm15, %v12385_v50, %v1753_v4  ;;  %v1757_v43 = vsel %vm1755_vm12, %v1756_v30, %v8700_v37  ;;  %v12394_v37 = vld [vmem:[#allocation42_spill] sm:$0xff] }
 0x289   : >> { %vm8803_vm2 = vcmp.le.f32.partialorder %v12387_v44, 0.7853982  ;;  %vm12393_vm6 = vcmp.lt.s32.totalorder %v12386_v24, 0  ;;  %vm1852_vm10 = vweird.f32 %v8063_v23  ;;  %v1862_v2 = vsel %vm1855_vm8, %v1858_v0, %v1861_v59  ;;  %v12410_v4 = vld [vmem:[#allocation66_spill] sm:$0xff]  ;;  %v12411_v44 = vld [vmem:[#allocation65_spill] sm:$0xff] }
 0x28a   : >> { %v1432_v38 = vsel %vm8803_vm2, %v12386_v24, %v12391_v47  ;;  %v1431_v9 = vsel %vm12393_vm6, %v1430_v18, %v12390_v56  ;;  %vm1751_vm14 = vcmp.lt.s32.totalorder %v1750_v14, 2  ;;  %v8823_v16 = vand.u32 3, %v1229_v63  ;;  %v12412_v47 = vld [vmem:[#allocation39_spill] sm:$0xff] }
 0x28b   : >> { %6862 = vcosq.f32 %v1432_v38  ;;  %v1433_v33 = vsel %vm8803_vm2, 0, %v1431_v9  ;;  %vm12395_vm0 = vcmp.lt.s32.totalorder %v12394_v37, 0  ;;  %vm1748_vm1 = vweird.f32 %v7957_v11  ;;  %v12403_v11 = vld [vmem:[#allocation61_spill] sm:$0xff] }
 0x28c   : >> { %6864 = vsinq.f32 %v1432_v38  ;;  %v1437_v53 = vadd.s32 3, %v1433_v33  ;;  %v1119_v36 = vsel %vm12395_vm0, %v1118_v42, %v12392_v3  ;;  %v1758_v21 = vsel %vm1751_vm14, %v1754_v1, %v1757_v43  ;;  %v12429_v3 = vld [vmem:[#allocation52_spill] sm:$0xff] }
 0x28d   : >> { %v1121_v23 = vsel %vm7979_vm4, 0, %v1119_v36  ;;  %v1326_v10 = vsub.s32 4, %v12397_v60  ;;  %vm2275_vm8 = vcmp.eq.s32.totalorder %v8727_v61, 2  ;;  %v8833_v15 = vsel %vm1852_vm10, nan, %v1862_v2  ;;  %v12416_v2 = vld [vmem:[#allocation45_spill] sm:$0xff] }
 0x28e   : >> { %v1125_v31 = vadd.s32 3, %v1121_v23  ;;  %v1129_v40 = vxor.u32 2147483648, %v12398_v55  ;;  %v12400_v29 = vand.u32 2147483647, %v12399_v13  ;;  %vm2272_vm13 = vcmp.eq.s32.totalorder %v8727_v61, 0  ;;  %v12417_v23 = vld [vmem:[#allocation59_spill] sm:$0xff] }
 0x28f   : >> { %v1132_v22 = vxor.u32 2147483648, %v12403_v11  ;;  %vm12405_vm4 = vcmp.lt.s32.totalorder %v12404_v49, 0  ;;  %v806_v28 = vsub.s32 4, %v12406_v20  ;;  %vm2271_vm3 = vcmp.lt.s32.totalorder %v8727_v61, 2 }
 0x290   : >> { %vm8838_vm11 = vcmp.le.f32.partialorder %v12400_v29, 0.7853982  ;;  %v1327_v19 = vsel %vm12405_vm4, %v1326_v10, %v12397_v60  ;;  %v8853_v5 = vsel %vm1748_vm1, nan, %v1758_v21  ;;  %vm1232_vm15 = vcmp.eq.s32.totalorder %v8823_v16, 0 }
 0x291   : >> { %v808_v57 = vsel %vm8838_vm11, %v12399_v13, %v12407_v17  ;;  %v8856_v27 = vand.u32 3, %v1437_v53  ;;  %v1126_v14 = vand.u32 3, %v1125_v31  ;;  %vm2268_vm2 = vweird.f32 %v8398_v25 }
 0x292   : >> { %vm1231_vm12 = vcmp.lt.s32.totalorder %v8823_v16, 2  ;;  %vm1235_vm6 = vcmp.eq.s32.totalorder %v8823_v16, 2  ;;  %v1329_v12 = vsel %vm8217_vm9, 0, %v1327_v19  ;;  %vm12409_vm10 = vcmp.lt.s32.totalorder %v12399_v13, 0  ;;  %v6855_v7 = vpop.eup %6854 }
 0x293   : >> { %v807_v45 = vsel %vm12409_vm10, %v806_v28, %v12406_v20  ;;  %6866 = vcosq.f32 %v808_v57  ;;  %vm1228_vm14 = vweird.f32 %v12378_v62  ;;  %vm1128_vm1 = vcmp.eq.s32.totalorder %v1126_v14, 0  ;;  %v6857_v0 = vpop.eup %6856 }
 0x294   : >> { %vm1131_vm4 = vcmp.eq.s32.totalorder %v1126_v14, 2  ;;  %v1333_v39 = vadd.s32 3, %v1329_v12  ;;  %v1337_v46 = vxor.u32 2147483648, %v12410_v4  ;;  %v1130_v6 = vsel %vm1128_vm1, %v12403_v11, %v1129_v40  ;;  %v6859_v56 = vpop.eup %6858 }
 0x295   : >> { %v1133_v50 = vsel %vm1131_vm4, %v1132_v22, %v12398_v55  ;;  %v809_v30 = vsel %vm8838_vm11, 0, %v807_v45  ;;  %6868 = vsinq.f32 %v808_v57  ;;  %v1236_v59 = vxor.u32 2147483648, %v6855_v7  ;;  %v6861_v42 = vpop.eup %6860  ;;  %v12421_v45 = vld [vmem:[#allocation41_spill] sm:$0xff] }
 0x296   : >> { %vm1439_vm9 = vcmp.lt.s32.totalorder %v8856_v27, 2  ;;  %v1334_v63 = vand.u32 3, %v1333_v39  ;;  %v1340_v8 = vxor.u32 2147483648, %v12411_v44  ;;  %v2276_v18 = vxor.u32 2147483648, %v6857_v0 }
 0x297   : >> { %vm1443_vm10 = vcmp.eq.s32.totalorder %v8856_v27, 2  ;;  %vm1127_vm0 = vcmp.lt.s32.totalorder %v1126_v14, 2  ;;  %v12413_v38 = vand.u32 2147483647, %v12412_v47  ;;  %v2273_v1 = vxor.u32 2147483648, %v6859_v56 }
 0x298   : >> { %v1134_v43 = vsel %vm1127_vm0, %v1130_v6, %v1133_v50  ;;  %v813_v9 = vadd.s32 3, %v809_v30  ;;  %v1014_v33 = vsub.s32 4, %v12416_v2  ;;  %v6863_v53 = vpop.eup %6862  ;;  %v2277_v36 = vsel %vm2275_vm8, %v2276_v18, %v6859_v56  ;;  %v12425_v30 = vld [vmem:[#allocation37_spill] sm:$0xff] }
 0x299   : >> { %vm8878_vm1 = vcmp.le.f32.partialorder %v12413_v38, 0.7853982  ;;  %v1233_v21 = vxor.u32 2147483648, %v6861_v42  ;;  %v1237_v32 = vsel %vm1235_vm6, %v1236_v59, %v6861_v42  ;;  %v2274_v10 = vsel %vm2272_vm13, %v6857_v0, %v2273_v1  ;;  %v6865_v55 = vpop.eup %6864  ;;  %v12428_v38 = vld [vmem:[#allocation55_spill] sm:$0xff] }
 0x29a   : >> { %v1016_v60 = vsel %vm8878_vm1, %v12412_v47, %v12417_v23  ;;  %v1444_v31 = vxor.u32 2147483648, %v6863_v53  ;;  %vm1336_vm11 = vcmp.eq.s32.totalorder %v1334_v63, 0  ;;  %vm1339_vm0 = vcmp.eq.s32.totalorder %v1334_v63, 2 }
 0x29b   : >> { %v2278_v40 = vsel %vm2271_vm3, %v2274_v10, %v2277_v36  ;;  %v1234_v29 = vsel %vm1232_vm15, %v6855_v7, %v1233_v21  ;;  %v1338_v51 = vsel %vm1336_vm11, %v12411_v44, %v1337_v46  ;;  %v1341_v11 = vsel %vm1339_vm0, %v1340_v8, %v12410_v4  ;;  %v12422_v46 = vld [vmem:[#allocation36_spill] sm:$0xff]  ;;  %v12431_v36 = vld [vmem:[#allocation57_spill] sm:$0xff] }
 0x29c   : >> { %v2279_v22 = vsel %vm2268_vm2, nan, %v2278_v40  ;;  %v1238_v19 = vsel %vm1231_vm12, %v1234_v29, %v1237_v32  ;;  %v1441_v20 = vxor.u32 2147483648, %v6865_v55  ;;  %v1445_v28 = vsel %vm1443_vm10, %v1444_v31, %v6865_v55 }
 0x29d   : >> { %2426 = vmatprep.subr.mxu1 %v2279_v22  ;;  %v1239_v61 = vsel %vm1228_vm14, nan, %v1238_v19  ;;  %vm1440_vm8 = vcmp.eq.s32.totalorder %v8856_v27, 0  ;;  %vm12418_vm13 = vweird.f32 %v12394_v37  ;;  %vm1335_vm3 = vcmp.lt.s32.totalorder %v1334_v63, 2 }
 0x29e   : >> { %v1135_v17 = vsel %vm12418_vm13, nan, %v1134_v43  ;;  %2427 = vmatpush1.msra.mxu1 %v8743_v26  ;;  %2341 = vmatprep.subr.mxu0 %v1239_v61  ;;  %v1442_v25 = vsel %vm1440_vm8, %v6863_v53, %v1441_v20  ;;  %v1342_v16 = vsel %vm1335_vm3, %v1338_v51, %v1341_v11  ;;  %v814_v57 = vand.u32 3, %v813_v9  ;;  %v12432_v20 = vld [vmem:[#allocation14_spill] sm:$0xff] }
 0x29f   : >> { %6870 = vcosq.f32 %v1016_v60  ;;  %2428 = vmatprep.subr.mxu1 %v8833_v15  ;;  %vm1436_vm15 = vweird.f32 %v12386_v24  ;;  %v1446_v62 = vsel %vm1439_vm9, %v1442_v25, %v1445_v28  ;;  %2342 = vmatpush1.msra.mxu0 %v1135_v17  ;;  %vm12419_vm2 = vcmp.lt.s32.totalorder %v12412_v47, 0 }
 0x2a0   : >> { %v1015_v37 = vsel %vm12419_vm2, %v1014_v33, %v12416_v2  ;;  %6872 = vsinq.f32 %v1016_v60  ;;  %v6867_v14 = vpop.eup %6866  ;;  %2429 = vmatpush1.msra.mxu1 %v8853_v5  ;;  %v1447_v26 = vsel %vm1436_vm15, nan, %v1446_v62  ;;  %vm1332_vm12 = vweird.f32 %v12404_v49  ;;  %v12430_v33 = vld [vmem:[#allocation60_spill] sm:$0xff]  ;;  %v12434_v62 = vld [vmem:[#allocation15_spill] sm:$0xff] }
 0x2a1   : >> { %v702_v12 = vsub.s32 4, %v12420_v54  ;;  %2430 = vmatprep.subr.mxu1 %v1447_v26  ;;  %v1343_v15 = vsel %vm1332_vm12, nan, %v1342_v16  ;;  %v820_v24 = vxor.u32 2147483648, %v6867_v14  ;;  %v910_v27 = vsub.s32 4, %v12421_v45 }
 0x2a2   : >> { %v6869_v39 = vpop.eup %6868  ;;  %2431 = vmatpush1.msra.mxu1 %v1343_v15  ;;  %vm819_vm6 = vcmp.eq.s32.totalorder %v814_v57, 2  ;;  %v1017_v4 = vsel %vm8878_vm1, 0, %v1015_v37  ;;  %vm12423_vm14 = vcmp.lt.s32.totalorder %v12422_v46, 0  ;;  %vm812_vm4 = vweird.f32 %v12399_v13  ;;  %v12435_v37 = vld [vmem:[#allocation16_spill] sm:$0xff] }
 0x2a3   : >> { %v703_v5 = vsel %vm12423_vm14, %v702_v12, %v12420_v54  ;;  %v817_v49 = vxor.u32 2147483648, %v6869_v39  ;;  %v821_v7 = vsel %vm819_vm6, %v820_v24, %v6869_v39  ;;  %vm815_vm9 = vcmp.lt.s32.totalorder %v814_v57, 2 }
 0x2a4   : >> { %vm816_vm10 = vcmp.eq.s32.totalorder %v814_v57, 0  ;;  %v705_v50 = vsel %vm7720_vm5, 0, %v703_v5  ;;  %vm12426_vm11 = vcmp.lt.s32.totalorder %v12425_v30, 0  ;;  %v1021_v63 = vadd.s32 3, %v1017_v4 }
 0x2a5   : >> { %v911_v0 = vsel %vm12426_vm11, %v910_v27, %v12421_v45  ;;  %v818_v59 = vsel %vm816_vm10, %v6867_v14, %v817_v49  ;;  %v709_v44 = vadd.s32 3, %v705_v50  ;;  %v713_v13 = vxor.u32 2147483648, %v12428_v38  ;;  %v8970_v14 = vpop.permute.xlu1 %2292 }
 0x2a6   : >> { %v913_v56 = vsel %vm7758_vm7, 0, %v911_v0  ;;  %v822_v18 = vsel %vm815_vm9, %v818_v59, %v821_v7  ;;  %v716_v42 = vxor.u32 2147483648, %v12429_v3  ;;  %v921_v53 = vxor.u32 2147483648, %v12430_v33 }
 0x2a7   : >> { %v917_v1 = vadd.s32 3, %v913_v56  ;;  %v823_v43 = vsel %vm812_vm4, nan, %v822_v18  ;;  %v710_v9 = vand.u32 3, %v709_v44  ;;  %v924_v21 = vxor.u32 2147483648, %v12431_v36 }
 0x2a8   : >> { %2343 = vmatprep.subr.mxu0 %v823_v43  ;;  %v1022_v32 = vand.u32 3, %v1021_v63  ;;  %vm708_vm0 = vweird.f32 %v12422_v46  ;;  %vm12134_vm3 = vcmask 261120   ;;  %v12433_v17 = vmov 0.0  }
 0x2a9   : >> { %v918_v2 = vand.u32 3, %v917_v1  ;;  %vm712_vm5 = vcmp.eq.s32.totalorder %v710_v9, 0  ;;  %vm715_vm1 = vcmp.eq.s32.totalorder %v710_v9, 2  ;;  %vm711_vm7 = vcmp.lt.s32.totalorder %v710_v9, 2  ;;  %v2283_v26 = vpop.permute.xlu1 %2282 }
 0x2aa   : >> { %v714_v23 = vsel %vm712_vm5, %v12429_v3, %v713_v13  ;;  %v717_v60 = vsel %vm715_vm1, %v716_v42, %v12428_v38  ;;  %vm1027_vm15 = vcmp.eq.s32.totalorder %v1022_v32, 2  ;;  %vm1024_vm2 = vcmp.eq.s32.totalorder %v1022_v32, 0 }
 0x2ab   : >> { %v718_v31 = vsel %vm711_vm7, %v714_v23, %v717_v60  ;;  %vm920_vm8 = vcmp.eq.s32.totalorder %v918_v2, 0  ;;  %vm923_vm13 = vcmp.eq.s32.totalorder %v918_v2, 2  ;;  %vm919_vm12 = vcmp.lt.s32.totalorder %v918_v2, 2 }
 0x2ac   : >> { %v6871_v10 = vpop.eup %6870  ;;  %v719_v29 = vsel %vm708_vm0, nan, %v718_v31  ;;  %v922_v51 = vsel %vm920_vm8, %v12431_v36, %v921_v53  ;;  %v925_v11 = vsel %vm923_vm13, %v924_v21, %v12430_v33  ;;  %vm1023_vm6 = vcmp.lt.s32.totalorder %v1022_v32, 2 }
 0x2ad   : >> { %v6873_v55 = vpop.eup %6872  ;;  %v1028_v40 = vxor.u32 2147483648, %v6871_v10  ;;  %2344 = vmatpush1.msra.mxu0 %v719_v29  ;;  %v926_v61 = vsel %vm919_vm12, %v922_v51, %v925_v11  ;;  %vm1020_vm14 = vweird.f32 %v12412_v47  ;;  %vm916_vm4 = vweird.f32 %v12425_v30  ;;  %v12436_v47 = vld [vmem:[#allocation17_spill] sm:$0xff] }
 0x2ae   : >> { %v1025_v22 = vxor.u32 2147483648, %v6873_v55  ;;  %6398 = vmatmul.mubr.msk.f32.vlgmr.msra.gmra.mxu0 %vm12134_vm3, %v12432_v20  ;;  %v927_v57 = vsel %vm916_vm4, nan, %v926_v61 }
 0x2af   : >> { %v1029_v19 = vsel %vm1027_vm15, %v1028_v40, %v6873_v55  ;;  %2383 = vmatprep.mubr.f32.mxu0 %v12433_v17 }
 0x2b0   : >> { %v1026_v28 = vsel %vm1024_vm2, %v6871_v10, %v1025_v22 }
 0x2b1   : >> { %v1030_v25 = vsel %vm1023_vm6, %v1026_v28, %v1029_v19 }
 0x2b2   : >> { %v1031_v16 = vsel %vm1020_vm14, nan, %v1030_v25  ;;  %6399 = vmatmul.mubr.msk.f32.gmra.mxu0 %vm12134_vm3, %v12434_v62 }
 0x2b3   : >> { %2432 = vmatprep.subr.mxu1 %v1031_v16  ;;  %2389 = vmatprep.mubr.f32.mxu0 %v12433_v17 }
 0x2b4   : >> { %2433 = vmatpush1.msra.mxu1 %v927_v57 }
 0x2b5   : >> { %6402 = vmatmul.mubr.msk.f32.vlgmr.msra.gmra.mxu1 %vm12134_vm3, %v12432_v20 }
 0x2b6   : >> { %2472 = vmatprep.mubr.f32.mxu1 %v12433_v17  ;;  %6400 = vmatmul.mubr.msk.f32.gmra.mxu0 %vm12134_vm3, %v12435_v37 }
 0x2b7   : >> { %2395 = vmatprep.mubr.f32.mxu0 %v12433_v17 }
 0x2b9   : >> { %6403 = vmatmul.mubr.msk.f32.gmra.mxu1 %vm12134_vm3, %v12434_v62 }
 0x2ba   : >> { %2478 = vmatprep.mubr.f32.mxu1 %v12433_v17  ;;  %6401 = vmatmul.mubr.msk.f32.gmra.mxu0 %vm12134_vm3, %v12436_v47 }
 0x2bb   : >> { %4251 = vmatprep.mubr.f32.mxu0 %v12433_v17 }
 0x2bd   : >> { %6404 = vmatmul.mubr.msk.f32.gmra.mxu1 %vm12134_vm3, %v12435_v37 }
 0x2be   : >> { %2484 = vmatprep.mubr.f32.mxu1 %v12433_v17 }
 0x2c1   : >> { %6405 = vmatmul.mubr.msk.f32.gmra.mxu1 %vm12134_vm3, %v12436_v47 }
 0x2c2   : >> { %4340 = vmatprep.mubr.f32.mxu1 %v12433_v17 }
 0x36e   : >> { %v2379_v54 = vpop.f32.mrf.mxu0 }
 0x36f   : >> { %v8972_v12 = vadd.f32 %v2379_v54, %v2283_v26 }
 0x370   : >> { %v2381_v15 = vpop.f32.mrf.mxu0 }
 0x371   : >> { %12437 = vst [vmem:[#allocation53_spill] sm:$0xff] %v8972_v12  ;;  %v12100_v24 = vand.u32 2147483647, %v8972_v12  ;;  %v2494_v45 = vand.u32 2139095040, %v8972_v12  ;;  %v8976_v27 = vadd.f32 %v2381_v15, %v2283_v26 }
 0x373   : >> { %12438 = vst [vmem:[#allocation46_spill] sm:$0xff] %v8976_v27  ;;  %v2495_v39 = vshrl.u32 %v2494_v45, 23  ;;  %v2498_v4 = vand.u32 8388607, %v12100_v24  ;;  %v12097_v5 = vand.u32 2147483647, %v8976_v27 }
 0x374   : >> { %v2598_v49 = vand.u32 2139095040, %v8976_v27 }
 0x375   : >> { %v2468_v46 = vpop.f32.mrf.mxu1  ;;  %v6406_v7 = vadd.s32 4294967169, %v2495_v39  ;;  %v2499_v59 = vor.u32 8388608, %v2498_v4  ;;  %v2602_v8 = vand.u32 8388607, %v12097_v5 }
 0x376   : >> { %v8982_v6 = vadd.f32 %v2468_v46, %v2283_v26  ;;  %v2599_v50 = vshrl.u32 %v2598_v49, 23 }
 0x377   : >> { %v2501_v30 = vadd.s32 1, %v6406_v7  ;;  %v2470_v18 = vpop.f32.mrf.mxu1  ;;  %v8990_v43 = vshll.u32 %v2499_v59, 8  ;;  %v2603_v2 = vor.u32 8388608, %v2602_v8 }
 0x378   : >> { %12439 = vst [vmem:[#allocation64_spill] sm:$0xff] %v8982_v6  ;;  %v12099_v0 = vand.u32 2147483647, %v8982_v6  ;;  %v2702_v63 = vand.u32 2139095040, %v8982_v6  ;;  %v6410_v44 = vadd.s32 4294967169, %v2599_v50  ;;  %v8992_v33 = vadd.f32 %v2470_v18, %v2283_v26 }
 0x379   : >> { %vm2502_vm9 = vcmp.gt.s32.totalorder %v2501_v30, 0 }
 0x37a   : >> { %v2706_v56 = vand.u32 8388607, %v12099_v0  ;;  %v2503_v38 = vsel %vm2502_vm9, %v2501_v30, 0  ;;  %v2703_v13 = vshrl.u32 %v2702_v63, 23  ;;  %v2605_v3 = vadd.s32 1, %v6410_v44  ;;  %12440 = vst [vmem:[#allocation68_spill] sm:$0xff] %v8992_v33 }
 0x37b   : >> { %v2504_v42 = vshrl.u32 %v2503_v38, 5  ;;  %v2505_v1 = vand.u32 31, %v2503_v38 }
 0x37c   : >> { %v2707_v9 = vor.u32 8388608, %v2706_v56  ;;  %v6414_v21 = vadd.s32 4294967169, %v2703_v13  ;;  %vm2606_vm10 = vcmp.gt.s32.totalorder %v2605_v3, 0 }
 0x37d   : >> { %v2506_v53 = vsub.s32 32, %v2505_v1  ;;  %v2508_v36 = vshll.u32 %v12296_v35, %v2505_v1  ;;  %v2511_v32 = vshll.u32 %v12288_v41, %v2505_v1  ;;  %v2514_v23 = vshll.u32 %v12289_v58, %v2505_v1 }
 0x37e   : >> { %v2517_v60 = vshll.u32 %v12290_v34, %v2505_v1  ;;  %v2520_v10 = vshll.u32 %v12291_v52, %v2505_v1  ;;  %vm2523_vm11 = vcmp.lt.s32.totalorder %v2504_v42, 1  ;;  %vm2524_vm5 = vcmp.lt.s32.totalorder %v2504_v42, 2 }
 0x37f   : >> { %v2509_v31 = vshrl.u32 %v12288_v41, %v2506_v53  ;;  %v2512_v55 = vshrl.u32 %v12289_v58, %v2506_v53  ;;  %v2515_v40 = vshrl.u32 %v12290_v34, %v2506_v53  ;;  %v2507_v29 = vshrl.u32 %v12296_v35, %v2506_v53 }
 0x380   : >> { %v2518_v51 = vshrl.u32 %v12291_v52, %v2506_v53  ;;  %v2521_v11 = vshrl.u32 %v12292_v48, %v2506_v53  ;;  %v2709_v61 = vadd.s32 1, %v6414_v21  ;;  %vm2525_vm1 = vcmp.lt.s32.totalorder %v2504_v42, 3 }
 0x381   : >> { %v2510_v22 = vor.u32 %v2509_v31, %v2508_v36  ;;  %v2513_v19 = vor.u32 %v2512_v55, %v2511_v32  ;;  %v2516_v28 = vor.u32 %v2515_v40, %v2514_v23  ;;  %vm2526_vm0 = vcmp.lt.s32.totalorder %v2504_v42, 4 }
 0x382   : >> { %v2519_v25 = vor.u32 %v2518_v51, %v2517_v60  ;;  %v2522_v16 = vor.u32 %v2521_v11, %v2520_v10  ;;  %vm2710_vm7 = vcmp.gt.s32.totalorder %v2709_v61, 0  ;;  %v2607_v50 = vsel %vm2606_vm10, %v2605_v3, 0 }
 0x383   : >> { %v2527_v57 = vsel %vm2523_vm11, %v2507_v29, %v2510_v22  ;;  %v2528_v26 = vsel %vm2526_vm0, %v2516_v28, 2102212464  ;;  %v2531_v54 = vsel %vm2523_vm11, %v2510_v22, %v2513_v19  ;;  %v2535_v15 = vsel %vm2523_vm11, %v2513_v19, %v2516_v28 }
 0x384   : >> { %v2529_v45 = vsel %vm2525_vm1, %v2513_v19, %v2528_v26  ;;  %v2532_v39 = vsel %vm2526_vm0, %v2519_v25, 920167782  ;;  %v2536_v4 = vsel %vm2526_vm0, %v2522_v16, 1326507024  ;;  %v2711_v7 = vsel %vm2710_vm7, %v2709_v61, 0 }
 0x385   : >> { %v2533_v46 = vsel %vm2525_vm1, %v2516_v28, %v2532_v39  ;;  %v2537_v49 = vsel %vm2525_vm1, %v2519_v25, %v2536_v4  ;;  %v2530_v30 = vsel %vm2524_vm5, %v2527_v57, %v2529_v45  ;;  %v2712_v44 = vshrl.u32 %v2711_v7, 5 }
 0x386   : >> { %v2534_v59 = vsel %vm2524_vm5, %v2531_v54, %v2533_v46  ;;  %v2538_v63 = vsel %vm2524_vm5, %v2535_v15, %v2537_v49  ;;  %v2713_v13 = vand.u32 31, %v2711_v7  ;;  %v9021_v1 = vshll.u32 %v2603_v2, 8 }
 0x387   : >> { %v9013_v8 = vmul.u32.u64.low %v8990_v43, %v2538_v63  ;;  %v9014_v56 = vmul.u32.u64.high %v8990_v43, %v2538_v63, %v9013_v8  ;;  %v9017_v18 = vmul.u32.u64.low %v8990_v43, %v2534_v59  ;;  %v9018_v38 = vmul.u32.u64.high %v8990_v43, %v2534_v59, %v9017_v18 }
 0x388   : >> { %v2806_v3 = vand.u32 2139095040, %v8992_v33  ;;  %v2546_v53 = vmul.u32 %v8990_v43, %v2530_v30  ;;  %vm2731_vm8 = vcmp.lt.s32.totalorder %v2712_v44, 1  ;;  %vm2733_vm13 = vcmp.lt.s32.totalorder %v2712_v44, 3 }
 0x389   : >> { %v9025_v42 = vshll.u32 %v2707_v9, 8  ;;  %v2714_v36 = vsub.s32 32, %v2713_v13  ;;  %v2716_v21 = vshll.u32 %v12296_v35, %v2713_v13  ;;  %v2719_v32 = vshll.u32 %v12288_v41, %v2713_v13 }
 0x38a   : >> { %vm2732_vm15 = vcmp.lt.s32.totalorder %v2712_v44, 2  ;;  %v2609_v23 = vand.u32 31, %v2607_v50  ;;  %vm2548_vm2 = vc.u32 %v9014_v56, %v9017_v18  ;;  %v2549_v2 = vadd.s32 1, %v9018_v38 }
 0x38b   : >> { %v2722_v60 = vshll.u32 %v12289_v58, %v2713_v13  ;;  %v2725_v43 = vshll.u32 %v12290_v34, %v2713_v13  ;;  %v2715_v10 = vshrl.u32 %v12296_v35, %v2714_v36  ;;  %v2717_v9 = vshrl.u32 %v12288_v41, %v2714_v36 }
 0x38c   : >> { %v2720_v31 = vshrl.u32 %v12289_v58, %v2714_v36  ;;  %v2723_v55 = vshrl.u32 %v12290_v34, %v2714_v36  ;;  %v2550_v40 = vsel %vm2548_vm2, %v2549_v2, %v9018_v38  ;;  %v2726_v29 = vshrl.u32 %v12291_v52, %v2714_v36 }
 0x38d   : >> { %v2728_v51 = vshll.u32 %v12291_v52, %v2713_v13  ;;  %v2729_v11 = vshrl.u32 %v12292_v48, %v2714_v36  ;;  %v2551_v22 = vadd.s32 %v2550_v40, %v2546_v53  ;;  %v2718_v19 = vor.u32 %v2717_v9, %v2716_v21 }
 0x38e   : >> { %v2721_v28 = vor.u32 %v2720_v31, %v2719_v32  ;;  %v2724_v61 = vor.u32 %v2723_v55, %v2722_v60  ;;  %v2727_v25 = vor.u32 %v2726_v29, %v2725_v43  ;;  %vm2734_vm12 = vcmp.lt.s32.totalorder %v2712_v44, 4 }
 0x38f   : >> { %v2730_v16 = vor.u32 %v2729_v11, %v2728_v51  ;;  %v2610_v57 = vsub.s32 32, %v2609_v23  ;;  %v2552_v26 = vadd.s32 536870912, %v2551_v22  ;;  %v2735_v54 = vsel %vm2731_vm8, %v2715_v10, %v2718_v19 }
 0x390   : >> { %v2736_v15 = vsel %vm2734_vm12, %v2724_v61, 2102212464  ;;  %v2739_v45 = vsel %vm2731_vm8, %v2718_v19, %v2721_v28  ;;  %v2740_v4 = vsel %vm2734_vm12, %v2727_v25, 920167782  ;;  %v2743_v46 = vsel %vm2731_vm8, %v2721_v28, %v2724_v61 }
 0x391   : >> { %v2737_v39 = vsel %vm2733_vm13, %v2721_v28, %v2736_v15  ;;  %v2744_v49 = vsel %vm2734_vm12, %v2730_v16, 1326507024  ;;  %v9046_v7 = vshrl.u32 %v2552_v26, 30  ;;  %v2741_v30 = vsel %vm2733_vm13, %v2724_v61, %v2740_v4 }
 0x392   : >> { %v2745_v59 = vsel %vm2733_vm13, %v2727_v25, %v2744_v49  ;;  %v9050_v63 = vshrl.u32 %v2607_v50, 5  ;;  %v2738_v8 = vsel %vm2732_vm15, %v2735_v54, %v2737_v39  ;;  %v2742_v38 = vsel %vm2732_vm15, %v2739_v45, %v2741_v30  ;;  %v9089_v45 = vpop.permute.xlu0 %2297 }
 0x393   : >> { %12441 = vst [vmem:[#allocation50_spill] sm:$0xff] %v9046_v7  ;;  %v2746_v13 = vsel %vm2732_vm15, %v2743_v46, %v2745_v59  ;;  %v2807_v53 = vshrl.u32 %v2806_v3, 23  ;;  %v2554_v36 = vshll.u32 %v9046_v7, 30  ;;  %v2613_v2 = vshrl.u32 %v12288_v41, %v2610_v57 }
 0x394   : >> { %v9057_v21 = vmul.u32.u64.low %v9025_v42, %v2746_v13  ;;  %v9058_v32 = vmul.u32.u64.high %v9025_v42, %v2746_v13, %v9057_v21  ;;  %v9062_v60 = vmul.u32.u64.low %v9025_v42, %v2742_v38  ;;  %v9063_v43 = vmul.u32.u64.high %v9025_v42, %v2742_v38, %v9062_v60 }
 0x395   : >> { %v2612_v50 = vshll.u32 %v12296_v35, %v2609_v23  ;;  %v2616_v10 = vshrl.u32 %v12289_v58, %v2610_v57  ;;  %v9068_v44 = vsub.s32 %v2551_v22, %v2554_v36  ;;  %v2615_v3 = vshll.u32 %v12288_v41, %v2609_v23 }
 0x396   : >> { %v2618_v9 = vshll.u32 %v12289_v58, %v2609_v23  ;;  %v2619_v31 = vshrl.u32 %v12290_v34, %v2610_v57  ;;  %v2754_v55 = vmul.u32 %v9025_v42, %v2738_v8  ;;  %v2621_v29 = vshll.u32 %v12290_v34, %v2609_v23 }
 0x397   : >> { %v2614_v40 = vor.u32 %v2613_v2, %v2612_v50  ;;  %v2622_v51 = vshrl.u32 %v12291_v52, %v2610_v57  ;;  %v2557_v11 = vsub.s32 0, %v9068_v44  ;;  %vm2756_vm6 = vc.u32 %v9058_v32, %v9062_v60 }
 0x398   : >> { %v2617_v22 = vor.u32 %v2616_v10, %v2615_v3  ;;  %v2620_v19 = vor.u32 %v2619_v31, %v2618_v9  ;;  %v2757_v28 = vadd.s32 1, %v9063_v43  ;;  %v2624_v25 = vshll.u32 %v12291_v52, %v2609_v23  ;;  %v2385_v31 = vpop.f32.mrf.mxu0 }
 0x399   : >> { %v2623_v61 = vor.u32 %v2622_v51, %v2621_v29  ;;  %v2625_v16 = vshrl.u32 %v12292_v48, %v2610_v57  ;;  %v6407_v42 = vmin.u32 %v2557_v11, %v9068_v44  ;;  %v2611_v26 = vshrl.u32 %v12296_v35, %v2610_v57  ;;  %v9106_v29 = vpop.permute.xlu0 %2287 }
 0x39a   : >> { %vm2627_vm14 = vcmp.lt.s32.totalorder %v9050_v63, 1  ;;  %vm2628_vm4 = vcmp.lt.s32.totalorder %v9050_v63, 2  ;;  %v2758_v54 = vsel %vm2756_vm6, %v2757_v28, %v9063_v43  ;;  %vm2629_vm9 = vcmp.lt.s32.totalorder %v9050_v63, 3 }
 0x39b   : >> { %v2626_v15 = vor.u32 %v2625_v16, %v2624_v25  ;;  %vm2630_vm10 = vcmp.lt.s32.totalorder %v9050_v63, 4  ;;  %v2559_v23 = vclz %v6407_v42  ;;  %v2759_v39 = vadd.s32 %v2758_v54, %v2754_v55 }
 0x39c   : >> { %v2632_v4 = vsel %vm2630_vm10, %v2620_v19, 2102212464  ;;  %v2635_v46 = vsel %vm2627_vm14, %v2614_v40, %v2617_v22  ;;  %v2631_v49 = vsel %vm2627_vm14, %v2611_v26, %v2614_v40  ;;  %v2636_v30 = vsel %vm2630_vm10, %v2623_v61, 920167782 }
 0x39d   : >> { %v2639_v57 = vsel %vm2627_vm14, %v2617_v22, %v2620_v19  ;;  %v2640_v59 = vsel %vm2630_vm10, %v2626_v15, 1326507024  ;;  %v6408_v8 = vadd.s32 4294967294, %v2559_v23  ;;  %v2760_v38 = vadd.s32 536870912, %v2759_v39 }
 0x39e   : >> { %v2637_v13 = vsel %vm2629_vm9, %v2620_v19, %v2636_v30  ;;  %v2641_v36 = vsel %vm2629_vm9, %v2623_v61, %v2640_v59  ;;  %v2633_v21 = vsel %vm2629_vm9, %v2617_v22, %v2632_v4  ;;  %v6418_v50 = vadd.s32 4294967169, %v2807_v53 }
 0x39f   : >> { %v2638_v2 = vsel %vm2628_vm4, %v2635_v46, %v2637_v13  ;;  %v2642_v43 = vsel %vm2628_vm4, %v2639_v57, %v2641_v36  ;;  %vm6409_vm11 = vcmp.lt.s32.totalorder %v6408_v8, 0  ;;  %v9095_v10 = vshrl.u32 %v2760_v38, 30 }
 0x3a0   : >> { %v9098_v3 = vmul.u32.u64.low %v9021_v1, %v2642_v43  ;;  %v9099_v9 = vmul.u32.u64.high %v9021_v1, %v2642_v43, %v9098_v3  ;;  %v9102_v55 = vmul.u32.u64.low %v9021_v1, %v2638_v2  ;;  %v9103_v40 = vmul.u32.u64.high %v9021_v1, %v2638_v2, %v9102_v55 }
 0x3a1   : >> { %12442 = vst [vmem:[#allocation54_spill] sm:$0xff] %v9095_v10  ;;  %v2562_v51 = vsel %vm6409_vm11, 0, %v6408_v8  ;;  %v2762_v11 = vshll.u32 %v9095_v10, 30  ;;  %v2634_v53 = vsel %vm2628_vm4, %v2631_v49, %v2633_v21  ;;  %v12096_v22 = vand.u32 2147483647, %v8992_v33 }
 0x3a2   : >> { %v2813_v19 = vadd.s32 1, %v6418_v50  ;;  %v9113_v28 = vadd.f32 %v2385_v31, %v9106_v29  ;;  %v2567_v25 = vsub.s32 4294967266, %v2562_v51  ;;  %vm2652_vm5 = vc.u32 %v9099_v9, %v9102_v55 }
 0x3a3   : >> { %v9115_v61 = vsub.s32 %v2759_v39, %v2762_v11  ;;  %v2653_v16 = vadd.s32 1, %v9103_v40  ;;  %v2650_v63 = vmul.u32 %v9021_v1, %v2634_v53  ;;  %v2810_v15 = vand.u32 8388607, %v12096_v22 }
 0x3a4   : >> { %12443 = vst [vmem:[#allocation67_spill] sm:$0xff] %v9113_v28  ;;  %vm2814_vm1 = vcmp.gt.s32.totalorder %v2813_v19, 0  ;;  %v2910_v39 = vand.u32 2139095040, %v9113_v28  ;;  %v2563_v49 = vsub.s32 32, %v2562_v51  ;;  %v2568_v30 = vadd.s32 127, %v2567_v25 }
 0x3a5   : >> { %v2765_v42 = vsub.s32 0, %v9115_v61  ;;  %v2815_v26 = vsel %vm2814_vm1, %v2813_v19, 0  ;;  %v2654_v54 = vsel %vm2652_vm5, %v2653_v16, %v9103_v40  ;;  %v2547_v59 = vadd.s32 %v9017_v18, %v9014_v56 }
 0x3a6   : >> { %v2817_v23 = vand.u32 31, %v2815_v26  ;;  %v2655_v46 = vadd.s32 %v2654_v54, %v2650_v63  ;;  %v2564_v38 = vshll.u32 %v9068_v44, %v2562_v51  ;;  %v2811_v13 = vor.u32 8388608, %v2810_v15 }
 0x3a7   : >> { %v6415_v4 = vmin.u32 %v2765_v42, %v9115_v61  ;;  %v2911_v21 = vshrl.u32 %v2910_v39, 23  ;;  %v2565_v31 = vshrl.u32 %v2547_v59, %v2563_v49  ;;  %v2569_v40 = vshll.u32 %v2568_v30, 23 }
 0x3a8   : >> { %v2818_v57 = vsub.s32 32, %v2817_v23  ;;  %v2656_v1 = vadd.s32 536870912, %v2655_v46  ;;  %v2820_v11 = vshll.u32 %v12296_v35, %v2817_v23  ;;  %v2823_v44 = vshll.u32 %v12288_v41, %v2817_v23 }
 0x3a9   : >> { %v2767_v8 = vclz %v6415_v4  ;;  %v2826_v51 = vshll.u32 %v12289_v58, %v2817_v23  ;;  %v2816_v19 = vshrl.u32 %v2815_v26, 5  ;;  %v2829_v25 = vshll.u32 %v12290_v34, %v2817_v23 }
 0x3aa   : >> { %v2821_v36 = vshrl.u32 %v12288_v41, %v2818_v57  ;;  %v9131_v43 = vshrl.u32 %v2656_v1, 30  ;;  %v2824_v50 = vshrl.u32 %v12289_v58, %v2818_v57  ;;  %v2827_v3 = vshrl.u32 %v12290_v34, %v2818_v57 }
 0x3ab   : >> { %v6416_v2 = vadd.s32 4294967294, %v2767_v8  ;;  %v2830_v56 = vshrl.u32 %v12291_v52, %v2818_v57  ;;  %v2833_v16 = vshrl.u32 %v12292_v48, %v2818_v57  ;;  %v2832_v15 = vshll.u32 %v12291_v52, %v2817_v23 }
 0x3ac   : >> { %12444 = vst [vmem:[#allocation48_spill] sm:$0xff] %v9131_v43  ;;  %v2658_v18 = vshll.u32 %v9131_v43, 30  ;;  %v2822_v42 = vor.u32 %v2821_v36, %v2820_v11  ;;  %v2825_v63 = vor.u32 %v2824_v50, %v2823_v44  ;;  %v2828_v54 = vor.u32 %v2827_v3, %v2826_v51 }
 0x3ad   : >> { %vm6417_vm0 = vcmp.lt.s32.totalorder %v6416_v2, 0  ;;  %v2831_v49 = vor.u32 %v2830_v56, %v2829_v25  ;;  %v2566_v30 = vor.u32 %v2565_v31, %v2564_v38  ;;  %v2570_v59 = vor.u32 4788187, %v2569_v40 }
 0x3ae   : >> { %v9140_v53 = vsel %vm6417_vm0, 0, %v6416_v2  ;;  %v9146_v4 = vsub.s32 %v2655_v46, %v2658_v18  ;;  %v2834_v8 = vor.u32 %v2833_v16, %v2832_v15  ;;  %v2851_v1 = vshll.u32 %v2811_v13, 8 }
 0x3af   : >> { %v2775_v39 = vsub.s32 4294967266, %v9140_v53  ;;  %vm2835_vm7 = vcmp.lt.s32.totalorder %v2816_v19, 1  ;;  %vm2838_vm8 = vcmp.lt.s32.totalorder %v2816_v19, 4  ;;  %v6422_v2 = vadd.s32 4294967169, %v2911_v21 }
 0x3b0   : >> { %v2661_v26 = vsub.s32 0, %v9146_v4  ;;  %v2819_v36 = vshrl.u32 %v12296_v35, %v2818_v57  ;;  %vm2837_vm13 = vcmp.lt.s32.totalorder %v2816_v19, 3  ;;  %v2840_v50 = vsel %vm2838_vm8, %v2828_v54, 2102212464 }
 0x3b1   : >> { %v2843_v3 = vsel %vm2835_vm7, %v2822_v42, %v2825_v63  ;;  %v2776_v23 = vadd.s32 127, %v2775_v39  ;;  %v2844_v46 = vsel %vm2838_vm8, %v2831_v49, 920167782  ;;  %v2847_v18 = vsel %vm2835_vm7, %v2825_v63, %v2828_v54 }
 0x3b2   : >> { %v6411_v11 = vmin.u32 %v2661_v26, %v9146_v4  ;;  %v2571_v56 = vand.u32 2147483647, %v2570_v59  ;;  %vm2836_vm15 = vcmp.lt.s32.totalorder %v2816_v19, 2  ;;  %v2845_v38 = vsel %vm2837_vm13, %v2828_v54, %v2844_v46 }
 0x3b3   : >> { %v2848_v31 = vsel %vm2838_vm8, %v2834_v8, 1326507024  ;;  %v2839_v13 = vsel %vm2835_vm7, %v2819_v36, %v2822_v42  ;;  %v2841_v40 = vsel %vm2837_vm13, %v2825_v63, %v2840_v50  ;;  %v2846_v44 = vsel %vm2836_vm15, %v2843_v3, %v2845_v38 }
 0x3b4   : >> { %v2849_v51 = vsel %vm2837_vm13, %v2831_v49, %v2848_v31  ;;  %v2663_v21 = vclz %v6411_v11  ;;  %v9153_v25 = vmul.u32.u64.low %v2851_v1, %v2846_v44  ;;  %v9154_v16 = vmul.u32.u64.high %v2851_v1, %v2846_v44, %v9153_v25 }
 0x3b5   : >> { %v2850_v57 = vsel %vm2836_vm15, %v2847_v18, %v2849_v51  ;;  %v2771_v15 = vsub.s32 32, %v9140_v53  ;;  %v2777_v39 = vshll.u32 %v2776_v23, 23  ;;  %v12098_v54 = vand.u32 2147483647, %v9113_v28  ;;  %v2474_v18 = vpop.f32.mrf.mxu1 }
 0x3b6   : >> { %v9158_v26 = vmul.u32.u64.low %v2851_v1, %v2850_v57  ;;  %v9159_v59 = vmul.u32.u64.high %v2851_v1, %v2850_v57, %v9158_v26  ;;  %v2917_v42 = vadd.s32 1, %v6422_v2  ;;  %v2573_v63 = vcvt.s32.f32 %v2566_v30 }
 0x3b7   : >> { %v2755_v49 = vadd.s32 %v9062_v60, %v9058_v32  ;;  %v2842_v8 = vsel %vm2836_vm15, %v2839_v13, %v2841_v40  ;;  %v6412_v36 = vadd.s32 4294967294, %v2663_v21  ;;  %v2861_v50 = vadd.s32 1, %v9154_v16  ;;  %v2387_v32 = vpop.f32.mrf.mxu0 }
 0x3b8   : >> { %vm2918_vm2 = vcmp.gt.s32.totalorder %v2917_v42, 0  ;;  %v9166_v3 = vmul.f32 %v2573_v63, %v2571_v56  ;;  %v9168_v23 = vor.u32 4788187, %v2777_v39  ;;  %v2858_v46 = vmul.u32 %v2851_v1, %v2842_v8 }
 0x3b9   : >> { %v2773_v11 = vshrl.u32 %v2755_v49, %v2771_v15  ;;  %vm2860_vm12 = vc.u32 %v9159_v59, %v9153_v25  ;;  %v2914_v30 = vand.u32 8388607, %v12098_v54  ;;  %v2919_v2 = vsel %vm2918_vm2, %v2917_v42, 0 }
 0x3ba   : >> { %v2772_v60 = vshll.u32 %v9115_v61, %v9140_v53  ;;  %v2862_v19 = vsel %vm2860_vm12, %v2861_v50, %v9154_v16  ;;  %vm6413_vm6 = vcmp.lt.s32.totalorder %v6412_v36, 0  ;;  %v2921_v38 = vand.u32 31, %v2919_v2 }
 0x3bb   : >> { %v2863_v56 = vadd.s32 %v2862_v19, %v2858_v46  ;;  %v2575_v31 = vxor.u32 2147483648, %v9166_v3  ;;  %v2779_v13 = vand.u32 2147483647, %v9168_v23  ;;  %v9180_v40 = vadd.f32 %v2387_v32, %v9106_v29 }
 0x3bc   : >> { %v2774_v1 = vor.u32 %v2773_v11, %v2772_v60  ;;  %v2915_v51 = vor.u32 8388608, %v2914_v30  ;;  %v2922_v21 = vsub.s32 32, %v2921_v38  ;;  %v9183_v57 = vadd.f32 %v2474_v18, %v9106_v29 }
 0x3bd   : >> { %v2864_v44 = vadd.s32 536870912, %v2863_v56  ;;  %v9185_v61 = vsel %vm6413_vm6, 0, %v6412_v36  ;;  %v2920_v53 = vshrl.u32 %v2919_v2, 5  ;;  %v2924_v16 = vshll.u32 %v12296_v35, %v2921_v38 }
 0x3be   : >> { %12445 = vst [vmem:[#allocation42_spill] sm:$0xff] %v9183_v57  ;;  %v2927_v15 = vshll.u32 %v12288_v41, %v2921_v38  ;;  %v2925_v26 = vshrl.u32 %v12288_v41, %v2922_v21  ;;  %v2928_v42 = vshrl.u32 %v12289_v58, %v2922_v21  ;;  %v2930_v63 = vshll.u32 %v12289_v58, %v2921_v38 }
 0x3bf   : >> { %v9189_v39 = vshrl.u32 %v2864_v44, 30  ;;  %v2931_v49 = vshrl.u32 %v12290_v34, %v2922_v21  ;;  %v2933_v8 = vshll.u32 %v12290_v34, %v2921_v38  ;;  %v2934_v36 = vshrl.u32 %v12291_v52, %v2922_v21 }
 0x3c0   : >> { %v2936_v50 = vshll.u32 %v12291_v52, %v2921_v38  ;;  %v2926_v23 = vor.u32 %v2925_v26, %v2924_v16  ;;  %v2929_v46 = vor.u32 %v2928_v42, %v2927_v15  ;;  %v2937_v30 = vshrl.u32 %v12292_v48, %v2922_v21 }
 0x3c1   : >> { %12446 = vst [vmem:[#allocation56_spill] sm:$0xff] %v9189_v39  ;;  %v2866_v11 = vshll.u32 %v9189_v39, 30  ;;  %v2667_v2 = vsub.s32 32, %v9185_v61  ;;  %v2932_v32 = vor.u32 %v2931_v49, %v2930_v63  ;;  %v2935_v60 = vor.u32 %v2934_v36, %v2933_v8 }
 0x3c2   : >> { %v3014_v19 = vand.u32 2139095040, %v9180_v40  ;;  %v2938_v44 = vor.u32 %v2937_v30, %v2936_v50  ;;  %vm2939_vm14 = vcmp.lt.s32.totalorder %v2920_v53, 1  ;;  %v2955_v22 = vshll.u32 %v2915_v51, 8 }
 0x3c3   : >> { %v9202_v18 = vsub.s32 %v2863_v56, %v2866_v11  ;;  %v2923_v5 = vshrl.u32 %v12296_v35, %v2922_v21  ;;  %vm2941_vm4 = vcmp.lt.s32.totalorder %v2920_v53, 3  ;;  %vm2942_vm9 = vcmp.lt.s32.totalorder %v2920_v53, 4 }
 0x3c4   : >> { %v2947_v38 = vsel %vm2939_vm14, %v2926_v23, %v2929_v46  ;;  %v2944_v15 = vsel %vm2942_vm9, %v2932_v32, 2102212464  ;;  %v2948_v26 = vsel %vm2942_vm9, %v2935_v60, 920167782  ;;  %v2951_v42 = vsel %vm2939_vm14, %v2929_v46, %v2932_v32 }
 0x3c5   : >> { %v2869_v16 = vsub.s32 0, %v9202_v18  ;;  %vm2940_vm10 = vcmp.lt.s32.totalorder %v2920_v53, 2  ;;  %v2943_v63 = vsel %vm2939_vm14, %v2923_v5, %v2926_v23  ;;  %v2949_v49 = vsel %vm2941_vm4, %v2932_v32, %v2948_v26 }
 0x3c6   : >> { %v2952_v8 = vsel %vm2942_vm9, %v2938_v44, 1326507024  ;;  %v2945_v36 = vsel %vm2941_vm4, %v2929_v46, %v2944_v15  ;;  %v2950_v50 = vsel %vm2940_vm10, %v2947_v38, %v2949_v49  ;;  %v2671_v51 = vsub.s32 4294967266, %v9185_v61 }
 0x3c7   : >> { %v6419_v56 = vmin.u32 %v2869_v16, %v9202_v18  ;;  %v2953_v11 = vsel %vm2941_vm4, %v2935_v60, %v2952_v8  ;;  %v9208_v30 = vmul.u32.u64.low %v2955_v22, %v2950_v50  ;;  %v9209_v54 = vmul.u32.u64.high %v2955_v22, %v2950_v50, %v9208_v30 }
 0x3c8   : >> { %v2954_v21 = vsel %vm2940_vm10, %v2951_v42, %v2953_v11  ;;  %vm12143_vm11 = vcmp.lt.s32.totalorder %v8972_v12, 0  ;;  %v2781_v0 = vcvt.s32.f32 %v2774_v1  ;;  %v2651_v5 = vadd.s32 %v9102_v55, %v9099_v9 }
 0x3c9   : >> { %v9212_v24 = vmul.u32.u64.low %v2955_v22, %v2954_v21  ;;  %v9213_v20 = vmul.u32.u64.high %v2955_v22, %v2954_v21, %v9212_v24  ;;  %v2946_v53 = vsel %vm2940_vm10, %v2943_v63, %v2945_v36  ;;  %v3118_v23 = vand.u32 2139095040, %v9183_v57 }
 0x3ca   : >> { %v3015_v46 = vshrl.u32 %v3014_v19, 23  ;;  %v12447_v32 = vand.u32 2147483647, %v8972_v12  ;;  %v12448_v60 = vmov 0  ;;  %v2576_v1 = vsel %vm12143_vm11, %v2575_v31, %v9166_v3 }
 0x3cb   : >> { %v2782_v44 = vmul.f32 %v2781_v0, %v2779_v13  ;;  %v2871_v38 = vclz %v6419_v56  ;;  %v2669_v24 = vshrl.u32 %v2651_v5, %v2667_v2  ;;  %v2672_v16 = vadd.s32 127, %v2671_v51 }
 0x3cc   : >> { %vm9220_vm5 = vcmp.le.f32.partialorder %v12447_v32, 0.7853982  ;;  %v2965_v9 = vadd.s32 1, %v9209_v54  ;;  %v3119_v55 = vshrl.u32 %v3118_v23, 23  ;;  %v2962_v15 = vmul.u32 %v2955_v22, %v2946_v53 }
 0x3cd   : >> { %v12449_v60 = vsel %vm9220_vm5, 4294967295, %v12448_v60  ;;  %vm2964_vm1 = vc.u32 %v9213_v20, %v9208_v30  ;;  %v12103_v19 = vand.u32 2147483647, %v9183_v57  ;;  %v12102_v26 = vand.u32 2147483647, %v9180_v40 }
 0x3ce   : >> { %12450 = vst [vmem:[#allocation51_spill] sm:$0xff] %v12449_v60  ;;  %v2668_v42 = vshll.u32 %v9146_v4, %v9185_v61  ;;  %v2966_v63 = vsel %vm2964_vm1, %v2965_v9, %v9209_v54  ;;  %v6430_v3 = vadd.s32 4294967169, %v3119_v55  ;;  %v6426_v0 = vadd.s32 4294967169, %v3015_v46  ;;  %v2476_v61 = vpop.f32.mrf.mxu1 }
 0x3cf   : >> { %v9237_v31 = vsel %vm9220_vm5, %v8972_v12, %v2576_v1  ;;  %v2783_v13 = vxor.u32 2147483648, %v2782_v44  ;;  %v6420_v22 = vadd.s32 4294967294, %v2871_v38  ;;  %v2967_v2 = vadd.s32 %v2966_v63, %v2962_v15 }
 0x3d0   : >> { %v9239_v49 = vor.u32 %v2669_v24, %v2668_v42  ;;  %v2673_v8 = vshll.u32 %v2672_v16, 23  ;;  %v3125_v56 = vadd.s32 1, %v6430_v3  ;;  %vm12135_vm0 = vcmp.lt.s32.totalorder %v8982_v6, 0 }
 0x3d1   : >> { %v2968_v36 = vadd.s32 536870912, %v2967_v2  ;;  %v3122_v4 = vand.u32 8388607, %v12103_v19  ;;  %v9246_v54 = vand.u32 8388607, %v12102_v26  ;;  %6874 = vcosq.f32 %v9237_v31 }
 0x3d2   : >> { %v9251_v50 = vadd.s32 %v9153_v25, %v9159_v59  ;;  %vm3126_vm7 = vcmp.gt.s32.totalorder %v3125_v56, 0  ;;  %v3021_v11 = vadd.s32 1, %v6426_v0  ;;  %v9255_v51 = vsel %vm12135_vm0, %v2783_v13, %v2782_v44 }
 0x3d3   : >> { %vm6421_vm8 = vcmp.lt.s32.totalorder %v6420_v22, 0  ;;  %v9257_v21 = vshrl.u32 %v2968_v36, 30  ;;  %v3127_v5 = vsel %vm3126_vm7, %v3125_v56, 0  ;;  %v9259_v53 = vor.u32 4788187, %v2673_v8 }
 0x3d4   : >> { %v3129_v46 = vand.u32 31, %v3127_v5  ;;  %v9263_v32 = vadd.f32 %v2476_v61, %v9106_v29  ;;  %v9266_v25 = vadd.s32 %v9208_v30, %v9213_v20  ;;  %v3123_v1 = vor.u32 8388608, %v3122_v4 }
 0x3d5   : >> { %12451 = vst [vmem:[#allocation62_spill] sm:$0xff] %v9257_v21  ;;  %v2970_v59 = vshll.u32 %v9257_v21, 30  ;;  %v3019_v44 = vor.u32 8388608, %v9246_v54  ;;  %v9270_v38 = vsel %vm6421_vm8, 0, %v6420_v22  ;;  %v3128_v24 = vshrl.u32 %v3127_v5, 5 }
 0x3d6   : >> { %12452 = vst [vmem:[#allocation38_spill] sm:$0xff] %v9263_v32  ;;  %v3130_v16 = vsub.s32 32, %v3129_v46  ;;  %vm3022_vm13 = vcmp.gt.s32.totalorder %v3021_v11, 0  ;;  %v3132_v55 = vshll.u32 %v12296_v35, %v3129_v46  ;;  %v3135_v29 = vshll.u32 %v12288_v41, %v3129_v46 }
 0x3d7   : >> { %v9272_v9 = vsub.s32 %v2967_v2, %v2970_v59  ;;  %v3138_v15 = vshll.u32 %v12289_v58, %v3129_v46  ;;  %v3141_v63 = vshll.u32 %v12290_v34, %v3129_v46  ;;  %v3144_v13 = vshll.u32 %v12291_v52, %v3129_v46 }
 0x3d8   : >> { %v3133_v20 = vshrl.u32 %v12288_v41, %v3130_v16  ;;  %v3136_v30 = vshrl.u32 %v12289_v58, %v3130_v16  ;;  %v3139_v42 = vshrl.u32 %v12290_v34, %v3130_v16  ;;  %v3142_v0 = vshrl.u32 %v12291_v52, %v3130_v16 }
 0x3d9   : >> { %v2973_v3 = vsub.s32 0, %v9272_v9  ;;  %v3145_v22 = vshrl.u32 %v12292_v48, %v3130_v16  ;;  %v3163_v36 = vshll.u32 %v3123_v1, 8  ;;  %v2879_v4 = vsub.s32 4294967266, %v9270_v38 }
 0x3da   : >> { %v3134_v2 = vor.u32 %v3133_v20, %v3132_v55  ;;  %v3137_v8 = vor.u32 %v3136_v30, %v3135_v29  ;;  %v3140_v56 = vor.u32 %v3139_v42, %v3138_v15  ;;  %v3143_v61 = vor.u32 %v3142_v0, %v3141_v63 }
 0x3db   : >> { %v6423_v54 = vmin.u32 %v2973_v3, %v9272_v9  ;;  %v3146_v5 = vor.u32 %v3145_v22, %v3144_v13  ;;  %v3131_v59 = vshrl.u32 %v12296_v35, %v3130_v16  ;;  %vm3147_vm15 = vcmp.lt.s32.totalorder %v3128_v24, 1 }
 0x3dc   : >> { %vm3150_vm2 = vcmp.lt.s32.totalorder %v3128_v24, 4  ;;  %v3023_v26 = vsel %vm3022_vm13, %v3021_v11, 0  ;;  %vm3148_vm12 = vcmp.lt.s32.totalorder %v3128_v24, 2  ;;  %v3155_v23 = vsel %vm3147_vm15, %v3134_v2, %v3137_v8 }
 0x3dd   : >> { %v2975_v19 = vclz %v6423_v54  ;;  %v3152_v46 = vsel %vm3150_vm2, %v3140_v56, 2102212464  ;;  %vm3149_vm6 = vcmp.lt.s32.totalorder %v3128_v24, 3  ;;  %v3156_v55 = vsel %vm3150_vm2, %v3143_v61, 920167782 }
 0x3de   : >> { %v3159_v29 = vsel %vm3147_vm15, %v3137_v8, %v3140_v56  ;;  %v3160_v1 = vsel %vm3150_vm2, %v3146_v5, 1326507024  ;;  %v9289_v15 = vpop.eup %6874  ;;  %v3151_v30 = vsel %vm3147_vm15, %v3131_v59, %v3134_v2  ;;  %v3157_v42 = vsel %vm3149_vm6, %v3140_v56, %v3156_v55 }
 0x3df   : >> { %12453 = vst [vmem:[#allocation61_spill] sm:$0xff] %v9289_v15  ;;  %v6424_v20 = vadd.s32 4294967294, %v2975_v19  ;;  %v3161_v63 = vsel %vm3149_vm6, %v3143_v61, %v3160_v1  ;;  %v3153_v3 = vsel %vm3149_vm6, %v3137_v8, %v3152_v46  ;;  %v3158_v16 = vsel %vm3148_vm12, %v3155_v23, %v3157_v42 }
 0x3e0   : >> { %v3162_v0 = vsel %vm3148_vm12, %v3159_v29, %v3161_v63  ;;  %v3025_v11 = vand.u32 31, %v3023_v26  ;;  %v9299_v5 = vmul.u32.u64.low %v3163_v36, %v3158_v16  ;;  %v9300_v47 = vmul.u32.u64.high %v3163_v36, %v3158_v16, %v9299_v5 }
 0x3e1   : >> { %vm6425_vm14 = vcmp.lt.s32.totalorder %v6424_v20, 0  ;;  %v9294_v22 = vmul.u32.u64.low %v3163_v36, %v3162_v0  ;;  %v9295_v54 = vmul.u32.u64.high %v3163_v36, %v3162_v0, %v9294_v22  ;;  %v3154_v23 = vsel %vm3148_vm12, %v3151_v30, %v3153_v3 }
 0x3e2   : >> { %v9297_v37 = vsel %vm6425_vm14, 0, %v6424_v20  ;;  %v3026_v19 = vsub.s32 32, %v3025_v11  ;;  %v9305_v8 = vshll.u32 %v3019_v44, 8  ;;  %v9308_v61 = vadd.s32 127, %v2879_v4 }
 0x3e3   : >> { %v2983_v2 = vsub.s32 4294967266, %v9297_v37  ;;  %v3028_v59 = vshll.u32 %v12296_v35, %v3025_v11  ;;  %vm3172_vm4 = vc.u32 %v9295_v54, %v9299_v5  ;;  %v3024_v29 = vshrl.u32 %v3023_v26, 5 }
 0x3e4   : >> { %v3029_v46 = vshrl.u32 %v12288_v41, %v3026_v19  ;;  %v3032_v55 = vshrl.u32 %v12289_v58, %v3026_v19  ;;  %v3031_v1 = vshll.u32 %v12288_v41, %v3025_v11  ;;  %v3222_v24 = vand.u32 2139095040, %v9263_v32 }
 0x3e5   : >> { %v2984_v44 = vadd.s32 127, %v2983_v2  ;;  %v3170_v20 = vmul.u32 %v3163_v36, %v3154_v23  ;;  %v3173_v30 = vadd.s32 1, %v9300_v47  ;;  %v3034_v63 = vshll.u32 %v12289_v58, %v3025_v11 }
 0x3e6   : >> { %v3030_v4 = vor.u32 %v3029_v46, %v3028_v59  ;;  %v3033_v42 = vor.u32 %v3032_v55, %v3031_v1  ;;  %v3035_v3 = vshrl.u32 %v12290_v34, %v3026_v19  ;;  %v3037_v16 = vshll.u32 %v12290_v34, %v3025_v11 }
 0x3e7   : >> { %v3174_v0 = vsel %vm3172_vm4, %v3173_v30, %v9300_v47  ;;  %v3038_v26 = vshrl.u32 %v12291_v52, %v3026_v19  ;;  %v3040_v22 = vshll.u32 %v12291_v52, %v3025_v11  ;;  %v3041_v56 = vshrl.u32 %v12292_v48, %v3026_v19 }
 0x3e8   : >> { %v3175_v2 = vadd.s32 %v3174_v0, %v3170_v20  ;;  %v3036_v36 = vor.u32 %v3035_v3, %v3034_v63  ;;  %vm3043_vm9 = vcmp.lt.s32.totalorder %v3024_v29, 1  ;;  %v3223_v23 = vshrl.u32 %v3222_v24, 23 }
 0x3e9   : >> { %v2979_v59 = vsub.s32 32, %v9297_v37  ;;  %v2980_v46 = vshll.u32 %v9272_v9, %v9297_v37  ;;  %v3039_v55 = vor.u32 %v3038_v26, %v3037_v16  ;;  %v3042_v1 = vor.u32 %v3041_v56, %v3040_v22  ;;  %v2391_v22 = vpop.f32.mrf.mxu0 }
 0x3ea   : >> { %v2985_v13 = vshll.u32 %v2984_v44, 23  ;;  %v3176_v62 = vadd.s32 536870912, %v3175_v2  ;;  %v3027_v47 = vshrl.u32 %v12296_v35, %v3026_v19  ;;  %vm3046_vm10 = vcmp.lt.s32.totalorder %v3024_v29, 4 }
 0x3eb   : >> { %vm3045_vm1 = vcmp.lt.s32.totalorder %v3024_v29, 3  ;;  %v3048_v11 = vsel %vm3046_vm10, %v3036_v36, 2102212464  ;;  %v3051_v30 = vsel %vm3043_vm9, %v3030_v4, %v3033_v42  ;;  %v3052_v20 = vsel %vm3046_vm10, %v3039_v55, 920167782 }
 0x3ec   : >> { %v9330_v63 = vshrl.u32 %v3176_v62, 30  ;;  %vm3044_vm7 = vcmp.lt.s32.totalorder %v3024_v29, 2  ;;  %v3053_v24 = vsel %vm3045_vm1, %v3036_v36, %v3052_v20  ;;  %v3055_v3 = vsel %vm3043_vm9, %v3033_v42, %v3036_v36 }
 0x3ed   : >> { %v2981_v37 = vshrl.u32 %v9266_v25, %v2979_v59  ;;  %v3054_v9 = vsel %vm3044_vm7, %v3051_v30, %v3053_v24  ;;  %v3056_v56 = vsel %vm3046_vm10, %v3042_v1, 1326507024  ;;  %v6434_v44 = vadd.s32 4294967169, %v3223_v23 }
 0x3ee   : >> { %12454 = vst [vmem:[#allocation44_spill] sm:$0xff] %v9330_v63  ;;  %v3178_v19 = vshll.u32 %v9330_v63, 30  ;;  %v3047_v16 = vsel %vm3043_vm9, %v3027_v47, %v3030_v4  ;;  %v3049_v0 = vsel %vm3045_vm1, %v3033_v42, %v3048_v11  ;;  %v3057_v26 = vsel %vm3045_vm1, %v3039_v55, %v3056_v56 }
 0x3ef   : >> { %v2986_v17 = vor.u32 4788187, %v2985_v13  ;;  %v3058_v62 = vsel %vm3044_vm7, %v3055_v3, %v3057_v26  ;;  %v9339_v20 = vmul.u32.u64.low %v9305_v8, %v3054_v9  ;;  %v9340_v15 = vmul.u32.u64.high %v9305_v8, %v3054_v9, %v9339_v20 }
 0x3f0   : >> { %v2675_v25 = vand.u32 2147483647, %v9259_v53  ;;  %v9344_v36 = vsub.s32 %v3175_v2, %v3178_v19  ;;  %v9347_v23 = vmul.u32.u64.low %v9305_v8, %v3058_v62  ;;  %v9348_v59 = vmul.u32.u64.high %v9305_v8, %v3058_v62, %v9347_v23 }
 0x3f1   : >> { %v2982_v4 = vor.u32 %v2981_v37, %v2980_v46  ;;  %v3050_v42 = vsel %vm3044_vm7, %v3047_v16, %v3049_v0  ;;  %v3229_v55 = vadd.s32 1, %v6434_v44  ;;  %v9352_v13 = vadd.f32 %v2391_v22, %v8970_v14 }
 0x3f2   : >> { %v2876_v1 = vshll.u32 %v9202_v18, %v9270_v38  ;;  %v12455_v47 = vsub.s32 32, %v9270_v38  ;;  %v2881_v2 = vshll.u32 %v9308_v61, 23  ;;  %v3181_v11 = vsub.s32 0, %v9344_v36 }
 0x3f3   : >> { %v2987_v30 = vand.u32 2147483647, %v2986_v17  ;;  %v3069_v46 = vadd.s32 1, %v9340_v15  ;;  %v12456_v29 = vand.u32 2147483647, %v9263_v32  ;;  %vm3230_vm8 = vcmp.gt.s32.totalorder %v3229_v55, 0 }
 0x3f4   : >> { %v2877_v53 = vshrl.u32 %v9251_v50, %v12455_v47  ;;  %v6431_v3 = vmin.u32 %v3181_v11, %v9344_v36  ;;  %v3066_v37 = vmul.u32 %v9305_v8, %v3050_v42  ;;  %vm3068_vm13 = vc.u32 %v9348_v59, %v9339_v20 }
 0x3f5   : >> { %v3226_v24 = vand.u32 8388607, %v12456_v29  ;;  %v3231_v18 = vsel %vm3230_vm8, %v3229_v55, 0  ;;  %v12457_v50 = vcvt.s32.f32 %v9239_v49  ;;  %v2989_v61 = vcvt.s32.f32 %v2982_v4 }
 0x3f6   : >> { %v3070_v17 = vsel %vm3068_vm13, %v3069_v46, %v9340_v15  ;;  %v3233_v9 = vand.u32 31, %v3231_v18  ;;  %v9373_v56 = vor.u32 %v2877_v53, %v2876_v1  ;;  %v9375_v44 = vor.u32 4788187, %v2881_v2 }
 0x3f7   : >> { %v9370_v38 = vmul.f32 %v12457_v50, %v2675_v25  ;;  %v3183_v19 = vclz %v6431_v3  ;;  %v3071_v16 = vadd.s32 %v3070_v17, %v3066_v37  ;;  %v9377_v0 = vmul.f32 %v2989_v61, %v2987_v30 }
 0x3f8   : >> { %v3227_v8 = vor.u32 8388608, %v3226_v24  ;;  %v3234_v26 = vsub.s32 32, %v3233_v9  ;;  %v3326_v22 = vand.u32 2139095040, %v9352_v13  ;;  %v9380_v25 = vshrl.u32 %v3231_v18, 5 }
 0x3f9   : >> { %v6432_v62 = vadd.s32 4294967294, %v3183_v19  ;;  %v3072_v49 = vadd.s32 536870912, %v3071_v16  ;;  %v3236_v23 = vshll.u32 %v12296_v35, %v3233_v9  ;;  %v3239_v4 = vshll.u32 %v12288_v41, %v3233_v9 }
 0x3fa   : >> { %v3237_v15 = vshrl.u32 %v12288_v41, %v3234_v26  ;;  %v3240_v42 = vshrl.u32 %v12289_v58, %v3234_v26  ;;  %v3243_v55 = vshrl.u32 %v12290_v34, %v3234_v26  ;;  %v3246_v47 = vshrl.u32 %v12291_v52, %v3234_v26 }
 0x3fb   : >> { %vm6433_vm15 = vcmp.lt.s32.totalorder %v6432_v62, 0  ;;  %v9387_v1 = vshrl.u32 %v3072_v49, 30  ;;  %v3249_v53 = vshrl.u32 %v12292_v48, %v3234_v26  ;;  %v3242_v11 = vshll.u32 %v12289_v58, %v3233_v9 }
 0x3fc   : >> { %v3186_v2 = vsel %vm6433_vm15, 0, %v6432_v62  ;;  %v3245_v30 = vshll.u32 %v12290_v34, %v3233_v9  ;;  %v3248_v46 = vshll.u32 %v12291_v52, %v3233_v9  ;;  %v3238_v3 = vor.u32 %v3237_v15, %v3236_v23 }
 0x3fd   : >> { %v3191_v29 = vsub.s32 4294967266, %v3186_v2  ;;  %v3074_v24 = vshll.u32 %v9387_v1, 30  ;;  %v3241_v37 = vor.u32 %v3240_v42, %v3239_v4  ;;  %v3171_v18 = vadd.s32 %v9299_v5, %v9295_v54 }
 0x3fe   : >> { %v3244_v50 = vor.u32 %v3243_v55, %v3242_v11  ;;  %v3247_v61 = vor.u32 %v3246_v47, %v3245_v30  ;;  %v3250_v17 = vor.u32 %v3249_v53, %v3248_v46  ;;  %vm12157_vm2 = vcmp.lt.s32.totalorder %v9113_v28, 0 }
 0x3ff   : >> { %v2991_v19 = vxor.u32 2147483648, %v9377_v0  ;;  %v3187_v62 = vsub.s32 32, %v3186_v2  ;;  %v9399_v49 = vsub.s32 %v3071_v16, %v3074_v24  ;;  %v3327_v60 = vshrl.u32 %v3326_v22, 23 }
 0x400   : >> { %v12458_v9 = vand.u32 2147483647, %v8982_v6  ;;  %v12459_v12 = vmov 0  ;;  %v3192_v23 = vadd.s32 127, %v3191_v29  ;;  %v3235_v54 = vshrl.u32 %v12296_v35, %v3234_v26 }
 0x401   : >> { %vm3251_vm6 = vcmp.lt.s32.totalorder %v9380_v25, 1  ;;  %v3267_v5 = vshll.u32 %v3227_v8, 8  ;;  %v3077_v15 = vsub.s32 0, %v9399_v49  ;;  %vm3252_vm14 = vcmp.lt.s32.totalorder %v9380_v25, 2 }
 0x402   : >> { %vm9403_vm12 = vcmp.le.f32.partialorder %v12458_v9, 0.7853982  ;;  %vm3254_vm4 = vcmp.lt.s32.totalorder %v9380_v25, 4  ;;  %v3259_v16 = vsel %vm3251_vm6, %v3238_v3, %v3241_v37  ;;  %v12462_v22 = vand.u32 2147483647, %v9113_v28 }
 0x403   : >> { %v12460_v12 = vsel %vm9403_vm12, 4294967295, %v12459_v12  ;;  %v12463_v4 = vmov 0  ;;  %v3256_v42 = vsel %vm3254_vm4, %v3244_v50, 2102212464  ;;  %v3260_v26 = vsel %vm3254_vm4, %v3247_v61, 920167782 }
 0x404   : >> { %12461 = vst [vmem:[#allocation43_spill] sm:$0xff] %v12460_v12  ;;  %vm9416_vm9 = vcmp.le.f32.partialorder %v12462_v22, 0.7853982  ;;  %v3263_v8 = vsel %vm3251_vm6, %v3241_v37, %v3244_v50  ;;  %v3264_v55 = vsel %vm3254_vm4, %v3250_v17, 1326507024  ;;  %v3189_v47 = vshrl.u32 %v3171_v18, %v3187_v62 }
 0x405   : >> { %v12464_v4 = vsel %vm9416_vm9, 4294967295, %v12463_v4  ;;  %v6427_v53 = vmin.u32 %v3077_v15, %v9399_v49  ;;  %vm3253_vm10 = vcmp.lt.s32.totalorder %v9380_v25, 3  ;;  %v6438_v11 = vadd.s32 4294967169, %v3327_v60 }
 0x406   : >> { %12465 = vst [vmem:[#allocation58_spill] sm:$0xff] %v12464_v4  ;;  %v3193_v30 = vshll.u32 %v3192_v23, 23  ;;  %v3255_v46 = vsel %vm3251_vm6, %v3235_v54, %v3238_v3  ;;  %v3261_v29 = vsel %vm3253_vm10, %v3244_v50, %v3260_v26  ;;  %v3265_v24 = vsel %vm3253_vm10, %v3247_v61, %v3264_v55 }
 0x407   : >> { %v3079_v9 = vclz %v6427_v53  ;;  %v3257_v22 = vsel %vm3253_vm10, %v3241_v37, %v3256_v42  ;;  %v3262_v10 = vsel %vm3252_vm14, %v3259_v16, %v3261_v29  ;;  %v3266_v17 = vsel %vm3252_vm14, %v3263_v8, %v3265_v24  ;;  %v2480_v16 = vpop.f32.mrf.mxu1 }
 0x408   : >> { %v9430_v18 = vmul.u32.u64.low %v3267_v5, %v3266_v17  ;;  %v9431_v62 = vmul.u32.u64.high %v3267_v5, %v3266_v17, %v9430_v18  ;;  %v9433_v15 = vmul.u32.u64.low %v3267_v5, %v3262_v10  ;;  %v9434_v7 = vmul.u32.u64.high %v3267_v5, %v3262_v10, %v9433_v15 }
 0x409   : >> { %6876 = vsinq.f32 %v9237_v31  ;;  %v2883_v60 = vand.u32 2147483647, %v9375_v44  ;;  %v12116_v3 = vand.u32 2147483647, %v9352_v13  ;;  %v3333_v37 = vadd.s32 1, %v6438_v11 }
 0x40a   : >> { %v2992_v50 = vsel %vm12157_vm2, %v2991_v19, %v9377_v0  ;;  %v3188_v61 = vshll.u32 %v9344_v36, %v3186_v2  ;;  %v3194_v23 = vor.u32 4788187, %v3193_v30  ;;  %v3258_v54 = vsel %vm3252_vm14, %v3255_v46, %v3257_v22 }
 0x40b   : >> { %v2787_v10 = vsel %vm9403_vm12, %v8982_v6, %v9255_v51  ;;  %v2679_v31 = vxor.u32 2147483648, %v9370_v38  ;;  %v2885_v44 = vcvt.s32.f32 %v9373_v56  ;;  %vm3334_vm1 = vcmp.gt.s32.totalorder %v3333_v37, 0 }
 0x40c   : >> { %v3190_v42 = vor.u32 %v3189_v47, %v3188_v61  ;;  %v6428_v26 = vadd.s32 4294967294, %v3079_v9  ;;  %vm3276_vm7 = vc.u32 %v9431_v62, %v9433_v15  ;;  %v3277_v36 = vadd.s32 1, %v9434_v7 }
 0x40d   : >> { %v9455_v0 = vmul.f32 %v2885_v44, %v2883_v60  ;;  %v9460_v25 = vsel %vm9416_vm9, %v9113_v28, %v2992_v50  ;;  %v3274_v51 = vmul.u32 %v3267_v5, %v3258_v54  ;;  %v3330_v56 = vand.u32 8388607, %v12116_v3 }
 0x40e   : >> { %v3195_v2 = vand.u32 2147483647, %v3194_v23  ;;  %v3278_v19 = vsel %vm3276_vm7, %v3277_v36, %v9434_v7  ;;  %v3335_v8 = vsel %vm3334_vm1, %v3333_v37, 0  ;;  %v9466_v55 = vadd.f32 %v2480_v16, %v8970_v14 }
 0x40f   : >> { %6878 = vcosq.f32 %v2787_v10  ;;  %vm12155_vm8 = vcmp.lt.s32.totalorder %v8976_v27, 0  ;;  %v3279_v47 = vadd.s32 %v3278_v19, %v3274_v51  ;;  %v3197_v53 = vcvt.s32.f32 %v3190_v42 }
 0x410   : >> { %6880 = vsinq.f32 %v2787_v10  ;;  %vm6429_vm13 = vcmp.lt.s32.totalorder %v6428_v26, 0  ;;  %v3337_v11 = vand.u32 31, %v3335_v8  ;;  %v9472_v5 = vsel %vm12155_vm8, %v2679_v31, %v9370_v38 }
 0x411   : >> { %12466 = vst [vmem:[#allocation63_spill] sm:$0xff] %v9472_v5  ;;  %6882 = vcosq.f32 %v9460_v25  ;;  %v3280_v7 = vadd.s32 536870912, %v3279_v47  ;;  %v9476_v46 = vmul.f32 %v3197_v53, %v3195_v2  ;;  %v3331_v29 = vor.u32 8388608, %v3330_v56 }
 0x412   : >> { %v3338_v24 = vsub.s32 32, %v3337_v11  ;;  %v3534_v9 = vand.u32 2139095040, %v9466_v55  ;;  %v9479_v22 = vsel %vm6429_vm13, 0, %v6428_v26  ;;  %v9483_v18 = vshrl.u32 %v3335_v8, 5 }
 0x413   : >> { %v9481_v17 = vshrl.u32 %v3280_v7, 30  ;;  %v3340_v38 = vshll.u32 %v12296_v35, %v3337_v11  ;;  %v3343_v37 = vshll.u32 %v12288_v41, %v3337_v11  ;;  %v3346_v54 = vshll.u32 %v12289_v58, %v3337_v11 }
 0x414   : >> { %v3341_v60 = vshrl.u32 %v12288_v41, %v3338_v24  ;;  %v3344_v50 = vshrl.u32 %v12289_v58, %v3338_v24  ;;  %v3347_v61 = vshrl.u32 %v12290_v34, %v3338_v24  ;;  %v3349_v10 = vshll.u32 %v12290_v34, %v3337_v11 }
 0x415   : >> { %12467 = vst [vmem:[#allocation66_spill] sm:$0xff] %v9481_v17  ;;  %v3282_v23 = vshll.u32 %v9481_v17, 30  ;;  %v3350_v31 = vshrl.u32 %v12291_v52, %v3338_v24  ;;  %v3352_v26 = vshll.u32 %v12291_v52, %v3337_v11  ;;  %v3353_v36 = vshrl.u32 %v12292_v48, %v3338_v24 }
 0x416   : >> { %v9494_v44 = vpop.eup %6876  ;;  %v3342_v16 = vor.u32 %v3341_v60, %v3340_v38  ;;  %v3345_v42 = vor.u32 %v3344_v50, %v3343_v37  ;;  %vm12156_vm15 = vcmp.lt.s32.totalorder %v9183_v57, 0  ;;  %v3067_v51 = vadd.s32 %v9339_v20, %v9348_v59 }
 0x417   : >> { %12468 = vst [vmem:[#allocation65_spill] sm:$0xff] %v9494_v44  ;;  %v9501_v56 = vsub.s32 %v3279_v47, %v3282_v23  ;;  %v3348_v2 = vor.u32 %v3347_v61, %v3346_v54  ;;  %v3351_v19 = vor.u32 %v3350_v31, %v3349_v10  ;;  %v3199_v8 = vxor.u32 2147483648, %v9476_v46  ;;  %v2393_v54 = vpop.f32.mrf.mxu0 }
 0x418   : >> { %v3354_v53 = vor.u32 %v3353_v36, %v3352_v26  ;;  %v3371_v7 = vshll.u32 %v3331_v29, 8  ;;  %v3535_v3 = vshrl.u32 %v3534_v9, 23  ;;  %vm12151_vm6 = vcmp.lt.s32.totalorder %v8992_v33, 0 }
 0x419   : >> { %v3087_v11 = vsub.s32 4294967266, %v9479_v22  ;;  %v3285_v38 = vsub.s32 0, %v9501_v56  ;;  %vm3355_vm14 = vcmp.lt.s32.totalorder %v9483_v18, 1  ;;  %vm3358_vm4 = vcmp.lt.s32.totalorder %v9483_v18, 4 }
 0x41a   : >> { %v3339_v20 = vshrl.u32 %v12296_v35, %v3338_v24  ;;  %vm3357_vm10 = vcmp.lt.s32.totalorder %v9483_v18, 3  ;;  %v3363_v59 = vsel %vm3355_vm14, %v3342_v16, %v3345_v42  ;;  %v3364_v47 = vsel %vm3358_vm4, %v3351_v19, 920167782 }
 0x41b   : >> { %vm3356_vm1 = vcmp.lt.s32.totalorder %v9483_v18, 2  ;;  %v3360_v29 = vsel %vm3358_vm4, %v3348_v2, 2102212464  ;;  %v3365_v9 = vsel %vm3357_vm10, %v3348_v2, %v3364_v47  ;;  %v3367_v60 = vsel %vm3355_vm14, %v3345_v42, %v3348_v2 }
 0x41c   : >> { %v9518_v37 = vpop.eup %6878  ;;  %v6435_v50 = vmin.u32 %v3285_v38, %v9501_v56  ;;  %v3366_v24 = vsel %vm3356_vm1, %v3363_v59, %v3365_v9  ;;  %v3368_v61 = vsel %vm3358_vm4, %v3354_v53, 1326507024  ;;  %v6446_v23 = vadd.s32 4294967169, %v3535_v3 }
 0x41d   : >> { %12469 = vst [vmem:[#allocation39_spill] sm:$0xff] %v9518_v37  ;;  %v9523_v10 = vpop.eup %6880  ;;  %v3369_v31 = vsel %vm3357_vm10, %v3351_v19, %v3368_v61  ;;  %v9527_v26 = vmul.u32.u64.low %v3371_v7, %v3366_v24  ;;  %v9528_v36 = vmul.u32.u64.high %v3371_v7, %v3366_v24, %v9527_v26  ;;  %v12117_v2 = vand.u32 2147483647, %v9466_v55 }
 0x41e   : >> { %12470 = vst [vmem:[#allocation45_spill] sm:$0xff] %v9523_v10  ;;  %v9532_v47 = vpop.eup %6882  ;;  %v3359_v38 = vsel %vm3355_vm14, %v3339_v20, %v3342_v16  ;;  %v3361_v3 = vsel %vm3357_vm10, %v3345_v42, %v3360_v29  ;;  %v3370_v53 = vsel %vm3356_vm1, %v3367_v60, %v3369_v31  ;;  %v3541_v59 = vadd.s32 1, %v6446_v23  ;;  %v2482_v42 = vpop.f32.mrf.mxu1 }
 0x41f   : >> { %12471 = vst [vmem:[#allocation59_spill] sm:$0xff] %v9532_v47  ;;  %v3083_v19 = vsub.s32 32, %v9479_v22  ;;  %v9541_v9 = vmul.u32.u64.low %v3371_v7, %v3370_v53  ;;  %v9542_v24 = vmul.u32.u64.high %v3371_v7, %v3370_v53, %v9541_v9  ;;  %v9545_v61 = vadd.f32 %v2393_v54, %v8970_v14 }
 0x420   : >> { %v3200_v30 = vsel %vm12156_vm15, %v3199_v8, %v9476_v46  ;;  %v9550_v16 = vadd.s32 127, %v3087_v11  ;;  %v3287_v20 = vclz %v6435_v50  ;;  %vm3542_vm7 = vcmp.gt.s32.totalorder %v3541_v59, 0 }
 0x421   : >> { %v3362_v29 = vsel %vm3356_vm1, %v3359_v38, %v3361_v3  ;;  %v3381_v60 = vadd.s32 1, %v9528_v36  ;;  %v3538_v23 = vand.u32 8388607, %v12117_v2  ;;  %v3543_v31 = vsel %vm3542_vm7, %v3541_v59, 0 }
 0x422   : >> { %v12472_v54 = vxor.u32 2147483648, %v9455_v0  ;;  %6884 = vsinq.f32 %v9460_v25  ;;  %v12474_v8 = vand.u32 2147483647, %v9183_v57  ;;  %v12475_v18 = vmov 0 }
 0x423   : >> { %v3545_v11 = vand.u32 31, %v3543_v31  ;;  %v9578_v3 = vshrl.u32 %v3067_v51, %v3083_v19  ;;  %v6436_v25 = vadd.s32 4294967294, %v3287_v20  ;;  %v3378_v53 = vmul.u32 %v3371_v7, %v3362_v29 }
 0x424   : >> { %v9562_v46 = vsel %vm12151_vm6, %v12472_v54, %v9455_v0  ;;  %vm9567_vm13 = vcmp.le.f32.partialorder %v12474_v8, 0.7853982  ;;  %v9581_v0 = vadd.f32 %v2482_v42, %v8970_v14  ;;  %vm3380_vm14 = vc.u32 %v9542_v24, %v9527_v26 }
 0x425   : >> { %12473 = vst [vmem:[#allocation40_spill] sm:$0xff] %v9562_v46  ;;  %v12476_v18 = vsel %vm9567_vm13, 4294967295, %v12475_v18  ;;  %v9574_v50 = vsel %vm9567_vm13, %v9183_v57, %v3200_v30  ;;  %v3546_v59 = vsub.s32 32, %v3545_v11  ;;  %v3089_v9 = vshll.u32 %v9550_v16, 23 }
 0x426   : >> { %12477 = vst [vmem:[#allocation41_spill] sm:$0xff] %v12476_v18  ;;  %v3382_v54 = vsel %vm3380_vm14, %v3381_v60, %v9528_v36  ;;  %v3539_v30 = vor.u32 8388608, %v3538_v23  ;;  %v3430_v8 = vand.u32 2139095040, %v9545_v61  ;;  %v3544_v38 = vshrl.u32 %v3543_v31, 5 }
 0x427   : >> { %v3383_v2 = vadd.s32 %v3382_v54, %v3378_v53  ;;  %v3549_v51 = vshrl.u32 %v12288_v41, %v3546_v59  ;;  %v3552_v14 = vshrl.u32 %v12289_v58, %v3546_v59  ;;  %v3548_v19 = vshll.u32 %v12296_v35, %v3545_v11 }
 0x428   : >> { %v3551_v7 = vshll.u32 %v12288_v41, %v3545_v11  ;;  %v3554_v20 = vshll.u32 %v12289_v58, %v3545_v11  ;;  %v3555_v42 = vshrl.u32 %v12290_v34, %v3546_v59  ;;  %vm6437_vm4 = vcmp.lt.s32.totalorder %v6436_v25, 0 }
 0x429   : >> { %v3384_v16 = vadd.s32 536870912, %v3383_v2  ;;  %v3557_v36 = vshll.u32 %v12290_v34, %v3545_v11  ;;  %v3558_v29 = vshrl.u32 %v12291_v52, %v3546_v59  ;;  %v3550_v60 = vor.u32 %v3549_v51, %v3548_v19 }
 0x42a   : >> { %v3553_v23 = vor.u32 %v3552_v14, %v3551_v7  ;;  %v3556_v31 = vor.u32 %v3555_v42, %v3554_v20  ;;  %v3560_v10 = vshll.u32 %v12291_v52, %v3545_v11  ;;  %v3561_v44 = vshrl.u32 %v12292_v48, %v3546_v59 }
 0x42b   : >> { %v9597_v54 = vshrl.u32 %v3384_v16, 30  ;;  %v3559_v37 = vor.u32 %v3558_v29, %v3557_v36  ;;  %v3290_v12 = vsel %vm6437_vm4, 0, %v6436_v25  ;;  %vm3566_vm10 = vcmp.lt.s32.totalorder %v3544_v38, 4 }
 0x42c   : >> { %v3579_v6 = vshll.u32 %v3539_v30, 8  ;;  %v3431_v46 = vshrl.u32 %v3430_v8, 23  ;;  %v3562_v33 = vor.u32 %v3561_v44, %v3560_v10  ;;  %vm3563_vm1 = vcmp.lt.s32.totalorder %v3544_v38, 1 }
 0x42d   : >> { %v3386_v39 = vshll.u32 %v9597_v54, 30  ;;  %v3568_v51 = vsel %vm3566_vm10, %v3556_v31, 2102212464  ;;  %v3547_v14 = vshrl.u32 %v12296_v35, %v3546_v59  ;;  %vm3565_vm7 = vcmp.lt.s32.totalorder %v3544_v38, 3 }
 0x42e   : >> { %v3571_v19 = vsel %vm3563_vm1, %v3550_v60, %v3553_v23  ;;  %v3572_v7 = vsel %vm3566_vm10, %v3559_v37, 920167782  ;;  %vm3564_vm14 = vcmp.lt.s32.totalorder %v3544_v38, 2  ;;  %v3575_v25 = vsel %vm3563_vm1, %v3553_v23, %v3556_v31 }
 0x42f   : >> { %v9605_v20 = vsub.s32 %v3383_v2, %v3386_v39  ;;  %v3573_v11 = vsel %vm3565_vm7, %v3556_v31, %v3572_v7  ;;  %v9607_v42 = vpop.eup %6884  ;;  %v3567_v30 = vsel %vm3563_vm1, %v3547_v14, %v3550_v60  ;;  %v3569_v8 = vsel %vm3565_vm7, %v3553_v23, %v3568_v51 }
 0x430   : >> { %12478 = vst [vmem:[#allocation36_spill] sm:$0xff] %v9607_v42  ;;  %v3574_v44 = vsel %vm3564_vm14, %v3571_v19, %v3573_v11  ;;  %v3576_v10 = vsel %vm3566_vm10, %v3562_v33, 1326507024  ;;  %v3291_v39 = vsub.s32 32, %v3290_v12  ;;  %v3295_v2 = vsub.s32 4294967266, %v3290_v12 }
 0x431   : >> { %v3389_v16 = vsub.s32 0, %v9605_v20  ;;  %v3577_v59 = vsel %vm3565_vm7, %v3559_v37, %v3576_v10  ;;  %v9612_v36 = vmul.u32.u64.low %v3579_v6, %v3574_v44  ;;  %v9613_v29 = vmul.u32.u64.high %v3579_v6, %v3574_v44, %v9612_v36 }
 0x432   : >> { %v3578_v7 = vsel %vm3564_vm14, %v3575_v25, %v3577_v59  ;;  %v6442_v31 = vadd.s32 4294967169, %v3431_v46  ;;  %v3570_v60 = vsel %vm3564_vm14, %v3567_v30, %v3569_v8  ;;  %6886 = vcosq.f32 %v9574_v50 }
 0x433   : >> { %v6439_v53 = vmin.u32 %v3389_v16, %v9605_v20  ;;  %v9619_v23 = vmul.u32.u64.low %v3579_v6, %v3578_v7  ;;  %v9620_v51 = vmul.u32.u64.high %v3579_v6, %v3578_v7, %v9619_v23  ;;  %v9623_v33 = vor.u32 4788187, %v3089_v9 }
 0x434   : >> { %v3275_v37 = vadd.s32 %v9433_v15, %v9431_v62  ;;  %v3437_v14 = vadd.s32 1, %v6442_v31  ;;  %v12479_v19 = vshll.u32 %v9399_v49, %v9479_v22  ;;  %v3589_v38 = vadd.s32 1, %v9613_v29 }
 0x435   : >> { %v3391_v11 = vclz %v6439_v53  ;;  %v12480_v25 = vand.u32 2147483647, %v9545_v61  ;;  %v9636_v44 = vadd.s32 127, %v3295_v2  ;;  %v3586_v9 = vmul.u32 %v3579_v6, %v3570_v60 }
 0x436   : >> { %v9631_v46 = vor.u32 %v9578_v3, %v12479_v19  ;;  %v3293_v8 = vshrl.u32 %v3275_v37, %v3291_v39  ;;  %vm3438_vm4 = vcmp.gt.s32.totalorder %v3437_v14, 0  ;;  %vm3588_vm10 = vc.u32 %v9620_v51, %v9612_v36 }
 0x437   : >> { %v3434_v30 = vand.u32 8388607, %v12480_v25  ;;  %v6440_v10 = vadd.s32 4294967294, %v3391_v11  ;;  %v3439_v62 = vsel %vm3438_vm4, %v3437_v14, 0  ;;  %v3638_v49 = vand.u32 2139095040, %v9581_v0 }
 0x438   : >> { %v3292_v22 = vshll.u32 %v9501_v56, %v3290_v12  ;;  %v3590_v3 = vsel %vm3588_vm10, %v3589_v38, %v9613_v29  ;;  %v3441_v53 = vand.u32 31, %v3439_v62  ;;  %v3379_v16 = vadd.s32 %v9527_v26, %v9542_v24 }
 0x439   : >> { %vm6441_vm1 = vcmp.lt.s32.totalorder %v6440_v10, 0  ;;  %v3591_v6 = vadd.s32 %v3590_v3, %v3586_v9  ;;  %v3297_v2 = vshll.u32 %v9636_v44, 23  ;;  %v3435_v37 = vor.u32 8388608, %v3434_v30 }
 0x43a   : >> { %v9647_v39 = vor.u32 %v3293_v8, %v3292_v22  ;;  %v3394_v7 = vsel %vm6441_vm1, 0, %v6440_v10  ;;  %v3442_v31 = vsub.s32 32, %v3441_v53  ;;  %v3639_v12 = vshrl.u32 %v3638_v49, 23 }
 0x43b   : >> { %v3399_v60 = vsub.s32 4294967266, %v3394_v7  ;;  %v3592_v23 = vadd.s32 536870912, %v3591_v6  ;;  %v9650_v56 = vshrl.u32 %v3439_v62, 5  ;;  %v3444_v29 = vshll.u32 %v12296_v35, %v3441_v53 }
 0x43c   : >> { %v3445_v26 = vshrl.u32 %v12288_v41, %v3442_v31  ;;  %v3448_v24 = vshrl.u32 %v12289_v58, %v3442_v31  ;;  %v3395_v14 = vsub.s32 32, %v3394_v7  ;;  %v3447_v11 = vshll.u32 %v12288_v41, %v3441_v53 }
 0x43d   : >> { %v9655_v19 = vshrl.u32 %v3592_v23, 30  ;;  %v3451_v38 = vshrl.u32 %v12290_v34, %v3442_v31  ;;  %v3400_v25 = vadd.s32 127, %v3399_v60  ;;  %v3450_v8 = vshll.u32 %v12289_v58, %v3441_v53 }
 0x43e   : >> { %v3453_v30 = vshll.u32 %v12290_v34, %v3441_v53  ;;  %v3454_v44 = vshrl.u32 %v12291_v52, %v3442_v31  ;;  %v3446_v10 = vor.u32 %v3445_v26, %v3444_v29  ;;  %v3449_v62 = vor.u32 %v3448_v24, %v3447_v11 }
 0x43f   : >> { %v3594_v9 = vshll.u32 %v9655_v19, 30  ;;  %v9663_v49 = vshll.u32 %v3435_v37, 8  ;;  %v3452_v22 = vor.u32 %v3451_v38, %v3450_v8  ;;  %v3456_v23 = vshll.u32 %v12291_v52, %v3441_v53  ;;  %v9667_v59 = vpop.eup %6886 }
 0x440   : >> { %v3455_v3 = vor.u32 %v3454_v44, %v3453_v30  ;;  %v3457_v15 = vshrl.u32 %v12292_v48, %v3442_v31  ;;  %12481 = vst [vmem:[#allocation47_spill] sm:$0xff] %v9667_v59  ;;  %v3396_v60 = vshll.u32 %v9605_v20, %v3394_v7  ;;  %v3397_v5 = vshrl.u32 %v3379_v16, %v3395_v14 }
 0x441   : >> { %v9670_v18 = vsub.s32 %v3591_v6, %v3594_v9  ;;  %v6450_v27 = vadd.s32 4294967169, %v3639_v12  ;;  %v3401_v43 = vshll.u32 %v3400_v25, 23  ;;  %v3443_v29 = vshrl.u32 %v12296_v35, %v3442_v31 }
 0x442   : >> { %v3458_v26 = vor.u32 %v3457_v15, %v3456_v23  ;;  %vm3459_vm7 = vcmp.lt.s32.totalorder %v9650_v56, 1  ;;  %vm3461_vm14 = vcmp.lt.s32.totalorder %v9650_v56, 3  ;;  %vm3462_vm4 = vcmp.lt.s32.totalorder %v9650_v56, 4 }
 0x443   : >> { %v3597_v37 = vsub.s32 0, %v9670_v18  ;;  %v3467_v53 = vsel %vm3459_vm7, %v3446_v10, %v3449_v62  ;;  %v3464_v20 = vsel %vm3462_vm4, %v3452_v22, 2102212464  ;;  %v3468_v16 = vsel %vm3462_vm4, %v3455_v3, 920167782 }
 0x444   : >> { %v3471_v6 = vsel %vm3459_vm7, %v3449_v62, %v3452_v22  ;;  %v3472_v7 = vsel %vm3462_vm4, %v3458_v26, 1326507024  ;;  %v3398_v12 = vor.u32 %v3397_v5, %v3396_v60  ;;  %vm3460_vm10 = vcmp.lt.s32.totalorder %v9650_v56, 2  ;;  %v2397_v26 = vpop.f32.mrf.mxu0 }
 0x445   : >> { %v6447_v15 = vmin.u32 %v3597_v37, %v9670_v18  ;;  %v3469_v31 = vsel %vm3461_vm14, %v3452_v22, %v3468_v16  ;;  %v3402_v24 = vor.u32 4788187, %v3401_v43  ;;  %v3473_v11 = vsel %vm3461_vm14, %v3455_v3, %v3472_v7  ;;  %v2486_v37 = vpop.f32.mrf.mxu1 }
 0x446   : >> { %v3470_v14 = vsel %vm3460_vm10, %v3467_v53, %v3469_v31  ;;  %v3645_v38 = vadd.s32 1, %v6450_v27  ;;  %v3463_v8 = vsel %vm3459_vm7, %v3443_v29, %v3446_v10  ;;  %v3465_v5 = vsel %vm3461_vm14, %v3449_v62, %v3464_v20 }
 0x447   : >> { %v3599_v25 = vclz %v6447_v15  ;;  %v3474_v30 = vsel %vm3460_vm10, %v3471_v6, %v3473_v11  ;;  %v9700_v9 = vmul.u32.u64.low %v9663_v49, %v3470_v14  ;;  %v9701_v22 = vmul.u32.u64.high %v9663_v49, %v3470_v14, %v9700_v9 }
 0x448   : >> { %v9696_v44 = vmul.u32.u64.low %v9663_v49, %v3474_v30  ;;  %v9697_v43 = vmul.u32.u64.high %v9663_v49, %v3474_v30, %v9696_v44  ;;  %v3093_v27 = vcvt.s32.f32 %v9631_v46  ;;  %v9705_v3 = vor.u32 4788187, %v3297_v2 }
 0x449   : >> { %v6448_v10 = vadd.s32 4294967294, %v3599_v25  ;;  %vm3646_vm1 = vcmp.gt.s32.totalorder %v3645_v38, 0  ;;  %6888 = vsinq.f32 %v9574_v50  ;;  %v3403_v62 = vand.u32 2147483647, %v3402_v24 }
 0x44a   : >> { %v12482_v23 = vand.u32 2147483647, %v9581_v0  ;;  %v3647_v29 = vsel %vm3646_vm1, %v3645_v38, 0  ;;  %v12483_v53 = vand.u32 2147483647, %v9623_v33  ;;  %v3466_v46 = vsel %vm3460_vm10, %v3463_v8, %v3465_v5 }
 0x44b   : >> { %vm6449_vm7 = vcmp.lt.s32.totalorder %v6448_v10, 0  ;;  %v3649_v2 = vand.u32 31, %v3647_v29  ;;  %v3405_v6 = vcvt.s32.f32 %v3398_v12  ;;  %vm3484_vm14 = vc.u32 %v9697_v43, %v9700_v9 }
 0x44c   : >> { %v3642_v60 = vand.u32 8388607, %v12482_v23  ;;  %v9712_v20 = vmul.f32 %v3093_v27, %v12483_v53  ;;  %v9717_v50 = vsel %vm6449_vm7, 0, %v6448_v10  ;;  %v3485_v15 = vadd.s32 1, %v9701_v22 }
 0x44d   : >> { %v9724_v33 = vadd.f32 %v2397_v26, %v9089_v45  ;;  %v9727_v31 = vadd.f32 %v2486_v37, %v9089_v45  ;;  %v3406_v56 = vmul.f32 %v3405_v6, %v3403_v62  ;;  %v3482_v24 = vmul.u32 %v9663_v49, %v3466_v46 }
 0x44e   : >> { %v3643_v14 = vor.u32 8388608, %v3642_v60  ;;  %v3650_v12 = vsub.s32 32, %v3649_v2  ;;  %v3607_v11 = vsub.s32 4294967266, %v9717_v50  ;;  %v3486_v38 = vsel %vm3484_vm14, %v3485_v15, %v9701_v22 }
 0x44f   : >> { %v3648_v25 = vshrl.u32 %v3647_v29, 5  ;;  %v3652_v8 = vshll.u32 %v12296_v35, %v3649_v2  ;;  %v3487_v5 = vadd.s32 %v3486_v38, %v3482_v24  ;;  %v3655_v44 = vshll.u32 %v12288_v41, %v3649_v2 }
 0x450   : >> { %v3653_v30 = vshrl.u32 %v12288_v41, %v3650_v12  ;;  %v3656_v27 = vshrl.u32 %v12289_v58, %v3650_v12  ;;  %v3658_v10 = vshll.u32 %v12289_v58, %v3649_v2  ;;  %v3659_v49 = vshrl.u32 %v12290_v34, %v3650_v12 }
 0x451   : >> { %v3661_v62 = vshll.u32 %v12290_v34, %v3649_v2  ;;  %v3662_v23 = vshrl.u32 %v12291_v52, %v3650_v12  ;;  %vm3325_vm4 = vcmp.lt.s32.totalorder %v9352_v13, 0  ;;  %v3587_v22 = vadd.s32 %v9612_v36, %v9620_v51 }
 0x452   : >> { %v3488_v60 = vadd.s32 536870912, %v3487_v5  ;;  %v3654_v29 = vor.u32 %v3653_v30, %v3652_v8  ;;  %v3657_v26 = vor.u32 %v3656_v27, %v3655_v44  ;;  %v3407_v37 = vxor.u32 2147483648, %v3406_v56 }
 0x453   : >> { %v3660_v53 = vor.u32 %v3659_v49, %v3658_v10  ;;  %v3663_v46 = vor.u32 %v3662_v23, %v3661_v62  ;;  %v3683_v6 = vshll.u32 %v3643_v14, 8  ;;  %v3664_v24 = vshll.u32 %v12291_v52, %v3649_v2 }
 0x454   : >> { %v9743_v15 = vshrl.u32 %v3488_v60, 30  ;;  %v3665_v38 = vshrl.u32 %v12292_v48, %v3650_v12  ;;  %v3742_v16 = vand.u32 2139095040, %v9724_v33  ;;  %v3603_v7 = vsub.s32 32, %v9717_v50 }
 0x455   : >> { %v3608_v59 = vadd.s32 127, %v3607_v11  ;;  %vm3667_vm10 = vcmp.lt.s32.totalorder %v3648_v25, 1  ;;  %vm3670_vm1 = vcmp.lt.s32.totalorder %v3648_v25, 4  ;;  %v12484_v36 = vand.u32 2147483647, %v9352_v13 }
 0x456   : >> { %v3490_v14 = vshll.u32 %v9743_v15, 30  ;;  %v3666_v8 = vor.u32 %v3665_v38, %v3664_v24  ;;  %v3672_v30 = vsel %vm3670_vm1, %v3660_v53, 2102212464  ;;  %v3675_v2 = vsel %vm3667_vm10, %v3654_v29, %v3657_v26  ;;  %v9757_v44 = vpop.eup %6888 }
 0x457   : >> { %vm9751_vm7 = vcmp.le.f32.partialorder %v12484_v36, 0.7853982  ;;  %12487 = vst [vmem:[#allocation37_spill] sm:$0xff] %v9757_v44  ;;  %v3651_v27 = vshrl.u32 %v12296_v35, %v3650_v12  ;;  %vm3669_vm14 = vcmp.lt.s32.totalorder %v3648_v25, 3  ;;  %v3676_v11 = vsel %vm3670_vm1, %v3663_v46, 920167782 }
 0x458   : >> { %v3679_v10 = vsel %vm3667_vm10, %v3657_v26, %v3660_v53  ;;  %v9761_v49 = vsub.s32 %v3487_v5, %v3490_v14  ;;  %vm3668_vm3 = vcmp.lt.s32.totalorder %v3648_v25, 2  ;;  %v3677_v62 = vsel %vm3669_vm14, %v3660_v53, %v3676_v11 }
 0x459   : >> { %v3680_v23 = vsel %vm3670_vm1, %v3666_v8, 1326507024  ;;  %vm12162_vm0 = vcmp.lt.s32.totalorder %v9180_v40, 0  ;;  %v3671_v60 = vsel %vm3667_vm10, %v3651_v27, %v3654_v29  ;;  %v3673_v24 = vsel %vm3669_vm14, %v3657_v26, %v3672_v30 }
 0x45a   : >> { %v3678_v38 = vsel %vm3668_vm3, %v3675_v2, %v3677_v62  ;;  %v3681_v36 = vsel %vm3669_vm14, %v3663_v46, %v3680_v23  ;;  %v3493_v44 = vsub.s32 0, %v9761_v49  ;;  %v3408_v5 = vsel %vm3325_vm4, %v3407_v37, %v3406_v56 }
 0x45b   : >> { %v3682_v12 = vsel %vm3668_vm3, %v3679_v10, %v3681_v36  ;;  %v9768_v57 = vmul.u32.u64.low %v3683_v6, %v3678_v38  ;;  %v9769_v47 = vmul.u32.u64.high %v3683_v6, %v3678_v38, %v9768_v57  ;;  %v3743_v8 = vshrl.u32 %v3742_v16, 23 }
 0x45c   : >> { %v9774_v53 = vmul.u32.u64.low %v3683_v6, %v3682_v12  ;;  %v9775_v14 = vmul.u32.u64.high %v3683_v6, %v3682_v12, %v9774_v53  ;;  %v3605_v29 = vshrl.u32 %v3587_v22, %v3603_v7  ;;  %v3609_v26 = vshll.u32 %v3608_v59, 23 }
 0x45d   : >> { %v6443_v30 = vmin.u32 %v3493_v44, %v9761_v49  ;;  %v3674_v46 = vsel %vm3668_vm3, %v3671_v60, %v3673_v24  ;;  %v3095_v2 = vxor.u32 2147483648, %v9712_v20  ;;  %v12488_v27 = vand.u32 2147483647, %v9705_v3 }
 0x45e   : >> { %v12489_v11 = vcvt.s32.f32 %v9647_v39  ;;  %v12141_v56 = vand.u32 2147483647, %v9724_v33  ;;  %v6454_v37 = vadd.s32 4294967169, %v3743_v8  ;;  %v3604_v16 = vshll.u32 %v9670_v18, %v9717_v50  ;;  %v2399_v50 = vpop.f32.mrf.mxu0 }
 0x45f   : >> { %v3495_v7 = vclz %v6443_v30  ;;  %v3693_v59 = vadd.s32 1, %v9769_v47  ;;  %v3950_v25 = vand.u32 2139095040, %v9727_v31  ;;  %v9794_v22 = vsel %vm9751_vm7, %v9352_v13, %v3408_v5 }
 0x460   : >> { %v9784_v10 = vmul.f32 %v12489_v11, %v12488_v27  ;;  %v3690_v3 = vmul.u32 %v3683_v6, %v3674_v46  ;;  %vm3692_vm3 = vc.u32 %v9775_v14, %v9768_v57  ;;  %v3749_v39 = vadd.s32 1, %v6454_v37 }
 0x461   : >> { %v3606_v44 = vor.u32 %v3605_v29, %v3604_v16  ;;  %v3610_v62 = vor.u32 4788187, %v3609_v26  ;;  %v6444_v23 = vadd.s32 4294967294, %v3495_v7  ;;  %v3694_v18 = vsel %vm3692_vm3, %v3693_v59, %v9769_v47 }
 0x462   : >> { %v3695_v60 = vadd.s32 %v3694_v18, %v3690_v3  ;;  %v3746_v24 = vand.u32 8388607, %v12141_v56  ;;  %vm3750_vm10 = vcmp.gt.s32.totalorder %v3749_v39, 0  ;;  %v12140_v38 = vand.u32 2147483647, %v9727_v31 }
 0x463   : >> { %v9805_v6 = vsel %vm12162_vm0, %v3095_v2, %v9712_v20  ;;  %v3751_v12 = vsel %vm3750_vm10, %v3749_v39, 0  ;;  %v3951_v5 = vshrl.u32 %v3950_v25, 23  ;;  %vm6445_vm1 = vcmp.lt.s32.totalorder %v6444_v23, 0 }
 0x464   : >> { %v3696_v53 = vadd.s32 536870912, %v3695_v60  ;;  %v3753_v47 = vand.u32 31, %v3751_v12  ;;  %v9809_v8 = vadd.f32 %v2399_v50, %v9089_v45  ;;  %6890 = vcosq.f32 %v9794_v22 }
 0x465   : >> { %v3611_v29 = vand.u32 2147483647, %v3610_v62  ;;  %v3613_v26 = vcvt.s32.f32 %v3606_v44  ;;  %v3483_v30 = vadd.s32 %v9700_v9, %v9697_v43  ;;  %v3747_v20 = vor.u32 8388608, %v3746_v24 }
 0x466   : >> { %v9814_v46 = vshrl.u32 %v3696_v53, 30  ;;  %v3754_v2 = vsub.s32 32, %v3753_v47  ;;  %v9818_v27 = vand.u32 8388607, %v12140_v38  ;;  %v9820_v11 = vsel %vm6445_vm1, 0, %v6444_v23 }
 0x467   : >> { %v3752_v37 = vshrl.u32 %v3751_v12, 5  ;;  %v3756_v16 = vshll.u32 %v12296_v35, %v3753_v47  ;;  %v6462_v7 = vadd.s32 4294967169, %v3951_v5  ;;  %v3759_v43 = vshll.u32 %v12288_v41, %v3753_v47 }
 0x468   : >> { %v3698_v59 = vshll.u32 %v9814_v46, 30  ;;  %v3757_v25 = vshrl.u32 %v12288_v41, %v3754_v2  ;;  %v3760_v9 = vshrl.u32 %v12289_v58, %v3754_v2  ;;  %v3762_v3 = vshll.u32 %v12289_v58, %v3753_v47 }
 0x469   : >> { %v3763_v39 = vshrl.u32 %v12290_v34, %v3754_v2  ;;  %v3765_v44 = vshll.u32 %v12290_v34, %v3753_v47  ;;  %v3766_v62 = vshrl.u32 %v12291_v52, %v3754_v2  ;;  %v9831_v23 = vmul.f32 %v3613_v26, %v3611_v29 }
 0x46a   : >> { %v9833_v18 = vsub.s32 %v3695_v60, %v3698_v59  ;;  %v3758_v50 = vor.u32 %v3757_v25, %v3756_v16  ;;  %v3761_v24 = vor.u32 %v3760_v9, %v3759_v43  ;;  %v3787_v53 = vshll.u32 %v3747_v20, 8 }
 0x46b   : >> { %v3764_v12 = vor.u32 %v3763_v39, %v3762_v3  ;;  %v3767_v5 = vor.u32 %v3766_v62, %v3765_v44  ;;  %v3955_v38 = vor.u32 8388608, %v9818_v27  ;;  %vm12161_vm14 = vcmp.lt.s32.totalorder %v9263_v32, 0 }
 0x46c   : >> { %v3499_v56 = vsub.s32 32, %v9820_v11  ;;  %v3701_v36 = vsub.s32 0, %v9833_v18  ;;  %v3768_v42 = vshll.u32 %v12291_v52, %v3753_v47  ;;  %v3769_v29 = vshrl.u32 %v12292_v48, %v3754_v2 }
 0x46d   : >> { %v3503_v60 = vsub.s32 4294967266, %v9820_v11  ;;  %vm3771_vm3 = vcmp.lt.s32.totalorder %v3752_v37, 1  ;;  %vm3774_vm10 = vcmp.lt.s32.totalorder %v3752_v37, 4  ;;  %v3957_v26 = vadd.s32 1, %v6462_v7 }
 0x46e   : >> { %v6451_v16 = vmin.u32 %v3701_v36, %v9833_v18  ;;  %v3770_v20 = vor.u32 %v3769_v29, %v3768_v42  ;;  %v3776_v59 = vsel %vm3774_vm10, %v3764_v12, 2102212464  ;;  %v3779_v27 = vsel %vm3771_vm3, %v3758_v50, %v3761_v24 }
 0x46f   : >> { %v3755_v25 = vshrl.u32 %v12296_v35, %v3754_v2  ;;  %vm3773_vm1 = vcmp.lt.s32.totalorder %v3752_v37, 3  ;;  %v3780_v43 = vsel %vm3774_vm10, %v3767_v5, 920167782  ;;  %v3783_v9 = vsel %vm3771_vm3, %v3761_v24, %v3764_v12 }
 0x470   : >> { %v3703_v3 = vclz %v6451_v16  ;;  %vm3772_vm11 = vcmp.lt.s32.totalorder %v3752_v37, 2  ;;  %v3781_v47 = vsel %vm3773_vm1, %v3764_v12, %v3780_v43  ;;  %v3784_v39 = vsel %vm3774_vm10, %v3770_v20, 1326507024 }
 0x471   : >> { %v3775_v44 = vsel %vm3771_vm3, %v3755_v25, %v3758_v50  ;;  %v3777_v62 = vsel %vm3773_vm1, %v3761_v24, %v3776_v59  ;;  %v3782_v63 = vsel %vm3772_vm11, %v3779_v27, %v3781_v47  ;;  %v3785_v4 = vsel %vm3773_vm1, %v3767_v5, %v3784_v39  ;;  %v9845_v7 = vpop.eup %6890 }
 0x472   : >> { %v6452_v36 = vadd.s32 4294967294, %v3703_v3  ;;  %v3786_v42 = vsel %vm3772_vm11, %v3783_v9, %v3785_v4  ;;  %v9848_v29 = vmul.u32.u64.low %v3787_v53, %v3782_v63  ;;  %v9849_v28 = vmul.u32.u64.high %v3787_v53, %v3782_v63, %v9848_v29 }
 0x473   : >> { %v3501_v2 = vshrl.u32 %v3483_v30, %v3499_v56  ;;  %v9852_v21 = vmul.u32.u64.low %v3787_v53, %v3786_v42  ;;  %v9853_v16 = vmul.u32.u64.high %v3787_v53, %v3786_v42, %v9852_v21  ;;  %vm3958_vm6 = vcmp.gt.s32.totalorder %v3957_v26, 0 }
 0x474   : >> { %v9855_v12 = vadd.s32 127, %v3503_v60  ;;  %vm6453_vm3 = vcmp.lt.s32.totalorder %v6452_v36, 0  ;;  %v3778_v50 = vsel %vm3772_vm11, %v3775_v44, %v3777_v62  ;;  %v3959_v24 = vsel %vm3958_vm6, %v3957_v26, 0 }
 0x475   : >> { %v12490_v5 = vxor.u32 2147483648, %v9784_v10  ;;  %6892 = vsinq.f32 %v9794_v22  ;;  %v3615_v63 = vxor.u32 2147483648, %v9831_v23  ;;  %v3961_v56 = vand.u32 31, %v3959_v24 }
 0x476   : >> { %v3500_v21 = vshll.u32 %v9761_v49, %v9820_v11  ;;  %v3691_v30 = vadd.s32 %v9768_v57, %v9775_v14  ;;  %v3797_v37 = vadd.s32 1, %v9849_v28  ;;  %v12152_v60 = vand.u32 2147483647, %v9809_v8 }
 0x477   : >> { %v9863_v4 = vsel %vm12161_vm14, %v12490_v5, %v9784_v10  ;;  %v9873_v26 = vsel %vm6453_vm3, 0, %v6452_v36  ;;  %v3794_v20 = vmul.u32 %v3787_v53, %v3778_v50  ;;  %vm3796_vm11 = vc.u32 %v9853_v16, %v9848_v29 }
 0x478   : >> { %12491 = vst [vmem:[#allocation49_spill] sm:$0xff] %v9863_v4  ;;  %v3962_v10 = vsub.s32 32, %v3961_v56  ;;  %v9877_v22 = vor.u32 %v3501_v2, %v3500_v21  ;;  %v3505_v59 = vshll.u32 %v9855_v12, 23  ;;  %v3798_v49 = vsel %vm3796_vm11, %v3797_v37, %v9849_v28 }
 0x479   : >> { %v9881_v11 = vshll.u32 %v3955_v38, 8  ;;  %v3799_v57 = vadd.s32 %v3798_v49, %v3794_v20  ;;  %v3964_v14 = vshll.u32 %v12296_v35, %v3961_v56  ;;  %v3711_v53 = vsub.s32 4294967266, %v9873_v26 }
 0x47a   : >> { %v3965_v27 = vshrl.u32 %v12288_v41, %v3962_v10  ;;  %v3968_v25 = vshrl.u32 %v12289_v58, %v3962_v10  ;;  %v3967_v43 = vshll.u32 %v12288_v41, %v3961_v56  ;;  %v3970_v9 = vshll.u32 %v12289_v58, %v3961_v56 }
 0x47b   : >> { %v3971_v3 = vshrl.u32 %v12290_v34, %v3962_v10  ;;  %vm12163_vm6 = vcmp.lt.s32.totalorder %v9466_v55, 0  ;;  %v3800_v28 = vadd.s32 536870912, %v3799_v57  ;;  %v3960_v38 = vshrl.u32 %v3959_v24, 5 }
 0x47c   : >> { %v3966_v47 = vor.u32 %v3965_v27, %v3964_v14  ;;  %v3846_v39 = vand.u32 2139095040, %v9809_v8  ;;  %v3969_v44 = vor.u32 %v3968_v25, %v3967_v43  ;;  %v3973_v36 = vshll.u32 %v12290_v34, %v3961_v56 }
 0x47d   : >> { %v3972_v62 = vor.u32 %v3971_v3, %v3970_v9  ;;  %v3974_v42 = vshrl.u32 %v12291_v52, %v3962_v10  ;;  %v9894_v2 = vshrl.u32 %v3800_v28, 30  ;;  %v3976_v12 = vshll.u32 %v12291_v52, %v3961_v56 }
 0x47e   : >> { %v3977_v50 = vshrl.u32 %v12292_v48, %v3962_v10  ;;  %v3850_v5 = vand.u32 8388607, %v12152_v60  ;;  %v3707_v24 = vsub.s32 32, %v9873_v26  ;;  %v3712_v21 = vadd.s32 127, %v3711_v53 }
 0x47f   : >> { %v3963_v37 = vshrl.u32 %v12296_v35, %v3962_v10  ;;  %v3975_v20 = vor.u32 %v3974_v42, %v3973_v36  ;;  %v3802_v49 = vshll.u32 %v9894_v2, 30  ;;  %vm3979_vm10 = vcmp.lt.s32.totalorder %v3960_v38, 1 }
 0x480   : >> { %v3978_v14 = vor.u32 %v3977_v50, %v3976_v12  ;;  %vm3982_vm1 = vcmp.lt.s32.totalorder %v3960_v38, 4  ;;  %vm3981_vm3 = vcmp.lt.s32.totalorder %v3960_v38, 3  ;;  %v3987_v25 = vsel %vm3979_vm10, %v3966_v47, %v3969_v44 }
 0x481   : >> { %v3984_v27 = vsel %vm3982_vm1, %v3972_v62, 2102212464  ;;  %v3988_v56 = vsel %vm3982_vm1, %v3975_v20, 920167782  ;;  %v9903_v43 = vsub.s32 %v3799_v57, %v3802_v49  ;;  %vm3980_vm11 = vcmp.lt.s32.totalorder %v3960_v38, 2  ;;  %v2488_v57 = vpop.f32.mrf.mxu1 }
 0x482   : >> { %v3989_v9 = vsel %vm3981_vm3, %v3972_v62, %v3988_v56  ;;  %v3991_v3 = vsel %vm3979_vm10, %v3969_v44, %v3972_v62  ;;  %v9905_v28 = vpop.eup %6892  ;;  %v3983_v53 = vsel %vm3979_vm10, %v3963_v37, %v3966_v47  ;;  %v3985_v60 = vsel %vm3981_vm3, %v3969_v44, %v3984_v27 }
 0x483   : >> { %v3990_v10 = vsel %vm3980_vm11, %v3987_v25, %v3989_v9  ;;  %v3992_v36 = vsel %vm3982_vm1, %v3978_v14, 1326507024  ;;  %v3805_v42 = vsub.s32 0, %v9903_v43  ;;  %v9917_v62 = vsel %vm12163_vm6, %v3615_v63, %v9831_v23 }
 0x484   : >> { %v3993_v12 = vsel %vm3981_vm3, %v3975_v20, %v3992_v36  ;;  %v9910_v50 = vmul.u32.u64.low %v9881_v11, %v3990_v10  ;;  %v9911_v4 = vmul.u32.u64.high %v9881_v11, %v3990_v10, %v9910_v50  ;;  %v9919_v49 = vor.u32 4788187, %v3505_v59 }
 0x485   : >> { %v3994_v47 = vsel %vm3980_vm11, %v3991_v3, %v3993_v12  ;;  %v3847_v44 = vshrl.u32 %v3846_v39, 23  ;;  %v3709_v37 = vshrl.u32 %v3691_v30, %v3707_v24  ;;  %v6455_v14 = vmin.u32 %v3805_v42, %v9903_v43 }
 0x486   : >> { %v9924_v20 = vmul.u32.u64.low %v9881_v11, %v3994_v47  ;;  %v9925_v27 = vmul.u32.u64.high %v9881_v11, %v3994_v47, %v9924_v20  ;;  %v3713_v25 = vshll.u32 %v3712_v21, 23  ;;  %v3986_v56 = vsel %vm3980_vm11, %v3983_v53, %v3985_v60 }
 0x487   : >> { %v6458_v9 = vadd.s32 4294967169, %v3847_v44  ;;  %v9929_v10 = vadd.f32 %v2488_v57, %v9089_v45  ;;  %v3807_v63 = vclz %v6455_v14  ;;  %v4005_v59 = vadd.s32 1, %v9911_v4 }
 0x488   : >> { %v3851_v39 = vor.u32 8388608, %v3850_v5  ;;  %v3708_v24 = vshll.u32 %v9833_v18, %v9873_v26  ;;  %v3795_v60 = vadd.s32 %v9848_v29, %v9853_v16  ;;  %v4002_v45 = vmul.u32 %v9881_v11, %v3986_v56 }
 0x489   : >> { %v3853_v3 = vadd.s32 1, %v6458_v9  ;;  %v4054_v21 = vand.u32 2139095040, %v9929_v10  ;;  %v6456_v38 = vadd.s32 4294967294, %v3807_v63  ;;  %vm4004_vm10 = vc.u32 %v9925_v27, %v9910_v50 }
 0x48a   : >> { %v9942_v53 = vor.u32 %v3709_v37, %v3708_v24  ;;  %v9944_v5 = vor.u32 4788187, %v3713_v25  ;;  %v4006_v36 = vsel %vm4004_vm10, %v4005_v59, %v9911_v4  ;;  %v9947_v42 = vshll.u32 %v3851_v39, 8 }
 0x48b   : >> { %vm3854_vm1 = vcmp.gt.s32.totalorder %v3853_v3, 0  ;;  %vm6457_vm3 = vcmp.lt.s32.totalorder %v6456_v38, 0  ;;  %v4007_v18 = vadd.s32 %v4006_v36, %v4002_v45  ;;  %v12158_v16 = vand.u32 2147483647, %v9929_v10 }
 0x48c   : >> { %v3855_v26 = vsel %vm3854_vm1, %v3853_v3, 0  ;;  %v3810_v12 = vsel %vm6457_vm3, 0, %v6456_v38  ;;  %v4055_v11 = vshrl.u32 %v4054_v21, 23  ;;  %vm3741_vm10 = vcmp.lt.s32.totalorder %v9724_v33, 0 }
 0x48d   : >> { %v3857_v29 = vand.u32 31, %v3855_v26  ;;  %v3811_v57 = vsub.s32 32, %v3810_v12  ;;  %v3815_v47 = vsub.s32 4294967266, %v3810_v12  ;;  %v4008_v44 = vadd.s32 536870912, %v4007_v18 }
 0x48e   : >> { %v9950_v37 = vshrl.u32 %v3855_v26, 5  ;;  %v3812_v14 = vshll.u32 %v9903_v43, %v3810_v12  ;;  %vm3429_vm0 = vcmp.lt.s32.totalorder %v9545_v61, 0  ;;  %v3420_v51 = vxor.u32 2147483648, %v9905_v28 }
 0x48f   : >> { %v3858_v20 = vsub.s32 32, %v3857_v29  ;;  %v3860_v4 = vshll.u32 %v12296_v35, %v3857_v29  ;;  %v3863_v25 = vshll.u32 %v12288_v41, %v3857_v29  ;;  %v3813_v56 = vshrl.u32 %v3795_v60, %v3811_v57 }
 0x490   : >> { %v3816_v9 = vadd.s32 127, %v3815_v47  ;;  %v9955_v63 = vshrl.u32 %v4008_v44, 30  ;;  %v3866_v59 = vshll.u32 %v12289_v58, %v3857_v29  ;;  %v3869_v21 = vshll.u32 %v12290_v34, %v3857_v29 }
 0x491   : >> { %v3861_v39 = vshrl.u32 %v12288_v41, %v3858_v20  ;;  %v3864_v24 = vshrl.u32 %v12289_v58, %v3858_v20  ;;  %v3867_v3 = vshrl.u32 %v12290_v34, %v3858_v20  ;;  %v3814_v43 = vor.u32 %v3813_v56, %v3812_v14 }
 0x492   : >> { %v3817_v38 = vshll.u32 %v3816_v9, 23  ;;  %v4010_v45 = vshll.u32 %v9955_v63, 30  ;;  %v3870_v36 = vshrl.u32 %v12291_v52, %v3858_v20  ;;  %v12492_v60 = vand.u32 2147483647, %v9466_v55 }
 0x493   : >> { %v3859_v12 = vshrl.u32 %v12296_v35, %v3858_v20  ;;  %v3862_v57 = vor.u32 %v3861_v39, %v3860_v4  ;;  %v3865_v47 = vor.u32 %v3864_v24, %v3863_v25  ;;  %v9973_v44 = vand.u32 8388607, %v12158_v16 }
 0x494   : >> { %vm9966_vm11 = vcmp.le.f32.partialorder %v12492_v60, 0.7853982  ;;  %v3818_v14 = vor.u32 4788187, %v3817_v38  ;;  %v9976_v56 = vsub.s32 %v4007_v18, %v4010_v45  ;;  %v3868_v9 = vor.u32 %v3867_v3, %v3866_v59 }
 0x495   : >> { %v3871_v23 = vor.u32 %v3870_v36, %v3869_v21  ;;  %v3821_v30 = vcvt.s32.f32 %v3814_v43  ;;  %v3872_v60 = vshll.u32 %v12291_v52, %v3857_v29  ;;  %v3873_v17 = vshrl.u32 %v12292_v48, %v3858_v20 }
 0x496   : >> { %vm3875_vm1 = vcmp.lt.s32.totalorder %v9950_v37, 1  ;;  %v3819_v4 = vand.u32 2147483647, %v3818_v14  ;;  %v4013_v25 = vsub.s32 0, %v9976_v56  ;;  %vm3876_vm3 = vcmp.lt.s32.totalorder %v9950_v37, 2 }
 0x497   : >> { %vm3878_vm8 = vcmp.lt.s32.totalorder %v9950_v37, 4  ;;  %v12495_v39 = vand.u32 2147483647, %v9724_v33  ;;  %v3874_v59 = vor.u32 %v3873_v17, %v3872_v60  ;;  %vm3877_vm2 = vcmp.lt.s32.totalorder %v9950_v37, 3 }
 0x498   : >> { %v3883_v29 = vsel %vm3875_vm1, %v3862_v57, %v3865_v47  ;;  %v3884_v20 = vsel %vm3878_vm8, %v3871_v23, 920167782  ;;  %v3822_v24 = vmul.f32 %v3821_v30, %v3819_v4  ;;  %v6463_v3 = vmin.u32 %v4013_v25, %v9976_v56 }
 0x499   : >> { %vm9986_vm15 = vcmp.le.f32.partialorder %v12495_v39, 0.7853982  ;;  %v3880_v21 = vsel %vm3878_vm8, %v3868_v9, 2102212464  ;;  %v3885_v43 = vsel %vm3877_vm2, %v3868_v9, %v3884_v20  ;;  %v3887_v45 = vsel %vm3875_vm1, %v3865_v47, %v3868_v9 }
 0x49a   : >> { %v3886_v38 = vsel %vm3876_vm3, %v3883_v29, %v3885_v43  ;;  %v3888_v36 = vsel %vm3878_vm8, %v3874_v59, 1326507024  ;;  %v6466_v14 = vadd.s32 4294967169, %v4055_v11  ;;  %v3823_v17 = vxor.u32 2147483648, %v3822_v24 }
 0x49b   : >> { %v4015_v60 = vclz %v6463_v3  ;;  %v3879_v39 = vsel %vm3875_vm1, %v3859_v12, %v3862_v57  ;;  %v3889_v16 = vsel %vm3877_vm2, %v3871_v23, %v3888_v36  ;;  %v3881_v32 = vsel %vm3877_vm2, %v3865_v47, %v3880_v21 }
 0x49c   : >> { %v3890_v30 = vsel %vm3876_vm3, %v3887_v45, %v3889_v16  ;;  %v10003_v4 = vmul.u32.u64.low %v9947_v42, %v3886_v38  ;;  %v10004_v25 = vmul.u32.u64.high %v9947_v42, %v3886_v38, %v10003_v4  ;;  %v10011_v11 = vsel %vm9966_vm11, %v9466_v55, %v9917_v62 }
 0x49d   : >> { %v6464_v9 = vadd.s32 4294967294, %v4015_v60  ;;  %v10014_v59 = vmul.u32.u64.low %v9947_v42, %v3890_v30  ;;  %v10015_v12 = vmul.u32.u64.high %v9947_v42, %v3890_v30, %v10014_v59  ;;  %v12498_v23 = vand.u32 2147483647, %v9919_v49 }
 0x49e   : >> { %v12499_v16 = vcvt.s32.f32 %v9877_v22  ;;  %v3717_v47 = vcvt.s32.f32 %v9942_v53  ;;  %v3824_v29 = vsel %vm3741_vm10, %v3823_v17, %v3822_v24  ;;  %v4061_v20 = vadd.s32 1, %v6466_v14 }
 0x49f   : >> { %v3715_v62 = vand.u32 2147483647, %v9944_v5  ;;  %vm6465_vm2 = vcmp.lt.s32.totalorder %v6464_v9, 0  ;;  %v3882_v3 = vsel %vm3876_vm3, %v3879_v39, %v3881_v32  ;;  %v3825_v21 = vsub.s32 4, %v9894_v2 }
 0x4a0   : >> { %v10021_v57 = vmul.f32 %v12499_v16, %v12498_v23  ;;  %v4018_v43 = vsel %vm6465_vm2, 0, %v6464_v9  ;;  %v3901_v49 = vadd.s32 1, %v10004_v25  ;;  %v4059_v22 = vor.u32 8388608, %v9973_v44 }
 0x4a1   : >> { %vm4062_vm8 = vcmp.gt.s32.totalorder %v4061_v20, 0  ;;  %v3827_v38 = vsel %vm9986_vm15, %v9724_v33, %v3824_v29  ;;  %v4003_v24 = vadd.s32 %v9910_v50, %v9925_v27  ;;  %v4019_v45 = vsub.s32 32, %v4018_v43 }
 0x4a2   : >> { %v4023_v36 = vsub.s32 4294967266, %v4018_v43  ;;  %v4020_v37 = vshll.u32 %v9976_v56, %v4018_v43  ;;  %v3898_v32 = vmul.u32 %v9947_v42, %v3882_v3  ;;  %vm3900_vm1 = vc.u32 %v10015_v12, %v10003_v4 }
 0x4a3   : >> { %v4063_v14 = vsel %vm4062_vm8, %v4061_v20, 0  ;;  %v4021_v17 = vshrl.u32 %v4003_v24, %v4019_v45  ;;  %v3902_v60 = vsel %vm3900_vm1, %v3901_v49, %v10004_v25  ;;  %6894 = vcosq.f32 %v3827_v38 }
 0x4a4   : >> { %v4024_v44 = vadd.s32 127, %v4023_v36  ;;  %v10042_v39 = vshrl.u32 %v4063_v14, 5  ;;  %v3903_v30 = vadd.s32 %v3902_v60, %v3898_v32  ;;  %v4065_v9 = vand.u32 31, %v4063_v14 }
 0x4a5   : >> { %v10044_v50 = vshll.u32 %v4059_v22, 8  ;;  %6896 = vsinq.f32 %v3827_v38  ;;  %v4022_v27 = vor.u32 %v4021_v17, %v4020_v37  ;;  %v10049_v42 = vsel %vm3741_vm10, %v3825_v21, %v9894_v2 }
 0x4a6   : >> { %v4025_v56 = vshll.u32 %v4024_v44, 23  ;;  %vm3949_vm3 = vcmp.lt.s32.totalorder %v9727_v31, 0  ;;  %v3904_v59 = vadd.s32 536870912, %v3903_v30  ;;  %v4066_v23 = vsub.s32 32, %v4065_v9 }
 0x4a7   : >> { %v4068_v25 = vshll.u32 %v12296_v35, %v4065_v9  ;;  %vm4083_vm2 = vcmp.lt.s32.totalorder %v10042_v39, 1  ;;  %v4029_v29 = vcvt.s32.f32 %v4022_v27  ;;  %v4071_v20 = vshll.u32 %v12288_v41, %v4065_v9 }
 0x4a8   : >> { %v4026_v16 = vor.u32 4788187, %v4025_v56  ;;  %v4074_v3 = vshll.u32 %v12289_v58, %v4065_v9  ;;  %v10056_v43 = vshrl.u32 %v3904_v59, 30  ;;  %v4069_v49 = vshrl.u32 %v12288_v41, %v4066_v23 }
 0x4a9   : >> { %v4072_v2 = vshrl.u32 %v12289_v58, %v4066_v23  ;;  %v4077_v21 = vshll.u32 %v12290_v34, %v4065_v9  ;;  %v12500_v22 = vand.u32 2147483647, %v9727_v31  ;;  %v4075_v45 = vshrl.u32 %v12290_v34, %v4066_v23 }
 0x4aa   : >> { %v4027_v24 = vand.u32 2147483647, %v4026_v16  ;;  %v4078_v36 = vshrl.u32 %v12291_v52, %v4066_v23  ;;  %v4080_v37 = vshll.u32 %v12291_v52, %v4065_v9  ;;  %v3906_v32 = vshll.u32 %v10056_v43, 30 }
 0x4ab   : >> { %vm10063_vm10 = vcmp.le.f32.partialorder %v12500_v22, 0.7853982  ;;  %v4070_v14 = vor.u32 %v4069_v49, %v4068_v25  ;;  %v4073_v17 = vor.u32 %v4072_v2, %v4071_v20  ;;  %v4081_v44 = vshrl.u32 %v12292_v48, %v4066_v23 }
 0x4ac   : >> { %v4030_v60 = vmul.f32 %v4029_v29, %v4027_v24  ;;  %v4076_v27 = vor.u32 %v4075_v45, %v4074_v3  ;;  %v4079_v56 = vor.u32 %v4078_v36, %v4077_v21  ;;  %vm4084_vm8 = vcmp.lt.s32.totalorder %v10042_v39, 2 }
 0x4ad   : >> { %v10073_v59 = vsub.s32 %v3903_v30, %v3906_v32  ;;  %v4082_v16 = vor.u32 %v4081_v44, %v4080_v37  ;;  %vm4085_vm1 = vcmp.lt.s32.totalorder %v10042_v39, 3  ;;  %vm4086_vm14 = vcmp.lt.s32.totalorder %v10042_v39, 4 }
 0x4ae   : >> { %v4031_v22 = vxor.u32 2147483648, %v4030_v60  ;;  %v4088_v9 = vsel %vm4086_vm14, %v4076_v27, 2102212464  ;;  %v4091_v25 = vsel %vm4083_vm2, %v4070_v14, %v4073_v17  ;;  %v4092_v20 = vsel %vm4086_vm14, %v4079_v56, 920167782 }
 0x4af   : >> { %v3909_v49 = vsub.s32 0, %v10073_v59  ;;  %v4067_v29 = vshrl.u32 %v12296_v35, %v4066_v23  ;;  %v4093_v3 = vsel %vm4085_vm1, %v4076_v27, %v4092_v20  ;;  %v4095_v30 = vsel %vm4083_vm2, %v4073_v17, %v4076_v27 }
 0x4b0   : >> { %v4032_v2 = vsel %vm3949_vm3, %v4031_v22, %v4030_v60  ;;  %v4094_v21 = vsel %vm4084_vm8, %v4091_v25, %v4093_v3  ;;  %v4096_v24 = vsel %vm4086_vm14, %v4082_v16, 1326507024  ;;  %v3828_v45 = vsel %vm9986_vm15, 0, %v10049_v42  ;;  %v6895_v44 = vpop.eup %6894 }
 0x4b1   : >> { %v6459_v23 = vmin.u32 %v3909_v49, %v10073_v59  ;;  %v4087_v36 = vsel %vm4083_vm2, %v4067_v29, %v4070_v14  ;;  %v4089_v37 = vsel %vm4085_vm1, %v4073_v17, %v4088_v9  ;;  %v4097_v32 = vsel %vm4085_vm1, %v4079_v56, %v4096_v24 }
 0x4b2   : >> { %v4098_v60 = vsel %vm4084_vm8, %v4095_v30, %v4097_v32  ;;  %v10103_v18 = vmul.u32.u64.low %v10044_v50, %v4094_v21  ;;  %v10104_v42 = vmul.u32.u64.high %v10044_v50, %v4094_v21, %v10103_v18  ;;  %v4033_v27 = vsub.s32 4, %v9955_v63  ;;  %v6897_v16 = vpop.eup %6896 }
 0x4b3   : >> { %v4035_v14 = vsel %vm10063_vm10, %v9727_v31, %v4032_v2  ;;  %v3911_v17 = vclz %v6459_v23  ;;  %v10112_v22 = vmul.u32.u64.low %v10044_v50, %v4098_v60  ;;  %v10113_v56 = vmul.u32.u64.high %v10044_v50, %v4098_v60, %v10112_v22 }
 0x4b4   : >> { %6898 = vcosq.f32 %v10011_v11  ;;  %vm3637_vm15 = vcmp.lt.s32.totalorder %v9581_v0, 0  ;;  %v3718_v9 = vmul.f32 %v3717_v47, %v3715_v62  ;;  %v4090_v25 = vsel %vm4084_vm8, %v4087_v36, %v4089_v37 }
 0x4b5   : >> { %6900 = vsinq.f32 %v10011_v11  ;;  %v3511_v20 = vxor.u32 2147483648, %v10021_v57  ;;  %v6460_v49 = vadd.s32 4294967294, %v3911_v17  ;;  %v3832_v29 = vadd.s32 3, %v3828_v45 }
 0x4b6   : >> { %6902 = vcosq.f32 %v4035_v14  ;;  %v4109_v3 = vadd.s32 1, %v10104_v42  ;;  %v3929_v30 = vsub.s32 4, %v10056_v43  ;;  %v4034_v5 = vsel %vm3949_vm3, %v4033_v27, %v9955_v63 }
 0x4b7   : >> { %6904 = vsinq.f32 %v4035_v14  ;;  %vm6461_vm14 = vcmp.lt.s32.totalorder %v6460_v49, 0  ;;  %v4106_v53 = vmul.u32 %v10044_v50, %v4090_v25  ;;  %vm4108_vm2 = vc.u32 %v10113_v56, %v10103_v18 }
 0x4b8   : >> { %v3719_v11 = vxor.u32 2147483648, %v3718_v9  ;;  %vm3845_vm8 = vcmp.lt.s32.totalorder %v9809_v8, 0  ;;  %v3914_v47 = vsel %vm6461_vm14, 0, %v6460_v49  ;;  %v4110_v62 = vsel %vm4108_vm2, %v4109_v3, %v10104_v42 }
 0x4b9   : >> { %v3899_v39 = vadd.s32 %v10003_v4, %v10015_v12  ;;  %v3915_v2 = vsub.s32 32, %v3914_v47  ;;  %v3919_v21 = vsub.s32 4294967266, %v3914_v47  ;;  %v4111_v24 = vadd.s32 %v4110_v62, %v4106_v53 }
 0x4ba   : >> { %v3512_v63 = vsel %vm3429_vm0, %v3511_v20, %v10021_v57  ;;  %v3930_v50 = vsel %vm3845_vm8, %v3929_v30, %v10056_v43  ;;  %v3833_v45 = vand.u32 3, %v3832_v29  ;;  %v4036_v23 = vsel %vm10063_vm10, 0, %v4034_v5 }
 0x4bb   : >> { %v3916_v36 = vshll.u32 %v10073_v59, %v3914_v47  ;;  %v3917_v37 = vshrl.u32 %v3899_v39, %v3915_v2  ;;  %v3920_v32 = vadd.s32 127, %v3919_v21  ;;  %v4112_v4 = vadd.s32 536870912, %v4111_v24 }
 0x4bc   : >> { %v3720_v12 = vsel %vm3637_vm15, %v3719_v11, %v3718_v9  ;;  %v12503_v60 = vand.u32 2147483647, %v9809_v8  ;;  %v3836_v42 = vxor.u32 2147483648, %v6897_v16  ;;  %v3839_v43 = vxor.u32 2147483648, %v6895_v44 }
 0x4bd   : >> { %v3918_v27 = vor.u32 %v3917_v37, %v3916_v36  ;;  %v3921_v14 = vshll.u32 %v3920_v32, 23  ;;  %v4113_v38 = vshrl.u32 %v4112_v4, 30  ;;  %v12506_v17 = vand.u32 2147483647, %v9545_v61 }
 0x4be   : >> { %vm10150_vm3 = vcmp.le.f32.partialorder %v12503_v60, 0.7853982  ;;  %v4040_v9 = vadd.s32 3, %v4036_v23  ;;  %v3513_v25 = vsub.s32 4, %v9743_v15  ;;  %vm3835_vm1 = vcmp.eq.s32.totalorder %v3833_v45, 0 }
 0x4bf   : >> { %vm10156_vm10 = vcmp.le.f32.partialorder %v12506_v17, 0.7853982  ;;  %v3932_v22 = vsel %vm10150_vm3, 0, %v3930_v50  ;;  %v3922_v49 = vor.u32 4788187, %v3921_v14  ;;  %v4114_v29 = vshll.u32 %v4113_v38, 30 }
 0x4c0   : >> { %v3515_v20 = vsel %vm10156_vm10, %v9545_v61, %v3512_v63  ;;  %vm3838_vm14 = vcmp.eq.s32.totalorder %v3833_v45, 2  ;;  %vm3834_vm2 = vcmp.lt.s32.totalorder %v3833_v45, 2  ;;  %v3837_v3 = vsel %vm3835_vm1, %v6895_v44, %v3836_v42 }
 0x4c1   : >> { %v3840_v30 = vsel %vm3838_vm14, %v3839_v43, %v6897_v16  ;;  %6906 = vcosq.f32 %v3515_v20  ;;  %v10166_v5 = vpop.eup %6898  ;;  %v3923_v53 = vand.u32 2147483647, %v3922_v49  ;;  %v3925_v11 = vcvt.s32.f32 %v3918_v27 }
 0x4c2   : >> { %v10168_v47 = vsub.s32 %v4111_v24, %v4114_v29  ;;  %v3936_v62 = vadd.s32 3, %v3932_v22  ;;  %v10170_v39 = vpop.eup %6900  ;;  %v4137_v2 = vsub.s32 4, %v4113_v38  ;;  %v4041_v21 = vand.u32 3, %v4040_v9 }
 0x4c3   : >> { %v3514_v63 = vsel %vm3429_vm0, %v3513_v25, %v9743_v15  ;;  %6908 = vsinq.f32 %v3515_v20  ;;  %v6903_v50 = vpop.eup %6902  ;;  %v3926_v44 = vmul.f32 %v3925_v11, %v3923_v53  ;;  %vm12164_vm1 = vcmp.lt.s32.totalorder %v9929_v10, 0 }
 0x4c4   : >> { %v4117_v16 = vsub.s32 0, %v10168_v47  ;;  %v3841_v23 = vsel %vm3834_vm2, %v3837_v3, %v3840_v30  ;;  %v6905_v24 = vpop.eup %6904  ;;  %v4107_v36 = vadd.s32 %v10103_v18, %v10113_v56  ;;  %v12509_v37 = vand.u32 2147483647, %v9929_v10 }
 0x4c5   : >> { %vm3831_vm0 = vweird.f32 %v9724_v33  ;;  %v3721_v15 = vsub.s32 4, %v9814_v46  ;;  %v3927_v4 = vxor.u32 2147483648, %v3926_v44  ;;  %v10189_v42 = vand.u32 3, %v3936_v62 }
 0x4c6   : >> { %vm10182_vm14 = vcmp.le.f32.partialorder %v12509_v37, 0.7853982  ;;  %v6467_v60 = vmin.u32 %v4117_v16, %v10168_v47  ;;  %v3516_v45 = vsel %vm10156_vm10, 0, %v3514_v63  ;;  %v4138_v18 = vsel %vm12164_vm1, %v4137_v2, %v4113_v38 }
 0x4c7   : >> { %v10195_v56 = vsel %vm3831_vm0, nan, %v3841_v23  ;;  %vm4042_vm2 = vcmp.lt.s32.totalorder %v4041_v21, 2  ;;  %v4047_v43 = vxor.u32 2147483648, %v6903_v50  ;;  %v3928_v33 = vsel %vm3845_vm8, %v3927_v4, %v3926_v44 }
 0x4c8   : >> { %v4119_v27 = vclz %v6467_v60  ;;  %v4044_v14 = vxor.u32 2147483648, %v6905_v24  ;;  %v12512_v17 = vand.u32 2147483647, %v9581_v0  ;;  %v3931_v59 = vsel %vm10150_vm3, %v9809_v8, %v3928_v33 }
 0x4c9   : >> { %v3520_v38 = vadd.s32 3, %v3516_v45  ;;  %v3722_v9 = vsel %vm3637_vm15, %v3721_v15, %v9814_v46  ;;  %6910 = vcosq.f32 %v3931_v59  ;;  %vm4043_vm8 = vcmp.eq.s32.totalorder %v4041_v21, 0 }
 0x4ca   : >> { %vm10201_vm6 = vcmp.le.f32.partialorder %v12512_v17, 0.7853982  ;;  %v6468_v20 = vadd.s32 4294967294, %v4119_v27  ;;  %vm4046_vm10 = vcmp.eq.s32.totalorder %v4041_v21, 2  ;;  %6912 = vsinq.f32 %v3931_v59 }
 0x4cb   : >> { %v3723_v25 = vsel %vm10201_vm6, %v9581_v0, %v3720_v12  ;;  %v4140_v49 = vsel %vm10182_vm14, 0, %v4138_v18  ;;  %v4048_v29 = vsel %vm4046_vm10, %v4047_v43, %v6905_v24  ;;  %v3409_v57 = vsub.s32 4, %v9597_v54 }
 0x4cc   : >> { %vm6469_vm3 = vcmp.lt.s32.totalorder %v6468_v20, 0  ;;  %v4045_v3 = vsel %vm4043_vm8, %v6903_v50, %v4044_v14  ;;  %v3724_v46 = vsel %vm10201_vm6, 0, %v3722_v9  ;;  %6914 = vcosq.f32 %v3723_v25 }
 0x4cd   : >> { %v4122_v30 = vsel %vm6469_vm3, 0, %v6468_v20  ;;  %v3521_v53 = vand.u32 3, %v3520_v38  ;;  %6916 = vsinq.f32 %v3723_v25  ;;  %v3410_v12 = vsel %vm3325_vm4, %v3409_v57, %v9597_v54 }
 0x4ce   : >> { %v6907_v11 = vpop.eup %6906  ;;  %v4123_v62 = vsub.s32 32, %v4122_v30  ;;  %v4127_v2 = vsub.s32 4294967266, %v4122_v30  ;;  %v10222_v63 = vadd.s32 3, %v4140_v49  ;;  %v3412_v44 = vsel %vm9751_vm7, 0, %v3410_v12 }
 0x4cf   : >> { %v4124_v50 = vshll.u32 %v10168_v47, %v4122_v30  ;;  %v10228_v16 = vsel %vm4042_vm2, %v4045_v3, %v4048_v29  ;;  %v3527_v23 = vxor.u32 2147483648, %v6907_v11  ;;  %v3728_v24 = vadd.s32 3, %v3724_v46 }
 0x4d0   : >> { %v6909_v37 = vpop.eup %6908  ;;  %v4125_v15 = vshrl.u32 %v4107_v36, %v4123_v62  ;;  %v4128_v4 = vadd.s32 127, %v4127_v2  ;;  %v3416_v60 = vadd.s32 3, %v3412_v44  ;;  %v3617_v54 = vsub.s32 4, %v9655_v19 }
 0x4d1   : >> { %vm3942_vm4 = vcmp.eq.s32.totalorder %v10189_v42, 2  ;;  %vm3522_vm6 = vcmp.lt.s32.totalorder %v3521_v53, 2  ;;  %v3524_v45 = vxor.u32 2147483648, %v6909_v37  ;;  %v3423_v18 = vxor.u32 2147483648, %v9845_v7 }
 0x4d2   : >> { %v4126_v47 = vor.u32 %v4125_v15, %v4124_v50  ;;  %v4129_v21 = vshll.u32 %v4128_v4, 23  ;;  %v3417_v43 = vand.u32 3, %v3416_v60  ;;  %vm12515_vm0 = vcmp.lt.s32.totalorder %v9466_v55, 0 }
 0x4d3   : >> { %v3618_v36 = vsel %vm12515_vm0, %v3617_v54, %v9655_v19  ;;  %vm3938_vm2 = vcmp.lt.s32.totalorder %v10189_v42, 2  ;;  %vm3523_vm8 = vcmp.eq.s32.totalorder %v3521_v53, 0  ;;  %vm3526_vm10 = vcmp.eq.s32.totalorder %v3521_v53, 2 }
 0x4d4   : >> { %v10240_v33 = vand.u32 3, %v3728_v24  ;;  %v3620_v27 = vsel %vm9966_vm11, 0, %v3618_v36  ;;  %v4130_v14 = vor.u32 4788187, %v4129_v21  ;;  %vm3935_vm3 = vweird.f32 %v9809_v8 }
 0x4d5   : >> { %v3525_v17 = vsel %vm3523_vm8, %v6907_v11, %v3524_v45  ;;  %v3528_v22 = vsel %vm3526_vm10, %v3527_v23, %v6909_v37  ;;  %vm3415_vm1 = vweird.f32 %v9352_v13  ;;  %v4133_v59 = vcvt.s32.f32 %v4126_v47  ;;  %v12523_v47 = vld [vmem:[#allocation38_spill] sm:$0xff] }
 0x4d6   : >> { %vm3419_vm15 = vcmp.eq.s32.totalorder %v3417_v43, 0  ;;  %vm3422_vm7 = vcmp.eq.s32.totalorder %v3417_v43, 2  ;;  %v3624_v19 = vadd.s32 3, %v3620_v27  ;;  %v4131_v38 = vand.u32 2147483647, %v4130_v14  ;;  %v6911_v26 = vpop.eup %6910 }
 0x4d7   : >> { %v3421_v9 = vsel %vm3419_vm15, %v9845_v7, %v3420_v51  ;;  %v3424_v25 = vsel %vm3422_vm7, %v3423_v18, %v9905_v28  ;;  %v3097_v20 = vsub.s32 4, %v9387_v1  ;;  %vm3731_vm11 = vcmp.eq.s32.totalorder %v10240_v33, 0  ;;  %v6913_v29 = vpop.eup %6912 }
 0x4d8   : >> { %vm3734_vm0 = vcmp.eq.s32.totalorder %v10240_v33, 2  ;;  %vm3418_vm8 = vcmp.lt.s32.totalorder %v3417_v43, 2  ;;  %v3628_v49 = vxor.u32 2147483648, %v10170_v39  ;;  %v4134_v57 = vmul.f32 %v4133_v59, %v4131_v38  ;;  %v12527_v43 = vld [vmem:[#allocation66_spill] sm:$0xff] }
 0x4d9   : >> { %v3943_v3 = vxor.u32 2147483648, %v6911_v26  ;;  %v3529_v46 = vsel %vm3522_vm6, %v3525_v17, %v3528_v22  ;;  %v3425_v30 = vsel %vm3418_vm8, %v3421_v9, %v3424_v25  ;;  %v6915_v12 = vpop.eup %6914  ;;  %v3940_v7 = vxor.u32 2147483648, %v6913_v29  ;;  %v12531_v25 = vld [vmem:[#allocation67_spill] sm:$0xff] }
 0x4da   : >> { %vm4039_vm7 = vweird.f32 %v9727_v31  ;;  %v3625_v28 = vand.u32 3, %v3624_v19  ;;  %v3631_v11 = vxor.u32 2147483648, %v10166_v5  ;;  %vm12516_vm15 = vcmp.lt.s32.totalorder %v9180_v40, 0  ;;  %v6917_v2 = vpop.eup %6916 }
 0x4db   : >> { %v3098_v62 = vsel %vm12516_vm15, %v3097_v20, %v9387_v1  ;;  %v4135_v44 = vxor.u32 2147483648, %v4134_v57  ;;  %v3944_v50 = vsel %vm3942_vm4, %v3943_v3, %v6913_v29  ;;  %v3735_v23 = vxor.u32 2147483648, %v6915_v12 }
 0x4dc   : >> { %v12517_v53 = vand.u32 2147483647, %v9180_v40  ;;  %vm12520_vm10 = vcmp.eq.s32.totalorder %v10189_v42, 0  ;;  %vm12521_vm8 = vweird.f32 %v9545_v61  ;;  %v3426_v1 = vsel %vm3415_vm1, nan, %v3425_v30 }
 0x4dd   : >> { %v3941_v37 = vsel %vm12520_vm10, %v6911_v26, %v3940_v7  ;;  %v3530_v15 = vsel %vm12521_vm8, nan, %v3529_v46  ;;  %vm12522_vm4 = vcmp.lt.s32.totalorder %v9929_v10, 0  ;;  %v3732_v45 = vxor.u32 2147483648, %v6917_v2  ;;  %v12536_v46 = vld [vmem:[#allocation59_spill] sm:$0xff] }
 0x4de   : >> { %vm10262_vm6 = vcmp.le.f32.partialorder %v12517_v53, 0.7853982  ;;  %v4136_v60 = vsel %vm12522_vm4, %v4135_v44, %v4134_v57  ;;  %v3945_v54 = vsel %vm3938_vm2, %v3941_v37, %v3944_v50  ;;  %vm3627_vm1 = vcmp.eq.s32.totalorder %v3625_v28, 0  ;;  %v12535_v57 = vld [vmem:[#allocation36_spill] sm:$0xff] }
 0x4df   : >> { %v3099_v4 = vsel %vm10262_vm6, %v9180_v40, %v9805_v6  ;;  %v3100_v51 = vsel %vm10262_vm6, 0, %v3098_v62  ;;  %v3946_v61 = vsel %vm3935_vm3, nan, %v3945_v54  ;;  %v4139_v13 = vsel %vm10182_vm14, %v9929_v10, %v4136_v60 }
 0x4e0   : >> { %vm3630_vm15 = vcmp.eq.s32.totalorder %v3625_v28, 2  ;;  %4211 = vmatprep.subr.mxu0 %v3946_v61  ;;  %6918 = vcosq.f32 %v4139_v13  ;;  %v3736_v6 = vsel %vm3734_vm0, %v3735_v23, %v6917_v2  ;;  %v3629_v42 = vsel %vm3627_vm1, %v10166_v5, %v3628_v49  ;;  %v12528_v5 = vld [vmem:[#allocation49_spill] sm:$0xff]  ;;  %v12540_v2 = vld [vmem:[#allocation46_spill] sm:$0xff] }
 0x4e1   : >> { %v3632_v18 = vsel %vm3630_vm15, %v3631_v11, %v10170_v39  ;;  %6920 = vsinq.f32 %v4139_v13  ;;  %4212 = vmatpush1.msra.mxu0 %v10195_v56  ;;  %v3104_v8 = vadd.s32 3, %v3100_v51  ;;  %v12524_v21 = vand.u32 2147483647, %v12523_v47  ;;  %v12529_v56 = vld [vmem:[#allocation62_spill] sm:$0xff]  ;;  %v12547_v13 = vld [vmem:[#allocation37_spill] sm:$0xff] }
 0x4e2   : >> { %v3305_v36 = vsub.s32 4, %v12527_v43  ;;  %4213 = vmatprep.subr.mxu0 %v3530_v15  ;;  %v3733_v27 = vsel %vm3731_vm11, %v6915_v12, %v3732_v45  ;;  %6922 = vcosq.f32 %v3099_v4  ;;  %v2993_v14 = vsub.s32 4, %v12529_v56  ;;  %v12537_v12 = vld [vmem:[#allocation42_spill] sm:$0xff]  ;;  %v12546_v15 = vld [vmem:[#allocation63_spill] sm:$0xff] }
 0x4e3   : >> { %vm10294_vm2 = vcmp.le.f32.partialorder %v12524_v21, 0.7853982  ;;  %v10307_v17 = vand.u32 3, %v10222_v63  ;;  %4214 = vmatpush1.msra.mxu0 %v3426_v1  ;;  %vm3626_vm14 = vcmp.lt.s32.totalorder %v3625_v28, 2  ;;  %6924 = vsinq.f32 %v3099_v4  ;;  %v12539_v28 = vld [vmem:[#allocation48_spill] sm:$0xff] }
 0x4e4   : >> { %v3307_v39 = vsel %vm10294_vm2, %v12523_v47, %v12528_v5  ;;  %vm12530_vm3 = vcmp.lt.s32.totalorder %v12523_v47, 0  ;;  %v10315_v59 = vsel %vm4039_vm7, nan, %v10228_v16  ;;  %vm3730_vm11 = vcmp.lt.s32.totalorder %v10240_v33, 2  ;;  %v12534_v16 = vld [vmem:[#allocation44_spill] sm:$0xff] }
 0x4e5   : >> { %v3306_v22 = vsel %vm12530_vm3, %v3305_v36, %v12527_v43  ;;  %v3633_v19 = vsel %vm3626_vm14, %v3629_v42, %v3632_v18  ;;  %v3737_v63 = vsel %vm3730_vm11, %v3733_v27, %v3736_v6  ;;  %v10320_v9 = vand.u32 3, %v3104_v8  ;;  %v12548_v42 = vld [vmem:[#allocation47_spill] sm:$0xff]  ;;  %v12549_v5 = vld [vmem:[#allocation68_spill] sm:$0xff] }
 0x4e6   : >> { %v3308_v38 = vsel %vm10294_vm2, 0, %v3306_v22  ;;  %6926 = vcosq.f32 %v3307_v39  ;;  %vm12532_vm0 = vcmp.lt.s32.totalorder %v12531_v25, 0  ;;  %v3201_v29 = vsub.s32 4, %v12534_v16 }
 0x4e7   : >> { %v2994_v20 = vsel %vm12532_vm0, %v2993_v14, %v12529_v56  ;;  %6928 = vsinq.f32 %v3307_v39  ;;  %v3312_v26 = vadd.s32 3, %v3308_v38  ;;  %vm4150_vm7 = vcmp.eq.s32.totalorder %v10307_v17, 2  ;;  %v12553_v38 = vld [vmem:[#allocation56_spill] sm:$0xff] }
 0x4e8   : >> { %v2996_v31 = vsel %vm9416_vm9, 0, %v2994_v20  ;;  %vm3727_vm6 = vweird.f32 %v9581_v0  ;;  %vm3623_vm10 = vweird.f32 %v9466_v55  ;;  %vm4147_vm8 = vcmp.eq.s32.totalorder %v10307_v17, 0  ;;  %v12554_v20 = vld [vmem:[#allocation40_spill] sm:$0xff] }
 0x4e9   : >> { %v3000_v33 = vadd.s32 3, %v2996_v31  ;;  %v3004_v3 = vxor.u32 2147483648, %v12535_v57  ;;  %v3007_v30 = vxor.u32 2147483648, %v12536_v46  ;;  %vm12538_vm4 = vcmp.lt.s32.totalorder %v12537_v12, 0 }
 0x4ea   : >> { %v3202_v7 = vsel %vm12538_vm4, %v3201_v29, %v12534_v16  ;;  %v2681_v11 = vsub.s32 4, %v12539_v28  ;;  %vm4146_vm9 = vcmp.lt.s32.totalorder %v10307_v17, 2  ;;  %v10339_v62 = vsel %vm3727_vm6, nan, %v3737_v63 }
 0x4eb   : >> { %v10341_v0 = vsel %vm3623_vm10, nan, %v3633_v19  ;;  %v3001_v55 = vand.u32 3, %v3000_v33  ;;  %v12541_v44 = vand.u32 2147483647, %v12540_v2  ;;  %vm4143_vm15 = vweird.f32 %v9929_v10 }
 0x4ec   : >> { %vm3107_vm2 = vcmp.eq.s32.totalorder %v10320_v9, 0  ;;  %v10351_v23 = vand.u32 3, %v3312_v26  ;;  %v3204_v24 = vsel %vm9567_vm13, 0, %v3202_v7  ;;  %vm12545_vm14 = vcmp.lt.s32.totalorder %v12540_v2, 0 }
 0x4ed   : >> { %vm10345_vm1 = vcmp.le.f32.partialorder %v12541_v44, 0.7853982  ;;  %v2682_v37 = vsel %vm12545_vm14, %v2681_v11, %v12539_v28  ;;  %vm3106_vm3 = vcmp.lt.s32.totalorder %v10320_v9, 2  ;;  %vm3110_vm11 = vcmp.eq.s32.totalorder %v10320_v9, 2  ;;  %v6919_v51 = vpop.eup %6918 }
 0x4ee   : >> { %v2683_v1 = vsel %vm10345_vm1, %v12540_v2, %v12546_v15  ;;  %vm2999_vm0 = vweird.f32 %v12531_v25  ;;  %vm3003_vm6 = vcmp.eq.s32.totalorder %v3001_v55, 0  ;;  %vm3006_vm10 = vcmp.eq.s32.totalorder %v3001_v55, 2  ;;  %v6921_v8 = vpop.eup %6920 }
 0x4ef   : >> { %v3208_v4 = vadd.s32 3, %v3204_v24  ;;  %vm3103_vm13 = vweird.f32 %v9180_v40  ;;  %v3005_v60 = vsel %vm3003_vm6, %v12536_v46, %v3004_v3  ;;  %v3008_v54 = vsel %vm3006_vm10, %v3007_v30, %v12535_v57  ;;  %v6923_v32 = vpop.eup %6922 }
 0x4f0   : >> { %v2684_v45 = vsel %vm10345_vm1, 0, %v2682_v37  ;;  %6930 = vcosq.f32 %v2683_v1  ;;  %v3212_v6 = vxor.u32 2147483648, %v12547_v13  ;;  %v3215_v18 = vxor.u32 2147483648, %v12548_v42  ;;  %v6925_v14 = vpop.eup %6924  ;;  %v12557_v37 = vld [vmem:[#allocation54_spill] sm:$0xff] }
 0x4f1   : >> { %v3209_v61 = vand.u32 3, %v3208_v4  ;;  %6932 = vsinq.f32 %v2683_v1  ;;  %v4151_v21 = vxor.u32 2147483648, %v6919_v51  ;;  %vm3314_vm4 = vcmp.lt.s32.totalorder %v10351_v23, 2 }
 0x4f2   : >> { %vm3315_vm14 = vcmp.eq.s32.totalorder %v10351_v23, 0  ;;  %vm3002_vm6 = vcmp.lt.s32.totalorder %v3001_v55, 2  ;;  %v4148_v43 = vxor.u32 2147483648, %v6921_v8  ;;  %v2688_v27 = vadd.s32 3, %v2684_v45 }
 0x4f3   : >> { %v3009_v36 = vsel %vm3002_vm6, %v3005_v60, %v3008_v54  ;;  %v12550_v39 = vand.u32 2147483647, %v12549_v5  ;;  %v4152_v22 = vsel %vm4150_vm7, %v4151_v21, %v6921_v8  ;;  %v3111_v19 = vxor.u32 2147483648, %v6923_v32  ;;  %v6927_v16 = vpop.eup %6926 }
 0x4f4   : >> { %v2889_v63 = vsub.s32 4, %v12553_v38  ;;  %v4149_v49 = vsel %vm4147_vm8, %v6919_v51, %v4148_v43  ;;  %v3108_v31 = vxor.u32 2147483648, %v6925_v14  ;;  %vm3211_vm10 = vcmp.eq.s32.totalorder %v3209_v61, 0  ;;  %v6929_v46 = vpop.eup %6928  ;;  %v12564_v43 = vld [vmem:[#allocation65_spill] sm:$0xff] }
 0x4f5   : >> { %vm10376_vm1 = vcmp.le.f32.partialorder %v12550_v39, 0.7853982  ;;  %vm3214_vm6 = vcmp.eq.s32.totalorder %v3209_v61, 2  ;;  %v4153_v29 = vsel %vm4146_vm9, %v4149_v49, %v4152_v22  ;;  %v3112_v33 = vsel %vm3110_vm11, %v3111_v19, %v6925_v14 }
 0x4f6   : >> { %v2891_v26 = vsel %vm10376_vm1, %v12549_v5, %v12554_v20  ;;  %v3213_v57 = vsel %vm3211_vm10, %v12548_v42, %v3212_v6  ;;  %v3216_v3 = vsel %vm3214_vm6, %v3215_v18, %v12547_v13  ;;  %v4154_v30 = vsel %vm4143_vm15, nan, %v4153_v29 }
 0x4f7   : >> { %v3109_v7 = vsel %vm3107_vm2, %v6923_v32, %v3108_v31  ;;  %vm3318_vm7 = vcmp.eq.s32.totalorder %v10351_v23, 2  ;;  %v3319_v28 = vxor.u32 2147483648, %v6927_v16  ;;  %4300 = vmatprep.subr.mxu1 %v4154_v30  ;;  %v3316_v11 = vxor.u32 2147483648, %v6929_v46 }
 0x4f8   : >> { %v3113_v17 = vsel %vm3106_vm3, %v3109_v7, %v3112_v33  ;;  %v3010_v55 = vsel %vm2999_vm0, nan, %v3009_v36  ;;  %vm3210_vm8 = vcmp.lt.s32.totalorder %v3209_v61, 2  ;;  %4301 = vmatpush1.msra.mxu1 %v10315_v59  ;;  %6934 = vcosq.f32 %v2891_v26  ;;  %v12556_v59 = vld [vmem:[#allocation50_spill] sm:$0xff]  ;;  %v12561_v61 = vld [vmem:[#allocation64_spill] sm:$0xff] }
 0x4f9   : >> { %v3114_v10 = vsel %vm3103_vm13, nan, %v3113_v17  ;;  %v3320_v44 = vsel %vm3318_vm7, %v3319_v28, %v6929_v46  ;;  %v3217_v50 = vsel %vm3210_vm8, %v3213_v57, %v3216_v3  ;;  %4302 = vmatprep.subr.mxu1 %v10339_v62  ;;  %v3317_v9 = vsel %vm3315_vm14, %v6927_v16, %v3316_v11  ;;  %v12568_v11 = vld [vmem:[#allocation18_spill] sm:$0xff] }
 0x4fa   : >> { %4215 = vmatprep.subr.mxu0 %v3114_v10  ;;  %v2689_v53 = vand.u32 3, %v2688_v27  ;;  %vm12555_vm9 = vcmp.lt.s32.totalorder %v12549_v5, 0  ;;  %6936 = vsinq.f32 %v2891_v26  ;;  %4303 = vmatpush1.msra.mxu1 %v10341_v0  ;;  %vm3311_vm15 = vweird.f32 %v12523_v47  ;;  %v12558_v0 = vld [vmem:[#allocation53_spill] sm:$0xff]  ;;  %v12567_v26 = vld [vmem:[#allocation39_spill] sm:$0xff] }
 0x4fb   : >> { %v2890_v25 = vsel %vm12555_vm9, %v2889_v63, %v12553_v38  ;;  %v3321_v40 = vsel %vm3314_vm4, %v3317_v9, %v3320_v44  ;;  %4216 = vmatpush1.msra.mxu0 %v3010_v55  ;;  %v2577_v62 = vsub.s32 4, %v12556_v59  ;;  %vm3207_vm2 = vweird.f32 %v12537_v12  ;;  %v12565_v27 = vld [vmem:[#allocation61_spill] sm:$0xff] }
 0x4fc   : >> { %v3322_v24 = vsel %vm3311_vm15, nan, %v3321_v40  ;;  %v2785_v15 = vsub.s32 4, %v12557_v37  ;;  %v3218_v4 = vsel %vm3207_vm2, nan, %v3217_v50  ;;  %v2892_v60 = vsel %vm10376_vm1, 0, %v2890_v25  ;;  %v12566_v63 = vld [vmem:[#allocation45_spill] sm:$0xff]  ;;  %v12571_v25 = vld [vmem:[#allocation19_spill] sm:$0xff] }
 0x4fd   : >> { %v6931_v1 = vpop.eup %6930  ;;  %4304 = vmatprep.subr.mxu1 %v3322_v24  ;;  %vm12559_vm3 = vcmp.lt.s32.totalorder %v12558_v0, 0  ;;  %vm2690_vm11 = vcmp.lt.s32.totalorder %v2689_v53, 2  ;;  %vm2691_vm0 = vcmp.eq.s32.totalorder %v2689_v53, 0  ;;  %vm2694_vm13 = vcmp.eq.s32.totalorder %v2689_v53, 2  ;;  %v12574_v40 = vld [vmem:[#allocation20_spill] sm:$0xff] }
 0x4fe   : >> { %v2578_v47 = vsel %vm12559_vm3, %v2577_v62, %v12556_v59  ;;  %v6933_v23 = vpop.eup %6932  ;;  %4305 = vmatpush1.msra.mxu1 %v3218_v4  ;;  %v2695_v54 = vxor.u32 2147483648, %v6931_v1  ;;  %vm12562_vm4 = vcmp.lt.s32.totalorder %v12561_v61, 0  ;;  %v2896_v42 = vadd.s32 3, %v2892_v60  ;;  %v10469_v59 = vpop.permute.xlu1 %4167 }
 0x4ff   : >> { %v2692_v45 = vxor.u32 2147483648, %v6933_v23  ;;  %v2580_v51 = vsel %vm9220_vm5, 0, %v2578_v47  ;;  %v2786_v13 = vsel %vm12562_vm4, %v2785_v15, %v12557_v37  ;;  %v2588_v36 = vxor.u32 2147483648, %v12564_v43 }
 0x500   : >> { %v2696_v6 = vsel %vm2694_vm13, %v2695_v54, %v6933_v23  ;;  %v2584_v18 = vadd.s32 3, %v2580_v51  ;;  %v2788_v21 = vsel %vm9403_vm12, 0, %v2786_v13  ;;  %v2591_v39 = vxor.u32 2147483648, %v12565_v27 }
 0x501   : >> { %v2693_v32 = vsel %vm2691_vm0, %v6931_v1, %v2692_v45  ;;  %v2792_v56 = vadd.s32 3, %v2788_v21  ;;  %vm2687_vm14 = vweird.f32 %v12540_v2  ;;  %v2796_v20 = vxor.u32 2147483648, %v12566_v63 }
 0x502   : >> { %v2697_v14 = vsel %vm2690_vm11, %v2693_v32, %v2696_v6  ;;  %v2585_v22 = vand.u32 3, %v2584_v18  ;;  %v2799_v49 = vxor.u32 2147483648, %v12567_v26  ;;  %v2897_v31 = vand.u32 3, %v2896_v42  ;;  %v4158_v62 = vpop.permute.xlu1 %4157 }
 0x503   : >> { %v2698_v19 = vsel %vm2687_vm14, nan, %v2697_v14  ;;  %v2793_v38 = vand.u32 3, %v2792_v56  ;;  %vm2583_vm10 = vweird.f32 %v12558_v0  ;;  %vm12569_vm2 = vcmask 261120  }
 0x504   : >> { %4217 = vmatprep.subr.mxu0 %v2698_v19  ;;  %vm2587_vm5 = vcmp.eq.s32.totalorder %v2585_v22, 0  ;;  %vm2590_vm12 = vcmp.eq.s32.totalorder %v2585_v22, 2  ;;  %vm2586_vm1 = vcmp.lt.s32.totalorder %v2585_v22, 2  ;;  %vm2902_vm8 = vcmp.eq.s32.totalorder %v2897_v31, 2  ;;  %vm12572_vm13 = vmmov %vm12569_vm2 }
 0x505   : >> { %v2589_v16 = vsel %vm2587_vm5, %v12565_v27, %v2588_v36  ;;  %v2592_v29 = vsel %vm2590_vm12, %v2591_v39, %v12564_v43  ;;  %v6935_v33 = vpop.eup %6934  ;;  %vm2795_vm6 = vcmp.eq.s32.totalorder %v2793_v38, 0  ;;  %vm2798_vm7 = vcmp.eq.s32.totalorder %v2793_v38, 2  ;;  %vm12573_vm4 = vmmov %vm12569_vm2 }
 0x506   : >> { %v2593_v2 = vsel %vm2586_vm1, %v2589_v16, %v2592_v29  ;;  %v2903_v3 = vxor.u32 2147483648, %v6935_v33  ;;  %v2797_v30 = vsel %vm2795_vm6, %v12567_v26, %v2796_v20  ;;  %v2800_v7 = vsel %vm2798_vm7, %v2799_v49, %v12566_v63  ;;  %vm12575_vm14 = vmmov %vm12569_vm2 }
 0x507   : >> { %v6937_v57 = vpop.eup %6936  ;;  %v2594_v46 = vsel %vm2583_vm10, nan, %v2593_v2  ;;  %vm2899_vm9 = vcmp.eq.s32.totalorder %v2897_v31, 0  ;;  %vm2794_vm15 = vcmp.lt.s32.totalorder %v2793_v38, 2  ;;  %vm2898_vm3 = vcmp.lt.s32.totalorder %v2897_v31, 2  ;;  %vm12576_vm5 = vmmov %vm12569_vm2 }
 0x508   : >> { %v2900_v28 = vxor.u32 2147483648, %v6937_v57  ;;  %4218 = vmatpush1.msra.mxu0 %v2594_v46  ;;  %v2904_v17 = vsel %vm2902_vm8, %v2903_v3, %v6937_v57  ;;  %v2801_v10 = vsel %vm2794_vm15, %v2797_v30, %v2800_v7  ;;  %v12570_v44 = vmov 0.0   ;;  %vm12578_vm12 = vmmov %vm12569_vm2 }
 0x509   : >> { %6470 = vmatmul.mubr.msk.f32.vlgmr.msra.gmra.mxu0 %vm12569_vm2, %v12568_v11  ;;  %vm2895_vm11 = vweird.f32 %v12549_v5  ;;  %vm2791_vm0 = vweird.f32 %v12561_v61  ;;  %v12577_v5 = vld [vmem:[#allocation21_spill] sm:$0xff]  ;;  %vm12579_vm1 = vmmov %vm12569_vm2 }
 0x50a   : >> { %v2901_v55 = vsel %vm2899_vm9, %v6935_v33, %v2900_v28  ;;  %4257 = vmatprep.mubr.f32.mxu0 %v12570_v44  ;;  %v2802_v53 = vsel %vm2791_vm0, nan, %v2801_v10  ;;  %vm12580_vm10 = vmmov %vm12579_vm1 }
 0x50b   : >> { %v2905_v50 = vsel %vm2898_vm3, %v2901_v55, %v2904_v17 }
 0x50c   : >> { %v2906_v9 = vsel %vm2895_vm11, nan, %v2905_v50 }
 0x50d   : >> { %4306 = vmatprep.subr.mxu1 %v2906_v9  ;;  %6471 = vmatmul.mubr.msk.f32.gmra.mxu0 %vm12572_vm13, %v12571_v25 }
 0x50e   : >> { %4307 = vmatpush1.msra.mxu1 %v2802_v53  ;;  %4263 = vmatprep.mubr.f32.mxu0 %v12570_v44 }
 0x50f   : >> { %6474 = vmatmul.mubr.msk.f32.vlgmr.msra.gmra.mxu1 %vm12573_vm4, %v12568_v11 }
 0x510   : >> { %4346 = vmatprep.mubr.f32.mxu1 %v12570_v44 }
 0x511   : >> { %6472 = vmatmul.mubr.msk.f32.gmra.mxu0 %vm12575_vm14, %v12574_v40 }
 0x512   : >> { %4269 = vmatprep.mubr.f32.mxu0 %v12570_v44 }
 0x513   : >> { %6475 = vmatmul.mubr.msk.f32.gmra.mxu1 %vm12576_vm5, %v12571_v25 }
 0x514   : >> { %4352 = vmatprep.mubr.f32.mxu1 %v12570_v44 }
 0x515   : >> { %6473 = vmatmul.mubr.msk.f32.gmra.mxu0 %vm12578_vm12, %v12577_v5 }
 0x516   : >> { %6105 = vmatprep.mubr.f32.mxu0 %v12570_v44 }
 0x517   : >> { %6476 = vmatmul.mubr.msk.f32.gmra.mxu1 %vm12579_vm1, %v12574_v40 }
 0x518   : >> { %4358 = vmatprep.mubr.f32.mxu1 %v12570_v44 }
 0x51b   : >> { %6477 = vmatmul.mubr.msk.f32.gmra.mxu1 %vm12580_vm10, %v12577_v5 }
 0x51c   : >> { %6176 = vmatprep.mubr.f32.mxu1 %v12570_v44 }
 0x5c9   : >> { %v4253_v24 = vpop.f32.mrf.mxu0 }
 0x5ca   : >> { %v10471_v37 = vadd.f32 %v4253_v24, %v4158_v62 }
 0x5cb   : >> { %v4255_v15 = vpop.f32.mrf.mxu0 }
 0x5cc   : >> { %12581 = vst [vmem:[#allocation55_spill] sm:$0xff] %v10471_v37  ;;  %v12169_v1 = vand.u32 2147483647, %v10471_v37  ;;  %v4368_v4 = vand.u32 2139095040, %v10471_v37  ;;  %v10475_v60 = vadd.f32 %v4255_v15, %v4158_v62 }
 0x5ce   : >> { %12582 = vst [vmem:[#allocation52_spill] sm:$0xff] %v10475_v60  ;;  %v4369_v0 = vshrl.u32 %v4368_v4, 23  ;;  %v4372_v47 = vand.u32 8388607, %v12169_v1  ;;  %v12166_v54 = vand.u32 2147483647, %v10475_v60 }
 0x5cf   : >> { %v4342_v23 = vpop.f32.mrf.mxu1  ;;  %v4472_v45 = vand.u32 2139095040, %v10475_v60 }
 0x5d0   : >> { %v6478_v12 = vadd.s32 4294967169, %v4369_v0  ;;  %v10481_v51 = vadd.f32 %v4342_v23, %v4158_v62  ;;  %v4373_v42 = vor.u32 8388608, %v4372_v47  ;;  %v4476_v21 = vand.u32 8388607, %v12166_v54 }
 0x5d1   : >> { %v4473_v61 = vshrl.u32 %v4472_v45, 23  ;;  %v4344_v43 = vpop.f32.mrf.mxu1 }
 0x5d2   : >> { %12583 = vst [vmem:[#allocation60_spill] sm:$0xff] %v10481_v51  ;;  %v4375_v13 = vadd.s32 1, %v6478_v12  ;;  %v12168_v6 = vand.u32 2147483647, %v10481_v51  ;;  %v4576_v18 = vand.u32 2139095040, %v10481_v51  ;;  %v10489_v22 = vshll.u32 %v4373_v42, 8 }
 0x5d3   : >> { %v6482_v8 = vadd.s32 4294967169, %v4473_v61  ;;  %v4477_v38 = vor.u32 8388608, %v4476_v21  ;;  %v10491_v63 = vadd.f32 %v4344_v43, %v4158_v62 }
 0x5d4   : >> { %vm4376_vm6 = vcmp.gt.s32.totalorder %v4375_v13, 0  ;;  %v4580_v32 = vand.u32 8388607, %v12168_v6  ;;  %v4577_v27 = vshrl.u32 %v4576_v18, 23 }
 0x5d5   : >> { %v4377_v36 = vsel %vm4376_vm6, %v4375_v13, 0  ;;  %v4479_v39 = vadd.s32 1, %v6482_v8  ;;  %12584 = vst [vmem:[#allocation57_spill] sm:$0xff] %v10491_v63 }
 0x5d6   : >> { %v4378_v56 = vshrl.u32 %v4377_v36, 5  ;;  %v4379_v14 = vand.u32 31, %v4377_v36  ;;  %v4581_v19 = vor.u32 8388608, %v4580_v32  ;;  %v6486_v49 = vadd.s32 4294967169, %v4577_v27 }
 0x5d7   : >> { %vm4480_vm7 = vcmp.gt.s32.totalorder %v4479_v39, 0  ;;  %v10520_v27 = vshll.u32 %v4477_v38, 8 }
 0x5d8   : >> { %v4380_v20 = vsub.s32 32, %v4379_v14  ;;  %v4382_v26 = vshll.u32 %v12296_v35, %v4379_v14  ;;  %v4385_v31 = vshll.u32 %v12288_v41, %v4379_v14  ;;  %v4388_v16 = vshll.u32 %v12289_v58, %v4379_v14 }
 0x5d9   : >> { %v4391_v29 = vshll.u32 %v12290_v34, %v4379_v14  ;;  %v4394_v33 = vshll.u32 %v12291_v52, %v4379_v14  ;;  %vm4397_vm8 = vcmp.lt.s32.totalorder %v4378_v56, 1  ;;  %vm4398_vm9 = vcmp.lt.s32.totalorder %v4378_v56, 2 }
 0x5da   : >> { %v4383_v2 = vshrl.u32 %v12288_v41, %v4380_v20  ;;  %v4386_v57 = vshrl.u32 %v12289_v58, %v4380_v20  ;;  %v4389_v3 = vshrl.u32 %v12290_v34, %v4380_v20  ;;  %v4381_v46 = vshrl.u32 %v12296_v35, %v4380_v20 }
 0x5db   : >> { %v4392_v30 = vshrl.u32 %v12291_v52, %v4380_v20  ;;  %v4395_v7 = vshrl.u32 %v12292_v48, %v4380_v20  ;;  %v4583_v10 = vadd.s32 1, %v6486_v49  ;;  %vm4399_vm15 = vcmp.lt.s32.totalorder %v4378_v56, 3 }
 0x5dc   : >> { %v4384_v28 = vor.u32 %v4383_v2, %v4382_v26  ;;  %v4387_v17 = vor.u32 %v4386_v57, %v4385_v31  ;;  %v4390_v55 = vor.u32 %v4389_v3, %v4388_v16  ;;  %vm4400_vm2 = vcmp.lt.s32.totalorder %v4378_v56, 4 }
 0x5dd   : >> { %v4393_v44 = vor.u32 %v4392_v30, %v4391_v29  ;;  %v4396_v50 = vor.u32 %v4395_v7, %v4394_v33  ;;  %vm4584_vm3 = vcmp.gt.s32.totalorder %v4583_v10, 0  ;;  %v4481_v12 = vsel %vm4480_vm7, %v4479_v39, 0 }
 0x5de   : >> { %v4401_v9 = vsel %vm4397_vm8, %v4381_v46, %v4384_v28  ;;  %v4402_v53 = vsel %vm4400_vm2, %v4390_v55, 2102212464  ;;  %v4405_v62 = vsel %vm4397_vm8, %v4384_v28, %v4387_v17  ;;  %v4409_v24 = vsel %vm4397_vm8, %v4387_v17, %v4390_v55 }
 0x5df   : >> { %v4403_v15 = vsel %vm4399_vm15, %v4387_v17, %v4402_v53  ;;  %v4406_v4 = vsel %vm4400_vm2, %v4393_v44, 920167782  ;;  %v4410_v0 = vsel %vm4400_vm2, %v4396_v50, 1326507024  ;;  %v4585_v45 = vsel %vm4584_vm3, %v4583_v10, 0 }
 0x5e0   : >> { %v4407_v47 = vsel %vm4399_vm15, %v4390_v55, %v4406_v4  ;;  %v4411_v23 = vsel %vm4399_vm15, %v4393_v44, %v4410_v0  ;;  %v4404_v61 = vsel %vm4398_vm9, %v4401_v9, %v4403_v15  ;;  %v4586_v18 = vshrl.u32 %v4585_v45, 5 }
 0x5e1   : >> { %v4408_v13 = vsel %vm4398_vm9, %v4405_v62, %v4407_v47  ;;  %v4412_v42 = vsel %vm4398_vm9, %v4409_v24, %v4411_v23  ;;  %v4587_v36 = vand.u32 31, %v4585_v45  ;;  %v4680_v39 = vand.u32 2139095040, %v10491_v63 }
 0x5e2   : >> { %v10512_v8 = vmul.u32.u64.low %v10489_v22, %v4412_v42  ;;  %v10513_v21 = vmul.u32.u64.high %v10489_v22, %v4412_v42, %v10512_v8  ;;  %v10516_v32 = vmul.u32.u64.low %v10489_v22, %v4408_v13  ;;  %v10517_v43 = vmul.u32.u64.high %v10489_v22, %v4408_v13, %v10516_v32 }
 0x5e3   : >> { %v4420_v14 = vmul.u32 %v10489_v22, %v4404_v61  ;;  %vm4605_vm11 = vcmp.lt.s32.totalorder %v4586_v18, 1  ;;  %vm4607_vm0 = vcmp.lt.s32.totalorder %v4586_v18, 3  ;;  %v10524_v56 = vshll.u32 %v4581_v19, 8 }
 0x5e4   : >> { %v4588_v20 = vsub.s32 32, %v4587_v36  ;;  %v4590_v26 = vshll.u32 %v12296_v35, %v4587_v36  ;;  %v4593_v49 = vshll.u32 %v12288_v41, %v4587_v36  ;;  %vm4606_vm13 = vcmp.lt.s32.totalorder %v4586_v18, 2 }
 0x5e5   : >> { %v4483_v31 = vand.u32 31, %v4481_v12  ;;  %vm4422_vm4 = vc.u32 %v10513_v21, %v10516_v32  ;;  %v4423_v38 = vadd.s32 1, %v10517_v43  ;;  %v4596_v16 = vshll.u32 %v12289_v58, %v4587_v36 }
 0x5e6   : >> { %v4599_v22 = vshll.u32 %v12290_v34, %v4587_v36  ;;  %v4589_v29 = vshrl.u32 %v12296_v35, %v4588_v20  ;;  %v4591_v19 = vshrl.u32 %v12288_v41, %v4588_v20  ;;  %v4594_v33 = vshrl.u32 %v12289_v58, %v4588_v20 }
 0x5e7   : >> { %v4597_v2 = vshrl.u32 %v12290_v34, %v4588_v20  ;;  %v4424_v57 = vsel %vm4422_vm4, %v4423_v38, %v10517_v43  ;;  %v4600_v3 = vshrl.u32 %v12291_v52, %v4588_v20  ;;  %v4602_v46 = vshll.u32 %v12291_v52, %v4587_v36 }
 0x5e8   : >> { %v4603_v30 = vshrl.u32 %v12292_v48, %v4588_v20  ;;  %v4425_v7 = vadd.s32 %v4424_v57, %v4420_v14  ;;  %v4592_v28 = vor.u32 %v4591_v19, %v4590_v26  ;;  %v4595_v17 = vor.u32 %v4594_v33, %v4593_v49 }
 0x5e9   : >> { %v4598_v55 = vor.u32 %v4597_v2, %v4596_v16  ;;  %v4601_v10 = vor.u32 %v4600_v3, %v4599_v22  ;;  %vm4608_vm14 = vcmp.lt.s32.totalorder %v4586_v18, 4  ;;  %v4484_v50 = vsub.s32 32, %v4483_v31 }
 0x5ea   : >> { %v4604_v44 = vor.u32 %v4603_v30, %v4602_v46  ;;  %v4426_v9 = vadd.s32 536870912, %v4425_v7  ;;  %v4609_v53 = vsel %vm4605_vm11, %v4589_v29, %v4592_v28  ;;  %v4613_v24 = vsel %vm4605_vm11, %v4592_v28, %v4595_v17 }
 0x5eb   : >> { %v4610_v62 = vsel %vm4608_vm14, %v4598_v55, 2102212464  ;;  %v4614_v4 = vsel %vm4608_vm14, %v4601_v10, 920167782  ;;  %v4617_v0 = vsel %vm4605_vm11, %v4595_v17, %v4598_v55  ;;  %v10549_v13 = vshrl.u32 %v4481_v12, 5 }
 0x5ec   : >> { %v4611_v15 = vsel %vm4607_vm0, %v4595_v17, %v4610_v62  ;;  %v4618_v47 = vsel %vm4608_vm14, %v4604_v44, 1326507024  ;;  %v10545_v23 = vshrl.u32 %v4426_v9, 30  ;;  %v4615_v45 = vsel %vm4607_vm0, %v4598_v55, %v4614_v4  ;;  %v10588_v62 = vpop.permute.xlu0 %4172 }
 0x5ed   : >> { %v4619_v61 = vsel %vm4607_vm0, %v4601_v10, %v4618_v47  ;;  %v4612_v42 = vsel %vm4606_vm13, %v4609_v53, %v4611_v15  ;;  %v4616_v8 = vsel %vm4606_vm13, %v4613_v24, %v4615_v45  ;;  %v4681_v36 = vshrl.u32 %v4680_v39, 23 }
 0x5ee   : >> { %12585 = vst [vmem:[#allocation38_spill] sm:$0xff] %v10545_v23  ;;  %v4620_v43 = vsel %vm4606_vm13, %v4617_v0, %v4619_v61  ;;  %v4428_v14 = vshll.u32 %v10545_v23, 30  ;;  %v4487_v49 = vshrl.u32 %v12288_v41, %v4484_v50  ;;  %v4486_v12 = vshll.u32 %v12296_v35, %v4483_v31 }
 0x5ef   : >> { %v10556_v20 = vmul.u32.u64.low %v10524_v56, %v4620_v43  ;;  %v10557_v26 = vmul.u32.u64.high %v10524_v56, %v4620_v43, %v10556_v20  ;;  %v10561_v38 = vmul.u32.u64.low %v10524_v56, %v4616_v8  ;;  %v10562_v16 = vmul.u32.u64.high %v10524_v56, %v4616_v8, %v10561_v38 }
 0x5f0   : >> { %v4490_v22 = vshrl.u32 %v12289_v58, %v4484_v50  ;;  %v10567_v18 = vsub.s32 %v4425_v7, %v4428_v14  ;;  %v4489_v39 = vshll.u32 %v12288_v41, %v4483_v31  ;;  %v4492_v29 = vshll.u32 %v12289_v58, %v4483_v31 }
 0x5f1   : >> { %v4493_v19 = vshrl.u32 %v12290_v34, %v4484_v50  ;;  %v4628_v33 = vmul.u32 %v10524_v56, %v4612_v42  ;;  %v4488_v2 = vor.u32 %v4487_v49, %v4486_v12  ;;  %v4495_v57 = vshll.u32 %v12290_v34, %v4483_v31 }
 0x5f2   : >> { %v4496_v3 = vshrl.u32 %v12291_v52, %v4484_v50  ;;  %v4431_v46 = vsub.s32 0, %v10567_v18  ;;  %vm4630_vm5 = vc.u32 %v10557_v26, %v10561_v38  ;;  %v4491_v30 = vor.u32 %v4490_v22, %v4489_v39 }
 0x5f3   : >> { %v4494_v7 = vor.u32 %v4493_v19, %v4492_v29  ;;  %v4631_v28 = vadd.s32 1, %v10562_v16  ;;  %v4498_v55 = vshll.u32 %v12291_v52, %v4483_v31  ;;  %v4499_v10 = vshrl.u32 %v12292_v48, %v4484_v50  ;;  %v4259_v29 = vpop.f32.mrf.mxu0 }
 0x5f4   : >> { %v4497_v17 = vor.u32 %v4496_v3, %v4495_v57  ;;  %v6479_v56 = vmin.u32 %v4431_v46, %v10567_v18  ;;  %v4485_v44 = vshrl.u32 %v12296_v35, %v4484_v50  ;;  %vm4501_vm12 = vcmp.lt.s32.totalorder %v10549_v13, 1 }
 0x5f5   : >> { %vm4502_vm1 = vcmp.lt.s32.totalorder %v10549_v13, 2  ;;  %v4632_v9 = vsel %vm4630_vm5, %v4631_v28, %v10562_v16  ;;  %v4500_v53 = vor.u32 %v4499_v10, %v4498_v55  ;;  %vm4503_vm10 = vcmp.lt.s32.totalorder %v10549_v13, 3 }
 0x5f6   : >> { %vm4504_vm6 = vcmp.lt.s32.totalorder %v10549_v13, 4  ;;  %v4433_v31 = vclz %v6479_v56  ;;  %v4633_v24 = vadd.s32 %v4632_v9, %v4628_v33  ;;  %v4509_v4 = vsel %vm4501_vm12, %v4488_v2, %v4491_v30 }
 0x5f7   : >> { %v4506_v15 = vsel %vm4504_vm6, %v4494_v7, 2102212464  ;;  %v4505_v0 = vsel %vm4501_vm12, %v4485_v44, %v4488_v2  ;;  %v4510_v47 = vsel %vm4504_vm6, %v4497_v17, 920167782  ;;  %v4513_v50 = vsel %vm4501_vm12, %v4491_v30, %v4494_v7  ;;  %v10605_v2 = vpop.permute.xlu0 %4162 }
 0x5f8   : >> { %v4514_v45 = vsel %vm4504_vm6, %v4500_v53, 1326507024  ;;  %v6480_v61 = vadd.s32 4294967294, %v4433_v31  ;;  %v4634_v42 = vadd.s32 536870912, %v4633_v24  ;;  %v4511_v8 = vsel %vm4503_vm10, %v4494_v7, %v4510_v47 }
 0x5f9   : >> { %v4515_v43 = vsel %vm4503_vm10, %v4497_v17, %v4514_v45  ;;  %v4507_v14 = vsel %vm4503_vm10, %v4491_v30, %v4506_v15  ;;  %v4512_v20 = vsel %vm4502_vm1, %v4509_v4, %v4511_v8  ;;  %v6490_v16 = vadd.s32 4294967169, %v4681_v36 }
 0x5fa   : >> { %v4516_v49 = vsel %vm4502_vm1, %v4513_v50, %v4515_v43  ;;  %vm6481_vm7 = vcmp.lt.s32.totalorder %v6480_v61, 0  ;;  %v10594_v12 = vshrl.u32 %v4634_v42, 30  ;;  %v4508_v36 = vsel %vm4502_vm1, %v4505_v0, %v4507_v14 }
 0x5fb   : >> { %v10597_v22 = vmul.u32.u64.low %v10520_v27, %v4516_v49  ;;  %v10598_v39 = vmul.u32.u64.high %v10520_v27, %v4516_v49, %v10597_v22  ;;  %v10601_v19 = vmul.u32.u64.low %v10520_v27, %v4512_v20  ;;  %v10602_v33 = vmul.u32.u64.high %v10520_v27, %v4512_v20, %v10601_v19 }
 0x5fc   : >> { %12586 = vst [vmem:[#allocation66_spill] sm:$0xff] %v10594_v12  ;;  %v4436_v57 = vsel %vm6481_vm7, 0, %v6480_v61  ;;  %v4636_v3 = vshll.u32 %v10594_v12, 30  ;;  %v12165_v46 = vand.u32 2147483647, %v10491_v63  ;;  %v4687_v30 = vadd.s32 1, %v6490_v16 }
 0x5fd   : >> { %v10612_v7 = vadd.f32 %v4259_v29, %v10605_v2  ;;  %v4441_v17 = vsub.s32 4294967266, %v4436_v57  ;;  %vm4526_vm8 = vc.u32 %v10598_v39, %v10601_v19  ;;  %v4527_v55 = vadd.s32 1, %v10602_v33 }
 0x5fe   : >> { %v10614_v28 = vsub.s32 %v4633_v24, %v4636_v3  ;;  %vm4688_vm9 = vcmp.gt.s32.totalorder %v4687_v30, 0  ;;  %v4524_v13 = vmul.u32 %v10520_v27, %v4508_v36  ;;  %v4684_v9 = vand.u32 8388607, %v12165_v46 }
 0x5ff   : >> { %12587 = vst [vmem:[#allocation49_spill] sm:$0xff] %v10612_v7  ;;  %v4689_v56 = vsel %vm4688_vm9, %v4687_v30, 0  ;;  %v4528_v44 = vsel %vm4526_vm8, %v4527_v55, %v10602_v33  ;;  %v4784_v31 = vand.u32 2139095040, %v10612_v7  ;;  %v4437_v4 = vsub.s32 32, %v4436_v57 }
 0x600   : >> { %v4639_v10 = vsub.s32 0, %v10614_v28  ;;  %v4691_v53 = vand.u32 31, %v4689_v56  ;;  %v4529_v15 = vadd.s32 %v4528_v44, %v4524_v13  ;;  %v4442_v0 = vadd.s32 127, %v4441_v17 }
 0x601   : >> { %v4421_v50 = vadd.s32 %v10516_v32, %v10513_v21  ;;  %v4438_v61 = vshll.u32 %v10567_v18, %v4436_v57  ;;  %v4685_v42 = vor.u32 8388608, %v4684_v9  ;;  %v4785_v43 = vshrl.u32 %v4784_v31, 23 }
 0x602   : >> { %v6487_v24 = vmin.u32 %v4639_v10, %v10614_v28  ;;  %v4692_v47 = vsub.s32 32, %v4691_v53  ;;  %v4530_v27 = vadd.s32 536870912, %v4529_v15  ;;  %v4443_v29 = vshll.u32 %v4442_v0, 23 }
 0x603   : >> { %v4439_v22 = vshrl.u32 %v4421_v50, %v4437_v4  ;;  %v4694_v33 = vshll.u32 %v12296_v35, %v4691_v53  ;;  %v4697_v18 = vshll.u32 %v12288_v41, %v4691_v53  ;;  %v4700_v57 = vshll.u32 %v12289_v58, %v4691_v53 }
 0x604   : >> { %v4641_v45 = vclz %v6487_v24  ;;  %v4695_v8 = vshrl.u32 %v12288_v41, %v4692_v47  ;;  %v10630_v20 = vshrl.u32 %v4530_v27, 30  ;;  %v4698_v49 = vshrl.u32 %v12289_v58, %v4692_v47 }
 0x605   : >> { %v4701_v16 = vshrl.u32 %v12290_v34, %v4692_v47  ;;  %v4704_v21 = vshrl.u32 %v12291_v52, %v4692_v47  ;;  %v4690_v36 = vshrl.u32 %v4689_v56, 5  ;;  %v4703_v30 = vshll.u32 %v12290_v34, %v4691_v53 }
 0x606   : >> { %v6488_v14 = vadd.s32 4294967294, %v4641_v45  ;;  %12588 = vst [vmem:[#allocation62_spill] sm:$0xff] %v10630_v20  ;;  %v4532_v32 = vshll.u32 %v10630_v20, 30  ;;  %v4707_v17 = vshrl.u32 %v12292_v48, %v4692_v47  ;;  %v4696_v55 = vor.u32 %v4695_v8, %v4694_v33 }
 0x607   : >> { %v4699_v10 = vor.u32 %v4698_v49, %v4697_v18  ;;  %v4702_v13 = vor.u32 %v4701_v16, %v4700_v57  ;;  %v4706_v44 = vshll.u32 %v12291_v52, %v4691_v53  ;;  %v4705_v24 = vor.u32 %v4704_v21, %v4703_v30 }
 0x608   : >> { %vm6489_vm15 = vcmp.lt.s32.totalorder %v6488_v14, 0  ;;  %v10645_v31 = vsub.s32 %v4529_v15, %v4532_v32  ;;  %v4440_v4 = vor.u32 %v4439_v22, %v4438_v61  ;;  %v4444_v0 = vor.u32 4788187, %v4443_v29 }
 0x609   : >> { %v10639_v3 = vsel %vm6489_vm15, 0, %v6488_v14  ;;  %v4708_v50 = vor.u32 %v4707_v17, %v4706_v44  ;;  %v4725_v45 = vshll.u32 %v4685_v42, 8  ;;  %vm4709_vm2 = vcmp.lt.s32.totalorder %v4690_v36, 1 }
 0x60a   : >> { %v4649_v9 = vsub.s32 4294967266, %v10639_v3  ;;  %v4535_v56 = vsub.s32 0, %v10645_v31  ;;  %vm4712_vm3 = vcmp.lt.s32.totalorder %v4690_v36, 4  ;;  %v6494_v27 = vadd.s32 4294967169, %v4785_v43 }
 0x60b   : >> { %v4693_v8 = vshrl.u32 %v12296_v35, %v4692_v47  ;;  %vm4711_vm11 = vcmp.lt.s32.totalorder %v4690_v36, 3  ;;  %v4714_v14 = vsel %vm4712_vm3, %v4702_v13, 2102212464  ;;  %v4717_v49 = vsel %vm4709_vm2, %v4696_v55, %v4699_v10 }
 0x60c   : >> { %v4650_v53 = vadd.s32 127, %v4649_v9  ;;  %v6483_v16 = vmin.u32 %v4535_v56, %v10645_v31  ;;  %v4718_v15 = vsel %vm4712_vm3, %v4705_v24, 920167782  ;;  %v4721_v33 = vsel %vm4709_vm2, %v4699_v10, %v4702_v13 }
 0x60d   : >> { %v4445_v21 = vand.u32 2147483647, %v4444_v0  ;;  %vm4710_vm0 = vcmp.lt.s32.totalorder %v4690_v36, 2  ;;  %v4719_v61 = vsel %vm4711_vm11, %v4702_v13, %v4718_v15  ;;  %v4722_v22 = vsel %vm4712_vm3, %v4708_v50, 1326507024  ;;  %v4348_v15 = vpop.f32.mrf.mxu1 }
 0x60e   : >> { %v4713_v42 = vsel %vm4709_vm2, %v4693_v8, %v4696_v55  ;;  %v4715_v29 = vsel %vm4711_vm11, %v4699_v10, %v4714_v14  ;;  %v4720_v32 = vsel %vm4710_vm0, %v4717_v49, %v4719_v61  ;;  %v4723_v18 = vsel %vm4711_vm11, %v4705_v24, %v4722_v22 }
 0x60f   : >> { %v4537_v43 = vclz %v6483_v16  ;;  %v4724_v47 = vsel %vm4710_vm0, %v4721_v33, %v4723_v18  ;;  %v10652_v57 = vmul.u32.u64.low %v4725_v45, %v4720_v32  ;;  %v10653_v30 = vmul.u32.u64.high %v4725_v45, %v4720_v32, %v10652_v57 }
 0x610   : >> { %v4645_v17 = vsub.s32 32, %v10639_v3  ;;  %v4651_v44 = vshll.u32 %v4650_v53, 23  ;;  %v10657_v9 = vmul.u32.u64.low %v4725_v45, %v4724_v47  ;;  %v10658_v0 = vmul.u32.u64.high %v4725_v45, %v4724_v47, %v10657_v9 }
 0x611   : >> { %v12167_v13 = vand.u32 2147483647, %v10612_v7  ;;  %v4791_v55 = vadd.s32 1, %v6494_v27  ;;  %v4447_v10 = vcvt.s32.f32 %v4440_v4  ;;  %v4629_v24 = vadd.s32 %v10561_v38, %v10557_v26  ;;  %v4261_v26 = vpop.f32.mrf.mxu0 }
 0x612   : >> { %v4716_v50 = vsel %vm4710_vm0, %v4713_v42, %v4715_v29  ;;  %v6484_v56 = vadd.s32 4294967294, %v4537_v43  ;;  %v4735_v8 = vadd.s32 1, %v10653_v30  ;;  %v10667_v53 = vor.u32 4788187, %v4651_v44 }
 0x613   : >> { %vm4792_vm13 = vcmp.gt.s32.totalorder %v4791_v55, 0  ;;  %v10665_v14 = vmul.f32 %v4447_v10, %v4445_v21  ;;  %v4647_v49 = vshrl.u32 %v4629_v24, %v4645_v17  ;;  %v4732_v16 = vmul.u32 %v4725_v45, %v4716_v50 }
 0x614   : >> { %vm4734_vm4 = vc.u32 %v10658_v0, %v10652_v57  ;;  %v4788_v4 = vand.u32 8388607, %v12167_v13  ;;  %v4793_v27 = vsel %vm4792_vm13, %v4791_v55, 0  ;;  %v4646_v38 = vshll.u32 %v10614_v28, %v10639_v3 }
 0x615   : >> { %v4736_v36 = vsel %vm4734_vm4, %v4735_v8, %v10653_v30  ;;  %vm6485_vm14 = vcmp.lt.s32.totalorder %v6484_v56, 0  ;;  %v4795_v21 = vand.u32 31, %v4793_v27  ;;  %v4449_v61 = vxor.u32 2147483648, %v10665_v14 }
 0x616   : >> { %v4737_v33 = vadd.s32 %v4736_v36, %v4732_v16  ;;  %v4648_v45 = vor.u32 %v4647_v49, %v4646_v38  ;;  %v4653_v22 = vand.u32 2147483647, %v10667_v53  ;;  %v10679_v42 = vadd.f32 %v4261_v26, %v10605_v2 }
 0x617   : >> { %v4789_v32 = vor.u32 8388608, %v4788_v4  ;;  %v4796_v18 = vsub.s32 32, %v4795_v21  ;;  %v10682_v43 = vadd.f32 %v4348_v15, %v10605_v2  ;;  %v10684_v28 = vsel %vm6485_vm14, 0, %v6484_v56 }
 0x618   : >> { %v4738_v29 = vadd.s32 536870912, %v4737_v33  ;;  %v4794_v3 = vshrl.u32 %v4793_v27, 5  ;;  %v4798_v47 = vshll.u32 %v12296_v35, %v4795_v21  ;;  %v4801_v30 = vshll.u32 %v12288_v41, %v4795_v21 }
 0x619   : >> { %12589 = vst [vmem:[#allocation67_spill] sm:$0xff] %v10682_v43  ;;  %v4799_v44 = vshrl.u32 %v12288_v41, %v4796_v18  ;;  %v4802_v9 = vshrl.u32 %v12289_v58, %v4796_v18  ;;  %v4804_v55 = vshll.u32 %v12289_v58, %v4795_v21  ;;  %v4805_v10 = vshrl.u32 %v12290_v34, %v4796_v18 }
 0x61a   : >> { %v10688_v17 = vshrl.u32 %v4738_v29, 30  ;;  %v4807_v24 = vshll.u32 %v12290_v34, %v4795_v21  ;;  %v4808_v50 = vshrl.u32 %v12291_v52, %v4796_v18  ;;  %v4810_v56 = vshll.u32 %v12291_v52, %v4795_v21 }
 0x61b   : >> { %v4800_v49 = vor.u32 %v4799_v44, %v4798_v47  ;;  %v4803_v53 = vor.u32 %v4802_v9, %v4801_v30  ;;  %v4811_v16 = vshrl.u32 %v12292_v48, %v4796_v18  ;;  %v4541_v4 = vsub.s32 32, %v10684_v28 }
 0x61c   : >> { %12590 = vst [vmem:[#allocation58_spill] sm:$0xff] %v10688_v17  ;;  %v4740_v8 = vshll.u32 %v10688_v17, 30  ;;  %v4806_v27 = vor.u32 %v4805_v10, %v4804_v55  ;;  %v4809_v26 = vor.u32 %v4808_v50, %v4807_v24  ;;  %v4888_v38 = vand.u32 2139095040, %v10679_v42 }
 0x61d   : >> { %v4812_v15 = vor.u32 %v4811_v16, %v4810_v56  ;;  %vm4813_vm5 = vcmp.lt.s32.totalorder %v4794_v3, 1  ;;  %v4829_v29 = vshll.u32 %v4789_v32, 8  ;;  %v4797_v46 = vshrl.u32 %v12296_v35, %v4796_v18 }
 0x61e   : >> { %v10701_v36 = vsub.s32 %v4737_v33, %v4740_v8  ;;  %vm4815_vm12 = vcmp.lt.s32.totalorder %v4794_v3, 3  ;;  %vm4816_vm1 = vcmp.lt.s32.totalorder %v4794_v3, 4  ;;  %v4821_v21 = vsel %vm4813_vm5, %v4800_v49, %v4803_v53 }
 0x61f   : >> { %v4818_v30 = vsel %vm4816_vm1, %v4806_v27, 2102212464  ;;  %v4822_v44 = vsel %vm4816_vm1, %v4809_v26, 920167782  ;;  %v4825_v9 = vsel %vm4813_vm5, %v4803_v53, %v4806_v27  ;;  %vm4814_vm10 = vcmp.lt.s32.totalorder %v4794_v3, 2 }
 0x620   : >> { %v4743_v47 = vsub.s32 0, %v10701_v36  ;;  %v4817_v55 = vsel %vm4813_vm5, %v4797_v46, %v4800_v49  ;;  %v4823_v10 = vsel %vm4815_vm12, %v4806_v27, %v4822_v44  ;;  %v4826_v24 = vsel %vm4816_vm1, %v4812_v15, 1326507024 }
 0x621   : >> { %v4819_v50 = vsel %vm4815_vm12, %v4803_v53, %v4818_v30  ;;  %v4824_v56 = vsel %vm4814_vm10, %v4821_v21, %v4823_v10  ;;  %v4827_v8 = vsel %vm4815_vm12, %v4809_v26, %v4826_v24  ;;  %v4545_v32 = vsub.s32 4294967266, %v10684_v28 }
 0x622   : >> { %v6491_v33 = vmin.u32 %v4743_v47, %v10701_v36  ;;  %v4828_v18 = vsel %vm4814_vm10, %v4825_v9, %v4827_v8  ;;  %v10707_v16 = vmul.u32.u64.low %v4829_v29, %v4824_v56  ;;  %v10708_v54 = vmul.u32.u64.high %v4829_v29, %v4824_v56, %v10707_v16 }
 0x623   : >> { %vm12210_vm6 = vcmp.lt.s32.totalorder %v10471_v37, 0  ;;  %v4655_v13 = vcvt.s32.f32 %v4648_v45  ;;  %v10711_v6 = vmul.u32.u64.low %v4829_v29, %v4828_v18  ;;  %v10712_v1 = vmul.u32.u64.high %v4829_v29, %v4828_v18, %v10711_v6 }
 0x624   : >> { %v4525_v46 = vadd.s32 %v10601_v19, %v10598_v39  ;;  %v4820_v3 = vsel %vm4814_vm10, %v4817_v55, %v4819_v50  ;;  %v4992_v49 = vand.u32 2139095040, %v10682_v43  ;;  %v4889_v53 = vshrl.u32 %v4888_v38, 23 }
 0x625   : >> { %v12591_v27 = vand.u32 2147483647, %v10471_v37  ;;  %v12592_v26 = vmov 0  ;;  %v4450_v45 = vsel %vm12210_vm6, %v4449_v61, %v10665_v14  ;;  %v4656_v15 = vmul.f32 %v4655_v13, %v4653_v22 }
 0x626   : >> { %v4745_v21 = vclz %v6491_v33  ;;  %v4543_v6 = vshrl.u32 %v4525_v46, %v4541_v4  ;;  %v4546_v47 = vadd.s32 127, %v4545_v32  ;;  %v4839_v39 = vadd.s32 1, %v10708_v54 }
 0x627   : >> { %vm10719_vm7 = vcmp.le.f32.partialorder %v12591_v27, 0.7853982  ;;  %v4993_v19 = vshrl.u32 %v4992_v49, 23  ;;  %v4836_v30 = vmul.u32 %v4829_v29, %v4820_v3  ;;  %vm4838_vm8 = vc.u32 %v10712_v1, %v10707_v16 }
 0x628   : >> { %v12593_v26 = vsel %vm10719_vm7, 4294967295, %v12592_v26  ;;  %v12171_v38 = vand.u32 2147483647, %v10682_v43  ;;  %v12170_v44 = vand.u32 2147483647, %v10679_v42  ;;  %v4542_v9 = vshll.u32 %v10645_v31, %v10684_v28  ;;  %v4350_v28 = vpop.f32.mrf.mxu1 }
 0x629   : >> { %12594 = vst [vmem:[#allocation44_spill] sm:$0xff] %v12593_v26  ;;  %v4840_v55 = vsel %vm4838_vm8, %v4839_v39, %v10708_v54  ;;  %v6502_v14 = vadd.s32 4294967169, %v4993_v19  ;;  %v6498_v13 = vadd.s32 4294967169, %v4889_v53  ;;  %v10736_v61 = vsel %vm10719_vm7, %v10471_v37, %v4450_v45 }
 0x62a   : >> { %v4657_v22 = vxor.u32 2147483648, %v4656_v15  ;;  %v6492_v4 = vadd.s32 4294967294, %v4745_v21  ;;  %v4841_v29 = vadd.s32 %v4840_v55, %v4836_v30  ;;  %v10738_v10 = vor.u32 %v4543_v6, %v4542_v9 }
 0x62b   : >> { %v4547_v24 = vshll.u32 %v4546_v47, 23  ;;  %v4999_v33 = vadd.s32 1, %v6502_v14  ;;  %vm12202_vm9 = vcmp.lt.s32.totalorder %v10481_v51, 0  ;;  %v4996_v54 = vand.u32 8388607, %v12171_v38 }
 0x62c   : >> { %v4842_v50 = vadd.s32 536870912, %v4841_v29  ;;  %v10745_v31 = vand.u32 8388607, %v12170_v44  ;;  %6938 = vcosq.f32 %v10736_v61  ;;  %v10750_v56 = vadd.s32 %v10652_v57, %v10658_v0 }
 0x62d   : >> { %vm5000_vm15 = vcmp.gt.s32.totalorder %v4999_v33, 0  ;;  %v4895_v8 = vadd.s32 1, %v6498_v13  ;;  %v10754_v32 = vsel %vm12202_vm9, %v4657_v22, %v4656_v15  ;;  %vm6493_vm2 = vcmp.lt.s32.totalorder %v6492_v4, 0 }
 0x62e   : >> { %v10756_v18 = vshrl.u32 %v4842_v50, 30  ;;  %v5001_v46 = vsel %vm5000_vm15, %v4999_v33, 0  ;;  %v10758_v3 = vor.u32 4788187, %v4547_v24  ;;  %v10762_v27 = vadd.f32 %v4350_v28, %v10605_v2 }
 0x62f   : >> { %v5003_v53 = vand.u32 31, %v5001_v46  ;;  %v10765_v57 = vadd.s32 %v10707_v16, %v10712_v1  ;;  %v4997_v45 = vor.u32 8388608, %v4996_v54  ;;  %v4893_v15 = vor.u32 8388608, %v10745_v31 }
 0x630   : >> { %12595 = vst [vmem:[#allocation36_spill] sm:$0xff] %v10756_v18  ;;  %12596 = vst [vmem:[#allocation59_spill] sm:$0xff] %v10762_v27  ;;  %v4844_v0 = vshll.u32 %v10756_v18, 30  ;;  %v10769_v21 = vsel %vm6493_vm2, 0, %v6492_v4  ;;  %v5002_v6 = vshrl.u32 %v5001_v46, 5  ;;  %vm4896_vm3 = vcmp.gt.s32.totalorder %v4895_v8, 0 }
 0x631   : >> { %v5004_v47 = vsub.s32 32, %v5003_v53  ;;  %v5006_v19 = vshll.u32 %v12296_v35, %v5003_v53  ;;  %v5009_v2 = vshll.u32 %v12288_v41, %v5003_v53  ;;  %v5012_v30 = vshll.u32 %v12289_v58, %v5003_v53 }
 0x632   : >> { %v10771_v39 = vsub.s32 %v4841_v29, %v4844_v0  ;;  %v5015_v55 = vshll.u32 %v12290_v34, %v5003_v53  ;;  %v5018_v22 = vshll.u32 %v12291_v52, %v5003_v53  ;;  %v5037_v50 = vshll.u32 %v4997_v45, 8 }
 0x633   : >> { %v5007_v1 = vshrl.u32 %v12288_v41, %v5004_v47  ;;  %v5010_v16 = vshrl.u32 %v12289_v58, %v5004_v47  ;;  %v5013_v9 = vshrl.u32 %v12290_v34, %v5004_v47  ;;  %v5016_v13 = vshrl.u32 %v12291_v52, %v5004_v47 }
 0x634   : >> { %v4847_v14 = vsub.s32 0, %v10771_v39  ;;  %v5019_v4 = vshrl.u32 %v12292_v48, %v5004_v47  ;;  %v4753_v54 = vsub.s32 4294967266, %v10769_v21  ;;  %v5005_v0 = vshrl.u32 %v12296_v35, %v5004_v47 }
 0x635   : >> { %v5008_v29 = vor.u32 %v5007_v1, %v5006_v19  ;;  %v5011_v24 = vor.u32 %v5010_v16, %v5009_v2  ;;  %v5014_v33 = vor.u32 %v5013_v9, %v5012_v30  ;;  %v5017_v28 = vor.u32 %v5016_v13, %v5015_v55 }
 0x636   : >> { %v6495_v31 = vmin.u32 %v4847_v14, %v10771_v39  ;;  %v5020_v46 = vor.u32 %v5019_v4, %v5018_v22  ;;  %vm5021_vm11 = vcmp.lt.s32.totalorder %v5002_v6, 1  ;;  %vm5024_vm0 = vcmp.lt.s32.totalorder %v5002_v6, 4 }
 0x637   : >> { %v4897_v44 = vsel %vm4896_vm3, %v4895_v8, 0  ;;  %vm5022_vm13 = vcmp.lt.s32.totalorder %v5002_v6, 2  ;;  %v5026_v53 = vsel %vm5024_vm0, %v5014_v33, 2102212464  ;;  %v5029_v49 = vsel %vm5021_vm11, %v5008_v29, %v5011_v24 }
 0x638   : >> { %v4849_v38 = vclz %v6495_v31  ;;  %vm5023_vm4 = vcmp.lt.s32.totalorder %v5002_v6, 3  ;;  %v5030_v19 = vsel %vm5024_vm0, %v5017_v28, 920167782  ;;  %v5033_v2 = vsel %vm5021_vm11, %v5011_v24, %v5014_v33 }
 0x639   : >> { %v5034_v45 = vsel %vm5024_vm0, %v5020_v46, 1326507024  ;;  %v10788_v30 = vpop.eup %6938  ;;  %v5025_v16 = vsel %vm5021_vm11, %v5005_v0, %v5008_v29  ;;  %v5031_v9 = vsel %vm5023_vm4, %v5014_v33, %v5030_v19  ;;  %v5027_v14 = vsel %vm5023_vm4, %v5011_v24, %v5026_v53 }
 0x63a   : >> { %12597 = vst [vmem:[#allocation42_spill] sm:$0xff] %v10788_v30  ;;  %v6496_v1 = vadd.s32 4294967294, %v4849_v38  ;;  %v5035_v55 = vsel %vm5023_vm4, %v5017_v28, %v5034_v45  ;;  %v5032_v47 = vsel %vm5022_vm13, %v5029_v49, %v5031_v9  ;;  %v4899_v8 = vand.u32 31, %v4897_v44 }
 0x63b   : >> { %v5036_v13 = vsel %vm5022_vm13, %v5033_v2, %v5035_v55  ;;  %v10798_v46 = vmul.u32.u64.low %v5037_v50, %v5032_v47  ;;  %v10799_v11 = vmul.u32.u64.high %v5037_v50, %v5032_v47, %v10798_v46  ;;  %v5028_v49 = vsel %vm5022_vm13, %v5025_v16, %v5027_v14 }
 0x63c   : >> { %vm6497_vm14 = vcmp.lt.s32.totalorder %v6496_v1, 0  ;;  %v10793_v4 = vmul.u32.u64.low %v5037_v50, %v5036_v13  ;;  %v10794_v31 = vmul.u32.u64.high %v5037_v50, %v5036_v13, %v10793_v4  ;;  %v4900_v38 = vsub.s32 32, %v4899_v8 }
 0x63d   : >> { %v10796_v5 = vsel %vm6497_vm14, 0, %v6496_v1  ;;  %v10804_v24 = vshll.u32 %v4893_v15, 8  ;;  %v10807_v28 = vadd.s32 127, %v4753_v54  ;;  %v4902_v0 = vshll.u32 %v12296_v35, %v4899_v8 }
 0x63e   : >> { %v4857_v29 = vsub.s32 4294967266, %v10796_v5  ;;  %v4903_v53 = vshrl.u32 %v12288_v41, %v4900_v38  ;;  %v4906_v19 = vshrl.u32 %v12289_v58, %v4900_v38  ;;  %vm5046_vm5 = vc.u32 %v10794_v31, %v10798_v46 }
 0x63f   : >> { %v4898_v2 = vshrl.u32 %v4897_v44, 5  ;;  %v4905_v45 = vshll.u32 %v12288_v41, %v4899_v8  ;;  %v5096_v6 = vand.u32 2139095040, %v10762_v27  ;;  %v5044_v1 = vmul.u32 %v5037_v50, %v5028_v49 }
 0x640   : >> { %v4858_v15 = vadd.s32 127, %v4857_v29  ;;  %v5047_v16 = vadd.s32 1, %v10799_v11  ;;  %v4904_v54 = vor.u32 %v4903_v53, %v4902_v0  ;;  %v4908_v55 = vshll.u32 %v12289_v58, %v4899_v8 }
 0x641   : >> { %v4907_v9 = vor.u32 %v4906_v19, %v4905_v45  ;;  %v4909_v14 = vshrl.u32 %v12290_v34, %v4900_v38  ;;  %v4911_v47 = vshll.u32 %v12290_v34, %v4899_v8  ;;  %v4912_v44 = vshrl.u32 %v12291_v52, %v4900_v38 }
 0x642   : >> { %v5048_v13 = vsel %vm5046_vm5, %v5047_v16, %v10799_v11  ;;  %v4914_v4 = vshll.u32 %v12291_v52, %v4899_v8  ;;  %v4915_v33 = vshrl.u32 %v12292_v48, %v4900_v38  ;;  %vm4917_vm12 = vcmp.lt.s32.totalorder %v4898_v2, 1 }
 0x643   : >> { %v5049_v29 = vadd.s32 %v5048_v13, %v5044_v1  ;;  %v4910_v50 = vor.u32 %v4909_v14, %v4908_v55  ;;  %v5097_v49 = vshrl.u32 %v5096_v6, 23  ;;  %v4853_v0 = vsub.s32 32, %v10796_v5 }
 0x644   : >> { %v4854_v53 = vshll.u32 %v10771_v39, %v10796_v5  ;;  %v4913_v19 = vor.u32 %v4912_v44, %v4911_v47  ;;  %v4916_v45 = vor.u32 %v4915_v33, %v4914_v4  ;;  %v4859_v22 = vshll.u32 %v4858_v15, 23  ;;  %v4265_v4 = vpop.f32.mrf.mxu0 }
 0x645   : >> { %v5050_v25 = vadd.s32 536870912, %v5049_v29  ;;  %v4901_v11 = vshrl.u32 %v12296_v35, %v4900_v38  ;;  %vm4920_vm1 = vcmp.lt.s32.totalorder %v4898_v2, 4  ;;  %vm4919_vm10 = vcmp.lt.s32.totalorder %v4898_v2, 3 }
 0x646   : >> { %v4922_v8 = vsel %vm4920_vm1, %v4910_v50, 2102212464  ;;  %v4925_v16 = vsel %vm4917_vm12, %v4904_v54, %v4907_v9  ;;  %v4926_v1 = vsel %vm4920_vm1, %v4913_v19, 920167782  ;;  %vm4918_vm8 = vcmp.lt.s32.totalorder %v4898_v2, 2 }
 0x647   : >> { %v10829_v55 = vshrl.u32 %v5050_v25, 30  ;;  %v4927_v6 = vsel %vm4919_vm10, %v4910_v50, %v4926_v1  ;;  %v4929_v14 = vsel %vm4917_vm12, %v4907_v9, %v4910_v50  ;;  %v4855_v5 = vshrl.u32 %v10765_v57, %v4853_v0 }
 0x648   : >> { %v4928_v39 = vsel %vm4918_vm8, %v4925_v16, %v4927_v6  ;;  %v4930_v33 = vsel %vm4920_vm1, %v4916_v45, 1326507024  ;;  %v6506_v15 = vadd.s32 4294967169, %v5097_v49  ;;  %v4921_v47 = vsel %vm4917_vm12, %v4901_v11, %v4904_v54 }
 0x649   : >> { %12598 = vst [vmem:[#allocation48_spill] sm:$0xff] %v10829_v55  ;;  %v5052_v38 = vshll.u32 %v10829_v55, 30  ;;  %v4923_v13 = vsel %vm4919_vm10, %v4907_v9, %v4922_v8  ;;  %v4931_v44 = vsel %vm4919_vm10, %v4913_v19, %v4930_v33  ;;  %v4860_v40 = vor.u32 4788187, %v4859_v22 }
 0x64a   : >> { %v4932_v25 = vsel %vm4918_vm8, %v4929_v14, %v4931_v44  ;;  %v10838_v1 = vmul.u32.u64.low %v10804_v24, %v4928_v39  ;;  %v10839_v30 = vmul.u32.u64.high %v10804_v24, %v4928_v39, %v10838_v1  ;;  %v4549_v57 = vand.u32 2147483647, %v10758_v3 }
 0x64b   : >> { %v10843_v50 = vsub.s32 %v5049_v29, %v5052_v38  ;;  %v10846_v49 = vmul.u32.u64.low %v10804_v24, %v4932_v25  ;;  %v10847_v0 = vmul.u32.u64.high %v10804_v24, %v4932_v25, %v10846_v49  ;;  %v4856_v54 = vor.u32 %v4855_v5, %v4854_v53 }
 0x64c   : >> { %v4924_v9 = vsel %vm4918_vm8, %v4921_v47, %v4923_v13  ;;  %v5103_v19 = vadd.s32 1, %v6506_v15  ;;  %v10851_v22 = vadd.f32 %v4265_v4, %v10469_v59  ;;  %v4750_v45 = vshll.u32 %v10701_v36, %v10769_v21 }
 0x64d   : >> { %v12599_v11 = vsub.s32 32, %v10769_v21  ;;  %v4755_v29 = vshll.u32 %v10807_v28, 23  ;;  %v5055_v8 = vsub.s32 0, %v10843_v50  ;;  %v4861_v16 = vand.u32 2147483647, %v4860_v40 }
 0x64e   : >> { %v4943_v53 = vadd.s32 1, %v10839_v30  ;;  %v12600_v2 = vand.u32 2147483647, %v10762_v27  ;;  %vm5104_vm15 = vcmp.gt.s32.totalorder %v5103_v19, 0  ;;  %v4940_v5 = vmul.u32 %v10804_v24, %v4924_v9 }
 0x64f   : >> { %v4751_v3 = vshrl.u32 %v10750_v56, %v12599_v11  ;;  %v6503_v14 = vmin.u32 %v5055_v8, %v10843_v50  ;;  %vm4942_vm2 = vc.u32 %v10847_v0, %v10838_v1  ;;  %v5105_v36 = vsel %vm5104_vm15, %v5103_v19, 0 }
 0x650   : >> { %v5100_v6 = vand.u32 8388607, %v12600_v2  ;;  %v12601_v56 = vcvt.s32.f32 %v10738_v10  ;;  %v4863_v28 = vcvt.s32.f32 %v4856_v54  ;;  %v4944_v40 = vsel %vm4942_vm2, %v4943_v53, %v10839_v30 }
 0x651   : >> { %v5107_v39 = vand.u32 31, %v5105_v36  ;;  %v10872_v33 = vor.u32 %v4751_v3, %v4750_v45  ;;  %v10874_v15 = vor.u32 4788187, %v4755_v29  ;;  %v5057_v38 = vclz %v6503_v14 }
 0x652   : >> { %v10869_v21 = vmul.f32 %v12601_v56, %v4549_v57  ;;  %v4945_v47 = vadd.s32 %v4944_v40, %v4940_v5  ;;  %v10876_v13 = vmul.f32 %v4863_v28, %v4861_v16  ;;  %v5101_v24 = vor.u32 8388608, %v5100_v6 }
 0x653   : >> { %v5108_v44 = vsub.s32 32, %v5107_v39  ;;  %v5200_v4 = vand.u32 2139095040, %v10851_v22  ;;  %v6504_v25 = vadd.s32 4294967294, %v5057_v38  ;;  %v10879_v57 = vshrl.u32 %v5105_v36, 5 }
 0x654   : >> { %v4946_v10 = vadd.s32 536870912, %v4945_v47  ;;  %v5110_v49 = vshll.u32 %v12296_v35, %v5107_v39  ;;  %v5113_v54 = vshll.u32 %v12288_v41, %v5107_v39  ;;  %v5116_v8 = vshll.u32 %v12289_v58, %v5107_v39 }
 0x655   : >> { %v5111_v30 = vshrl.u32 %v12288_v41, %v5108_v44  ;;  %v5114_v9 = vshrl.u32 %v12289_v58, %v5108_v44  ;;  %v5117_v19 = vshrl.u32 %v12290_v34, %v5108_v44  ;;  %vm6505_vm3 = vcmp.lt.s32.totalorder %v6504_v25, 0 }
 0x656   : >> { %v10886_v45 = vshrl.u32 %v4946_v10, 30  ;;  %v5120_v11 = vshrl.u32 %v12291_v52, %v5108_v44  ;;  %v5123_v3 = vshrl.u32 %v12292_v48, %v5108_v44  ;;  %v5060_v29 = vsel %vm6505_vm3, 0, %v6504_v25 }
 0x657   : >> { %v5119_v16 = vshll.u32 %v12290_v34, %v5107_v39  ;;  %v5122_v53 = vshll.u32 %v12291_v52, %v5107_v39  ;;  %v5065_v2 = vsub.s32 4294967266, %v5060_v29  ;;  %v5112_v14 = vor.u32 %v5111_v30, %v5110_v49 }
 0x658   : >> { %v4948_v6 = vshll.u32 %v10886_v45, 30  ;;  %v5115_v5 = vor.u32 %v5114_v9, %v5113_v54  ;;  %v5045_v36 = vadd.s32 %v10798_v46, %v10794_v31  ;;  %v5118_v56 = vor.u32 %v5117_v19, %v5116_v8 }
 0x659   : >> { %v5121_v28 = vor.u32 %v5120_v11, %v5119_v16  ;;  %v5124_v40 = vor.u32 %v5123_v3, %v5122_v53  ;;  %vm12224_vm11 = vcmp.lt.s32.totalorder %v10612_v7, 0  ;;  %v4865_v38 = vxor.u32 2147483648, %v10876_v13 }
 0x65a   : >> { %v5061_v25 = vsub.s32 32, %v5060_v29  ;;  %v10898_v10 = vsub.s32 %v4945_v47, %v4948_v6  ;;  %v5201_v26 = vshrl.u32 %v5200_v4, 23  ;;  %v12602_v39 = vand.u32 2147483647, %v10481_v51 }
 0x65b   : >> { %v12603_v37 = vmov 0  ;;  %v5066_v49 = vadd.s32 127, %v5065_v2  ;;  %v5109_v31 = vshrl.u32 %v12296_v35, %v5108_v44  ;;  %vm5125_vm13 = vcmp.lt.s32.totalorder %v10879_v57, 1 }
 0x65c   : >> { %vm10902_vm0 = vcmp.le.f32.partialorder %v12602_v39, 0.7853982  ;;  %v5141_v46 = vshll.u32 %v5101_v24, 8  ;;  %v4951_v30 = vsub.s32 0, %v10898_v10  ;;  %vm5126_vm4 = vcmp.lt.s32.totalorder %v10879_v57, 2 }
 0x65d   : >> { %v12604_v37 = vsel %vm10902_vm0, 4294967295, %v12603_v37  ;;  %vm5128_vm14 = vcmp.lt.s32.totalorder %v10879_v57, 4  ;;  %v5133_v47 = vsel %vm5125_vm13, %v5112_v14, %v5115_v5  ;;  %v12606_v4 = vand.u32 2147483647, %v10612_v7 }
 0x65e   : >> { %12605 = vst [vmem:[#allocation46_spill] sm:$0xff] %v12604_v37  ;;  %v12607_v54 = vmov 0  ;;  %v5130_v9 = vsel %vm5128_vm14, %v5118_v56, 2102212464  ;;  %v5134_v44 = vsel %vm5128_vm14, %v5121_v28, 920167782  ;;  %v5137_v24 = vsel %vm5125_vm13, %v5115_v5, %v5118_v56 }
 0x65f   : >> { %vm10915_vm5 = vcmp.le.f32.partialorder %v12606_v4, 0.7853982  ;;  %v5138_v19 = vsel %vm5128_vm14, %v5124_v40, 1326507024  ;;  %v5063_v11 = vshrl.u32 %v5045_v36, %v5061_v25  ;;  %v6499_v3 = vmin.u32 %v4951_v30, %v10898_v10 }
 0x660   : >> { %v12608_v54 = vsel %vm10915_vm5, 4294967295, %v12607_v54  ;;  %vm5127_vm12 = vcmp.lt.s32.totalorder %v10879_v57, 3  ;;  %v6510_v8 = vadd.s32 4294967169, %v5201_v26  ;;  %v5067_v16 = vshll.u32 %v5066_v49, 23 }
 0x661   : >> { %12609 = vst [vmem:[#allocation41_spill] sm:$0xff] %v12608_v54  ;;  %v5129_v53 = vsel %vm5125_vm13, %v5109_v31, %v5112_v14  ;;  %v5135_v2 = vsel %vm5127_vm12, %v5118_v56, %v5134_v44  ;;  %v5139_v6 = vsel %vm5127_vm12, %v5121_v28, %v5138_v19  ;;  %v4953_v39 = vclz %v6499_v3 }
 0x662   : >> { %v5131_v4 = vsel %vm5127_vm12, %v5115_v5, %v5130_v9  ;;  %v5136_v12 = vsel %vm5126_vm4, %v5133_v47, %v5135_v2  ;;  %v5140_v40 = vsel %vm5126_vm4, %v5137_v24, %v5139_v6  ;;  %6940 = vsinq.f32 %v10736_v61  ;;  %v4354_v47 = vpop.f32.mrf.mxu1 }
 0x663   : >> { %v10929_v36 = vmul.u32.u64.low %v5141_v46, %v5140_v40  ;;  %v10930_v25 = vmul.u32.u64.high %v5141_v46, %v5140_v40, %v10929_v36  ;;  %v10932_v30 = vmul.u32.u64.low %v5141_v46, %v5136_v12  ;;  %v10933_v23 = vmul.u32.u64.high %v5141_v46, %v5136_v12, %v10932_v30 }
 0x664   : >> { %v4757_v26 = vand.u32 2147483647, %v10874_v15  ;;  %v12184_v14 = vand.u32 2147483647, %v10851_v22  ;;  %v5207_v5 = vadd.s32 1, %v6510_v8  ;;  %v4866_v56 = vsel %vm12224_vm11, %v4865_v38, %v10876_v13 }
 0x665   : >> { %v5062_v28 = vshll.u32 %v10843_v50, %v5060_v29  ;;  %v5068_v49 = vor.u32 4788187, %v5067_v16  ;;  %v5132_v31 = vsel %vm5126_vm4, %v5129_v53, %v5131_v4  ;;  %v4661_v12 = vsel %vm10902_vm0, %v10481_v51, %v10754_v32 }
 0x666   : >> { %v4553_v61 = vxor.u32 2147483648, %v10869_v21  ;;  %v4759_v15 = vcvt.s32.f32 %v10872_v33  ;;  %vm5208_vm1 = vcmp.gt.s32.totalorder %v5207_v5, 0  ;;  %v6500_v44 = vadd.s32 4294967294, %v4953_v39 }
 0x667   : >> { %v5064_v9 = vor.u32 %v5063_v11, %v5062_v28  ;;  %vm5150_vm10 = vc.u32 %v10930_v25, %v10932_v30  ;;  %v5151_v50 = vadd.s32 1, %v10933_v23  ;;  %v10959_v57 = vsel %vm10915_vm5, %v10612_v7, %v4866_v56 }
 0x668   : >> { %v10954_v13 = vmul.f32 %v4759_v15, %v4757_v26  ;;  %v5148_v32 = vmul.u32 %v5141_v46, %v5132_v31  ;;  %v5204_v33 = vand.u32 8388607, %v12184_v14  ;;  %v5069_v29 = vand.u32 2147483647, %v5068_v49 }
 0x669   : >> { %v5152_v38 = vsel %vm5150_vm10, %v5151_v50, %v10933_v23  ;;  %v5209_v24 = vsel %vm5208_vm1, %v5207_v5, 0  ;;  %v10965_v19 = vadd.f32 %v4354_v47, %v10469_v59  ;;  %6942 = vcosq.f32 %v4661_v12 }
 0x66a   : >> { %vm12222_vm8 = vcmp.lt.s32.totalorder %v10475_v60, 0  ;;  %v5153_v11 = vadd.s32 %v5152_v38, %v5148_v32  ;;  %6944 = vsinq.f32 %v4661_v12  ;;  %v5071_v3 = vcvt.s32.f32 %v5064_v9 }
 0x66b   : >> { %vm6501_vm15 = vcmp.lt.s32.totalorder %v6500_v44, 0  ;;  %v5211_v8 = vand.u32 31, %v5209_v24  ;;  %v10971_v46 = vsel %vm12222_vm8, %v4553_v61, %v10869_v21  ;;  %6946 = vcosq.f32 %v10959_v57 }
 0x66c   : >> { %12610 = vst [vmem:[#allocation63_spill] sm:$0xff] %v10971_v46  ;;  %v5154_v23 = vadd.s32 536870912, %v5153_v11  ;;  %v10975_v53 = vmul.f32 %v5071_v3, %v5069_v29  ;;  %v5205_v2 = vor.u32 8388608, %v5204_v33  ;;  %v5408_v39 = vand.u32 2139095040, %v10965_v19 }
 0x66d   : >> { %v5212_v6 = vsub.s32 32, %v5211_v8  ;;  %v10978_v4 = vsel %vm6501_vm15, 0, %v6500_v44  ;;  %v10982_v36 = vshrl.u32 %v5209_v24, 5  ;;  %v5214_v21 = vshll.u32 %v12296_v35, %v5211_v8 }
 0x66e   : >> { %v10980_v40 = vshrl.u32 %v5154_v23, 30  ;;  %v5217_v5 = vshll.u32 %v12288_v41, %v5211_v8  ;;  %v5220_v31 = vshll.u32 %v12289_v58, %v5211_v8  ;;  %v5223_v12 = vshll.u32 %v12290_v34, %v5211_v8 }
 0x66f   : >> { %v5215_v26 = vshrl.u32 %v12288_v41, %v5212_v6  ;;  %v5218_v56 = vshrl.u32 %v12289_v58, %v5212_v6  ;;  %v5221_v28 = vshrl.u32 %v12290_v34, %v5212_v6  ;;  %v5224_v61 = vshrl.u32 %v12291_v52, %v5212_v6  ;;  %v10993_v15 = vpop.eup %6940 }
 0x670   : >> { %12611 = vst [vmem:[#allocation37_spill] sm:$0xff] %v10980_v40  ;;  %v5156_v49 = vshll.u32 %v10980_v40, 30  ;;  %12612 = vst [vmem:[#allocation47_spill] sm:$0xff] %v10993_v15  ;;  %v5226_v44 = vshll.u32 %v12291_v52, %v5211_v8  ;;  %v5227_v50 = vshrl.u32 %v12292_v48, %v5212_v6  ;;  %vm12223_vm2 = vcmp.lt.s32.totalorder %v10682_v43, 0 }
 0x671   : >> { %v5216_v47 = vor.u32 %v5215_v26, %v5214_v21  ;;  %v5219_v9 = vor.u32 %v5218_v56, %v5217_v5  ;;  %v4941_v32 = vadd.s32 %v10838_v1, %v10847_v0  ;;  %v5222_v29 = vor.u32 %v5221_v28, %v5220_v31  ;;  %v4267_v31 = vpop.f32.mrf.mxu0 }
 0x672   : >> { %v11000_v33 = vsub.s32 %v5153_v11, %v5156_v49  ;;  %v5225_v38 = vor.u32 %v5224_v61, %v5223_v12  ;;  %v5073_v24 = vxor.u32 2147483648, %v10975_v53  ;;  %v5228_v3 = vor.u32 %v5227_v50, %v5226_v44 }
 0x673   : >> { %v5245_v23 = vshll.u32 %v5205_v2, 8  ;;  %v5409_v14 = vshrl.u32 %v5408_v39, 23  ;;  %vm12218_vm3 = vcmp.lt.s32.totalorder %v10491_v63, 0  ;;  %v4961_v8 = vsub.s32 4294967266, %v10978_v4 }
 0x674   : >> { %v5159_v21 = vsub.s32 0, %v11000_v33  ;;  %vm5229_vm13 = vcmp.lt.s32.totalorder %v10982_v36, 1  ;;  %vm5232_vm4 = vcmp.lt.s32.totalorder %v10982_v36, 4  ;;  %v5213_v1 = vshrl.u32 %v12296_v35, %v5212_v6 }
 0x675   : >> { %vm5231_vm14 = vcmp.lt.s32.totalorder %v10982_v36, 3  ;;  %v5237_v0 = vsel %vm5229_vm13, %v5216_v47, %v5219_v9  ;;  %v5238_v11 = vsel %vm5232_vm4, %v5225_v38, 920167782  ;;  %vm5230_vm12 = vcmp.lt.s32.totalorder %v10982_v36, 2 }
 0x676   : >> { %v5234_v2 = vsel %vm5232_vm4, %v5222_v29, 2102212464  ;;  %v5239_v39 = vsel %vm5231_vm14, %v5222_v29, %v5238_v11  ;;  %v5241_v26 = vsel %vm5229_vm13, %v5219_v9, %v5222_v29  ;;  %v11017_v5 = vpop.eup %6942  ;;  %v6507_v56 = vmin.u32 %v5159_v21, %v11000_v33 }
 0x677   : >> { %12613 = vst [vmem:[#allocation68_spill] sm:$0xff] %v11017_v5  ;;  %v5240_v6 = vsel %vm5230_vm12, %v5237_v0, %v5239_v39  ;;  %v5242_v28 = vsel %vm5232_vm4, %v5228_v3, 1326507024  ;;  %v6518_v49 = vadd.s32 4294967169, %v5409_v14  ;;  %v11022_v12 = vpop.eup %6944  ;;  %v12185_v29 = vand.u32 2147483647, %v10965_v19 }
 0x678   : >> { %12614 = vst [vmem:[#allocation56_spill] sm:$0xff] %v11022_v12  ;;  %v5243_v61 = vsel %vm5231_vm14, %v5225_v38, %v5242_v28  ;;  %v11026_v44 = vmul.u32.u64.low %v5245_v23, %v5240_v6  ;;  %v11027_v50 = vmul.u32.u64.high %v5245_v23, %v5240_v6, %v11026_v44  ;;  %v11031_v11 = vpop.eup %6946  ;;  %v5233_v21 = vsel %vm5229_vm13, %v5213_v1, %v5216_v47 }
 0x679   : >> { %12615 = vst [vmem:[#allocation40_spill] sm:$0xff] %v11031_v11  ;;  %v5235_v14 = vsel %vm5231_vm14, %v5219_v9, %v5234_v2  ;;  %v5244_v3 = vsel %vm5230_vm12, %v5241_v26, %v5243_v61  ;;  %v5415_v0 = vadd.s32 1, %v6518_v49  ;;  %v4957_v38 = vsub.s32 32, %v10978_v4  ;;  %v4356_v9 = vpop.f32.mrf.mxu1 }
 0x67a   : >> { %v11040_v39 = vmul.u32.u64.low %v5245_v23, %v5244_v3  ;;  %v11041_v6 = vmul.u32.u64.high %v5245_v23, %v5244_v3, %v11040_v39  ;;  %v11044_v28 = vadd.f32 %v4267_v31, %v10469_v59  ;;  %v5074_v16 = vsel %vm12223_vm2, %v5073_v24, %v10975_v53 }
 0x67b   : >> { %v11049_v47 = vadd.s32 127, %v4961_v8  ;;  %v5161_v1 = vclz %v6507_v56  ;;  %vm5416_vm1 = vcmp.gt.s32.totalorder %v5415_v0, 0  ;;  %v5236_v2 = vsel %vm5230_vm12, %v5233_v21, %v5235_v14 }
 0x67c   : >> { %v5255_v26 = vadd.s32 1, %v11027_v50  ;;  %v5412_v49 = vand.u32 8388607, %v12185_v29  ;;  %v5417_v61 = vsel %vm5416_vm1, %v5415_v0, 0  ;;  %v12616_v31 = vxor.u32 2147483648, %v10954_v13 }
 0x67d   : >> { %6948 = vsinq.f32 %v10959_v57  ;;  %v12618_v24 = vand.u32 2147483647, %v10682_v43  ;;  %v12619_v36 = vmov 0  ;;  %v5419_v8 = vand.u32 31, %v5417_v61 }
 0x67e   : >> { %v11061_v53 = vsel %vm12218_vm3, %v12616_v31, %v10954_v13  ;;  %v11077_v14 = vshrl.u32 %v4941_v32, %v4957_v38  ;;  %v11080_v13 = vadd.f32 %v4356_v9, %v10469_v59  ;;  %v6508_v57 = vadd.s32 4294967294, %v5161_v1 }
 0x67f   : >> { %12617 = vst [vmem:[#allocation50_spill] sm:$0xff] %v11061_v53  ;;  %vm11066_vm10 = vcmp.le.f32.partialorder %v12618_v24, 0.7853982  ;;  %v5252_v3 = vmul.u32 %v5245_v23, %v5236_v2  ;;  %vm5254_vm15 = vc.u32 %v11041_v6, %v11026_v44  ;;  %v5420_v0 = vsub.s32 32, %v5419_v8 }
 0x680   : >> { %v12620_v36 = vsel %vm11066_vm10, 4294967295, %v12619_v36  ;;  %v11073_v56 = vsel %vm11066_vm10, %v10682_v43, %v5074_v16  ;;  %v4963_v39 = vshll.u32 %v11049_v47, 23  ;;  %v5256_v31 = vsel %vm5254_vm15, %v5255_v26, %v11027_v50 }
 0x681   : >> { %12621 = vst [vmem:[#allocation54_spill] sm:$0xff] %v12620_v36  ;;  %v5413_v16 = vor.u32 8388608, %v5412_v49  ;;  %v5304_v24 = vand.u32 2139095040, %v11044_v28  ;;  %v5257_v29 = vadd.s32 %v5256_v31, %v5252_v3  ;;  %v5418_v21 = vshrl.u32 %v5417_v61, 5 }
 0x682   : >> { %v5423_v32 = vshrl.u32 %v12288_v41, %v5420_v0  ;;  %v5426_v59 = vshrl.u32 %v12289_v58, %v5420_v0  ;;  %v5422_v38 = vshll.u32 %v12296_v35, %v5419_v8  ;;  %v5425_v23 = vshll.u32 %v12288_v41, %v5419_v8 }
 0x683   : >> { %v5428_v1 = vshll.u32 %v12289_v58, %v5419_v8  ;;  %v5429_v9 = vshrl.u32 %v12290_v34, %v5420_v0  ;;  %vm6509_vm13 = vcmp.lt.s32.totalorder %v6508_v57, 0  ;;  %v5258_v47 = vadd.s32 536870912, %v5257_v29 }
 0x684   : >> { %v5431_v50 = vshll.u32 %v12290_v34, %v5419_v8  ;;  %v5432_v2 = vshrl.u32 %v12291_v52, %v5420_v0  ;;  %v5424_v26 = vor.u32 %v5423_v32, %v5422_v38  ;;  %v5427_v49 = vor.u32 %v5426_v59, %v5425_v23 }
 0x685   : >> { %v5430_v61 = vor.u32 %v5429_v9, %v5428_v1  ;;  %v11096_v31 = vshrl.u32 %v5258_v47, 30  ;;  %v5434_v12 = vshll.u32 %v12291_v52, %v5419_v8  ;;  %v5435_v15 = vshrl.u32 %v12292_v48, %v5420_v0 }
 0x686   : >> { %v5433_v5 = vor.u32 %v5432_v2, %v5431_v50  ;;  %v5164_v37 = vsel %vm6509_vm13, 0, %v6508_v57  ;;  %vm5440_vm4 = vcmp.lt.s32.totalorder %v5418_v21, 4  ;;  %v5453_v51 = vshll.u32 %v5413_v16, 8 }
 0x687   : >> { %v5305_v53 = vshrl.u32 %v5304_v24, 23  ;;  %v5260_v17 = vshll.u32 %v11096_v31, 30  ;;  %v5436_v63 = vor.u32 %v5435_v15, %v5434_v12  ;;  %vm5437_vm14 = vcmp.lt.s32.totalorder %v5418_v21, 1 }
 0x688   : >> { %v5442_v32 = vsel %vm5440_vm4, %v5430_v61, 2102212464  ;;  %v5421_v59 = vshrl.u32 %v12296_v35, %v5420_v0  ;;  %vm5439_vm12 = vcmp.lt.s32.totalorder %v5418_v21, 3  ;;  %v5445_v38 = vsel %vm5437_vm14, %v5424_v26, %v5427_v49 }
 0x689   : >> { %v5446_v23 = vsel %vm5440_vm4, %v5433_v5, 920167782  ;;  %v11104_v1 = vsub.s32 %v5257_v29, %v5260_v17  ;;  %vm5438_vm1 = vcmp.lt.s32.totalorder %v5418_v21, 2  ;;  %v5449_v57 = vsel %vm5437_vm14, %v5427_v49, %v5430_v61 }
 0x68a   : >> { %v5447_v8 = vsel %vm5439_vm12, %v5430_v61, %v5446_v23  ;;  %v11106_v9 = vpop.eup %6948  ;;  %v5441_v16 = vsel %vm5437_vm14, %v5421_v59, %v5424_v26  ;;  %v5443_v24 = vsel %vm5439_vm12, %v5427_v49, %v5442_v32  ;;  %v5450_v12 = vsel %vm5440_vm4, %v5436_v63, 1326507024 }
 0x68b   : >> { %12622 = vst [vmem:[#allocation53_spill] sm:$0xff] %v11106_v9  ;;  %v5448_v15 = vsel %vm5438_vm1, %v5445_v38, %v5447_v8  ;;  %v5263_v47 = vsub.s32 0, %v11104_v1  ;;  %v5451_v0 = vsel %vm5439_vm12, %v5433_v5, %v5450_v12  ;;  %v5165_v17 = vsub.s32 32, %v5164_v37 }
 0x68c   : >> { %v11111_v50 = vmul.u32.u64.low %v5453_v51, %v5448_v15  ;;  %v11112_v2 = vmul.u32.u64.high %v5453_v51, %v5448_v15, %v11111_v50  ;;  %v5169_v29 = vsub.s32 4294967266, %v5164_v37  ;;  %v5452_v23 = vsel %vm5438_vm1, %v5449_v57, %v5451_v0 }
 0x68d   : >> { %v6514_v61 = vadd.s32 4294967169, %v5305_v53  ;;  %v6511_v3 = vmin.u32 %v5263_v47, %v11104_v1  ;;  %v5444_v26 = vsel %vm5438_vm1, %v5441_v16, %v5443_v24  ;;  %6950 = vcosq.f32 %v11073_v56 }
 0x68e   : >> { %v11118_v49 = vmul.u32.u64.low %v5453_v51, %v5452_v23  ;;  %v11119_v32 = vmul.u32.u64.high %v5453_v51, %v5452_v23, %v11118_v49  ;;  %v11122_v63 = vor.u32 4788187, %v4963_v39  ;;  %v5149_v5 = vadd.s32 %v10932_v30, %v10930_v25 }
 0x68f   : >> { %v5311_v59 = vadd.s32 1, %v6514_v61  ;;  %v12623_v38 = vshll.u32 %v10898_v10, %v10978_v4  ;;  %v5265_v8 = vclz %v6511_v3  ;;  %v5463_v21 = vadd.s32 1, %v11112_v2 }
 0x690   : >> { %v12624_v57 = vand.u32 2147483647, %v11044_v28  ;;  %v5167_v24 = vshrl.u32 %v5149_v5, %v5165_v17  ;;  %v11135_v15 = vadd.s32 127, %v5169_v29  ;;  %v5460_v39 = vmul.u32 %v5453_v51, %v5444_v26 }
 0x691   : >> { %v11130_v53 = vor.u32 %v11077_v14, %v12623_v38  ;;  %vm5312_vm15 = vcmp.gt.s32.totalorder %v5311_v59, 0  ;;  %v6512_v12 = vadd.s32 4294967294, %v5265_v8  ;;  %vm5462_vm13 = vc.u32 %v11119_v32, %v11111_v50 }
 0x692   : >> { %v5308_v16 = vand.u32 8388607, %v12624_v57  ;;  %v5313_v25 = vsel %vm5312_vm15, %v5311_v59, 0  ;;  %v5512_v10 = vand.u32 2139095040, %v11080_v13  ;;  %v5166_v4 = vshll.u32 %v11000_v33, %v5164_v37 }
 0x693   : >> { %v5464_v14 = vsel %vm5462_vm13, %v5463_v21, %v11112_v2  ;;  %v5315_v3 = vand.u32 31, %v5313_v25  ;;  %v5253_v47 = vadd.s32 %v11026_v44, %v11041_v6  ;;  %vm6513_vm4 = vcmp.lt.s32.totalorder %v6512_v12, 0 }
 0x694   : >> { %v5465_v51 = vadd.s32 %v5464_v14, %v5460_v39  ;;  %v11146_v17 = vor.u32 %v5167_v24, %v5166_v4  ;;  %v5171_v29 = vshll.u32 %v11135_v15, 23  ;;  %v5268_v23 = vsel %vm6513_vm4, 0, %v6512_v12 }
 0x695   : >> { %v5316_v61 = vsub.s32 32, %v5315_v3  ;;  %v5273_v26 = vsub.s32 4294967266, %v5268_v23  ;;  %v5309_v5 = vor.u32 8388608, %v5308_v16  ;;  %v5513_v37 = vshrl.u32 %v5512_v10, 23 }
 0x696   : >> { %v5466_v49 = vadd.s32 536870912, %v5465_v51  ;;  %v11149_v33 = vshrl.u32 %v5313_v25, 5  ;;  %v5318_v2 = vshll.u32 %v12296_v35, %v5315_v3  ;;  %v5269_v59 = vsub.s32 32, %v5268_v23 }
 0x697   : >> { %v5319_v44 = vshrl.u32 %v12288_v41, %v5316_v61  ;;  %v5322_v6 = vshrl.u32 %v12289_v58, %v5316_v61  ;;  %v5321_v8 = vshll.u32 %v12288_v41, %v5315_v3  ;;  %v5325_v21 = vshrl.u32 %v12290_v34, %v5316_v61 }
 0x698   : >> { %v11154_v38 = vshrl.u32 %v5466_v49, 30  ;;  %v5274_v57 = vadd.s32 127, %v5273_v26  ;;  %v5324_v24 = vshll.u32 %v12289_v58, %v5315_v3  ;;  %v5327_v16 = vshll.u32 %v12290_v34, %v5315_v3 }
 0x699   : >> { %v5328_v15 = vshrl.u32 %v12291_v52, %v5316_v61  ;;  %v5320_v12 = vor.u32 %v5319_v44, %v5318_v2  ;;  %v5323_v25 = vor.u32 %v5322_v6, %v5321_v8  ;;  %v11162_v10 = vshll.u32 %v5309_v5, 8 }
 0x69a   : >> { %v5468_v39 = vshll.u32 %v11154_v38, 30  ;;  %v5326_v4 = vor.u32 %v5325_v21, %v5324_v24  ;;  %v5330_v49 = vshll.u32 %v12291_v52, %v5315_v3  ;;  %v5331_v30 = vshrl.u32 %v12292_v48, %v5316_v61  ;;  %v11166_v0 = vpop.eup %6950 }
 0x69b   : >> { %v5329_v14 = vor.u32 %v5328_v15, %v5327_v16  ;;  %12625 = vst [vmem:[#allocation51_spill] sm:$0xff] %v11166_v0  ;;  %v5270_v26 = vshll.u32 %v11104_v1, %v5268_v23  ;;  %v5271_v46 = vshrl.u32 %v5253_v47, %v5269_v59  ;;  %v6522_v60 = vadd.s32 4294967169, %v5513_v37 }
 0x69c   : >> { %v11169_v36 = vsub.s32 %v5465_v51, %v5468_v39  ;;  %v5275_v20 = vshll.u32 %v5274_v57, 23  ;;  %v5317_v2 = vshrl.u32 %v12296_v35, %v5316_v61  ;;  %v5332_v44 = vor.u32 %v5331_v30, %v5330_v49 }
 0x69d   : >> { %vm5333_vm14 = vcmp.lt.s32.totalorder %v11149_v33, 1  ;;  %vm5335_vm12 = vcmp.lt.s32.totalorder %v11149_v33, 3  ;;  %vm5336_vm1 = vcmp.lt.s32.totalorder %v11149_v33, 4  ;;  %v5272_v37 = vor.u32 %v5271_v46, %v5270_v26 }
 0x69e   : >> { %v5471_v5 = vsub.s32 0, %v11169_v36  ;;  %v5341_v3 = vsel %vm5333_vm14, %v5320_v12, %v5323_v25  ;;  %v5338_v1 = vsel %vm5336_vm1, %v5326_v4, 2102212464  ;;  %v5342_v47 = vsel %vm5336_vm1, %v5329_v14, 920167782 }
 0x69f   : >> { %v5345_v51 = vsel %vm5333_vm14, %v5323_v25, %v5326_v4  ;;  %v5346_v23 = vsel %vm5336_vm1, %v5332_v44, 1326507024  ;;  %vm5334_vm15 = vcmp.lt.s32.totalorder %v11149_v33, 2  ;;  %v5343_v61 = vsel %vm5335_vm12, %v5326_v4, %v5342_v47  ;;  %v4271_v44 = vpop.f32.mrf.mxu0 }
 0x6a0   : >> { %v6519_v30 = vmin.u32 %v5471_v5, %v11169_v36  ;;  %v5276_v6 = vor.u32 4788187, %v5275_v20  ;;  %v5344_v59 = vsel %vm5334_vm15, %v5341_v3, %v5343_v61  ;;  %v5347_v8 = vsel %vm5335_vm12, %v5329_v14, %v5346_v23  ;;  %v4360_v5 = vpop.f32.mrf.mxu1 }
 0x6a1   : >> { %v5519_v21 = vadd.s32 1, %v6522_v60  ;;  %v5337_v24 = vsel %vm5333_vm14, %v5317_v2, %v5320_v12  ;;  %v5339_v46 = vsel %vm5335_vm12, %v5323_v25, %v5338_v1  ;;  %v5348_v16 = vsel %vm5334_vm15, %v5345_v51, %v5347_v8 }
 0x6a2   : >> { %v5473_v57 = vclz %v6519_v30  ;;  %v11195_v15 = vmul.u32.u64.low %v11162_v10, %v5348_v16  ;;  %v11196_v20 = vmul.u32.u64.high %v11162_v10, %v5348_v16, %v11195_v15  ;;  %v4967_v60 = vcvt.s32.f32 %v11130_v53 }
 0x6a3   : >> { %v11199_v39 = vmul.u32.u64.low %v11162_v10, %v5344_v59  ;;  %v11200_v4 = vmul.u32.u64.high %v11162_v10, %v5344_v59, %v11199_v39  ;;  %v11204_v14 = vor.u32 4788187, %v5171_v29  ;;  %vm5520_vm13 = vcmp.gt.s32.totalorder %v5519_v21, 0 }
 0x6a4   : >> { %v6520_v12 = vadd.s32 4294967294, %v5473_v57  ;;  %6952 = vsinq.f32 %v11073_v56  ;;  %v5277_v25 = vand.u32 2147483647, %v5276_v6  ;;  %v12626_v49 = vand.u32 2147483647, %v11080_v13 }
 0x6a5   : >> { %v5521_v2 = vsel %vm5520_vm13, %v5519_v21, 0  ;;  %v12627_v3 = vand.u32 2147483647, %v11122_v63  ;;  %v5340_v53 = vsel %vm5334_vm15, %v5337_v24, %v5339_v46  ;;  %v5279_v51 = vcvt.s32.f32 %v5272_v37 }
 0x6a6   : >> { %v5516_v26 = vand.u32 8388607, %v12626_v49  ;;  %vm6521_vm4 = vcmp.lt.s32.totalorder %v6520_v12, 0  ;;  %v5523_v29 = vand.u32 31, %v5521_v2  ;;  %vm5358_vm14 = vc.u32 %v11196_v20, %v11199_v39 }
 0x6a7   : >> { %v11211_v1 = vmul.f32 %v4967_v60, %v12627_v3  ;;  %v11216_v56 = vsel %vm6521_vm4, 0, %v6520_v12  ;;  %v5359_v30 = vadd.s32 1, %v11200_v4  ;;  %v11223_v63 = vadd.f32 %v4271_v44, %v10588_v62 }
 0x6a8   : >> { %v11226_v61 = vadd.f32 %v4360_v5, %v10588_v62  ;;  %v5280_v33 = vmul.f32 %v5279_v51, %v5277_v25  ;;  %v5356_v6 = vmul.u32 %v11162_v10, %v5340_v53  ;;  %v5517_v59 = vor.u32 8388608, %v5516_v26 }
 0x6a9   : >> { %v5524_v37 = vsub.s32 32, %v5523_v29  ;;  %v5481_v8 = vsub.s32 4294967266, %v11216_v56  ;;  %v5360_v21 = vsel %vm5358_vm14, %v5359_v30, %v11200_v4  ;;  %v5522_v57 = vshrl.u32 %v5521_v2, 5 }
 0x6aa   : >> { %v5526_v24 = vshll.u32 %v12296_v35, %v5523_v29  ;;  %v5361_v46 = vadd.s32 %v5360_v21, %v5356_v6  ;;  %v5529_v15 = vshll.u32 %v12288_v41, %v5523_v29  ;;  %v5532_v12 = vshll.u32 %v12289_v58, %v5523_v29 }
 0x6ab   : >> { %v5527_v16 = vshrl.u32 %v12288_v41, %v5524_v37  ;;  %v5530_v60 = vshrl.u32 %v12289_v58, %v5524_v37  ;;  %v5533_v10 = vshrl.u32 %v12290_v34, %v5524_v37  ;;  %v5535_v25 = vshll.u32 %v12290_v34, %v5523_v29 }
 0x6ac   : >> { %v5536_v49 = vshrl.u32 %v12291_v52, %v5524_v37  ;;  %vm5199_vm12 = vcmp.lt.s32.totalorder %v10851_v22, 0  ;;  %v5461_v4 = vadd.s32 %v11111_v50, %v11119_v32  ;;  %v5362_v26 = vadd.s32 536870912, %v5361_v46 }
 0x6ad   : >> { %v5528_v2 = vor.u32 %v5527_v16, %v5526_v24  ;;  %v5531_v44 = vor.u32 %v5530_v60, %v5529_v15  ;;  %v5281_v5 = vxor.u32 2147483648, %v5280_v33  ;;  %v5534_v3 = vor.u32 %v5533_v10, %v5532_v12 }
 0x6ae   : >> { %v5537_v53 = vor.u32 %v5536_v49, %v5535_v25  ;;  %v5557_v51 = vshll.u32 %v5517_v59, 8  ;;  %v11242_v30 = vshrl.u32 %v5362_v26, 30  ;;  %v5538_v6 = vshll.u32 %v12291_v52, %v5523_v29 }
 0x6af   : >> { %v5539_v21 = vshrl.u32 %v12292_v48, %v5524_v37  ;;  %v5616_v47 = vand.u32 2139095040, %v11223_v63  ;;  %v5477_v23 = vsub.s32 32, %v11216_v56  ;;  %v5482_v0 = vadd.s32 127, %v5481_v8 }
 0x6b0   : >> { %vm5541_vm1 = vcmp.lt.s32.totalorder %v5522_v57, 1  ;;  %vm5544_vm15 = vcmp.lt.s32.totalorder %v5522_v57, 4  ;;  %v12628_v50 = vand.u32 2147483647, %v10851_v22  ;;  %v5364_v59 = vshll.u32 %v11242_v30, 30 }
 0x6b1   : >> { %v5540_v24 = vor.u32 %v5539_v21, %v5538_v6  ;;  %v5546_v16 = vsel %vm5544_vm15, %v5534_v3, 2102212464  ;;  %v5549_v29 = vsel %vm5541_vm1, %v5528_v2, %v5531_v44  ;;  %v11256_v15 = vpop.eup %6952  ;;  %v5525_v60 = vshrl.u32 %v12296_v35, %v5524_v37 }
 0x6b2   : >> { %vm11250_vm13 = vcmp.le.f32.partialorder %v12628_v50, 0.7853982  ;;  %12631 = vst [vmem:[#allocation64_spill] sm:$0xff] %v11256_v15  ;;  %vm5543_vm4 = vcmp.lt.s32.totalorder %v5522_v57, 3  ;;  %v5550_v8 = vsel %vm5544_vm15, %v5537_v53, 920167782  ;;  %v5553_v12 = vsel %vm5541_vm1, %v5531_v44, %v5534_v3 }
 0x6b3   : >> { %v11260_v10 = vsub.s32 %v5361_v46, %v5364_v59  ;;  %vm5542_vm14 = vcmp.lt.s32.totalorder %v5522_v57, 2  ;;  %v5551_v25 = vsel %vm5543_vm4, %v5534_v3, %v5550_v8  ;;  %v5554_v49 = vsel %vm5544_vm15, %v5540_v24, 1326507024 }
 0x6b4   : >> { %vm12229_vm9 = vcmp.lt.s32.totalorder %v10679_v42, 0  ;;  %v5545_v26 = vsel %vm5541_vm1, %v5525_v60, %v5528_v2  ;;  %v5547_v6 = vsel %vm5543_vm4, %v5531_v44, %v5546_v16  ;;  %v5552_v21 = vsel %vm5542_vm14, %v5549_v29, %v5551_v25 }
 0x6b5   : >> { %v5555_v50 = vsel %vm5543_vm4, %v5537_v53, %v5554_v49  ;;  %v5367_v15 = vsub.s32 0, %v11260_v10  ;;  %v11267_v43 = vmul.u32.u64.low %v5557_v51, %v5552_v21  ;;  %v11268_v11 = vmul.u32.u64.high %v5557_v51, %v5552_v21, %v11267_v43 }
 0x6b6   : >> { %v5556_v37 = vsel %vm5542_vm14, %v5553_v12, %v5555_v50  ;;  %v5282_v46 = vsel %vm5199_vm12, %v5281_v5, %v5280_v33  ;;  %v5617_v24 = vshrl.u32 %v5616_v47, 23  ;;  %v5479_v2 = vshrl.u32 %v5461_v4, %v5477_v23 }
 0x6b7   : >> { %v11273_v3 = vmul.u32.u64.low %v5557_v51, %v5556_v37  ;;  %v11274_v59 = vmul.u32.u64.high %v5557_v51, %v5556_v37, %v11273_v3  ;;  %v5483_v44 = vshll.u32 %v5482_v0, 23  ;;  %v6515_v16 = vmin.u32 %v5367_v15, %v11260_v10 }
 0x6b8   : >> { %v5548_v53 = vsel %vm5542_vm14, %v5545_v26, %v5547_v6  ;;  %v4969_v29 = vxor.u32 2147483648, %v11211_v1  ;;  %v12632_v60 = vand.u32 2147483647, %v11204_v14  ;;  %v12633_v8 = vcvt.s32.f32 %v11146_v17 }
 0x6b9   : >> { %v12208_v33 = vand.u32 2147483647, %v11223_v63  ;;  %v6526_v5 = vadd.s32 4294967169, %v5617_v24  ;;  %v5478_v47 = vshll.u32 %v11169_v36, %v11216_v56  ;;  %v5369_v23 = vclz %v6515_v16  ;;  %v4273_v56 = vpop.f32.mrf.mxu0 }
 0x6ba   : >> { %v11283_v12 = vmul.f32 %v12633_v8, %v12632_v60  ;;  %v5567_v0 = vadd.s32 1, %v11268_v11  ;;  %v5824_v57 = vand.u32 2139095040, %v11226_v61  ;;  %v11293_v4 = vsel %vm11250_vm13, %v10851_v22, %v5282_v46 }
 0x6bb   : >> { %v5564_v14 = vmul.u32 %v5557_v51, %v5548_v53  ;;  %vm5566_vm1 = vc.u32 %v11274_v59, %v11267_v43  ;;  %v5623_v17 = vadd.s32 1, %v6526_v5  ;;  %v5480_v15 = vor.u32 %v5479_v2, %v5478_v47 }
 0x6bc   : >> { %v5484_v25 = vor.u32 4788187, %v5483_v44  ;;  %v6516_v49 = vadd.s32 4294967294, %v5369_v23  ;;  %v5568_v36 = vsel %vm5566_vm1, %v5567_v0, %v11268_v11  ;;  %v5620_v6 = vand.u32 8388607, %v12208_v33 }
 0x6bd   : >> { %v5569_v26 = vadd.s32 %v5568_v36, %v5564_v14  ;;  %vm5624_vm15 = vcmp.gt.s32.totalorder %v5623_v17, 0  ;;  %v12207_v21 = vand.u32 2147483647, %v11226_v61  ;;  %v11304_v51 = vsel %vm12229_vm9, %v4969_v29, %v11211_v1 }
 0x6be   : >> { %v5625_v37 = vsel %vm5624_vm15, %v5623_v17, 0  ;;  %v5825_v46 = vshrl.u32 %v5824_v57, 23  ;;  %vm6517_vm4 = vcmp.lt.s32.totalorder %v6516_v49, 0  ;;  %v11308_v24 = vadd.f32 %v4273_v56, %v10588_v62 }
 0x6bf   : >> { %v5570_v3 = vadd.s32 536870912, %v5569_v26  ;;  %v5627_v11 = vand.u32 31, %v5625_v37  ;;  %6954 = vcosq.f32 %v11293_v4  ;;  %v5485_v2 = vand.u32 2147483647, %v5484_v25 }
 0x6c0   : >> { %v5487_v44 = vcvt.s32.f32 %v5480_v15  ;;  %v5357_v16 = vadd.s32 %v11199_v39, %v11196_v20  ;;  %v5621_v1 = vor.u32 8388608, %v5620_v6  ;;  %v11317_v60 = vand.u32 8388607, %v12207_v21 }
 0x6c1   : >> { %v11313_v53 = vshrl.u32 %v5570_v3, 30  ;;  %v5628_v29 = vsub.s32 32, %v5627_v11  ;;  %v11319_v8 = vsel %vm6517_vm4, 0, %v6516_v49  ;;  %v5626_v5 = vshrl.u32 %v5625_v37, 5 }
 0x6c2   : >> { %v5630_v47 = vshll.u32 %v12296_v35, %v5627_v11  ;;  %v6534_v23 = vadd.s32 4294967169, %v5825_v46  ;;  %v5633_v20 = vshll.u32 %v12288_v41, %v5627_v11  ;;  %v5636_v14 = vshll.u32 %v12289_v58, %v5627_v11 }
 0x6c3   : >> { %v5572_v0 = vshll.u32 %v11313_v53, 30  ;;  %v5631_v57 = vshrl.u32 %v12288_v41, %v5628_v29  ;;  %v5634_v39 = vshrl.u32 %v12289_v58, %v5628_v29  ;;  %v5637_v17 = vshrl.u32 %v12290_v34, %v5628_v29 }
 0x6c4   : >> { %v5639_v15 = vshll.u32 %v12290_v34, %v5627_v11  ;;  %v5640_v25 = vshrl.u32 %v12291_v52, %v5628_v29  ;;  %v11330_v49 = vmul.f32 %v5487_v44, %v5485_v2  ;;  %v5661_v3 = vshll.u32 %v5621_v1, 8 }
 0x6c5   : >> { %v11332_v36 = vsub.s32 %v5569_v26, %v5572_v0  ;;  %v5632_v56 = vor.u32 %v5631_v57, %v5630_v47  ;;  %v5635_v6 = vor.u32 %v5634_v39, %v5633_v20  ;;  %v5638_v37 = vor.u32 %v5637_v17, %v5636_v14 }
 0x6c6   : >> { %v5641_v46 = vor.u32 %v5640_v25, %v5639_v15  ;;  %v5829_v21 = vor.u32 8388608, %v11317_v60  ;;  %vm12228_vm14 = vcmp.lt.s32.totalorder %v10762_v27, 0  ;;  %v5373_v33 = vsub.s32 32, %v11319_v8 }
 0x6c7   : >> { %v5575_v50 = vsub.s32 0, %v11332_v36  ;;  %v5642_v9 = vshll.u32 %v12291_v52, %v5627_v11  ;;  %v5643_v2 = vshrl.u32 %v12292_v48, %v5628_v29  ;;  %v5377_v26 = vsub.s32 4294967266, %v11319_v8 }
 0x6c8   : >> { %vm5645_vm1 = vcmp.lt.s32.totalorder %v5626_v5, 1  ;;  %vm5648_vm15 = vcmp.lt.s32.totalorder %v5626_v5, 4  ;;  %v5831_v44 = vadd.s32 1, %v6534_v23  ;;  %v5629_v57 = vshrl.u32 %v12296_v35, %v5628_v29 }
 0x6c9   : >> { %v6523_v47 = vmin.u32 %v5575_v50, %v11332_v36  ;;  %v5644_v1 = vor.u32 %v5643_v2, %v5642_v9  ;;  %v5650_v0 = vsel %vm5648_vm15, %v5638_v37, 2102212464  ;;  %v5653_v60 = vsel %vm5645_vm1, %v5632_v56, %v5635_v6 }
 0x6ca   : >> { %vm5647_vm4 = vcmp.lt.s32.totalorder %v5626_v5, 3  ;;  %v5654_v20 = vsel %vm5648_vm15, %v5641_v46, 920167782  ;;  %v5657_v39 = vsel %vm5645_vm1, %v5635_v6, %v5638_v37  ;;  %vm5646_vm6 = vcmp.lt.s32.totalorder %v5626_v5, 2 }
 0x6cb   : >> { %v5577_v14 = vclz %v6523_v47  ;;  %v5655_v11 = vsel %vm5647_vm4, %v5638_v37, %v5654_v20  ;;  %v5658_v17 = vsel %vm5648_vm15, %v5644_v1, 1326507024  ;;  %v5649_v15 = vsel %vm5645_vm1, %v5629_v57, %v5632_v56 }
 0x6cc   : >> { %v5651_v25 = vsel %vm5647_vm4, %v5635_v6, %v5650_v0  ;;  %v5656_v55 = vsel %vm5646_vm6, %v5653_v60, %v5655_v11  ;;  %v5659_v54 = vsel %vm5647_vm4, %v5641_v46, %v5658_v17  ;;  %v11344_v23 = vpop.eup %6954  ;;  %v5375_v29 = vshrl.u32 %v5357_v16, %v5373_v33 }
 0x6cd   : >> { %v6524_v50 = vadd.s32 4294967294, %v5577_v14  ;;  %v5660_v9 = vsel %vm5646_vm6, %v5657_v39, %v5659_v54  ;;  %v11347_v2 = vmul.u32.u64.low %v5661_v3, %v5656_v55  ;;  %v11348_v7 = vmul.u32.u64.high %v5661_v3, %v5656_v55, %v11347_v2 }
 0x6ce   : >> { %v11351_v18 = vmul.u32.u64.low %v5661_v3, %v5660_v9  ;;  %v11352_v47 = vmul.u32.u64.high %v5661_v3, %v5660_v9, %v11351_v18  ;;  %vm5832_vm3 = vcmp.gt.s32.totalorder %v5831_v44, 0  ;;  %v11354_v37 = vadd.s32 127, %v5377_v26 }
 0x6cf   : >> { %vm6525_vm1 = vcmp.lt.s32.totalorder %v6524_v50, 0  ;;  %v5652_v56 = vsel %vm5646_vm6, %v5649_v15, %v5651_v25  ;;  %v5833_v6 = vsel %vm5832_vm3, %v5831_v44, 0  ;;  %v12634_v46 = vxor.u32 2147483648, %v11283_v12 }
 0x6d0   : >> { %6956 = vsinq.f32 %v11293_v4  ;;  %v5489_v55 = vxor.u32 2147483648, %v11330_v49  ;;  %v5835_v33 = vand.u32 31, %v5833_v6  ;;  %v5374_v18 = vshll.u32 %v11260_v10, %v11319_v8 }
 0x6d1   : >> { %v11362_v54 = vsel %vm12228_vm14, %v12634_v46, %v11283_v12  ;;  %v5565_v16 = vadd.s32 %v11267_v43, %v11274_v59  ;;  %v5671_v5 = vadd.s32 1, %v11348_v7  ;;  %v12219_v26 = vand.u32 2147483647, %v11308_v24 }
 0x6d2   : >> { %12635 = vst [vmem:[#allocation43_spill] sm:$0xff] %v11362_v54  ;;  %v11372_v44 = vsel %vm6525_vm1, 0, %v6524_v50  ;;  %v5668_v1 = vmul.u32 %v5661_v3, %v5652_v56  ;;  %vm5670_vm6 = vc.u32 %v11352_v47, %v11347_v2  ;;  %v5836_v12 = vsub.s32 32, %v5835_v33 }
 0x6d3   : >> { %v11376_v4 = vor.u32 %v5375_v29, %v5374_v18  ;;  %v5379_v0 = vshll.u32 %v11354_v37, 23  ;;  %v5672_v10 = vsel %vm5670_vm6, %v5671_v5, %v11348_v7  ;;  %v11380_v8 = vshll.u32 %v5829_v21, 8 }
 0x6d4   : >> { %v5673_v43 = vadd.s32 %v5672_v10, %v5668_v1  ;;  %v5838_v59 = vshll.u32 %v12296_v35, %v5835_v33  ;;  %v5839_v60 = vshrl.u32 %v12288_v41, %v5836_v12  ;;  %v5842_v57 = vshrl.u32 %v12289_v58, %v5836_v12 }
 0x6d5   : >> { %v5585_v3 = vsub.s32 4294967266, %v11372_v44  ;;  %v5841_v20 = vshll.u32 %v12288_v41, %v5835_v33  ;;  %v5844_v39 = vshll.u32 %v12289_v58, %v5835_v33  ;;  %v5845_v14 = vshrl.u32 %v12290_v34, %v5836_v12 }
 0x6d6   : >> { %vm12230_vm3 = vcmp.lt.s32.totalorder %v10965_v19, 0  ;;  %v5674_v7 = vadd.s32 536870912, %v5673_v43  ;;  %v5834_v21 = vshrl.u32 %v5833_v6, 5  ;;  %v5840_v11 = vor.u32 %v5839_v60, %v5838_v59 }
 0x6d7   : >> { %v5720_v17 = vand.u32 2139095040, %v11308_v24  ;;  %v5843_v15 = vor.u32 %v5842_v57, %v5841_v20  ;;  %v5846_v25 = vor.u32 %v5845_v14, %v5844_v39  ;;  %v5847_v50 = vshll.u32 %v12290_v34, %v5835_v33 }
 0x6d8   : >> { %v5848_v9 = vshrl.u32 %v12291_v52, %v5836_v12  ;;  %v11393_v29 = vshrl.u32 %v5674_v7, 30  ;;  %v5850_v37 = vshll.u32 %v12291_v52, %v5835_v33  ;;  %v5851_v56 = vshrl.u32 %v12292_v48, %v5836_v12 }
 0x6d9   : >> { %v5724_v46 = vand.u32 8388607, %v12219_v26  ;;  %v5581_v6 = vsub.s32 32, %v11372_v44  ;;  %v5586_v18 = vadd.s32 127, %v5585_v3  ;;  %v5837_v5 = vshrl.u32 %v12296_v35, %v5836_v12 }
 0x6da   : >> { %v5849_v1 = vor.u32 %v5848_v9, %v5847_v50  ;;  %v5676_v10 = vshll.u32 %v11393_v29, 30  ;;  %v5852_v59 = vor.u32 %v5851_v56, %v5850_v37  ;;  %vm5853_vm15 = vcmp.lt.s32.totalorder %v5834_v21, 1 }
 0x6db   : >> { %vm5856_vm4 = vcmp.lt.s32.totalorder %v5834_v21, 4  ;;  %vm5855_vm1 = vcmp.lt.s32.totalorder %v5834_v21, 3  ;;  %v5861_v57 = vsel %vm5853_vm15, %v5840_v11, %v5843_v15  ;;  %vm5854_vm6 = vcmp.lt.s32.totalorder %v5834_v21, 2 }
 0x6dc   : >> { %v5858_v60 = vsel %vm5856_vm4, %v5846_v25, 2102212464  ;;  %v5862_v33 = vsel %vm5856_vm4, %v5849_v1, 920167782  ;;  %v11402_v20 = vsub.s32 %v5673_v43, %v5676_v10  ;;  %v5865_v14 = vsel %vm5853_vm15, %v5843_v15, %v5846_v25  ;;  %v4362_v43 = vpop.f32.mrf.mxu1 }
 0x6dd   : >> { %v5863_v39 = vsel %vm5855_vm1, %v5846_v25, %v5862_v33  ;;  %v11404_v7 = vpop.eup %6956  ;;  %v5857_v3 = vsel %vm5853_vm15, %v5837_v5, %v5840_v11  ;;  %v5859_v26 = vsel %vm5855_vm1, %v5843_v15, %v5858_v60  ;;  %v5866_v50 = vsel %vm5856_vm4, %v5852_v59, 1326507024 }
 0x6de   : >> { %v5864_v12 = vsel %vm5854_vm6, %v5861_v57, %v5863_v39  ;;  %v5679_v9 = vsub.s32 0, %v11402_v20  ;;  %v5867_v37 = vsel %vm5855_vm1, %v5849_v1, %v5866_v50  ;;  %v11416_v25 = vsel %vm12230_vm3, %v5489_v55, %v11330_v49 }
 0x6df   : >> { %v11409_v56 = vmul.u32.u64.low %v11380_v8, %v5864_v12  ;;  %v11410_v54 = vmul.u32.u64.high %v11380_v8, %v5864_v12, %v11409_v56  ;;  %v11418_v10 = vor.u32 4788187, %v5379_v0  ;;  %v5868_v11 = vsel %vm5854_vm6, %v5865_v14, %v5867_v37 }
 0x6e0   : >> { %v5721_v15 = vshrl.u32 %v5720_v17, 23  ;;  %v5583_v5 = vshrl.u32 %v5565_v16, %v5581_v6  ;;  %v6527_v59 = vmin.u32 %v5679_v9, %v11402_v20  ;;  %v5587_v57 = vshll.u32 %v5586_v18, 23 }
 0x6e1   : >> { %v11423_v1 = vmul.u32.u64.low %v11380_v8, %v5868_v11  ;;  %v11424_v60 = vmul.u32.u64.high %v11380_v8, %v5868_v11, %v11423_v1  ;;  %v5860_v33 = vsel %vm5854_vm6, %v5857_v3, %v5859_v26  ;;  %v11428_v12 = vadd.f32 %v4362_v43, %v10588_v62 }
 0x6e2   : >> { %v6530_v39 = vadd.s32 4294967169, %v5721_v15  ;;  %v5681_v55 = vclz %v6527_v59  ;;  %v5879_v0 = vadd.s32 1, %v11410_v54  ;;  %v5725_v17 = vor.u32 8388608, %v5724_v46 }
 0x6e3   : >> { %v5582_v6 = vshll.u32 %v11332_v36, %v11372_v44  ;;  %v5928_v18 = vand.u32 2139095040, %v11428_v12  ;;  %v5669_v26 = vadd.s32 %v11347_v2, %v11352_v47  ;;  %v5876_v62 = vmul.u32 %v11380_v8, %v5860_v33 }
 0x6e4   : >> { %v5727_v14 = vadd.s32 1, %v6530_v39  ;;  %v6528_v21 = vadd.s32 4294967294, %v5681_v55  ;;  %vm5878_vm15 = vc.u32 %v11424_v60, %v11409_v56  ;;  %v11443_v46 = vor.u32 4788187, %v5587_v57 }
 0x6e5   : >> { %v11441_v3 = vor.u32 %v5583_v5, %v5582_v6  ;;  %v5880_v50 = vsel %vm5878_vm15, %v5879_v0, %v11410_v54  ;;  %v11446_v9 = vshll.u32 %v5725_v17, 8  ;;  %v12225_v47 = vand.u32 2147483647, %v11428_v12 }
 0x6e6   : >> { %vm5728_vm4 = vcmp.gt.s32.totalorder %v5727_v14, 0  ;;  %vm6529_vm1 = vcmp.lt.s32.totalorder %v6528_v21, 0  ;;  %v5881_v36 = vadd.s32 %v5880_v50, %v5876_v62  ;;  %v5929_v8 = vshrl.u32 %v5928_v18, 23 }
 0x6e7   : >> { %v5729_v44 = vsel %vm5728_vm4, %v5727_v14, 0  ;;  %v5684_v37 = vsel %vm6529_vm1, 0, %v6528_v21  ;;  %vm5615_vm15 = vcmp.lt.s32.totalorder %v11223_v63, 0  ;;  %vm5303_vm9 = vcmp.lt.s32.totalorder %v11044_v28, 0 }
 0x6e8   : >> { %v5731_v2 = vand.u32 31, %v5729_v44  ;;  %v5685_v43 = vsub.s32 32, %v5684_v37  ;;  %v5689_v11 = vsub.s32 4294967266, %v5684_v37  ;;  %v5882_v15 = vadd.s32 536870912, %v5881_v36 }
 0x6e9   : >> { %v11449_v5 = vshrl.u32 %v5729_v44, 5  ;;  %v5686_v59 = vshll.u32 %v11402_v20, %v5684_v37  ;;  %v5294_v32 = vxor.u32 2147483648, %v11404_v7 }
 0x6ea   : >> { %v5732_v1 = vsub.s32 32, %v5731_v2  ;;  %v5734_v54 = vshll.u32 %v12296_v35, %v5731_v2  ;;  %v5737_v57 = vshll.u32 %v12288_v41, %v5731_v2  ;;  %v5687_v33 = vshrl.u32 %v5669_v26, %v5685_v43 }
 0x6eb   : >> { %v5690_v39 = vadd.s32 127, %v5689_v11  ;;  %v11454_v55 = vshrl.u32 %v5882_v15, 30  ;;  %v5740_v0 = vshll.u32 %v12289_v58, %v5731_v2  ;;  %v5743_v18 = vshll.u32 %v12290_v34, %v5731_v2 }
 0x6ec   : >> { %v5735_v17 = vshrl.u32 %v12288_v41, %v5732_v1  ;;  %v5738_v6 = vshrl.u32 %v12289_v58, %v5732_v1  ;;  %v5741_v14 = vshrl.u32 %v12290_v34, %v5732_v1  ;;  %v5688_v20 = vor.u32 %v5687_v33, %v5686_v59 }
 0x6ed   : >> { %v5691_v21 = vshll.u32 %v5690_v39, 23  ;;  %v5884_v62 = vshll.u32 %v11454_v55, 30  ;;  %v5744_v50 = vshrl.u32 %v12291_v52, %v5732_v1  ;;  %v12636_v26 = vand.u32 2147483647, %v10965_v19 }
 0x6ee   : >> { %v5733_v37 = vshrl.u32 %v12296_v35, %v5732_v1  ;;  %v5736_v43 = vor.u32 %v5735_v17, %v5734_v54  ;;  %v5739_v11 = vor.u32 %v5738_v6, %v5737_v57  ;;  %v11472_v15 = vand.u32 8388607, %v12225_v47 }
 0x6ef   : >> { %vm11465_vm6 = vcmp.le.f32.partialorder %v12636_v26, 0.7853982  ;;  %v5692_v59 = vor.u32 4788187, %v5691_v21  ;;  %v11475_v33 = vsub.s32 %v5881_v36, %v5884_v62  ;;  %v5742_v39 = vor.u32 %v5741_v14, %v5740_v0 }
 0x6f0   : >> { %v5745_v49 = vor.u32 %v5744_v50, %v5743_v18  ;;  %v5695_v16 = vcvt.s32.f32 %v5688_v20  ;;  %v5746_v26 = vshll.u32 %v12291_v52, %v5731_v2  ;;  %v5747_v40 = vshrl.u32 %v12292_v48, %v5732_v1 }
 0x6f1   : >> { %vm5749_vm4 = vcmp.lt.s32.totalorder %v11449_v5, 1  ;;  %v5693_v54 = vand.u32 2147483647, %v5692_v59  ;;  %v5887_v57 = vsub.s32 0, %v11475_v33  ;;  %vm5750_vm1 = vcmp.lt.s32.totalorder %v11449_v5, 2 }
 0x6f2   : >> { %vm5752_vm8 = vcmp.lt.s32.totalorder %v11449_v5, 4  ;;  %v12639_v17 = vand.u32 2147483647, %v11223_v63  ;;  %v5748_v0 = vor.u32 %v5747_v40, %v5746_v26  ;;  %vm5751_vm11 = vcmp.lt.s32.totalorder %v11449_v5, 3 }
 0x6f3   : >> { %v5757_v2 = vsel %vm5749_vm4, %v5736_v43, %v5739_v11  ;;  %v5758_v1 = vsel %vm5752_vm8, %v5745_v49, 920167782  ;;  %v5696_v6 = vmul.f32 %v5695_v16, %v5693_v54  ;;  %v6535_v14 = vmin.u32 %v5887_v57, %v11475_v33 }
 0x6f4   : >> { %vm11485_vm2 = vcmp.le.f32.partialorder %v12639_v17, 0.7853982  ;;  %v5754_v18 = vsel %vm5752_vm8, %v5742_v39, 2102212464  ;;  %v5759_v20 = vsel %vm5751_vm11, %v5742_v39, %v5758_v1  ;;  %v5761_v62 = vsel %vm5749_vm4, %v5739_v11, %v5742_v39 }
 0x6f5   : >> { %v5760_v21 = vsel %vm5750_vm1, %v5757_v2, %v5759_v20  ;;  %v5762_v50 = vsel %vm5752_vm8, %v5748_v0, 1326507024  ;;  %v6538_v59 = vadd.s32 4294967169, %v5929_v8  ;;  %v5697_v40 = vxor.u32 2147483648, %v5696_v6 }
 0x6f6   : >> { %v5889_v26 = vclz %v6535_v14  ;;  %v5753_v17 = vsel %vm5749_vm4, %v5733_v37, %v5736_v43  ;;  %v5763_v47 = vsel %vm5751_vm11, %v5745_v49, %v5762_v50  ;;  %v5755_v27 = vsel %vm5751_vm11, %v5739_v11, %v5754_v18 }
 0x6f7   : >> { %v5764_v16 = vsel %vm5750_vm1, %v5761_v62, %v5763_v47  ;;  %v11502_v54 = vmul.u32.u64.low %v11446_v9, %v5760_v21  ;;  %v11503_v57 = vmul.u32.u64.high %v11446_v9, %v5760_v21, %v11502_v54  ;;  %v11510_v8 = vsel %vm11465_vm6, %v10965_v19, %v11416_v25 }
 0x6f8   : >> { %v6536_v39 = vadd.s32 4294967294, %v5889_v26  ;;  %v11513_v0 = vmul.u32.u64.low %v11446_v9, %v5764_v16  ;;  %v11514_v37 = vmul.u32.u64.high %v11446_v9, %v5764_v16, %v11513_v0  ;;  %v12642_v49 = vand.u32 2147483647, %v11418_v10 }
 0x6f9   : >> { %v12643_v47 = vcvt.s32.f32 %v11376_v4  ;;  %v5591_v11 = vcvt.s32.f32 %v11441_v3  ;;  %v5698_v2 = vsel %vm5615_vm15, %v5697_v40, %v5696_v6  ;;  %v5935_v1 = vadd.s32 1, %v6538_v59 }
 0x6fa   : >> { %v5589_v25 = vand.u32 2147483647, %v11443_v46  ;;  %vm6537_vm11 = vcmp.lt.s32.totalorder %v6536_v39, 0  ;;  %v5756_v14 = vsel %vm5750_vm1, %v5753_v17, %v5755_v27  ;;  %v5699_v18 = vsub.s32 4, %v11393_v29 }
 0x6fb   : >> { %v11520_v43 = vmul.f32 %v12643_v47, %v12642_v49  ;;  %v5892_v20 = vsel %vm6537_vm11, 0, %v6536_v39  ;;  %v5775_v10 = vadd.s32 1, %v11503_v57  ;;  %v5933_v4 = vor.u32 8388608, %v11472_v15 }
 0x6fc   : >> { %vm5936_vm8 = vcmp.gt.s32.totalorder %v5935_v1, 0  ;;  %v5701_v21 = vsel %vm11485_vm2, %v11223_v63, %v5698_v2  ;;  %v5877_v6 = vadd.s32 %v11409_v56, %v11424_v60  ;;  %v5893_v62 = vsub.s32 32, %v5892_v20 }
 0x6fd   : >> { %v5897_v50 = vsub.s32 4294967266, %v5892_v20  ;;  %v5894_v5 = vshll.u32 %v11475_v33, %v5892_v20  ;;  %v5772_v27 = vmul.u32 %v11446_v9, %v5756_v14  ;;  %vm5774_vm4 = vc.u32 %v11514_v37, %v11502_v54 }
 0x6fe   : >> { %v5937_v59 = vsel %vm5936_vm8, %v5935_v1, 0  ;;  %v5895_v40 = vshrl.u32 %v5877_v6, %v5893_v62  ;;  %v5776_v26 = vsel %vm5774_vm4, %v5775_v10, %v11503_v57  ;;  %6958 = vcosq.f32 %v5701_v21 }
 0x6ff   : >> { %v5898_v15 = vadd.s32 127, %v5897_v50  ;;  %v11541_v17 = vshrl.u32 %v5937_v59, 5  ;;  %v5777_v16 = vadd.s32 %v5776_v26, %v5772_v27  ;;  %v5939_v39 = vand.u32 31, %v5937_v59 }
 0x700   : >> { %v11543_v56 = vshll.u32 %v5933_v4, 8  ;;  %6960 = vsinq.f32 %v5701_v21  ;;  %v5896_v60 = vor.u32 %v5895_v40, %v5894_v5  ;;  %v11548_v9 = vsel %vm5615_vm15, %v5699_v18, %v11393_v29 }
 0x701   : >> { %v5899_v33 = vshll.u32 %v5898_v15, 23  ;;  %vm5823_vm1 = vcmp.lt.s32.totalorder %v11226_v61, 0  ;;  %v5778_v0 = vadd.s32 536870912, %v5777_v16  ;;  %v5940_v49 = vsub.s32 32, %v5939_v39 }
 0x702   : >> { %v5942_v57 = vshll.u32 %v12296_v35, %v5939_v39  ;;  %vm5957_vm11 = vcmp.lt.s32.totalorder %v11541_v17, 1  ;;  %v5903_v2 = vcvt.s32.f32 %v5896_v60  ;;  %v5945_v1 = vshll.u32 %v12288_v41, %v5939_v39 }
 0x703   : >> { %v5900_v47 = vor.u32 4788187, %v5899_v33  ;;  %v5948_v14 = vshll.u32 %v12289_v58, %v5939_v39  ;;  %v11555_v20 = vshrl.u32 %v5778_v0, 30  ;;  %v5943_v10 = vshrl.u32 %v12288_v41, %v5940_v49 }
 0x704   : >> { %v5946_v29 = vshrl.u32 %v12289_v58, %v5940_v49  ;;  %v5951_v18 = vshll.u32 %v12290_v34, %v5939_v39  ;;  %v12644_v4 = vand.u32 2147483647, %v11226_v61  ;;  %v5949_v62 = vshrl.u32 %v12290_v34, %v5940_v49 }
 0x705   : >> { %v5901_v6 = vand.u32 2147483647, %v5900_v47  ;;  %v5952_v50 = vshrl.u32 %v12291_v52, %v5940_v49  ;;  %v5954_v5 = vshll.u32 %v12291_v52, %v5939_v39  ;;  %v5780_v27 = vshll.u32 %v11555_v20, 30 }
 0x706   : >> { %vm11562_vm15 = vcmp.le.f32.partialorder %v12644_v4, 0.7853982  ;;  %v5944_v41 = vor.u32 %v5943_v10, %v5942_v57  ;;  %v5947_v59 = vor.u32 %v5946_v29, %v5945_v1  ;;  %v5955_v58 = vshrl.u32 %v12292_v48, %v5940_v49 }
 0x707   : >> { %v5904_v40 = vmul.f32 %v5903_v2, %v5901_v6  ;;  %v5950_v15 = vor.u32 %v5949_v62, %v5948_v14  ;;  %v5953_v26 = vor.u32 %v5952_v50, %v5951_v18  ;;  %vm5958_vm8 = vcmp.lt.s32.totalorder %v11541_v17, 2 }
 0x708   : >> { %v11572_v60 = vsub.s32 %v5777_v16, %v5780_v27  ;;  %v5956_v33 = vor.u32 %v5955_v58, %v5954_v5  ;;  %vm5959_vm4 = vcmp.lt.s32.totalorder %v11541_v17, 3  ;;  %vm5960_vm14 = vcmp.lt.s32.totalorder %v11541_v17, 4 }
 0x709   : >> { %v5905_v34 = vxor.u32 2147483648, %v5904_v40  ;;  %v5962_v52 = vsel %vm5960_vm14, %v5950_v15, 2102212464  ;;  %v5965_v39 = vsel %vm5957_vm11, %v5944_v41, %v5947_v59  ;;  %v5966_v0 = vsel %vm5960_vm14, %v5953_v26, 920167782 }
 0x70a   : >> { %v5783_v48 = vsub.s32 0, %v11572_v60  ;;  %v5941_v57 = vshrl.u32 %v12296_v35, %v5940_v49  ;;  %v5967_v47 = vsel %vm5959_vm4, %v5950_v15, %v5966_v0  ;;  %v5969_v16 = vsel %vm5957_vm11, %v5947_v59, %v5950_v15 }
 0x70b   : >> { %v5906_v2 = vsel %vm5823_vm1, %v5905_v34, %v5904_v40  ;;  %v5968_v1 = vsel %vm5958_vm8, %v5965_v39, %v5967_v47  ;;  %v5970_v14 = vsel %vm5960_vm14, %v5956_v33, 1326507024  ;;  %v5702_v10 = vsel %vm11485_vm2, 0, %v11548_v9  ;;  %v6959_v4 = vpop.eup %6958 }
 0x70c   : >> { %v6531_v35 = vmin.u32 %v5783_v48, %v11572_v60  ;;  %v5961_v49 = vsel %vm5957_vm11, %v5941_v57, %v5944_v41  ;;  %v5963_v29 = vsel %vm5959_vm4, %v5947_v59, %v5962_v52  ;;  %v5971_v18 = vsel %vm5959_vm4, %v5953_v26, %v5970_v14 }
 0x70d   : >> { %v5972_v6 = vsel %vm5958_vm8, %v5969_v16, %v5971_v18  ;;  %v11602_v36 = vmul.u32.u64.low %v11543_v56, %v5968_v1  ;;  %v11603_v9 = vmul.u32.u64.high %v11543_v56, %v5968_v1, %v11602_v36  ;;  %v5907_v62 = vsub.s32 4, %v11454_v55  ;;  %v6961_v50 = vpop.eup %6960 }
 0x70e   : >> { %v5909_v5 = vsel %vm11562_vm15, %v11226_v61, %v5906_v2  ;;  %v5785_v27 = vclz %v6531_v35  ;;  %v11611_v41 = vmul.u32.u64.low %v11543_v56, %v5972_v6  ;;  %v11612_v59 = vmul.u32.u64.high %v11543_v56, %v5972_v6, %v11611_v41 }
 0x70f   : >> { %6962 = vcosq.f32 %v11510_v8  ;;  %vm5511_vm2 = vcmp.lt.s32.totalorder %v11080_v13, 0  ;;  %v5592_v58 = vmul.f32 %v5591_v11, %v5589_v25  ;;  %v5964_v40 = vsel %vm5958_vm8, %v5961_v49, %v5963_v29 }
 0x710   : >> { %6964 = vsinq.f32 %v11510_v8  ;;  %v5385_v15 = vxor.u32 2147483648, %v11520_v43  ;;  %v6532_v26 = vadd.s32 4294967294, %v5785_v27  ;;  %v5706_v33 = vadd.s32 3, %v5702_v10 }
 0x711   : >> { %6966 = vcosq.f32 %v5909_v5  ;;  %v5983_v34 = vadd.s32 1, %v11603_v9  ;;  %v5803_v52 = vsub.s32 4, %v11555_v20  ;;  %v5908_v46 = vsel %vm5823_vm1, %v5907_v62, %v11454_v55 }
 0x712   : >> { %6968 = vsinq.f32 %v5909_v5  ;;  %vm6533_vm14 = vcmp.lt.s32.totalorder %v6532_v26, 0  ;;  %v5980_v3 = vmul.u32 %v11543_v56, %v5964_v40  ;;  %vm5982_vm11 = vc.u32 %v11612_v59, %v11602_v36 }
 0x713   : >> { %v5593_v8 = vxor.u32 2147483648, %v5592_v58  ;;  %vm5719_vm8 = vcmp.lt.s32.totalorder %v11308_v24, 0  ;;  %v5788_v11 = vsel %vm6533_vm14, 0, %v6532_v26  ;;  %v5984_v25 = vsel %vm5982_vm11, %v5983_v34, %v11603_v9 }
 0x714   : >> { %v5773_v17 = vadd.s32 %v11502_v54, %v11514_v37  ;;  %v5789_v39 = vsub.s32 32, %v5788_v11  ;;  %v5793_v0 = vsub.s32 4294967266, %v5788_v11  ;;  %v5985_v48 = vadd.s32 %v5984_v25, %v5980_v3 }
 0x715   : >> { %v5386_v55 = vsel %vm5303_vm9, %v5385_v15, %v11520_v43  ;;  %v5804_v56 = vsel %vm5719_vm8, %v5803_v52, %v11555_v20  ;;  %v5707_v57 = vand.u32 3, %v5706_v33  ;;  %v5910_v47 = vsel %vm11562_vm15, 0, %v5908_v46 }
 0x716   : >> { %v5790_v16 = vshll.u32 %v11572_v60, %v5788_v11  ;;  %v5791_v2 = vshrl.u32 %v5773_v17, %v5789_v39  ;;  %v5794_v1 = vadd.s32 127, %v5793_v0  ;;  %v5986_v54 = vadd.s32 536870912, %v5985_v48 }
 0x717   : >> { %v5594_v37 = vsel %vm5511_vm2, %v5593_v8, %v5592_v58  ;;  %v12647_v14 = vand.u32 2147483647, %v11308_v24  ;;  %v5710_v10 = vxor.u32 2147483648, %v6961_v50  ;;  %v5713_v20 = vxor.u32 2147483648, %v6959_v4 }
 0x718   : >> { %v5792_v35 = vor.u32 %v5791_v2, %v5790_v16  ;;  %v5795_v49 = vshll.u32 %v5794_v1, 23  ;;  %v5987_v21 = vshrl.u32 %v5986_v54, 30  ;;  %v12650_v29 = vand.u32 2147483647, %v11044_v28 }
 0x719   : >> { %vm11649_vm1 = vcmp.le.f32.partialorder %v12647_v14, 0.7853982  ;;  %v5914_v6 = vadd.s32 3, %v5910_v47  ;;  %v5387_v9 = vsub.s32 4, %v11242_v30  ;;  %vm5709_vm4 = vcmp.eq.s32.totalorder %v5707_v57, 0 }
 0x71a   : >> { %vm11655_vm15 = vcmp.le.f32.partialorder %v12650_v29, 0.7853982  ;;  %v5806_v18 = vsel %vm11649_vm1, 0, %v5804_v56  ;;  %v5796_v5 = vor.u32 4788187, %v5795_v49  ;;  %v5988_v27 = vshll.u32 %v5987_v21, 30 }
 0x71b   : >> { %v5389_v62 = vsel %vm11655_vm15, %v11044_v28, %v5386_v55  ;;  %vm5712_vm14 = vcmp.eq.s32.totalorder %v5707_v57, 2  ;;  %vm5708_vm11 = vcmp.lt.s32.totalorder %v5707_v57, 2  ;;  %v5711_v41 = vsel %vm5709_vm4, %v6959_v4, %v5710_v10 }
 0x71c   : >> { %v5714_v58 = vsel %vm5712_vm14, %v5713_v20, %v6961_v50  ;;  %6970 = vcosq.f32 %v5389_v62  ;;  %v11665_v40 = vpop.eup %6962  ;;  %v5797_v15 = vand.u32 2147483647, %v5796_v5  ;;  %v5799_v26 = vcvt.s32.f32 %v5792_v35 }
 0x71d   : >> { %v11667_v33 = vsub.s32 %v5985_v48, %v5988_v27  ;;  %v5810_v34 = vadd.s32 3, %v5806_v18  ;;  %v11669_v52 = vpop.eup %6964  ;;  %v6011_v46 = vsub.s32 4, %v5987_v21  ;;  %v5915_v3 = vand.u32 3, %v5914_v6 }
 0x71e   : >> { %v5388_v8 = vsel %vm5303_vm9, %v5387_v9, %v11242_v30  ;;  %6972 = vsinq.f32 %v5389_v62  ;;  %v6967_v11 = vpop.eup %6966  ;;  %v5800_v4 = vmul.f32 %v5799_v26, %v5797_v15  ;;  %vm12231_vm4 = vcmp.lt.s32.totalorder %v11428_v12, 0 }
 0x71f   : >> { %v5991_v50 = vsub.s32 0, %v11667_v33  ;;  %v5715_v25 = vsel %vm5708_vm11, %v5711_v41, %v5714_v58  ;;  %v6969_v17 = vpop.eup %6968  ;;  %v5981_v39 = vadd.s32 %v11602_v36, %v11612_v59  ;;  %v12653_v0 = vand.u32 2147483647, %v11428_v12 }
 0x720   : >> { %vm5705_vm9 = vweird.f32 %v11223_v63  ;;  %v5595_v30 = vsub.s32 4, %v11313_v53  ;;  %v5801_v55 = vxor.u32 2147483648, %v5800_v4  ;;  %v11688_v47 = vand.u32 3, %v5810_v34 }
 0x721   : >> { %vm11681_vm14 = vcmp.le.f32.partialorder %v12653_v0, 0.7853982  ;;  %v6539_v56 = vmin.u32 %v5991_v50, %v11667_v33  ;;  %v5390_v57 = vsel %vm11655_vm15, 0, %v5388_v8  ;;  %v6012_v36 = vsel %vm12231_vm4, %v6011_v46, %v5987_v21 }
 0x722   : >> { %v11694_v59 = vsel %vm5705_vm9, nan, %v5715_v25  ;;  %vm5916_vm11 = vcmp.lt.s32.totalorder %v5915_v3, 2  ;;  %v5921_v16 = vxor.u32 2147483648, %v6967_v11  ;;  %v5802_v63 = vsel %vm5719_vm8, %v5801_v55, %v5800_v4 }
 0x723   : >> { %v5993_v2 = vclz %v6539_v56  ;;  %v5918_v1 = vxor.u32 2147483648, %v6969_v17  ;;  %v12656_v54 = vand.u32 2147483647, %v11080_v13  ;;  %v5805_v10 = vsel %vm11649_vm1, %v11308_v24, %v5802_v63 }
 0x724   : >> { %v5394_v20 = vadd.s32 3, %v5390_v57  ;;  %v5596_v35 = vsel %vm5511_vm2, %v5595_v30, %v11313_v53  ;;  %6974 = vcosq.f32 %v5805_v10  ;;  %vm5917_vm8 = vcmp.eq.s32.totalorder %v5915_v3, 0 }
 0x725   : >> { %vm11700_vm3 = vcmp.le.f32.partialorder %v12656_v54, 0.7853982  ;;  %v6540_v21 = vadd.s32 4294967294, %v5993_v2  ;;  %vm5920_vm15 = vcmp.eq.s32.totalorder %v5915_v3, 2  ;;  %6976 = vsinq.f32 %v5805_v10 }
 0x726   : >> { %v5597_v49 = vsel %vm11700_vm3, %v11080_v13, %v5594_v37  ;;  %v6014_v29 = vsel %vm11681_vm14, 0, %v6012_v36  ;;  %v5922_v60 = vsel %vm5920_vm15, %v5921_v16, %v6969_v17  ;;  %v5283_v43 = vsub.s32 4, %v11096_v31 }
 0x727   : >> { %vm6541_vm1 = vcmp.lt.s32.totalorder %v6540_v21, 0  ;;  %v5919_v18 = vsel %vm5917_vm8, %v6967_v11, %v5918_v1  ;;  %v5598_v53 = vsel %vm11700_vm3, 0, %v5596_v35  ;;  %6978 = vcosq.f32 %v5597_v49 }
 0x728   : >> { %v5996_v6 = vsel %vm6541_vm1, 0, %v6540_v21  ;;  %v5395_v9 = vand.u32 3, %v5394_v20  ;;  %6980 = vsinq.f32 %v5597_v49  ;;  %v5284_v37 = vsel %vm5199_vm12, %v5283_v43, %v11096_v31 }
 0x729   : >> { %v6971_v62 = vpop.eup %6970  ;;  %v5997_v5 = vsub.s32 32, %v5996_v6  ;;  %v6001_v27 = vsub.s32 4294967266, %v5996_v6  ;;  %v11721_v41 = vadd.s32 3, %v6014_v29  ;;  %v5286_v58 = vsel %vm11250_vm13, 0, %v5284_v37 }
 0x72a   : >> { %v5998_v15 = vshll.u32 %v11667_v33, %v5996_v6  ;;  %v11727_v26 = vsel %vm5916_vm11, %v5919_v18, %v5922_v60  ;;  %v5401_v34 = vxor.u32 2147483648, %v6971_v62  ;;  %v5602_v46 = vadd.s32 3, %v5598_v53 }
 0x72b   : >> { %v6973_v8 = vpop.eup %6972  ;;  %v5999_v11 = vshrl.u32 %v5981_v39, %v5997_v5  ;;  %v6002_v4 = vadd.s32 127, %v6001_v27  ;;  %v5290_v50 = vadd.s32 3, %v5286_v58  ;;  %v5491_v31 = vsub.s32 4, %v11154_v38 }
 0x72c   : >> { %vm5816_vm12 = vcmp.eq.s32.totalorder %v11688_v47, 2  ;;  %vm5396_vm3 = vcmp.lt.s32.totalorder %v5395_v9, 2  ;;  %v5398_v25 = vxor.u32 2147483648, %v6973_v8  ;;  %v5297_v17 = vxor.u32 2147483648, %v11344_v23 }
 0x72d   : >> { %v6000_v33 = vor.u32 %v5999_v11, %v5998_v15  ;;  %v6003_v3 = vshll.u32 %v6002_v4, 23  ;;  %v5291_v0 = vand.u32 3, %v5290_v50  ;;  %vm12659_vm9 = vcmp.lt.s32.totalorder %v10965_v19, 0  ;;  %v12667_v4 = vld [vmem:[#allocation59_spill] sm:$0xff] }
 0x72e   : >> { %v5492_v39 = vsel %vm12659_vm9, %v5491_v31, %v11154_v38  ;;  %vm5812_vm11 = vcmp.lt.s32.totalorder %v11688_v47, 2  ;;  %vm5397_vm8 = vcmp.eq.s32.totalorder %v5395_v9, 0  ;;  %vm5400_vm15 = vcmp.eq.s32.totalorder %v5395_v9, 2  ;;  %v12671_v31 = vld [vmem:[#allocation37_spill] sm:$0xff] }
 0x72f   : >> { %v11739_v30 = vand.u32 3, %v5602_v46  ;;  %v5494_v55 = vsel %vm11465_vm6, 0, %v5492_v39  ;;  %v6004_v56 = vor.u32 4788187, %v6003_v3  ;;  %vm5809_vm1 = vweird.f32 %v11308_v24 }
 0x730   : >> { %v5399_v57 = vsel %vm5397_vm8, %v6971_v62, %v5398_v25  ;;  %v5402_v36 = vsel %vm5400_vm15, %v5401_v34, %v6973_v8  ;;  %vm5289_vm4 = vweird.f32 %v10851_v22  ;;  %v6007_v16 = vcvt.s32.f32 %v6000_v33 }
 0x731   : >> { %vm5293_vm2 = vcmp.eq.s32.totalorder %v5291_v0, 0  ;;  %vm5296_vm13 = vcmp.eq.s32.totalorder %v5291_v0, 2  ;;  %v5498_v38 = vadd.s32 3, %v5494_v55  ;;  %v6005_v63 = vand.u32 2147483647, %v6004_v56  ;;  %v6975_v44 = vpop.eup %6974 }
 0x732   : >> { %v5295_v2 = vsel %vm5293_vm2, %v11344_v23, %v5294_v32  ;;  %v5298_v1 = vsel %vm5296_vm13, %v5297_v17, %v11404_v7  ;;  %v4971_v54 = vsub.s32 4, %v10886_v45  ;;  %vm5605_vm6 = vcmp.eq.s32.totalorder %v11739_v30, 0  ;;  %v6977_v10 = vpop.eup %6976 }
 0x733   : >> { %vm5608_vm9 = vcmp.eq.s32.totalorder %v11739_v30, 2  ;;  %vm5292_vm8 = vcmp.lt.s32.totalorder %v5291_v0, 2  ;;  %v5502_v14 = vxor.u32 2147483648, %v11669_v52  ;;  %v6008_v20 = vmul.f32 %v6007_v16, %v6005_v63 }
 0x734   : >> { %v5817_v35 = vxor.u32 2147483648, %v6975_v44  ;;  %v5403_v49 = vsel %vm5396_vm3, %v5399_v57, %v5402_v36  ;;  %v5299_v21 = vsel %vm5292_vm8, %v5295_v2, %v5298_v1  ;;  %v6979_v29 = vpop.eup %6978  ;;  %v5814_v23 = vxor.u32 2147483648, %v6977_v10  ;;  %v12675_v57 = vld [vmem:[#allocation49_spill] sm:$0xff] }
 0x735   : >> { %vm5913_vm13 = vweird.f32 %v11226_v61  ;;  %v5499_v7 = vand.u32 3, %v5498_v38  ;;  %v5505_v60 = vxor.u32 2147483648, %v11665_v40  ;;  %vm12660_vm2 = vcmp.lt.s32.totalorder %v10679_v42, 0  ;;  %v6981_v18 = vpop.eup %6980  ;;  %v12679_v2 = vld [vmem:[#allocation53_spill] sm:$0xff] }
 0x736   : >> { %v4972_v43 = vsel %vm12660_vm2, %v4971_v54, %v10886_v45  ;;  %v6009_v53 = vxor.u32 2147483648, %v6008_v20  ;;  %v5818_v6 = vsel %vm5816_vm12, %v5817_v35, %v6977_v10  ;;  %v5609_v37 = vxor.u32 2147483648, %v6979_v29  ;;  %v12680_v54 = vld [vmem:[#allocation40_spill] sm:$0xff] }
 0x737   : >> { %v12661_v9 = vand.u32 2147483647, %v10679_v42  ;;  %vm12664_vm15 = vcmp.eq.s32.totalorder %v11688_v47, 0  ;;  %vm12665_vm8 = vweird.f32 %v11044_v28  ;;  %v5300_v45 = vsel %vm5289_vm4, nan, %v5299_v21  ;;  %v12684_v21 = vld [vmem:[#allocation52_spill] sm:$0xff] }
 0x738   : >> { %v5815_v5 = vsel %vm12664_vm15, %v6975_v44, %v5814_v23  ;;  %v5404_v27 = vsel %vm12665_vm8, nan, %v5403_v49  ;;  %vm12666_vm12 = vcmp.lt.s32.totalorder %v11428_v12, 0  ;;  %v5606_v46 = vxor.u32 2147483648, %v6981_v18 }
 0x739   : >> { %vm11761_vm3 = vcmp.le.f32.partialorder %v12661_v9, 0.7853982  ;;  %v6010_v15 = vsel %vm12666_vm12, %v6009_v53, %v6008_v20  ;;  %v5819_v34 = vsel %vm5812_vm11, %v5815_v5, %v5818_v6  ;;  %vm5501_vm4 = vcmp.eq.s32.totalorder %v5499_v7, 0  ;;  %v12683_v20 = vld [vmem:[#allocation62_spill] sm:$0xff]  ;;  %v12690_v53 = vld [vmem:[#allocation63_spill] sm:$0xff] }
 0x73a   : >> { %v4973_v58 = vsel %vm11761_vm3, %v10679_v42, %v11304_v51  ;;  %v4974_v8 = vsel %vm11761_vm3, 0, %v4972_v43  ;;  %v5820_v28 = vsel %vm5809_vm1, nan, %v5819_v34  ;;  %v6013_v22 = vsel %vm11681_vm14, %v11428_v12, %v6010_v15  ;;  %v12692_v34 = vld [vmem:[#allocation51_spill] sm:$0xff] }
 0x73b   : >> { %vm5504_vm2 = vcmp.eq.s32.totalorder %v5499_v7, 2  ;;  %6065 = vmatprep.subr.mxu0 %v5820_v28  ;;  %6982 = vcosq.f32 %v6013_v22  ;;  %v5610_v51 = vsel %vm5608_vm9, %v5609_v37, %v6981_v18  ;;  %v5503_v47 = vsel %vm5501_vm4, %v11665_v40, %v5502_v14  ;;  %v12672_v40 = vld [vmem:[#allocation43_spill] sm:$0xff] }
 0x73c   : >> { %v5506_v11 = vsel %vm5504_vm2, %v5505_v60, %v11669_v52  ;;  %6984 = vsinq.f32 %v6013_v22  ;;  %6066 = vmatpush1.msra.mxu0 %v11694_v59  ;;  %v4978_v24 = vadd.s32 3, %v4974_v8  ;;  %v12668_v50 = vand.u32 2147483647, %v12667_v4  ;;  %v12673_v59 = vld [vmem:[#allocation36_spill] sm:$0xff]  ;;  %v12681_v14 = vld [vmem:[#allocation67_spill] sm:$0xff] }
 0x73d   : >> { %v5179_v25 = vsub.s32 4, %v12671_v31  ;;  %6067 = vmatprep.subr.mxu0 %v5404_v27  ;;  %v5607_v32 = vsel %vm5605_vm6, %v6979_v29, %v5606_v46  ;;  %6986 = vcosq.f32 %v4973_v58  ;;  %v4867_v17 = vsub.s32 4, %v12673_v59 }
 0x73e   : >> { %vm11793_vm11 = vcmp.le.f32.partialorder %v12668_v50, 0.7853982  ;;  %v11806_v33 = vand.u32 3, %v11721_v41  ;;  %6068 = vmatpush1.msra.mxu0 %v5300_v45  ;;  %vm5500_vm14 = vcmp.lt.s32.totalorder %v5499_v7, 2  ;;  %6988 = vsinq.f32 %v4973_v58  ;;  %v12691_v58 = vld [vmem:[#allocation64_spill] sm:$0xff] }
 0x73f   : >> { %v5181_v52 = vsel %vm11793_vm11, %v12667_v4, %v12672_v40  ;;  %vm12674_vm1 = vcmp.lt.s32.totalorder %v12667_v4, 0  ;;  %v11814_v0 = vsel %vm5913_vm13, nan, %v11727_v26  ;;  %vm5604_vm6 = vcmp.lt.s32.totalorder %v11739_v30, 2  ;;  %v12678_v26 = vld [vmem:[#allocation48_spill] sm:$0xff]  ;;  %v12697_v40 = vld [vmem:[#allocation58_spill] sm:$0xff] }
 0x740   : >> { %v5180_v3 = vsel %vm12674_vm1, %v5179_v25, %v12671_v31  ;;  %v5507_v39 = vsel %vm5500_vm14, %v5503_v47, %v5506_v11  ;;  %v5611_v41 = vsel %vm5604_vm6, %v5607_v32, %v5610_v51  ;;  %v11819_v56 = vand.u32 3, %v4978_v24  ;;  %v12693_v24 = vld [vmem:[#allocation57_spill] sm:$0xff] }
 0x741   : >> { %v5182_v55 = vsel %vm11793_vm11, 0, %v5180_v3  ;;  %6990 = vcosq.f32 %v5181_v52  ;;  %vm12676_vm9 = vcmp.lt.s32.totalorder %v12675_v57, 0  ;;  %v5075_v63 = vsub.s32 4, %v12678_v26 }
 0x742   : >> { %v4868_v36 = vsel %vm12676_vm9, %v4867_v17, %v12673_v59  ;;  %6992 = vsinq.f32 %v5181_v52  ;;  %v5186_v16 = vadd.s32 3, %v5182_v55  ;;  %vm6024_vm13 = vcmp.eq.s32.totalorder %v11806_v33, 2  ;;  %v12698_v59 = vld [vmem:[#allocation50_spill] sm:$0xff] }
 0x743   : >> { %v4870_v61 = vsel %vm10915_vm5, 0, %v4868_v36  ;;  %vm5601_vm3 = vweird.f32 %v11080_v13  ;;  %vm5497_vm15 = vweird.f32 %v10965_v19  ;;  %vm6021_vm8 = vcmp.eq.s32.totalorder %v11806_v33, 0 }
 0x744   : >> { %v4874_v30 = vadd.s32 3, %v4870_v61  ;;  %v4878_v1 = vxor.u32 2147483648, %v12679_v2  ;;  %v4881_v44 = vxor.u32 2147483648, %v12680_v54  ;;  %vm12682_vm12 = vcmp.lt.s32.totalorder %v12681_v14, 0 }
 0x745   : >> { %v5076_v10 = vsel %vm12682_vm12, %v5075_v63, %v12678_v26  ;;  %v4555_v35 = vsub.s32 4, %v12683_v20  ;;  %vm6020_vm5 = vcmp.lt.s32.totalorder %v11806_v33, 2  ;;  %v11838_v49 = vsel %vm5601_vm3, nan, %v5611_v41 }
 0x746   : >> { %v11840_v13 = vsel %vm5497_vm15, nan, %v5507_v39  ;;  %v4875_v19 = vand.u32 3, %v4874_v30  ;;  %v12685_v29 = vand.u32 2147483647, %v12684_v21  ;;  %vm6017_vm2 = vweird.f32 %v11428_v12 }
 0x747   : >> { %vm4981_vm11 = vcmp.eq.s32.totalorder %v11819_v56, 0  ;;  %v11850_v7 = vand.u32 3, %v5186_v16  ;;  %v5078_v43 = vsel %vm11066_vm10, 0, %v5076_v10  ;;  %vm12689_vm14 = vcmp.lt.s32.totalorder %v12684_v21, 0 }
 0x748   : >> { %vm11844_vm4 = vcmp.le.f32.partialorder %v12685_v29, 0.7853982  ;;  %v4556_v18 = vsel %vm12689_vm14, %v4555_v35, %v12683_v20  ;;  %vm4980_vm1 = vcmp.lt.s32.totalorder %v11819_v56, 2  ;;  %vm4984_vm6 = vcmp.eq.s32.totalorder %v11819_v56, 2  ;;  %v6983_v27 = vpop.eup %6982 }
 0x749   : >> { %v4557_v6 = vsel %vm11844_vm4, %v12684_v21, %v12690_v53  ;;  %vm4873_vm9 = vweird.f32 %v12675_v57  ;;  %vm4877_vm3 = vcmp.eq.s32.totalorder %v4875_v19, 0  ;;  %vm4880_vm15 = vcmp.eq.s32.totalorder %v4875_v19, 2  ;;  %v6985_v8 = vpop.eup %6984 }
 0x74a   : >> { %v5082_v37 = vadd.s32 3, %v5078_v43  ;;  %vm4977_vm10 = vweird.f32 %v10679_v42  ;;  %v4879_v9 = vsel %vm4877_vm3, %v12680_v54, %v4878_v1  ;;  %v4882_v62 = vsel %vm4880_vm15, %v4881_v44, %v12679_v2  ;;  %v6987_v22 = vpop.eup %6986 }
 0x74b   : >> { %v4558_v5 = vsel %vm11844_vm4, 0, %v4556_v18  ;;  %6994 = vcosq.f32 %v4557_v6  ;;  %v5086_v15 = vxor.u32 2147483648, %v12691_v58  ;;  %v5089_v46 = vxor.u32 2147483648, %v12692_v34  ;;  %v6989_v31 = vpop.eup %6988 }
 0x74c   : >> { %v5083_v45 = vand.u32 3, %v5082_v37  ;;  %6996 = vsinq.f32 %v4557_v6  ;;  %v6025_v28 = vxor.u32 2147483648, %v6983_v27  ;;  %vm5188_vm12 = vcmp.lt.s32.totalorder %v11850_v7, 2  ;;  %v12705_v6 = vld [vmem:[#allocation60_spill] sm:$0xff] }
 0x74d   : >> { %vm5189_vm14 = vcmp.eq.s32.totalorder %v11850_v7, 0  ;;  %vm4876_vm3 = vcmp.lt.s32.totalorder %v4875_v19, 2  ;;  %v6022_v51 = vxor.u32 2147483648, %v6985_v8  ;;  %v4562_v11 = vadd.s32 3, %v4558_v5 }
 0x74e   : >> { %v4883_v47 = vsel %vm4876_vm3, %v4879_v9, %v4882_v62  ;;  %v12694_v50 = vand.u32 2147483647, %v12693_v24  ;;  %v6026_v25 = vsel %vm6024_vm13, %v6025_v28, %v6985_v8  ;;  %v4985_v32 = vxor.u32 2147483648, %v6987_v22  ;;  %v6991_v55 = vpop.eup %6990 }
 0x74f   : >> { %v4763_v52 = vsub.s32 4, %v12697_v40  ;;  %v6023_v3 = vsel %vm6021_vm8, %v6983_v27, %v6022_v51  ;;  %v4982_v39 = vxor.u32 2147483648, %v6989_v31  ;;  %vm5085_vm15 = vcmp.eq.s32.totalorder %v5083_v45, 0  ;;  %v6993_v61 = vpop.eup %6992 }
 0x750   : >> { %vm11875_vm4 = vcmp.le.f32.partialorder %v12694_v50, 0.7853982  ;;  %vm5088_vm3 = vcmp.eq.s32.totalorder %v5083_v45, 2  ;;  %v6027_v41 = vsel %vm6020_vm5, %v6023_v3, %v6026_v25  ;;  %v4986_v36 = vsel %vm4984_vm6, %v4985_v32, %v6989_v31  ;;  %v12710_v50 = vld [vmem:[#allocation56_spill] sm:$0xff] }
 0x751   : >> { %v4765_v17 = vsel %vm11875_vm4, %v12693_v24, %v12698_v59  ;;  %v5087_v16 = vsel %vm5085_vm15, %v12692_v34, %v5086_v15  ;;  %v5090_v38 = vsel %vm5088_vm3, %v5089_v46, %v12691_v58  ;;  %v6028_v26 = vsel %vm6017_vm2, nan, %v6027_v41  ;;  %v12708_v15 = vld [vmem:[#allocation47_spill] sm:$0xff]  ;;  %v12709_v46 = vld [vmem:[#allocation42_spill] sm:$0xff]  ;;  %v12711_v31 = vld [vmem:[#allocation68_spill] sm:$0xff] }
 0x752   : >> { %v4983_v63 = vsel %vm4981_vm11, %v6987_v22, %v4982_v39  ;;  %vm5192_vm13 = vcmp.eq.s32.totalorder %v11850_v7, 2  ;;  %v5193_v30 = vxor.u32 2147483648, %v6991_v55  ;;  %6136 = vmatprep.subr.mxu1 %v6028_v26  ;;  %v5190_v2 = vxor.u32 2147483648, %v6993_v61 }
 0x753   : >> { %v4987_v33 = vsel %vm4980_vm1, %v4983_v63, %v4986_v36  ;;  %v4884_v1 = vsel %vm4873_vm9, nan, %v4883_v47  ;;  %vm5084_vm8 = vcmp.lt.s32.totalorder %v5083_v45, 2  ;;  %6137 = vmatpush1.msra.mxu1 %v11814_v0  ;;  %6998 = vcosq.f32 %v4765_v17  ;;  %v12700_v0 = vld [vmem:[#allocation38_spill] sm:$0xff] }
 0x754   : >> { %v4988_v12 = vsel %vm4977_vm10, nan, %v4987_v33  ;;  %v5194_v54 = vsel %vm5192_vm13, %v5193_v30, %v6993_v61  ;;  %v5091_v44 = vsel %vm5084_vm8, %v5087_v16, %v5090_v38  ;;  %6138 = vmatprep.subr.mxu1 %v11838_v49  ;;  %v5191_v56 = vsel %vm5189_vm14, %v6991_v55, %v5190_v2  ;;  %v12701_v49 = vld [vmem:[#allocation66_spill] sm:$0xff] }
 0x755   : >> { %6069 = vmatprep.subr.mxu0 %v4988_v12  ;;  %v4563_v10 = vand.u32 3, %v4562_v11  ;;  %vm12699_vm5 = vcmp.lt.s32.totalorder %v12693_v24, 0  ;;  %7000 = vsinq.f32 %v4765_v17  ;;  %6139 = vmatpush1.msra.mxu1 %v11840_v13  ;;  %vm5185_vm2 = vweird.f32 %v12667_v4  ;;  %v12702_v13 = vld [vmem:[#allocation55_spill] sm:$0xff]  ;;  %v12712_v38 = vld [vmem:[#allocation22_spill] sm:$0xff] }
 0x756   : >> { %v4764_v57 = vsel %vm12699_vm5, %v4763_v52, %v12697_v40  ;;  %v5195_v42 = vsel %vm5188_vm12, %v5191_v56, %v5194_v54  ;;  %6070 = vmatpush1.msra.mxu0 %v4884_v1  ;;  %v4451_v20 = vsub.s32 4, %v12700_v0  ;;  %vm5081_vm11 = vweird.f32 %v12681_v14  ;;  %v6032_v54 = vpop.permute.xlu0 %6031 }
 0x757   : >> { %v5196_v35 = vsel %vm5185_vm2, nan, %v5195_v42  ;;  %v4659_v19 = vsub.s32 4, %v12701_v49  ;;  %v5092_v23 = vsel %vm5081_vm11, nan, %v5091_v44  ;;  %v4766_v60 = vsel %vm11875_vm4, 0, %v4764_v57 }
 0x758   : >> { %v6995_v29 = vpop.eup %6994  ;;  %6140 = vmatprep.subr.mxu1 %v5196_v35  ;;  %vm12703_vm1 = vcmp.lt.s32.totalorder %v12702_v13, 0  ;;  %vm4564_vm6 = vcmp.lt.s32.totalorder %v4563_v10, 2  ;;  %vm4565_vm9 = vcmp.eq.s32.totalorder %v4563_v10, 0  ;;  %vm4568_vm10 = vcmp.eq.s32.totalorder %v4563_v10, 2 }
 0x759   : >> { %v4452_v4 = vsel %vm12703_vm1, %v4451_v20, %v12700_v0  ;;  %v6997_v7 = vpop.eup %6996  ;;  %6141 = vmatpush1.msra.mxu1 %v5092_v23  ;;  %v4569_v43 = vxor.u32 2147483648, %v6995_v29  ;;  %vm12706_vm12 = vcmp.lt.s32.totalorder %v12705_v6, 0  ;;  %v4770_v62 = vadd.s32 3, %v4766_v60 }
 0x75a   : >> { %v4566_v18 = vxor.u32 2147483648, %v6997_v7  ;;  %v4454_v53 = vsel %vm10719_vm7, 0, %v4452_v4  ;;  %v4660_v37 = vsel %vm12706_vm12, %v4659_v19, %v12701_v49  ;;  %v4462_v34 = vxor.u32 2147483648, %v12708_v15 }
 0x75b   : >> { %v4570_v9 = vsel %vm4568_vm10, %v4569_v43, %v6997_v7  ;;  %v4458_v5 = vadd.s32 3, %v4454_v53  ;;  %v4662_v45 = vsel %vm10902_vm0, 0, %v4660_v37  ;;  %v4465_v8 = vxor.u32 2147483648, %v12709_v46 }
 0x75c   : >> { %v4567_v58 = vsel %vm4565_vm9, %v6995_v29, %v4566_v18  ;;  %v4666_v28 = vadd.s32 3, %v4662_v45  ;;  %vm4561_vm14 = vweird.f32 %v12684_v21  ;;  %v4670_v48 = vxor.u32 2147483648, %v12710_v50 }
 0x75d   : >> { %v4571_v22 = vsel %vm4564_vm6, %v4567_v58, %v4570_v9  ;;  %v4459_v51 = vand.u32 3, %v4458_v5  ;;  %v4673_v25 = vxor.u32 2147483648, %v12711_v31  ;;  %v4771_v32 = vand.u32 3, %v4770_v62 }
 0x75e   : >> { %v4572_v47 = vsel %vm4561_vm14, nan, %v4571_v22  ;;  %v4667_v11 = vand.u32 3, %v4666_v28  ;;  %vm4457_vm15 = vweird.f32 %v12702_v13  ;;  %vm12713_vm11 = vcmask 261120  }
 0x75f   : >> { %6071 = vmatprep.subr.mxu0 %v4572_v47  ;;  %vm4461_vm7 = vcmp.eq.s32.totalorder %v4459_v51, 0  ;;  %vm4464_vm0 = vcmp.eq.s32.totalorder %v4459_v51, 2  ;;  %vm4460_vm4 = vcmp.lt.s32.totalorder %v4459_v51, 2  ;;  %vm4776_vm8 = vcmp.eq.s32.totalorder %v4771_v32, 2  ;;  %vm12714_vm10 = vmmov %vm12713_vm11 }
 0x760   : >> { %v4463_v40 = vsel %vm4461_vm7, %v12709_v46, %v4462_v34  ;;  %v4466_v52 = vsel %vm4464_vm0, %v4465_v8, %v12708_v15  ;;  %v6999_v59 = vpop.eup %6998  ;;  %vm4669_vm3 = vcmp.eq.s32.totalorder %v4667_v11, 0  ;;  %vm4672_vm13 = vcmp.eq.s32.totalorder %v4667_v11, 2 }
 0x761   : >> { %v4467_v21 = vsel %vm4460_vm4, %v4463_v40, %v4466_v52  ;;  %v4777_v3 = vxor.u32 2147483648, %v6999_v59  ;;  %v4671_v55 = vsel %vm4669_vm3, %v12711_v31, %v4670_v48  ;;  %v4674_v41 = vsel %vm4672_vm13, %v4673_v25, %v12710_v50 }
 0x762   : >> { %v7001_v17 = vpop.eup %7000  ;;  %v4468_v39 = vsel %vm4457_vm15, nan, %v4467_v21  ;;  %vm4773_vm5 = vcmp.eq.s32.totalorder %v4771_v32, 0  ;;  %vm4668_vm2 = vcmp.lt.s32.totalorder %v4667_v11, 2  ;;  %vm4772_vm1 = vcmp.lt.s32.totalorder %v4771_v32, 2 }
 0x763   : >> { %v4774_v36 = vxor.u32 2147483648, %v7001_v17  ;;  %6072 = vmatpush1.msra.mxu0 %v4468_v39  ;;  %v4778_v16 = vsel %vm4776_vm8, %v4777_v3, %v7001_v17  ;;  %v4675_v26 = vsel %vm4668_vm2, %v4671_v55, %v4674_v41  ;;  %vm4769_vm6 = vweird.f32 %v12693_v24 }
 0x764   : >> { %6542 = vmatmul.mubr.msk.f32.vlgmr.msra.gmra.mxu0 %vm12713_vm11, %v12712_v38  ;;  %vm4665_vm9 = vweird.f32 %v12705_v6  ;;  %v6034_v2 = vlaneseq  ;;  %v7113_v44 = vmov 1966171168  }
 0x765   : >> { %v4775_v61 = vsel %vm4773_vm5, %v6999_v59, %v4774_v36  ;;  %v4676_v33 = vsel %vm4665_vm9, nan, %v4675_v26  ;;  %v6190_v56 = vunpack.c.l.s4 %v7113_v44 }
 0x766   : >> { %v4779_v63 = vsel %vm4772_vm1, %v4775_v61, %v4778_v16  ;;  %v6035_v1 = vshrl.u32 %v6034_v2, 7  ;;  %vm6215_vm12 = vcmp.lt.s32.totalorder %v6034_v2, 512 }
 0x767   : >> { %v4780_v30 = vsel %vm4769_vm6, nan, %v4779_v63  ;;  %v6191_v42 = vunpack.c.0.s8 %v6190_v56 }
 0x768   : >> { %6142 = vmatprep.subr.mxu1 %v4780_v30  ;;  %v6036_v12 = vsub.s32 0, %v6035_v1 }
 0x769   : >> { %6143 = vmatpush1.msra.mxu1 %v4676_v33  ;;  %v6194_v49 = vsub.s32 %v6191_v42, %v6035_v1 }
 0x76a   : >> { %6543 = vmatmul.mubr.msk.f32.vlgmr.msra.gmra.mxu1 %vm12714_vm10, %v12712_v38  ;;  %v6037_v24 = vrot.slane %v6032_v54, %v6036_v12 }
 0x824   : >> { %v6107_v10 = vpop.f32.mrf.mxu0 }
 0x825   : >> { %v6108_v20 = vadd.f32 %v6107_v10, %v6037_v24 }
 0x826   : >> { %v6109_v57 = vpop.f32.mrf.mxu0 }
 0x827   : >> { %v6110_v0 = vadd.f32 %v6109_v57, %v6037_v24 }
 0x829   : >> { %v6187_v19 = vcombine.low %v6108_v20, %v6110_v0 }
 0x82a   : >> { %v6178_v35 = vpop.f32.mrf.mxu1 }
 0x82b   : >> { %v6179_v23 = vadd.f32 %v6178_v35, %v6037_v24  ;;  %v6195_v13 = vrot.slane %v6187_v19, %v6194_v49 }
 0x82c   : >> { %v6180_v29 = vpop.f32.mrf.mxu1 }
 0x82d   : >> { %v6181_v60 = vadd.f32 %v6180_v29, %v6037_v24 }
 0x82f   : >> { %v6188_v4 = vcombine.low %v6179_v23, %v6181_v60 }
 0x831   : >> { %v6202_v7 = vrot.slane %v6188_v4, %v6194_v49 }
 0x833   : >> { %v6203_v43 = vcombine.low %v6195_v13, %v6202_v7  ;;  %383 = sbr.rel (!%p381_p10) target bundleno = 73 (0x49), region = 110 }
 0x835   : >> { %v6210_v18 = vrot.slane %v6203_v43, %v6194_v49 }
 0x837   : >> { %6217 = vst.msk [vmem:[%s6212_s10] sm:$0xf] %vm6215_vm12, %v6210_v18 }
 0x838   : > { %7043 = shalt.err (!%p7040_p1)
}
 0x839   : > { %s7044_s8 = scalar_lea.hbm %s6231_s28, 128  ;;  %s7048_s26 = scalar_lea.hbm %s11997_s9, 1024 }
 0x83a   : > { %p7045_p3 = scmp.ne.s32.totalorder %s6231_s28, %s7044_s8  ;;  %p7049_p13 = scmp.lt.s32.totalorder %s6231_s28, %s11997_s9 }
 0x83b   : > { %p7050_p6 = scmp.lt.s32.totalorder %s7048_s26, %s7044_s8 }
 0x83c   : > { %p7046_p4 = pnand %p7045_p3, %p12715_p12 }
 0x83d   : > { %p7051_p10 = por %p7050_p6, %p7049_p13 }
 0x83e   : > { %p7047_p5 = pneg %p7046_p4 }
 0x840   : > { %p7052_p11 = pnand %p7051_p10, %p7047_p5 }
 0x842   : > { %7055 = shalt.err (!%p7052_p11)
}
 0x843   : > { %6745 = dma.vmem_to_hbm [thread:$0]  (%p12715_p12), %s6234_s24, 128, %s6231_s28, %s6219_s25  }
 0x844 PF: > { %p6756_p0 = scmp.ge.s32.totalorder %s7098_s14, 2  ;;  %s6245_s17 = sand.u32 1, %s7086_s11  }
 0x845   : > { %p12716_p2 = scmp.ne.s32.totalorder %s12236_s23, 0  ;;  %s6246_s27 = scalar_lea.sflag [#allocation5], %s6245_s17 }
 0x847   : > { %p6752_p7 = pnand %p6756_p0, %p12716_p2 }
 0x849   : > { %p6753_p8 = pneg %p6752_p7 }
 0x84b   : > { %7081 = dma.done.wait (%p6753_p8), %s6246_s27, 128  }
 0x84c   : > { %7083 = vsyncadd (%p6753_p8), %s6246_s27, 4294967168  ;;  %s12717_s29 = sld [smem:[#allocation9_spill]]  ;;  %p24_p9 = scmp.ge.s32.totalorder %s7193_s16, 10  }
 0x84d   : > { %s12718_s11 = smov %s7090_s12  ;;  %s12719_s12 = smov %s7094_s13 }
 0x84e   : > { %s12721_s14 = smov %s7193_s16  ;;  %26 = sbr.rel (!%p24_p9) target bundleno = 8 (0x8), region = 121 }
 0x852   : > { %s12720_s13 = smov %s12717_s29 }
 0x853   :  { %6251 = vsyncpa [#allocation4], 1 }
 0x854   :  { %6253 = vsyncpa [#allocation4 + $0x1], 1 }
 0x855   :  { %6254 = vsyncpa [#allocation5], 1 }
 0x856   :  { %6256 = vsyncpa [#allocation5 + $0x1], 1 }

</bundles_post_ra>
